<compile_context>
chip_gen: v5e
topology: v5e:2x2
jax: 0.10.0
libtpu: 0.0.40
codegen_flags: <defaults>
</compile_context>

<pallas_src>
import functools

import jax
import jax.numpy as jnp
from jax import lax
from jax.experimental import pallas as pl
from jax.experimental.pallas import tpu as pltpu

LANE = 128


def _round_up(v, m):
    return (v + m - 1) // m * m


def _pick_strip(H):
    """Rows per grid step: prefer ~8-row strips that divide H exactly."""
    if H <= 8:
        return H
    for cand in (8, 7, 6, 5, 4, 3, 2):
        if H % cand == 0:
            return cand
    return H


def _vmem_limit_bytes():
    mib = 1024 * 1024
    try:
        cap = pltpu.get_tpu_info().vmem_capacity_bytes
    except Exception:
        cap = 64 * mib                      # conservative (v7x-sized) default
    return int(max(min(cap - 24 * mib, 100 * mib), 32 * mib))


def bottleneck_kernel(x_mid_ref, x_top_ref, x_bot_ref,
                      w1_ref, s1_ref, b1_ref,
                      w2_ref, s2_ref, b2_ref,
                      w3_ref, s3_ref, b3_ref,
                      out_ref, pad_ref, *, W, strip, G):
    """One (image, row-strip) per grid step.  x refs are bf16 NHWC tiles."""
    s = pl.program_id(1)
    n_strips = pl.num_programs(1)
    Cin_p = x_mid_ref.shape[-1]
    Cw = w1_ref.shape[1]                     # padded bottleneck width (lanes)
    HWs = strip * W                          # output rows this step
    HWe = (strip + 2) * W                    # strip + one halo row above/below

    # ---- conv1 (1x1) + bn1 + relu on the strip plus its two halo rows -----
    x_top = x_top_ref[...].reshape(W, Cin_p)
    x_mid = x_mid_ref[...].reshape(HWs, Cin_p)
    x_bot = x_bot_ref[...].reshape(W, Cin_p)
    x_ext = jnp.concatenate([x_top, x_mid, x_bot], axis=0)        # bf16
    h1 = jnp.dot(x_ext, w1_ref[...], preferred_element_type=jnp.float32)
    h1 = jnp.maximum(h1 * s1_ref[...] + b1_ref[...], 0.0)         # (HWe, Cw) f32

    # ---- write h1 (bf16) into the guarded scratch --------------------------
    guard = jnp.zeros((G, Cw), jnp.bfloat16)
    pad_ref[0:G, :] = guard
    pad_ref[G + HWe:G + HWe + G, :] = guard
    pad_ref[G:G + HWe, :] = h1.astype(jnp.bfloat16)

    # conv2 zero-pads the *activation*; zero halo rows at true image borders.
    @pl.when(s == 0)
    def _():
        pad_ref[G:G + W, :] = jnp.zeros((W, Cw), jnp.bfloat16)

    @pl.when(s == n_strips - 1)
    def _():
        pad_ref[G + W + HWs:G + HWe, :] = jnp.zeros((W, Cw), jnp.bfloat16)

    # ---- column-boundary masks (hoisted; reused by the six edge taps) -----
    col = lax.broadcasted_iota(jnp.int32, (HWs, 1), 0) % W
    mask_l = col > 0                         # valid when dx == -1
    mask_r = col < (W - 1)                   # valid when dx == +1
    zero_bf16 = jnp.zeros((), jnp.bfloat16)

    # ---- conv2 (3x3): 9 accumulating MXU dots over shifted bf16 taps ------
    acc = jnp.zeros((HWs, Cw), jnp.float32)
    for dy in (-1, 0, 1):
        for dx in (-1, 0, 1):
            k = (dy + 1) * 3 + (dx + 1)
            start = G + (1 + dy) * W + dx                # static Python int
            tap = pad_ref[start:start + HWs, :]          # bf16
            if dx == -1:
                tap = jnp.where(mask_l, tap, zero_bf16)
            elif dx == 1:
                tap = jnp.where(mask_r, tap, zero_bf16)
            acc = acc + jnp.dot(tap, w2_ref[k * Cw:(k + 1) * Cw, :],
                                preferred_element_type=jnp.float32)
    h2 = jnp.maximum(acc * s2_ref[...] + b2_ref[...], 0.0)        # (HWs, Cw)

    # ---- conv3 (1x1) + bn3 + residual add + relu --------------------------
    h3 = jnp.dot(h2.astype(jnp.bfloat16), w3_ref[...],
                 preferred_element_type=jnp.float32)
    h3 = h3 * s3_ref[...] + b3_ref[...]
    # Re-read x here (instead of keeping an f32 copy live across the matmuls).
    x_res = x_mid_ref[...].reshape(HWs, Cin_p).astype(jnp.float32)
    out = jnp.maximum(h3 + x_res, 0.0)                   # Cin_p == Cout_p
    out_ref[...] = out.reshape(out_ref.shape).astype(out_ref.dtype)


def _fold_bn(gamma, beta, mean, var, eps=1e-5):
    scale = gamma / jnp.sqrt(var + eps)
    bias = beta - mean * scale
    return scale, bias


def _pad_mat(a, rows, cols, dtype):
    out = jnp.zeros((rows, cols), jnp.float32).at[:a.shape[0], :a.shape[1]].set(a)
    return out.astype(dtype)


def _pad_vec(v, cols):
    return jnp.zeros((1, cols), jnp.float32).at[0, :v.shape[0]].set(v)


def prepare_params(w1, w2_hwio, w3, bn1, bn2, bn3):
    """Fold BN, zero-pad channel dims to 128 lanes, cast MXU weights to bf16."""
    Cin, Wd = w1.shape
    Cout = w3.shape[1]
    Cin_p, Wd_p, Cout_p = (_round_up(c, LANE) for c in (Cin, Wd, Cout))

    s1, b1 = _fold_bn(*bn1)
    s2, b2 = _fold_bn(*bn2)
    s3, b3 = _fold_bn(*bn3)

    w1_p = _pad_mat(w1, Cin_p, Wd_p, jnp.bfloat16)
    w3_p = _pad_mat(w3, Wd_p, Cout_p, jnp.bfloat16)

    # (3,3,Wd,Wd) HWIO -> per-tap padded -> (9*Wd_p, Wd_p), rows ordered to
    # match the tap order k = (dy+1)*3 + (dx+1).
    w2_p = jnp.zeros((3, 3, Wd_p, Wd_p), jnp.float32)
    w2_p = w2_p.at[:, :, :Wd, :Wd].set(w2_hwio)
    w2_p = w2_p.reshape(9 * Wd_p, Wd_p).astype(jnp.bfloat16)

    params = (w1_p, _pad_vec(s1, Wd_p), _pad_vec(b1, Wd_p),
              w2_p, _pad_vec(s2, Wd_p), _pad_vec(b2, Wd_p),
              w3_p, _pad_vec(s3, Cout_p), _pad_vec(b3, Cout_p))
    dims = dict(Cin=Cin, Wd=Wd, Cout=Cout, Cin_p=Cin_p, Wd_p=Wd_p, Cout_p=Cout_p)
    return params, dims


def bottleneck_forward_nhwc(x_nhwc, params, dims, strip=None):
    """x_nhwc: (N, H, W, Cin_p) bf16, channels already lane-padded.

    Returns (N, H, W, Cout_p) bf16 (lane-padded).  Activations stay NHWC /
    bf16 end-to-end; layout conversion is the caller's responsibility.
    """
    (w1, s1, b1, w2, s2, b2, w3, s3, b3) = params
    N, H, W, Cin_p = x_nhwc.shape
    Wd_p, Cout_p = dims["Wd_p"], dims["Cout_p"]
    assert Cin_p == dims["Cin_p"] and Cin_p == Cout_p, \
        "identity path needs Cin == Cout"
    assert x_nhwc.dtype == jnp.bfloat16

    if strip is None:
        strip = _pick_strip(H)
    assert H % strip == 0
    n_strips = H // strip
    G = 8                                    # sublane-aligned guard rows

    kernel = functools.partial(bottleneck_kernel, W=W, strip=strip, G=G)

    def build(single_buffer_weights):
        def resident(shape):                 # VMEM-resident across grid steps
            rank = len(shape)
            idx = lambda n, s, _r=rank: (0,) * _r
            if single_buffer_weights:
                return pl.BlockSpec(shape, idx, pipeline_mode=pl.Buffered(1))
            return pl.BlockSpec(shape, idx)

        in_specs = [
            # the strip of x rows
            pl.BlockSpec((1, strip, W, Cin_p), lambda n, s: (n, s, 0, 0)),
            # one halo row above / below (row index clamped at image borders;
            # the kernel zeroes the corresponding h1 halo there).
            pl.BlockSpec((1, 1, W, Cin_p),
                         lambda n, s: (n, jnp.maximum(s * strip - 1, 0), 0, 0)),
            pl.BlockSpec((1, 1, W, Cin_p),
                         lambda n, s: (n, jnp.minimum((s + 1) * strip, H - 1), 0, 0)),
            resident((Cin_p, Wd_p)), resident((1, Wd_p)), resident((1, Wd_p)),
            resident((9 * Wd_p, Wd_p)), resident((1, Wd_p)), resident((1, Wd_p)),
            resident((Wd_p, Cout_p)), resident((1, Cout_p)), resident((1, Cout_p)),
        ]

        flops = 2 * N * H * W * (Cin_p * Wd_p + 9 * Wd_p * Wd_p + Wd_p * Cout_p)
        bytes_accessed = int(x_nhwc.size * 2 + N * H * W * Cout_p * 2
                             + (w1.size + w2.size + w3.size) * 2
                             + (s1.size + b1.size + s2.size + b2.size
                                + s3.size + b3.size) * 4)

        return pl.pallas_call(
            kernel,
            grid=(N, n_strips),
            in_specs=in_specs,
            out_specs=pl.BlockSpec((1, strip, W, Cout_p),
                                   lambda n, s: (n, s, 0, 0)),
            out_shape=jax.ShapeDtypeStruct((N, H, W, Cout_p), jnp.bfloat16),
            scratch_shapes=[
                # guarded, row-padded bf16 h1 scratch (strip + 2 halo rows)
                pltpu.VMEM((2 * G + (strip + 2) * W, Wd_p), jnp.bfloat16),
            ],
            compiler_params=pltpu.CompilerParams(
                dimension_semantics=("parallel", "parallel"),
                vmem_limit_bytes=_vmem_limit_bytes()),
            cost_estimate=pl.CostEstimate(flops=flops, transcendentals=0,
                                          bytes_accessed=bytes_accessed),
        )

    args = (x_nhwc, x_nhwc, x_nhwc, w1, s1, b1, w2, s2, b2, w3, s3, b3)
    try:
        return build(True)(*args)
    except Exception:
        # Older jax may reject pl.Buffered(1); fall back to default buffering.
        return build(False)(*args)


def ref_forward(x_nchw, raw):
    """Pure-JAX f32 reference (eval-mode BN) for correctness checking."""
    (w1, w2_hwio, w3, bn1, bn2, bn3) = raw
    x = jnp.transpose(x_nchw, (0, 2, 3, 1))                  # NHWC

    s1, b1 = _fold_bn(*bn1)
    s2, b2 = _fold_bn(*bn2)
    s3, b3 = _fold_bn(*bn3)

    h = jnp.einsum('nhwc,co->nhwo', x, w1)
    h = jnp.maximum(h * s1 + b1, 0.0)
    h = lax.conv_general_dilated(h, w2_hwio, (1, 1), 'SAME',
                                 dimension_numbers=('NHWC', 'HWIO', 'NHWC'))
    h = jnp.maximum(h * s2 + b2, 0.0)
    h = jnp.einsum('nhwc,co->nhwo', h, w3)
    h = h * s3 + b3
    out = jnp.maximum(h + x, 0.0)
    return jnp.transpose(out, (0, 3, 1, 2))                  # back to NCHW


if __name__ == "__main__":
    # Bottleneck(inplanes=16, planes=4): width=4, planes*expansion=16, so the
    # identity path applies (downsample=None requires inplanes == planes*4).
    N, H, W = 2, 16, 16
    inplanes, planes, base_width, groups = 16, 4, 64, 1
    width = int(planes * (base_width / 64.0)) * groups        # 4
    Cout = planes * 4                                         # 16

    key = jax.random.PRNGKey(0)
    ks = jax.random.split(key, 8)

    x = jax.random.normal(ks[0], (N, inplanes, H, W), jnp.float32)

    # Conv weights (stored channels-last for the NHWC kernel).
    w1 = jax.random.normal(ks[1], (inplanes, width), jnp.float32) * 0.2
    w2_hwio = jax.random.normal(ks[2], (3, 3, width, width), jnp.float32) * 0.2
    w3 = jax.random.normal(ks[3], (width, Cout), jnp.float32) * 0.2

    # Eval-mode BatchNorm parameters (deterministic, nontrivial).
    def make_bn(k, c):
        k1, k2, k3, k4 = jax.random.split(k, 4)
        gamma = 1.0 + 0.1 * jax.random.normal(k1, (c,), jnp.float32)
        beta = 0.1 * jax.random.normal(k2, (c,), jnp.float32)
        mean = 0.1 * jax.random.normal(k3, (c,), jnp.float32)
        var = jax.random.uniform(k4, (c,), jnp.float32, 0.5, 1.5)
        return gamma, beta, mean, var

    bn1 = make_bn(ks[4], width)
    bn2 = make_bn(ks[5], width)
    bn3 = make_bn(ks[6], Cout)

    params, dims = prepare_params(w1, w2_hwio, w3, bn1, bn2, bn3)

    # Layout plumbing for parity with the PyTorch NCHW interface only; in a
    # real network activations stay NHWC / lane-padded / bf16 end-to-end.
    x_nhwc = jnp.transpose(x, (0, 2, 3, 1))
    x_nhwc = jnp.pad(x_nhwc, ((0, 0), (0, 0), (0, 0),
                              (0, dims["Cin_p"] - inplanes)))
    x_nhwc = x_nhwc.astype(jnp.bfloat16)

    out_nhwc = bottleneck_forward_nhwc(x_nhwc, params, dims)
    out_nhwc = jax.block_until_ready(out_nhwc)

    out = jnp.transpose(out_nhwc[..., :Cout].astype(jnp.float32), (0, 3, 1, 2))

    # Reference sees the same bf16-quantized input (kernel I/O is bf16).
    x_q = x.astype(jnp.bfloat16).astype(jnp.float32)
    ref = ref_forward(x_q, (w1, w2_hwio, w3, bn1, bn2, bn3))

    assert out.shape == (N, Cout, H, W)
    max_diff = float(jnp.max(jnp.abs(out - ref)))
    assert jnp.allclose(out, ref, atol=6e-2, rtol=6e-2), (
        f"mismatch vs reference: max abs diff = {max_diff}")

    print("KERNEL_OK")
</pallas_src>

<mosaic_0001>
module attributes {stable_mosaic.version = 11 : i64} {
  func.func @bottleneck_kernel(%arg0: i32, %arg1: i32, %arg2: memref<1x8x16x128xbf16, #tpu.memory_space<vmem>>, %arg3: memref<1x1x16x128xbf16, #tpu.memory_space<vmem>>, %arg4: memref<1x1x16x128xbf16, #tpu.memory_space<vmem>>, %arg5: memref<128x128xbf16, #tpu.memory_space<vmem>>, %arg6: memref<1x128xf32, #tpu.memory_space<vmem>>, %arg7: memref<1x128xf32, #tpu.memory_space<vmem>>, %arg8: memref<1152x128xbf16, #tpu.memory_space<vmem>>, %arg9: memref<1x128xf32, #tpu.memory_space<vmem>>, %arg10: memref<1x128xf32, #tpu.memory_space<vmem>>, %arg11: memref<128x128xbf16, #tpu.memory_space<vmem>>, %arg12: memref<1x128xf32, #tpu.memory_space<vmem>>, %arg13: memref<1x128xf32, #tpu.memory_space<vmem>>, %arg14: memref<1x8x16x128xbf16, #tpu.memory_space<vmem>>, %arg15: memref<176x128xbf16, #tpu.memory_space<vmem>>) attributes {dimension_semantics = [#tpu.dimension_semantics<parallel>, #tpu.dimension_semantics<parallel>], iteration_bounds = array<i64: 2, 2>, scalar_prefetch = 0 : i64, scratch_operands = 1 : i64, tpu.core_type = #tpu.core_type<tc>, window_params = [{transform_indices = @transform_0, window_bounds = array<i64: 1, 8, 16, 128>}, {transform_indices = @transform_1, window_bounds = array<i64: 1, 1, 16, 128>}, {transform_indices = @transform_2, window_bounds = array<i64: 1, 1, 16, 128>}, {pipeline_mode = #tpu.pipeline_mode<synchronous>, transform_indices = @transform_3, window_bounds = array<i64: 128, 128>}, {pipeline_mode = #tpu.pipeline_mode<synchronous>, transform_indices = @transform_4, window_bounds = array<i64: 1, 128>}, {pipeline_mode = #tpu.pipeline_mode<synchronous>, transform_indices = @transform_5, window_bounds = array<i64: 1, 128>}, {pipeline_mode = #tpu.pipeline_mode<synchronous>, transform_indices = @transform_6, window_bounds = array<i64: 1152, 128>}, {pipeline_mode = #tpu.pipeline_mode<synchronous>, transform_indices = @transform_7, window_bounds = array<i64: 1, 128>}, {pipeline_mode = #tpu.pipeline_mode<synchronous>, transform_indices = @transform_8, window_bounds = array<i64: 1, 128>}, {pipeline_mode = #tpu.pipeline_mode<synchronous>, transform_indices = @transform_9, window_bounds = array<i64: 128, 128>}, {pipeline_mode = #tpu.pipeline_mode<synchronous>, transform_indices = @transform_10, window_bounds = array<i64: 1, 128>}, {pipeline_mode = #tpu.pipeline_mode<synchronous>, transform_indices = @transform_11, window_bounds = array<i64: 1, 128>}, {transform_indices = @transform_12, window_bounds = array<i64: 1, 8, 16, 128>}]} {
    %c0 = arith.constant 0 : index
    %c0_0 = arith.constant 0 : index
    %c0_1 = arith.constant 0 : index
    %c0_2 = arith.constant 0 : index
    %0 = vector.load %arg3[%c0, %c0_0, %c0_1, %c0_2] : memref<1x1x16x128xbf16, #tpu.memory_space<vmem>>, vector<1x1x16x128xbf16>
    %1 = vector.shape_cast %0 : vector<1x1x16x128xbf16> to vector<16x128xbf16>
    %c0_3 = arith.constant 0 : index
    %c0_4 = arith.constant 0 : index
    %c0_5 = arith.constant 0 : index
    %c0_6 = arith.constant 0 : index
    %2 = vector.load %arg2[%c0_3, %c0_4, %c0_5, %c0_6] : memref<1x8x16x128xbf16, #tpu.memory_space<vmem>>, vector<1x8x16x128xbf16>
    %3 = vector.shape_cast %2 : vector<1x8x16x128xbf16> to vector<128x128xbf16>
    %c0_7 = arith.constant 0 : index
    %c0_8 = arith.constant 0 : index
    %c0_9 = arith.constant 0 : index
    %c0_10 = arith.constant 0 : index
    %4 = vector.load %arg4[%c0_7, %c0_8, %c0_9, %c0_10] : memref<1x1x16x128xbf16, #tpu.memory_space<vmem>>, vector<1x1x16x128xbf16>
    %5 = vector.shape_cast %4 : vector<1x1x16x128xbf16> to vector<16x128xbf16>
    %6 = tpu.concatenate %1, %3, %5 in 0 : vector<16x128xbf16>, vector<128x128xbf16>, vector<16x128xbf16> -> vector<160x128xbf16>
    %c0_11 = arith.constant 0 : index
    %c0_12 = arith.constant 0 : index
    %7 = vector.load %arg5[%c0_11, %c0_12] : memref<128x128xbf16, #tpu.memory_space<vmem>>, vector<128x128xbf16>
    %cst = arith.constant dense<0.000000e+00> : vector<160x128xf32>
    %8 = tpu.matmul %6, %7, %cst {dimension_numbers = #tpu.dot_dimension_numbers<[1], [0], [0], [1], [0, 0, 1, 1], [], []>} : vector<160x128xbf16>, vector<128x128xbf16>, vector<160x128xf32> -> vector<160x128xf32>
    %c0_13 = arith.constant 0 : index
    %c0_14 = arith.constant 0 : index
    %9 = vector.load %arg6[%c0_13, %c0_14] : memref<1x128xf32, #tpu.memory_space<vmem>>, vector<1x128xf32>
    %10 = vector.broadcast %9 : vector<1x128xf32> to vector<160x128xf32>
    %11 = arith.mulf %8, %10 : vector<160x128xf32>
    %c0_15 = arith.constant 0 : index
    %c0_16 = arith.constant 0 : index
    %12 = vector.load %arg7[%c0_15, %c0_16] : memref<1x128xf32, #tpu.memory_space<vmem>>, vector<1x128xf32>
    %13 = vector.broadcast %12 : vector<1x128xf32> to vector<160x128xf32>
    %14 = arith.addf %11, %13 : vector<160x128xf32>
    %cst_17 = arith.constant 0.000000e+00 : f32
    %15 = vector.broadcast %cst_17 : f32 to vector<160x128xf32>
    %16 = arith.maximumf %14, %15 : vector<160x128xf32>
    %cst_18 = arith.constant 0.000000e+00 : bf16
    %17 = vector.broadcast %cst_18 : bf16 to vector<8x128xbf16>
    %c0_19 = arith.constant 0 : index
    %c0_20 = arith.constant 0 : index
    %18 = vector.load %arg15[%c0_19, %c0_20] : memref<176x128xbf16, #tpu.memory_space<vmem>>, vector<8x128xbf16>
    tpu.vector_store %arg15[%c0_19, %c0_20], %17 {strides = array<i32>} : memref<176x128xbf16, #tpu.memory_space<vmem>>, vector<8x128xbf16>,
    %c168 = arith.constant 168 : index
    %c0_21 = arith.constant 0 : index
    %19 = vector.load %arg15[%c168, %c0_21] : memref<176x128xbf16, #tpu.memory_space<vmem>>, vector<8x128xbf16>
    tpu.vector_store %arg15[%c168, %c0_21], %17 {strides = array<i32>} : memref<176x128xbf16, #tpu.memory_space<vmem>>, vector<8x128xbf16>,
    %20 = arith.truncf %16 : vector<160x128xf32> to vector<160x128xbf16>
    %c8 = arith.constant 8 : index
    %c0_22 = arith.constant 0 : index
    %21 = vector.load %arg15[%c8, %c0_22] : memref<176x128xbf16, #tpu.memory_space<vmem>>, vector<160x128xbf16>
    tpu.vector_store %arg15[%c8, %c0_22], %20 {strides = array<i32>} : memref<176x128xbf16, #tpu.memory_space<vmem>>, vector<160x128xbf16>,
    %c0_i32 = arith.constant 0 : i32
    %22 = arith.cmpi eq, %arg1, %c0_i32 : i32
    %23 = arith.extui %22 : i1 to i32
    %c0_i32_23 = arith.constant 0 : i32
    %24 = arith.cmpi ne, %23, %c0_i32_23 : i32
    scf.if %24 {
      %cst_88 = arith.constant 0.000000e+00 : bf16
      %136 = vector.broadcast %cst_88 : bf16 to vector<16x128xbf16>
      %c8_89 = arith.constant 8 : index
      %c0_90 = arith.constant 0 : index
      %137 = vector.load %arg15[%c8_89, %c0_90] : memref<176x128xbf16, #tpu.memory_space<vmem>>, vector<16x128xbf16>
      tpu.vector_store %arg15[%c8_89, %c0_90], %136 {strides = array<i32>} : memref<176x128xbf16, #tpu.memory_space<vmem>>, vector<16x128xbf16>,
    } else {
    }
    %c1_i32 = arith.constant 1 : i32
    %25 = arith.cmpi eq, %arg1, %c1_i32 : i32
    %26 = arith.extui %25 : i1 to i32
    %c0_i32_24 = arith.constant 0 : i32
    %27 = arith.cmpi ne, %26, %c0_i32_24 : i32
    scf.if %27 {
      %cst_88 = arith.constant 0.000000e+00 : bf16
      %136 = vector.broadcast %cst_88 : bf16 to vector<16x128xbf16>
      %c152 = arith.constant 152 : index
      %c0_89 = arith.constant 0 : index
      %137 = vector.load %arg15[%c152, %c0_89] : memref<176x128xbf16, #tpu.memory_space<vmem>>, vector<16x128xbf16>
      tpu.vector_store %arg15[%c152, %c0_89], %136 {strides = array<i32>} : memref<176x128xbf16, #tpu.memory_space<vmem>>, vector<16x128xbf16>,
    } else {
    }
    %28 = tpu.iota {dimensions = array<i32: 0>} : vector<128x1xi32>
    %c16_i32 = arith.constant 16 : i32
    %c0_i32_25 = arith.constant 0 : i32
    %29 = arith.cmpi eq, %c16_i32, %c0_i32_25 : i32
    %c1_i32_26 = arith.constant 1 : i32
    %30 = arith.select %29, %c1_i32_26, %c16_i32 : i32
    %31 = vector.broadcast %30 : i32 to vector<128x1xi32>
    %32 = arith.remsi %28, %31 : vector<128x1xi32>
    %c0_i32_27 = arith.constant 0 : i32
    %33 = vector.broadcast %c0_i32_27 : i32 to vector<128x1xi32>
    %34 = arith.cmpi ne, %32, %33 : vector<128x1xi32>
    %c0_i32_28 = arith.constant 0 : i32
    %35 = vector.broadcast %c0_i32_28 : i32 to vector<128x1xi32>
    %36 = arith.cmpi slt, %32, %35 : vector<128x1xi32>
    %c0_i32_29 = arith.constant 0 : i32
    %37 = arith.cmpi slt, %30, %c0_i32_29 : i32
    %38 = vector.broadcast %37 : i1 to vector<128x1xi1>
    %39 = vector.broadcast %38 : vector<128x1xi1> to vector<128x1xi1>
    %40 = arith.xori %36, %39 : vector<128x1xi1>
    %41 = arith.andi %40, %34 : vector<128x1xi1>
    %42 = vector.broadcast %30 : i32 to vector<128x1xi32>
    %43 = arith.addi %32, %42 : vector<128x1xi32>
    %44 = arith.select %41, %43, %32 : vector<128x1xi1>, vector<128x1xi32>
    %c0_i32_30 = arith.constant 0 : i32
    %45 = vector.broadcast %c0_i32_30 : i32 to vector<128x1xi32>
    %46 = arith.cmpi sgt, %44, %45 : vector<128x1xi32>
    %c15_i32 = arith.constant 15 : i32
    %47 = vector.broadcast %c15_i32 : i32 to vector<128x1xi32>
    %48 = arith.cmpi slt, %44, %47 : vector<128x1xi32>
    %cst_31 = arith.constant 0.000000e+00 : f32
    %49 = vector.broadcast %cst_31 : f32 to vector<128x128xf32>
    %c7 = arith.constant 7 : index
    %c0_32 = arith.constant 0 : index
    %50 = vector.load %arg15[%c7, %c0_32] : memref<176x128xbf16, #tpu.memory_space<vmem>>, vector<128x128xbf16>
    %cst_33 = arith.constant 0.000000e+00 : bf16
    %51 = vector.shape_cast %46 : vector<128x1xi1> to vector<128x1xi1>
    %52 = vector.broadcast %51 : vector<128x1xi1> to vector<128x128xi1>
    %53 = vector.broadcast %cst_33 : bf16 to vector<128x128xbf16>
    %54 = arith.select %52, %50, %53 : vector<128x128xi1>, vector<128x128xbf16>
    %c0_34 = arith.constant 0 : index
    %c0_35 = arith.constant 0 : index
    %55 = vector.load %arg8[%c0_34, %c0_35] : memref<1152x128xbf16, #tpu.memory_space<vmem>>, vector<128x128xbf16>
    %cst_36 = arith.constant dense<0.000000e+00> : vector<128x128xf32>
    %56 = tpu.matmul %54, %55, %cst_36 {dimension_numbers = #tpu.dot_dimension_numbers<[1], [0], [0], [1], [0, 0, 1, 1], [], []>} : vector<128x128xbf16>, vector<128x128xbf16>, vector<128x128xf32> -> vector<128x128xf32>
    %57 = arith.addf %49, %56 : vector<128x128xf32>
    %c8_37 = arith.constant 8 : index
    %c0_38 = arith.constant 0 : index
    %58 = vector.load %arg15[%c8_37, %c0_38] : memref<176x128xbf16, #tpu.memory_space<vmem>>, vector<128x128xbf16>
    %c128 = arith.constant 128 : index
    %c0_39 = arith.constant 0 : index
    %59 = vector.load %arg8[%c128, %c0_39] : memref<1152x128xbf16, #tpu.memory_space<vmem>>, vector<128x128xbf16>
    %cst_40 = arith.constant dense<0.000000e+00> : vector<128x128xf32>
    %60 = tpu.matmul %58, %59, %cst_40 {dimension_numbers = #tpu.dot_dimension_numbers<[1], [0], [0], [1], [0, 0, 1, 1], [], []>} : vector<128x128xbf16>, vector<128x128xbf16>, vector<128x128xf32> -> vector<128x128xf32>
    %61 = arith.addf %57, %60 : vector<128x128xf32>
    %c9 = arith.constant 9 : index
    %c0_41 = arith.constant 0 : index
    %62 = vector.load %arg15[%c9, %c0_41] : memref<176x128xbf16, #tpu.memory_space<vmem>>, vector<128x128xbf16>
    %cst_42 = arith.constant 0.000000e+00 : bf16
    %63 = vector.shape_cast %48 : vector<128x1xi1> to vector<128x1xi1>
    %64 = vector.broadcast %63 : vector<128x1xi1> to vector<128x128xi1>
    %65 = vector.broadcast %cst_42 : bf16 to vector<128x128xbf16>
    %66 = arith.select %64, %62, %65 : vector<128x128xi1>, vector<128x128xbf16>
    %c256 = arith.constant 256 : index
    %c0_43 = arith.constant 0 : index
    %67 = vector.load %arg8[%c256, %c0_43] : memref<1152x128xbf16, #tpu.memory_space<vmem>>, vector<128x128xbf16>
    %cst_44 = arith.constant dense<0.000000e+00> : vector<128x128xf32>
    %68 = tpu.matmul %66, %67, %cst_44 {dimension_numbers = #tpu.dot_dimension_numbers<[1], [0], [0], [1], [0, 0, 1, 1], [], []>} : vector<128x128xbf16>, vector<128x128xbf16>, vector<128x128xf32> -> vector<128x128xf32>
    %69 = arith.addf %61, %68 : vector<128x128xf32>
    %c23 = arith.constant 23 : index
    %c0_45 = arith.constant 0 : index
    %70 = vector.load %arg15[%c23, %c0_45] : memref<176x128xbf16, #tpu.memory_space<vmem>>, vector<128x128xbf16>
    %cst_46 = arith.constant 0.000000e+00 : bf16
    %71 = vector.shape_cast %46 : vector<128x1xi1> to vector<128x1xi1>
    %72 = vector.broadcast %71 : vector<128x1xi1> to vector<128x128xi1>
    %73 = vector.broadcast %cst_46 : bf16 to vector<128x128xbf16>
    %74 = arith.select %72, %70, %73 : vector<128x128xi1>, vector<128x128xbf16>
    %c384 = arith.constant 384 : index
    %c0_47 = arith.constant 0 : index
    %75 = vector.load %arg8[%c384, %c0_47] : memref<1152x128xbf16, #tpu.memory_space<vmem>>, vector<128x128xbf16>
    %cst_48 = arith.constant dense<0.000000e+00> : vector<128x128xf32>
    %76 = tpu.matmul %74, %75, %cst_48 {dimension_numbers = #tpu.dot_dimension_numbers<[1], [0], [0], [1], [0, 0, 1, 1], [], []>} : vector<128x128xbf16>, vector<128x128xbf16>, vector<128x128xf32> -> vector<128x128xf32>
    %77 = arith.addf %69, %76 : vector<128x128xf32>
    %c24 = arith.constant 24 : index
    %c0_49 = arith.constant 0 : index
    %78 = vector.load %arg15[%c24, %c0_49] : memref<176x128xbf16, #tpu.memory_space<vmem>>, vector<128x128xbf16>
    %c512 = arith.constant 512 : index
    %c0_50 = arith.constant 0 : index
    %79 = vector.load %arg8[%c512, %c0_50] : memref<1152x128xbf16, #tpu.memory_space<vmem>>, vector<128x128xbf16>
    %cst_51 = arith.constant dense<0.000000e+00> : vector<128x128xf32>
    %80 = tpu.matmul %78, %79, %cst_51 {dimension_numbers = #tpu.dot_dimension_numbers<[1], [0], [0], [1], [0, 0, 1, 1], [], []>} : vector<128x128xbf16>, vector<128x128xbf16>, vector<128x128xf32> -> vector<128x128xf32>
    %81 = arith.addf %77, %80 : vector<128x128xf32>
    %c25 = arith.constant 25 : index
    %c0_52 = arith.constant 0 : index
    %82 = vector.load %arg15[%c25, %c0_52] : memref<176x128xbf16, #tpu.memory_space<vmem>>, vector<128x128xbf16>
    %cst_53 = arith.constant 0.000000e+00 : bf16
    %83 = vector.shape_cast %48 : vector<128x1xi1> to vector<128x1xi1>
    %84 = vector.broadcast %83 : vector<128x1xi1> to vector<128x128xi1>
    %85 = vector.broadcast %cst_53 : bf16 to vector<128x128xbf16>
    %86 = arith.select %84, %82, %85 : vector<128x128xi1>, vector<128x128xbf16>
    %c640 = arith.constant 640 : index
    %c0_54 = arith.constant 0 : index
    %87 = vector.load %arg8[%c640, %c0_54] : memref<1152x128xbf16, #tpu.memory_space<vmem>>, vector<128x128xbf16>
    %cst_55 = arith.constant dense<0.000000e+00> : vector<128x128xf32>
    %88 = tpu.matmul %86, %87, %cst_55 {dimension_numbers = #tpu.dot_dimension_numbers<[1], [0], [0], [1], [0, 0, 1, 1], [], []>} : vector<128x128xbf16>, vector<128x128xbf16>, vector<128x128xf32> -> vector<128x128xf32>
    %89 = arith.addf %81, %88 : vector<128x128xf32>
    %c39 = arith.constant 39 : index
    %c0_56 = arith.constant 0 : index
    %90 = vector.load %arg15[%c39, %c0_56] : memref<176x128xbf16, #tpu.memory_space<vmem>>, vector<128x128xbf16>
    %cst_57 = arith.constant 0.000000e+00 : bf16
    %91 = vector.shape_cast %46 : vector<128x1xi1> to vector<128x1xi1>
    %92 = vector.broadcast %91 : vector<128x1xi1> to vector<128x128xi1>
    %93 = vector.broadcast %cst_57 : bf16 to vector<128x128xbf16>
    %94 = arith.select %92, %90, %93 : vector<128x128xi1>, vector<128x128xbf16>
    %c768 = arith.constant 768 : index
    %c0_58 = arith.constant 0 : index
    %95 = vector.load %arg8[%c768, %c0_58] : memref<1152x128xbf16, #tpu.memory_space<vmem>>, vector<128x128xbf16>
    %cst_59 = arith.constant dense<0.000000e+00> : vector<128x128xf32>
    %96 = tpu.matmul %94, %95, %cst_59 {dimension_numbers = #tpu.dot_dimension_numbers<[1], [0], [0], [1], [0, 0, 1, 1], [], []>} : vector<128x128xbf16>, vector<128x128xbf16>, vector<128x128xf32> -> vector<128x128xf32>
    %97 = arith.addf %89, %96 : vector<128x128xf32>
    %c40 = arith.constant 40 : index
    %c0_60 = arith.constant 0 : index
    %98 = vector.load %arg15[%c40, %c0_60] : memref<176x128xbf16, #tpu.memory_space<vmem>>, vector<128x128xbf16>
    %c896 = arith.constant 896 : index
    %c0_61 = arith.constant 0 : index
    %99 = vector.load %arg8[%c896, %c0_61] : memref<1152x128xbf16, #tpu.memory_space<vmem>>, vector<128x128xbf16>
    %cst_62 = arith.constant dense<0.000000e+00> : vector<128x128xf32>
    %100 = tpu.matmul %98, %99, %cst_62 {dimension_numbers = #tpu.dot_dimension_numbers<[1], [0], [0], [1], [0, 0, 1, 1], [], []>} : vector<128x128xbf16>, vector<128x128xbf16>, vector<128x128xf32> -> vector<128x128xf32>
    %101 = arith.addf %97, %100 : vector<128x128xf32>
    %c41 = arith.constant 41 : index
    %c0_63 = arith.constant 0 : index
    %102 = vector.load %arg15[%c41, %c0_63] : memref<176x128xbf16, #tpu.memory_space<vmem>>, vector<128x128xbf16>
    %cst_64 = arith.constant 0.000000e+00 : bf16
    %103 = vector.shape_cast %48 : vector<128x1xi1> to vector<128x1xi1>
    %104 = vector.broadcast %103 : vector<128x1xi1> to vector<128x128xi1>
    %105 = vector.broadcast %cst_64 : bf16 to vector<128x128xbf16>
    %106 = arith.select %104, %102, %105 : vector<128x128xi1>, vector<128x128xbf16>
    %c1024 = arith.constant 1024 : index
    %c0_65 = arith.constant 0 : index
    %107 = vector.load %arg8[%c1024, %c0_65] : memref<1152x128xbf16, #tpu.memory_space<vmem>>, vector<128x128xbf16>
    %cst_66 = arith.constant dense<0.000000e+00> : vector<128x128xf32>
    %108 = tpu.matmul %106, %107, %cst_66 {dimension_numbers = #tpu.dot_dimension_numbers<[1], [0], [0], [1], [0, 0, 1, 1], [], []>} : vector<128x128xbf16>, vector<128x128xbf16>, vector<128x128xf32> -> vector<128x128xf32>
    %109 = arith.addf %101, %108 : vector<128x128xf32>
    %c0_67 = arith.constant 0 : index
    %c0_68 = arith.constant 0 : index
    %110 = vector.load %arg9[%c0_67, %c0_68] : memref<1x128xf32, #tpu.memory_space<vmem>>, vector<1x128xf32>
    %111 = vector.broadcast %110 : vector<1x128xf32> to vector<128x128xf32>
    %112 = arith.mulf %109, %111 : vector<128x128xf32>
    %c0_69 = arith.constant 0 : index
    %c0_70 = arith.constant 0 : index
    %113 = vector.load %arg10[%c0_69, %c0_70] : memref<1x128xf32, #tpu.memory_space<vmem>>, vector<1x128xf32>
    %114 = vector.broadcast %113 : vector<1x128xf32> to vector<128x128xf32>
    %115 = arith.addf %112, %114 : vector<128x128xf32>
    %cst_71 = arith.constant 0.000000e+00 : f32
    %116 = vector.broadcast %cst_71 : f32 to vector<128x128xf32>
    %117 = arith.maximumf %115, %116 : vector<128x128xf32>
    %118 = arith.truncf %117 : vector<128x128xf32> to vector<128x128xbf16>
    %c0_72 = arith.constant 0 : index
    %c0_73 = arith.constant 0 : index
    %119 = vector.load %arg11[%c0_72, %c0_73] : memref<128x128xbf16, #tpu.memory_space<vmem>>, vector<128x128xbf16>
    %cst_74 = arith.constant dense<0.000000e+00> : vector<128x128xf32>
    %120 = tpu.matmul %118, %119, %cst_74 {dimension_numbers = #tpu.dot_dimension_numbers<[1], [0], [0], [1], [0, 0, 1, 1], [], []>} : vector<128x128xbf16>, vector<128x128xbf16>, vector<128x128xf32> -> vector<128x128xf32>
    %c0_75 = arith.constant 0 : index
    %c0_76 = arith.constant 0 : index
    %121 = vector.load %arg12[%c0_75, %c0_76] : memref<1x128xf32, #tpu.memory_space<vmem>>, vector<1x128xf32>
    %122 = vector.broadcast %121 : vector<1x128xf32> to vector<128x128xf32>
    %123 = arith.mulf %120, %122 : vector<128x128xf32>
    %c0_77 = arith.constant 0 : index
    %c0_78 = arith.constant 0 : index
    %124 = vector.load %arg13[%c0_77, %c0_78] : memref<1x128xf32, #tpu.memory_space<vmem>>, vector<1x128xf32>
    %125 = vector.broadcast %124 : vector<1x128xf32> to vector<128x128xf32>
    %126 = arith.addf %123, %125 : vector<128x128xf32>
    %c0_79 = arith.constant 0 : index
    %c0_80 = arith.constant 0 : index
    %c0_81 = arith.constant 0 : index
    %c0_82 = arith.constant 0 : index
    %127 = vector.load %arg2[%c0_79, %c0_80, %c0_81, %c0_82] : memref<1x8x16x128xbf16, #tpu.memory_space<vmem>>, vector<1x8x16x128xbf16>
    %128 = vector.shape_cast %127 : vector<1x8x16x128xbf16> to vector<128x128xbf16>
    %129 = arith.extf %128 : vector<128x128xbf16> to vector<128x128xf32>
    %130 = arith.addf %126, %129 : vector<128x128xf32>
    %cst_83 = arith.constant 0.000000e+00 : f32
    %131 = vector.broadcast %cst_83 : f32 to vector<128x128xf32>
    %132 = arith.maximumf %130, %131 : vector<128x128xf32>
    %133 = vector.shape_cast %132 : vector<128x128xf32> to vector<1x8x16x128xf32>
    %134 = arith.truncf %133 : vector<1x8x16x128xf32> to vector<1x8x16x128xbf16>
    %c0_84 = arith.constant 0 : index
    %c0_85 = arith.constant 0 : index
    %c0_86 = arith.constant 0 : index
    %c0_87 = arith.constant 0 : index
    %135 = vector.load %arg14[%c0_84, %c0_85, %c0_86, %c0_87] : memref<1x8x16x128xbf16, #tpu.memory_space<vmem>>, vector<1x8x16x128xbf16>
    tpu.vector_store %arg14[%c0_84, %c0_85, %c0_86, %c0_87], %134 {strides = array<i32>} : memref<1x8x16x128xbf16, #tpu.memory_space<vmem>>, vector<1x8x16x128xbf16>,
    return
  }
  func.func @transform_0(%arg0: i32, %arg1: i32) -> (i32, i32, i32, i32) {
    %c0_i32 = arith.constant 0 : i32
    %c0_i32_0 = arith.constant 0 : i32
    %c0_i32_1 = arith.constant 0 : i32
    return %arg0, %arg1, %c0_i32, %c0_i32_0 : i32, i32, i32, i32
  }
  func.func @transform_1(%arg0: i32, %arg1: i32) -> (i32, i32, i32, i32) {
    %c8_i32 = arith.constant 8 : i32
    %0 = arith.muli %arg1, %c8_i32 : i32
    %c1_i32 = arith.constant 1 : i32
    %1 = arith.subi %0, %c1_i32 : i32
    %c0_i32 = arith.constant 0 : i32
    %2 = arith.maxsi %1, %c0_i32 : i32
    %c0_i32_0 = arith.constant 0 : i32
    %c0_i32_1 = arith.constant 0 : i32
    %c0_i32_2 = arith.constant 0 : i32
    return %arg0, %2, %c0_i32_0, %c0_i32_1 : i32, i32, i32, i32
  }
  func.func @transform_2(%arg0: i32, %arg1: i32) -> (i32, i32, i32, i32) {
    %c1_i32 = arith.constant 1 : i32
    %0 = arith.addi %arg1, %c1_i32 : i32
    %c8_i32 = arith.constant 8 : i32
    %1 = arith.muli %0, %c8_i32 : i32
    %c15_i32 = arith.constant 15 : i32
    %2 = arith.minsi %1, %c15_i32 : i32
    %c0_i32 = arith.constant 0 : i32
    %c0_i32_0 = arith.constant 0 : i32
    %c0_i32_1 = arith.constant 0 : i32
    return %arg0, %2, %c0_i32, %c0_i32_0 : i32, i32, i32, i32
  }
  func.func @transform_3(%arg0: i32, %arg1: i32) -> (i32, i32) {
    %c0_i32 = arith.constant 0 : i32
    %c0_i32_0 = arith.constant 0 : i32
    %c0_i32_1 = arith.constant 0 : i32
    return %c0_i32, %c0_i32_0 : i32, i32
  }
  func.func @transform_4(%arg0: i32, %arg1: i32) -> (i32, i32) {
    %c0_i32 = arith.constant 0 : i32
    %c0_i32_0 = arith.constant 0 : i32
    %c0_i32_1 = arith.constant 0 : i32
    return %c0_i32, %c0_i32_0 : i32, i32
  }
  func.func @transform_5(%arg0: i32, %arg1: i32) -> (i32, i32) {
    %c0_i32 = arith.constant 0 : i32
    %c0_i32_0 = arith.constant 0 : i32
    %c0_i32_1 = arith.constant 0 : i32
    return %c0_i32, %c0_i32_0 : i32, i32
  }
  func.func @transform_6(%arg0: i32, %arg1: i32) -> (i32, i32) {
    %c0_i32 = arith.constant 0 : i32
    %c0_i32_0 = arith.constant 0 : i32
    %c0_i32_1 = arith.constant 0 : i32
    return %c0_i32, %c0_i32_0 : i32, i32
  }
  func.func @transform_7(%arg0: i32, %arg1: i32) -> (i32, i32) {
    %c0_i32 = arith.constant 0 : i32
    %c0_i32_0 = arith.constant 0 : i32
    %c0_i32_1 = arith.constant 0 : i32
    return %c0_i32, %c0_i32_0 : i32, i32
  }
  func.func @transform_8(%arg0: i32, %arg1: i32) -> (i32, i32) {
    %c0_i32 = arith.constant 0 : i32
    %c0_i32_0 = arith.constant 0 : i32
    %c0_i32_1 = arith.constant 0 : i32
    return %c0_i32, %c0_i32_0 : i32, i32
  }
  func.func @transform_9(%arg0: i32, %arg1: i32) -> (i32, i32) {
    %c0_i32 = arith.constant 0 : i32
    %c0_i32_0 = arith.constant 0 : i32
    %c0_i32_1 = arith.constant 0 : i32
    return %c0_i32, %c0_i32_0 : i32, i32
  }
  func.func @transform_10(%arg0: i32, %arg1: i32) -> (i32, i32) {
    %c0_i32 = arith.constant 0 : i32
    %c0_i32_0 = arith.constant 0 : i32
    %c0_i32_1 = arith.constant 0 : i32
    return %c0_i32, %c0_i32_0 : i32, i32
  }
  func.func @transform_11(%arg0: i32, %arg1: i32) -> (i32, i32) {
    %c0_i32 = arith.constant 0 : i32
    %c0_i32_0 = arith.constant 0 : i32
    %c0_i32_1 = arith.constant 0 : i32
    return %c0_i32, %c0_i32_0 : i32, i32
  }
  func.func @transform_12(%arg0: i32, %arg1: i32) -> (i32, i32, i32, i32) {
    %c0_i32 = arith.constant 0 : i32
    %c0_i32_0 = arith.constant 0 : i32
    %c0_i32_1 = arith.constant 0 : i32
    return %arg0, %arg1, %c0_i32, %c0_i32_0 : i32, i32, i32, i32
  }
}

module attributes {stable_mosaic.version = 11 : i64} {
  func.func @bottleneck_kernel(%arg0: i32, %arg1: i32, %arg2: memref<1x8x16x128xbf16, #tpu.memory_space<vmem>>, %arg3: memref<1x1x16x128xbf16, #tpu.memory_space<vmem>>, %arg4: memref<1x1x16x128xbf16, #tpu.memory_space<vmem>>, %arg5: memref<128x128xbf16, #tpu.memory_space<vmem>>, %arg6: memref<1x128xf32, #tpu.memory_space<vmem>>, %arg7: memref<1x128xf32, #tpu.memory_space<vmem>>, %arg8: memref<1152x128xbf16, #tpu.memory_space<vmem>>, %arg9: memref<1x128xf32, #tpu.memory_space<vmem>>, %arg10: memref<1x128xf32, #tpu.memory_space<vmem>>, %arg11: memref<128x128xbf16, #tpu.memory_space<vmem>>, %arg12: memref<1x128xf32, #tpu.memory_space<vmem>>, %arg13: memref<1x128xf32, #tpu.memory_space<vmem>>, %arg14: memref<1x8x16x128xbf16, #tpu.memory_space<vmem>>, %arg15: memref<176x128xbf16, #tpu.memory_space<vmem>>) attributes {dimension_semantics = [#tpu.dimension_semantics<parallel>, #tpu.dimension_semantics<parallel>], iteration_bounds = array<i64: 2, 2>, scalar_prefetch = 0 : i64, scratch_operands = 1 : i64, tpu.core_type = #tpu.core_type<tc>, window_params = [{transform_indices = @transform_0, window_bounds = array<i64: 1, 8, 16, 128>}, {transform_indices = @transform_1, window_bounds = array<i64: 1, 1, 16, 128>}, {transform_indices = @transform_2, window_bounds = array<i64: 1, 1, 16, 128>}, {pipeline_mode = #tpu.pipeline_mode<synchronous>, transform_indices = @transform_3, window_bounds = array<i64: 128, 128>}, {pipeline_mode = #tpu.pipeline_mode<synchronous>, transform_indices = @transform_4, window_bounds = array<i64: 1, 128>}, {pipeline_mode = #tpu.pipeline_mode<synchronous>, transform_indices = @transform_5, window_bounds = array<i64: 1, 128>}, {pipeline_mode = #tpu.pipeline_mode<synchronous>, transform_indices = @transform_6, window_bounds = array<i64: 1152, 128>}, {pipeline_mode = #tpu.pipeline_mode<synchronous>, transform_indices = @transform_7, window_bounds = array<i64: 1, 128>}, {pipeline_mode = #tpu.pipeline_mode<synchronous>, transform_indices = @transform_8, window_bounds = array<i64: 1, 128>}, {pipeline_mode = #tpu.pipeline_mode<synchronous>, transform_indices = @transform_9, window_bounds = array<i64: 128, 128>}, {pipeline_mode = #tpu.pipeline_mode<synchronous>, transform_indices = @transform_10, window_bounds = array<i64: 1, 128>}, {pipeline_mode = #tpu.pipeline_mode<synchronous>, transform_indices = @transform_11, window_bounds = array<i64: 1, 128>}, {transform_indices = @transform_12, window_bounds = array<i64: 1, 8, 16, 128>}]} {
    %c0 = arith.constant 0 : index
    %c0_0 = arith.constant 0 : index
    %c0_1 = arith.constant 0 : index
    %c0_2 = arith.constant 0 : index
    %0 = vector.load %arg3[%c0, %c0_0, %c0_1, %c0_2] : memref<1x1x16x128xbf16, #tpu.memory_space<vmem>>, vector<1x1x16x128xbf16>
    %1 = vector.shape_cast %0 : vector<1x1x16x128xbf16> to vector<16x128xbf16>
    %c0_3 = arith.constant 0 : index
    %c0_4 = arith.constant 0 : index
    %c0_5 = arith.constant 0 : index
    %c0_6 = arith.constant 0 : index
    %2 = vector.load %arg2[%c0_3, %c0_4, %c0_5, %c0_6] : memref<1x8x16x128xbf16, #tpu.memory_space<vmem>>, vector<1x8x16x128xbf16>
    %3 = vector.shape_cast %2 : vector<1x8x16x128xbf16> to vector<128x128xbf16>
    %c0_7 = arith.constant 0 : index
    %c0_8 = arith.constant 0 : index
    %c0_9 = arith.constant 0 : index
    %c0_10 = arith.constant 0 : index
    %4 = vector.load %arg4[%c0_7, %c0_8, %c0_9, %c0_10] : memref<1x1x16x128xbf16, #tpu.memory_space<vmem>>, vector<1x1x16x128xbf16>
    %5 = vector.shape_cast %4 : vector<1x1x16x128xbf16> to vector<16x128xbf16>
    %6 = tpu.concatenate %1, %3, %5 in 0 : vector<16x128xbf16>, vector<128x128xbf16>, vector<16x128xbf16> -> vector<160x128xbf16>
    %c0_11 = arith.constant 0 : index
    %c0_12 = arith.constant 0 : index
    %7 = vector.load %arg5[%c0_11, %c0_12] : memref<128x128xbf16, #tpu.memory_space<vmem>>, vector<128x128xbf16>
    %cst = arith.constant dense<0.000000e+00> : vector<160x128xf32>
    %8 = tpu.matmul %6, %7, %cst {dimension_numbers = #tpu.dot_dimension_numbers<[1], [0], [0], [1], [0, 0, 1, 1], [], []>} : vector<160x128xbf16>, vector<128x128xbf16>, vector<160x128xf32> -> vector<160x128xf32>
    %c0_13 = arith.constant 0 : index
    %c0_14 = arith.constant 0 : index
    %9 = vector.load %arg6[%c0_13, %c0_14] : memref<1x128xf32, #tpu.memory_space<vmem>>, vector<1x128xf32>
    %10 = vector.broadcast %9 : vector<1x128xf32> to vector<160x128xf32>
    %11 = arith.mulf %8, %10 : vector<160x128xf32>
    %c0_15 = arith.constant 0 : index
    %c0_16 = arith.constant 0 : index
    %12 = vector.load %arg7[%c0_15, %c0_16] : memref<1x128xf32, #tpu.memory_space<vmem>>, vector<1x128xf32>
    %13 = vector.broadcast %12 : vector<1x128xf32> to vector<160x128xf32>
    %14 = arith.addf %11, %13 : vector<160x128xf32>
    %cst_17 = arith.constant 0.000000e+00 : f32
    %15 = vector.broadcast %cst_17 : f32 to vector<160x128xf32>
    %16 = arith.maximumf %14, %15 : vector<160x128xf32>
    %cst_18 = arith.constant 0.000000e+00 : bf16
    %17 = vector.broadcast %cst_18 : bf16 to vector<8x128xbf16>
    %c0_19 = arith.constant 0 : index
    %c0_20 = arith.constant 0 : index
    %18 = vector.load %arg15[%c0_19, %c0_20] : memref<176x128xbf16, #tpu.memory_space<vmem>>, vector<8x128xbf16>
    tpu.vector_store %arg15[%c0_19, %c0_20], %17 {strides = array<i32>} : memref<176x128xbf16, #tpu.memory_space<vmem>>, vector<8x128xbf16>,
    %c168 = arith.constant 168 : index
    %c0_21 = arith.constant 0 : index
    %19 = vector.load %arg15[%c168, %c0_21] : memref<176x128xbf16, #tpu.memory_space<vmem>>, vector<8x128xbf16>
    tpu.vector_store %arg15[%c168, %c0_21], %17 {strides = array<i32>} : memref<176x128xbf16, #tpu.memory_space<vmem>>, vector<8x128xbf16>,
    %20 = arith.truncf %16 : vector<160x128xf32> to vector<160x128xbf16>
    %c8 = arith.constant 8 : index
    %c0_22 = arith.constant 0 : index
    %21 = vector.load %arg15[%c8, %c0_22] : memref<176x128xbf16, #tpu.memory_space<vmem>>, vector<160x128xbf16>
    tpu.vector_store %arg15[%c8, %c0_22], %20 {strides = array<i32>} : memref<176x128xbf16, #tpu.memory_space<vmem>>, vector<160x128xbf16>,
    %c0_i32 = arith.constant 0 : i32
    %22 = arith.cmpi eq, %arg1, %c0_i32 : i32
    %23 = arith.extui %22 : i1 to i32
    %c0_i32_23 = arith.constant 0 : i32
    %24 = arith.cmpi ne, %23, %c0_i32_23 : i32
    scf.if %24 {
      %cst_88 = arith.constant 0.000000e+00 : bf16
      %136 = vector.broadcast %cst_88 : bf16 to vector<16x128xbf16>
      %c8_89 = arith.constant 8 : index
      %c0_90 = arith.constant 0 : index
      %137 = vector.load %arg15[%c8_89, %c0_90] : memref<176x128xbf16, #tpu.memory_space<vmem>>, vector<16x128xbf16>
      tpu.vector_store %arg15[%c8_89, %c0_90], %136 {strides = array<i32>} : memref<176x128xbf16, #tpu.memory_space<vmem>>, vector<16x128xbf16>,
    } else {
    }
    %c1_i32 = arith.constant 1 : i32
    %25 = arith.cmpi eq, %arg1, %c1_i32 : i32
    %26 = arith.extui %25 : i1 to i32
    %c0_i32_24 = arith.constant 0 : i32
    %27 = arith.cmpi ne, %26, %c0_i32_24 : i32
    scf.if %27 {
      %cst_88 = arith.constant 0.000000e+00 : bf16
      %136 = vector.broadcast %cst_88 : bf16 to vector<16x128xbf16>
      %c152 = arith.constant 152 : index
      %c0_89 = arith.constant 0 : index
      %137 = vector.load %arg15[%c152, %c0_89] : memref<176x128xbf16, #tpu.memory_space<vmem>>, vector<16x128xbf16>
      tpu.vector_store %arg15[%c152, %c0_89], %136 {strides = array<i32>} : memref<176x128xbf16, #tpu.memory_space<vmem>>, vector<16x128xbf16>,
    } else {
    }
    %28 = tpu.iota {dimensions = array<i32: 0>} : vector<128x1xi32>
    %c16_i32 = arith.constant 16 : i32
    %c0_i32_25 = arith.constant 0 : i32
    %29 = arith.cmpi eq, %c16_i32, %c0_i32_25 : i32
    %c1_i32_26 = arith.constant 1 : i32
    %30 = arith.select %29, %c1_i32_26, %c16_i32 : i32
    %31 = vector.broadcast %30 : i32 to vector<128x1xi32>
    %32 = arith.remsi %28, %31 : vector<128x1xi32>
    %c0_i32_27 = arith.constant 0 : i32
    %33 = vector.broadcast %c0_i32_27 : i32 to vector<128x1xi32>
    %34 = arith.cmpi ne, %32, %33 : vector<128x1xi32>
    %c0_i32_28 = arith.constant 0 : i32
    %35 = vector.broadcast %c0_i32_28 : i32 to vector<128x1xi32>
    %36 = arith.cmpi slt, %32, %35 : vector<128x1xi32>
    %c0_i32_29 = arith.constant 0 : i32
    %37 = arith.cmpi slt, %30, %c0_i32_29 : i32
    %38 = vector.broadcast %37 : i1 to vector<128x1xi1>
    %39 = vector.broadcast %38 : vector<128x1xi1> to vector<128x1xi1>
    %40 = arith.xori %36, %39 : vector<128x1xi1>
    %41 = arith.andi %40, %34 : vector<128x1xi1>
    %42 = vector.broadcast %30 : i32 to vector<128x1xi32>
    %43 = arith.addi %32, %42 : vector<128x1xi32>
    %44 = arith.select %41, %43, %32 : vector<128x1xi1>, vector<128x1xi32>
    %c0_i32_30 = arith.constant 0 : i32
    %45 = vector.broadcast %c0_i32_30 : i32 to vector<128x1xi32>
    %46 = arith.cmpi sgt, %44, %45 : vector<128x1xi32>
    %c15_i32 = arith.constant 15 : i32
    %47 = vector.broadcast %c15_i32 : i32 to vector<128x1xi32>
    %48 = arith.cmpi slt, %44, %47 : vector<128x1xi32>
    %cst_31 = arith.constant 0.000000e+00 : f32
    %49 = vector.broadcast %cst_31 : f32 to vector<128x128xf32>
    %c7 = arith.constant 7 : index
    %c0_32 = arith.constant 0 : index
    %50 = vector.load %arg15[%c7, %c0_32] : memref<176x128xbf16, #tpu.memory_space<vmem>>, vector<128x128xbf16>
    %cst_33 = arith.constant 0.000000e+00 : bf16
    %51 = vector.shape_cast %46 : vector<128x1xi1> to vector<128x1xi1>
    %52 = vector.broadcast %51 : vector<128x1xi1> to vector<128x128xi1>
    %53 = vector.broadcast %cst_33 : bf16 to vector<128x128xbf16>
    %54 = arith.select %52, %50, %53 : vector<128x128xi1>, vector<128x128xbf16>
    %c0_34 = arith.constant 0 : index
    %c0_35 = arith.constant 0 : index
    %55 = vector.load %arg8[%c0_34, %c0_35] : memref<1152x128xbf16, #tpu.memory_space<vmem>>, vector<128x128xbf16>
    %cst_36 = arith.constant dense<0.000000e+00> : vector<128x128xf32>
    %56 = tpu.matmul %54, %55, %cst_36 {dimension_numbers = #tpu.dot_dimension_numbers<[1], [0], [0], [1], [0, 0, 1, 1], [], []>} : vector<128x128xbf16>, vector<128x128xbf16>, vector<128x128xf32> -> vector<128x128xf32>
    %57 = arith.addf %49, %56 : vector<128x128xf32>
    %c8_37 = arith.constant 8 : index
    %c0_38 = arith.constant 0 : index
    %58 = vector.load %arg15[%c8_37, %c0_38] : memref<176x128xbf16, #tpu.memory_space<vmem>>, vector<128x128xbf16>
    %c128 = arith.constant 128 : index
    %c0_39 = arith.constant 0 : index
    %59 = vector.load %arg8[%c128, %c0_39] : memref<1152x128xbf16, #tpu.memory_space<vmem>>, vector<128x128xbf16>
    %cst_40 = arith.constant dense<0.000000e+00> : vector<128x128xf32>
    %60 = tpu.matmul %58, %59, %cst_40 {dimension_numbers = #tpu.dot_dimension_numbers<[1], [0], [0], [1], [0, 0, 1, 1], [], []>} : vector<128x128xbf16>, vector<128x128xbf16>, vector<128x128xf32> -> vector<128x128xf32>
    %61 = arith.addf %57, %60 : vector<128x128xf32>
    %c9 = arith.constant 9 : index
    %c0_41 = arith.constant 0 : index
    %62 = vector.load %arg15[%c9, %c0_41] : memref<176x128xbf16, #tpu.memory_space<vmem>>, vector<128x128xbf16>
    %cst_42 = arith.constant 0.000000e+00 : bf16
    %63 = vector.shape_cast %48 : vector<128x1xi1> to vector<128x1xi1>
    %64 = vector.broadcast %63 : vector<128x1xi1> to vector<128x128xi1>
    %65 = vector.broadcast %cst_42 : bf16 to vector<128x128xbf16>
    %66 = arith.select %64, %62, %65 : vector<128x128xi1>, vector<128x128xbf16>
    %c256 = arith.constant 256 : index
    %c0_43 = arith.constant 0 : index
    %67 = vector.load %arg8[%c256, %c0_43] : memref<1152x128xbf16, #tpu.memory_space<vmem>>, vector<128x128xbf16>
    %cst_44 = arith.constant dense<0.000000e+00> : vector<128x128xf32>
    %68 = tpu.matmul %66, %67, %cst_44 {dimension_numbers = #tpu.dot_dimension_numbers<[1], [0], [0], [1], [0, 0, 1, 1], [], []>} : vector<128x128xbf16>, vector<128x128xbf16>, vector<128x128xf32> -> vector<128x128xf32>
    %69 = arith.addf %61, %68 : vector<128x128xf32>
    %c23 = arith.constant 23 : index
    %c0_45 = arith.constant 0 : index
    %70 = vector.load %arg15[%c23, %c0_45] : memref<176x128xbf16, #tpu.memory_space<vmem>>, vector<128x128xbf16>
    %cst_46 = arith.constant 0.000000e+00 : bf16
    %71 = vector.shape_cast %46 : vector<128x1xi1> to vector<128x1xi1>
    %72 = vector.broadcast %71 : vector<128x1xi1> to vector<128x128xi1>
    %73 = vector.broadcast %cst_46 : bf16 to vector<128x128xbf16>
    %74 = arith.select %72, %70, %73 : vector<128x128xi1>, vector<128x128xbf16>
    %c384 = arith.constant 384 : index
    %c0_47 = arith.constant 0 : index
    %75 = vector.load %arg8[%c384, %c0_47] : memref<1152x128xbf16, #tpu.memory_space<vmem>>, vector<128x128xbf16>
    %cst_48 = arith.constant dense<0.000000e+00> : vector<128x128xf32>
    %76 = tpu.matmul %74, %75, %cst_48 {dimension_numbers = #tpu.dot_dimension_numbers<[1], [0], [0], [1], [0, 0, 1, 1], [], []>} : vector<128x128xbf16>, vector<128x128xbf16>, vector<128x128xf32> -> vector<128x128xf32>
    %77 = arith.addf %69, %76 : vector<128x128xf32>
    %c24 = arith.constant 24 : index
    %c0_49 = arith.constant 0 : index
    %78 = vector.load %arg15[%c24, %c0_49] : memref<176x128xbf16, #tpu.memory_space<vmem>>, vector<128x128xbf16>
    %c512 = arith.constant 512 : index
    %c0_50 = arith.constant 0 : index
    %79 = vector.load %arg8[%c512, %c0_50] : memref<1152x128xbf16, #tpu.memory_space<vmem>>, vector<128x128xbf16>
    %cst_51 = arith.constant dense<0.000000e+00> : vector<128x128xf32>
    %80 = tpu.matmul %78, %79, %cst_51 {dimension_numbers = #tpu.dot_dimension_numbers<[1], [0], [0], [1], [0, 0, 1, 1], [], []>} : vector<128x128xbf16>, vector<128x128xbf16>, vector<128x128xf32> -> vector<128x128xf32>
    %81 = arith.addf %77, %80 : vector<128x128xf32>
    %c25 = arith.constant 25 : index
    %c0_52 = arith.constant 0 : index
    %82 = vector.load %arg15[%c25, %c0_52] : memref<176x128xbf16, #tpu.memory_space<vmem>>, vector<128x128xbf16>
    %cst_53 = arith.constant 0.000000e+00 : bf16
    %83 = vector.shape_cast %48 : vector<128x1xi1> to vector<128x1xi1>
    %84 = vector.broadcast %83 : vector<128x1xi1> to vector<128x128xi1>
    %85 = vector.broadcast %cst_53 : bf16 to vector<128x128xbf16>
    %86 = arith.select %84, %82, %85 : vector<128x128xi1>, vector<128x128xbf16>
    %c640 = arith.constant 640 : index
    %c0_54 = arith.constant 0 : index
    %87 = vector.load %arg8[%c640, %c0_54] : memref<1152x128xbf16, #tpu.memory_space<vmem>>, vector<128x128xbf16>
    %cst_55 = arith.constant dense<0.000000e+00> : vector<128x128xf32>
    %88 = tpu.matmul %86, %87, %cst_55 {dimension_numbers = #tpu.dot_dimension_numbers<[1], [0], [0], [1], [0, 0, 1, 1], [], []>} : vector<128x128xbf16>, vector<128x128xbf16>, vector<128x128xf32> -> vector<128x128xf32>
    %89 = arith.addf %81, %88 : vector<128x128xf32>
    %c39 = arith.constant 39 : index
    %c0_56 = arith.constant 0 : index
    %90 = vector.load %arg15[%c39, %c0_56] : memref<176x128xbf16, #tpu.memory_space<vmem>>, vector<128x128xbf16>
    %cst_57 = arith.constant 0.000000e+00 : bf16
    %91 = vector.shape_cast %46 : vector<128x1xi1> to vector<128x1xi1>
    %92 = vector.broadcast %91 : vector<128x1xi1> to vector<128x128xi1>
    %93 = vector.broadcast %cst_57 : bf16 to vector<128x128xbf16>
    %94 = arith.select %92, %90, %93 : vector<128x128xi1>, vector<128x128xbf16>
    %c768 = arith.constant 768 : index
    %c0_58 = arith.constant 0 : index
    %95 = vector.load %arg8[%c768, %c0_58] : memref<1152x128xbf16, #tpu.memory_space<vmem>>, vector<128x128xbf16>
    %cst_59 = arith.constant dense<0.000000e+00> : vector<128x128xf32>
    %96 = tpu.matmul %94, %95, %cst_59 {dimension_numbers = #tpu.dot_dimension_numbers<[1], [0], [0], [1], [0, 0, 1, 1], [], []>} : vector<128x128xbf16>, vector<128x128xbf16>, vector<128x128xf32> -> vector<128x128xf32>
    %97 = arith.addf %89, %96 : vector<128x128xf32>
    %c40 = arith.constant 40 : index
    %c0_60 = arith.constant 0 : index
    %98 = vector.load %arg15[%c40, %c0_60] : memref<176x128xbf16, #tpu.memory_space<vmem>>, vector<128x128xbf16>
    %c896 = arith.constant 896 : index
    %c0_61 = arith.constant 0 : index
    %99 = vector.load %arg8[%c896, %c0_61] : memref<1152x128xbf16, #tpu.memory_space<vmem>>, vector<128x128xbf16>
    %cst_62 = arith.constant dense<0.000000e+00> : vector<128x128xf32>
    %100 = tpu.matmul %98, %99, %cst_62 {dimension_numbers = #tpu.dot_dimension_numbers<[1], [0], [0], [1], [0, 0, 1, 1], [], []>} : vector<128x128xbf16>, vector<128x128xbf16>, vector<128x128xf32> -> vector<128x128xf32>
    %101 = arith.addf %97, %100 : vector<128x128xf32>
    %c41 = arith.constant 41 : index
    %c0_63 = arith.constant 0 : index
    %102 = vector.load %arg15[%c41, %c0_63] : memref<176x128xbf16, #tpu.memory_space<vmem>>, vector<128x128xbf16>
    %cst_64 = arith.constant 0.000000e+00 : bf16
    %103 = vector.shape_cast %48 : vector<128x1xi1> to vector<128x1xi1>
    %104 = vector.broadcast %103 : vector<128x1xi1> to vector<128x128xi1>
    %105 = vector.broadcast %cst_64 : bf16 to vector<128x128xbf16>
    %106 = arith.select %104, %102, %105 : vector<128x128xi1>, vector<128x128xbf16>
    %c1024 = arith.constant 1024 : index
    %c0_65 = arith.constant 0 : index
    %107 = vector.load %arg8[%c1024, %c0_65] : memref<1152x128xbf16, #tpu.memory_space<vmem>>, vector<128x128xbf16>
    %cst_66 = arith.constant dense<0.000000e+00> : vector<128x128xf32>
    %108 = tpu.matmul %106, %107, %cst_66 {dimension_numbers = #tpu.dot_dimension_numbers<[1], [0], [0], [1], [0, 0, 1, 1], [], []>} : vector<128x128xbf16>, vector<128x128xbf16>, vector<128x128xf32> -> vector<128x128xf32>
    %109 = arith.addf %101, %108 : vector<128x128xf32>
    %c0_67 = arith.constant 0 : index
    %c0_68 = arith.constant 0 : index
    %110 = vector.load %arg9[%c0_67, %c0_68] : memref<1x128xf32, #tpu.memory_space<vmem>>, vector<1x128xf32>
    %111 = vector.broadcast %110 : vector<1x128xf32> to vector<128x128xf32>
    %112 = arith.mulf %109, %111 : vector<128x128xf32>
    %c0_69 = arith.constant 0 : index
    %c0_70 = arith.constant 0 : index
    %113 = vector.load %arg10[%c0_69, %c0_70] : memref<1x128xf32, #tpu.memory_space<vmem>>, vector<1x128xf32>
    %114 = vector.broadcast %113 : vector<1x128xf32> to vector<128x128xf32>
    %115 = arith.addf %112, %114 : vector<128x128xf32>
    %cst_71 = arith.constant 0.000000e+00 : f32
    %116 = vector.broadcast %cst_71 : f32 to vector<128x128xf32>
    %117 = arith.maximumf %115, %116 : vector<128x128xf32>
    %118 = arith.truncf %117 : vector<128x128xf32> to vector<128x128xbf16>
    %c0_72 = arith.constant 0 : index
    %c0_73 = arith.constant 0 : index
    %119 = vector.load %arg11[%c0_72, %c0_73] : memref<128x128xbf16, #tpu.memory_space<vmem>>, vector<128x128xbf16>
    %cst_74 = arith.constant dense<0.000000e+00> : vector<128x128xf32>
    %120 = tpu.matmul %118, %119, %cst_74 {dimension_numbers = #tpu.dot_dimension_numbers<[1], [0], [0], [1], [0, 0, 1, 1], [], []>} : vector<128x128xbf16>, vector<128x128xbf16>, vector<128x128xf32> -> vector<128x128xf32>
    %c0_75 = arith.constant 0 : index
    %c0_76 = arith.constant 0 : index
    %121 = vector.load %arg12[%c0_75, %c0_76] : memref<1x128xf32, #tpu.memory_space<vmem>>, vector<1x128xf32>
    %122 = vector.broadcast %121 : vector<1x128xf32> to vector<128x128xf32>
    %123 = arith.mulf %120, %122 : vector<128x128xf32>
    %c0_77 = arith.constant 0 : index
    %c0_78 = arith.constant 0 : index
    %124 = vector.load %arg13[%c0_77, %c0_78] : memref<1x128xf32, #tpu.memory_space<vmem>>, vector<1x128xf32>
    %125 = vector.broadcast %124 : vector<1x128xf32> to vector<128x128xf32>
    %126 = arith.addf %123, %125 : vector<128x128xf32>
    %c0_79 = arith.constant 0 : index
    %c0_80 = arith.constant 0 : index
    %c0_81 = arith.constant 0 : index
    %c0_82 = arith.constant 0 : index
    %127 = vector.load %arg2[%c0_79, %c0_80, %c0_81, %c0_82] : memref<1x8x16x128xbf16, #tpu.memory_space<vmem>>, vector<1x8x16x128xbf16>
    %128 = vector.shape_cast %127 : vector<1x8x16x128xbf16> to vector<128x128xbf16>
    %129 = arith.extf %128 : vector<128x128xbf16> to vector<128x128xf32>
    %130 = arith.addf %126, %129 : vector<128x128xf32>
    %cst_83 = arith.constant 0.000000e+00 : f32
    %131 = vector.broadcast %cst_83 : f32 to vector<128x128xf32>
    %132 = arith.maximumf %130, %131 : vector<128x128xf32>
    %133 = vector.shape_cast %132 : vector<128x128xf32> to vector<1x8x16x128xf32>
    %134 = arith.truncf %133 : vector<1x8x16x128xf32> to vector<1x8x16x128xbf16>
    %c0_84 = arith.constant 0 : index
    %c0_85 = arith.constant 0 : index
    %c0_86 = arith.constant 0 : index
    %c0_87 = arith.constant 0 : index
    %135 = vector.load %arg14[%c0_84, %c0_85, %c0_86, %c0_87] : memref<1x8x16x128xbf16, #tpu.memory_space<vmem>>, vector<1x8x16x128xbf16>
    tpu.vector_store %arg14[%c0_84, %c0_85, %c0_86, %c0_87], %134 {strides = array<i32>} : memref<1x8x16x128xbf16, #tpu.memory_space<vmem>>, vector<1x8x16x128xbf16>,
    return
  }
  func.func @transform_0(%arg0: i32, %arg1: i32) -> (i32, i32, i32, i32) {
    %c0_i32 = arith.constant 0 : i32
    %c0_i32_0 = arith.constant 0 : i32
    %c0_i32_1 = arith.constant 0 : i32
    return %arg0, %arg1, %c0_i32, %c0_i32_0 : i32, i32, i32, i32
  }
  func.func @transform_1(%arg0: i32, %arg1: i32) -> (i32, i32, i32, i32) {
    %c8_i32 = arith.constant 8 : i32
    %0 = arith.muli %arg1, %c8_i32 : i32
    %c1_i32 = arith.constant 1 : i32
    %1 = arith.subi %0, %c1_i32 : i32
    %c0_i32 = arith.constant 0 : i32
    %2 = arith.maxsi %1, %c0_i32 : i32
    %c0_i32_0 = arith.constant 0 : i32
    %c0_i32_1 = arith.constant 0 : i32
    %c0_i32_2 = arith.constant 0 : i32
    return %arg0, %2, %c0_i32_0, %c0_i32_1 : i32, i32, i32, i32
  }
  func.func @transform_2(%arg0: i32, %arg1: i32) -> (i32, i32, i32, i32) {
    %c1_i32 = arith.constant 1 : i32
    %0 = arith.addi %arg1, %c1_i32 : i32
    %c8_i32 = arith.constant 8 : i32
    %1 = arith.muli %0, %c8_i32 : i32
    %c15_i32 = arith.constant 15 : i32
    %2 = arith.minsi %1, %c15_i32 : i32
    %c0_i32 = arith.constant 0 : i32
    %c0_i32_0 = arith.constant 0 : i32
    %c0_i32_1 = arith.constant 0 : i32
    return %arg0, %2, %c0_i32, %c0_i32_0 : i32, i32, i32, i32
  }
  func.func @transform_3(%arg0: i32, %arg1: i32) -> (i32, i32) {
    %c0_i32 = arith.constant 0 : i32
    %c0_i32_0 = arith.constant 0 : i32
    %c0_i32_1 = arith.constant 0 : i32
    return %c0_i32, %c0_i32_0 : i32, i32
  }
  func.func @transform_4(%arg0: i32, %arg1: i32) -> (i32, i32) {
    %c0_i32 = arith.constant 0 : i32
    %c0_i32_0 = arith.constant 0 : i32
    %c0_i32_1 = arith.constant 0 : i32
    return %c0_i32, %c0_i32_0 : i32, i32
  }
  func.func @transform_5(%arg0: i32, %arg1: i32) -> (i32, i32) {
    %c0_i32 = arith.constant 0 : i32
    %c0_i32_0 = arith.constant 0 : i32
    %c0_i32_1 = arith.constant 0 : i32
    return %c0_i32, %c0_i32_0 : i32, i32
  }
  func.func @transform_6(%arg0: i32, %arg1: i32) -> (i32, i32) {
    %c0_i32 = arith.constant 0 : i32
    %c0_i32_0 = arith.constant 0 : i32
    %c0_i32_1 = arith.constant 0 : i32
    return %c0_i32, %c0_i32_0 : i32, i32
  }
  func.func @transform_7(%arg0: i32, %arg1: i32) -> (i32, i32) {
    %c0_i32 = arith.constant 0 : i32
    %c0_i32_0 = arith.constant 0 : i32
    %c0_i32_1 = arith.constant 0 : i32
    return %c0_i32, %c0_i32_0 : i32, i32
  }
  func.func @transform_8(%arg0: i32, %arg1: i32) -> (i32, i32) {
    %c0_i32 = arith.constant 0 : i32
    %c0_i32_0 = arith.constant 0 : i32
    %c0_i32_1 = arith.constant 0 : i32
    return %c0_i32, %c0_i32_0 : i32, i32
  }
  func.func @transform_9(%arg0: i32, %arg1: i32) -> (i32, i32) {
    %c0_i32 = arith.constant 0 : i32
    %c0_i32_0 = arith.constant 0 : i32
    %c0_i32_1 = arith.constant 0 : i32
    return %c0_i32, %c0_i32_0 : i32, i32
  }
  func.func @transform_10(%arg0: i32, %arg1: i32) -> (i32, i32) {
    %c0_i32 = arith.constant 0 : i32
    %c0_i32_0 = arith.constant 0 : i32
    %c0_i32_1 = arith.constant 0 : i32
    return %c0_i32, %c0_i32_0 : i32, i32
  }
  func.func @transform_11(%arg0: i32, %arg1: i32) -> (i32, i32) {
    %c0_i32 = arith.constant 0 : i32
    %c0_i32_0 = arith.constant 0 : i32
    %c0_i32_1 = arith.constant 0 : i32
    return %c0_i32, %c0_i32_0 : i32, i32
  }
  func.func @transform_12(%arg0: i32, %arg1: i32) -> (i32, i32, i32, i32) {
    %c0_i32 = arith.constant 0 : i32
    %c0_i32_0 = arith.constant 0 : i32
    %c0_i32_1 = arith.constant 0 : i32
    return %arg0, %arg1, %c0_i32, %c0_i32_0 : i32, i32, i32, i32
  }
}

</mosaic_0001>

<bundles_post_ra>
// kernel: tpu_custom_call.1
= control target key start
LH: loop header
LB: loop body
LE: loop exit
PB: predicated region body
PF: predicated region fallthrough
CT: control target
= control target key end

     0   :  { %s7688_s0 = inlined_call_operand.hbm [shape: bf16[2,16,16,128], index: 0, kind: input, shape index: {}]   ;;  %s7689_s1 = inlined_call_operand.hbm [shape: bf16[2,16,16,128], index: 1, kind: input, shape index: {}]   ;;  %s7690_s2 = inlined_call_operand.hbm [shape: bf16[2,16,16,128], index: 2, kind: input, shape index: {}]   ;;  %s7691_s3 = inlined_call_operand.hbm [shape: bf16[128,128], index: 3, kind: input, shape index: {}]   ;;  %s7692_s4 = inlined_call_operand.vmem [shape: f32[1,128], index: 4, kind: input, shape index: {}]   ;;  %s7693_s5 = inlined_call_operand.vmem [shape: f32[1,128], index: 5, kind: input, shape index: {}]   ;;  %s7694_s6 = inlined_call_operand.hbm [shape: bf16[1152,128], index: 6, kind: input, shape index: {}]   ;;  %s7695_s7 = inlined_call_operand.vmem [shape: f32[1,128], index: 7, kind: input, shape index: {}]   ;;  %s7696_s8 = inlined_call_operand.vmem [shape: f32[1,128], index: 8, kind: input, shape index: {}]   ;;  %s7697_s9 = inlined_call_operand.hbm [shape: bf16[128,128], index: 9, kind: input, shape index: {}]   ;;  %s7698_s10 = inlined_call_operand.vmem [shape: f32[1,128], index: 10, kind: input, shape index: {}]   ;;  %s7699_s11 = inlined_call_operand.vmem [shape: f32[1,128], index: 11, kind: input, shape index: {}]   ;;  %s7700_s12 = inlined_call_operand.hbm [shape: bf16[2,16,16,128], index: 12, kind: output, shape index: {}]  }
   0x1   :  { %7776 = sst [smem:[#allocation47_spill]] %s7688_s0 }
   0x2   :  { %7777 = sst [smem:[#allocation48_spill]] %s7689_s1 }
   0x3   :  { %7778 = sst [smem:[#allocation49_spill]] %s7690_s2 }
   0x4   :  { %7779 = sst [smem:[#allocation50_spill]] %s7691_s3 }
   0x5   :  { %7780 = sst [smem:[#allocation51_spill]] %s7692_s4 }
   0x6   :  { %7781 = sst [smem:[#allocation52_spill]] %s7693_s5 }
   0x7   :  { %7782 = sst [smem:[#allocation53_spill]] %s7694_s6 }
   0x8   :  { %7783 = sst [smem:[#allocation54_spill]] %s7695_s7 }
   0x9   :  { %7784 = sst [smem:[#allocation55_spill]] %s7696_s8 }
   0xa   :  { %7785 = sst [smem:[#allocation56_spill]] %s7697_s9 }
   0xb   :  { %7786 = sst [smem:[#allocation57_spill]] %s7698_s10 }
   0xc   :  { %7787 = sst [smem:[#allocation58_spill]] %s7699_s11 }
   0xd   :  { %7788 = sst [smem:[#allocation59_spill]] %s7700_s12 }
   0xe   :  { %17 = vsyncpa [#allocation4], 0 }
   0xf   :  { %19 = vsyncpa [#allocation4 + $0x1], 0 }
  0x10   :  { %20 = vsyncpa [#allocation7], 0 }
  0x11   :  { %22 = vsyncpa [#allocation7 + $0x1], 0 }
  0x12   :  { %23 = vsyncpa [#allocation10], 0 }
  0x13   :  { %24 = vsyncpa [#allocation13], 0 }
  0x14   :  { %25 = vsyncpa [#allocation5], 0 }
  0x15   :  { %27 = vsyncpa [#allocation5 + $0x1], 0  ;;  %s6027_s21 = smov 0   ;;  %s6029_s22 = smov 0  }
  0x16   :  { %s6031_s23 = smov 0   ;;  %s6033_s24 = smov 0  }
  0x17   :  { %s6035_s25 = smov 0   ;;  %s6037_s26 = smov 0  }
  0x18   :  { %s6039_s27 = smov 0   ;;  %s6041_s28 = smov 0  }
  0x19   :  { %s6043_s29 = smov 0   ;;  %s6045_s30 = smov 0  }
  0x1a   :  { %s6047_s13 = smov 0   ;;  %s6049_s14 = smov 0  }
  0x1b   :  { %s6051_s15 = smov 0   ;;  %s6053_s16 = smov 0  }
  0x1c LB: > { %7789 = sst [smem:[#allocation21_spill]] %s5897_s21  ;;  %s6098_s17 = sadd.s32 4294967295, %s5949_s16   ;;  %s5949_s16 = sphi %s6053_s16, %s33_s16   ;;  %s5945_s15 = sphi %s6051_s15, %s8054_s15   ;;  %s5941_s14 = sphi %s6049_s14, %s8053_s14   ;;  %s5937_s13 = sphi %s6047_s13, %s8052_s13   ;;  %s5933_s30 = sphi %s6045_s30, %s8051_s30   ;;  %s5929_s29 = sphi %s6043_s29, %s8050_s29   ;;  %s5925_s28 = sphi %s6041_s28, %s8058_s28   ;;  %s5921_s27 = sphi %s6039_s27, %s8057_s27   ;;  %s5917_s26 = sphi %s6037_s26, %s8048_s26   ;;  %s5913_s25 = sphi %s6035_s25, %s8047_s25   ;;  %s5909_s24 = sphi %s6033_s24, %s8046_s24   ;;  %s5905_s23 = sphi %s6031_s23, %s8056_s23   ;;  %s5901_s22 = sphi %s6029_s22, %s8055_s22   ;;  %s5897_s21 = sphi %s6027_s21, %s8045_s21  }
  0x1d   : > { %7790 = sst [smem:[#allocation22_spill]] %s5901_s22  ;;  %p4606_p0 = scmp.ge.s32.totalorder %s5949_s16, 1 }
  0x1e   : > { %7791 = sst [smem:[#allocation23_spill]] %s5913_s25  ;;  %p68_p1 = scmp.eq.s32.totalorder %s6098_s17, 0 }
  0x1f   : > { %7792 = sst [smem:[#allocation24_spill]] %s5917_s26  ;;  %p367_p2 = scmp.lt.s32.totalorder %s5949_s16, 5 }
  0x20   : > { %7793 = sst [smem:[#allocation25_spill]] %s5929_s29  ;;  %s7702_s18 = smov 64  }
  0x21   : > { %7794 = sst [smem:[#allocation26_spill]] %s5933_s30  ;;  %p6106_p3 = pnand %p4606_p0, %p367_p2 }
  0x22   : > { %7795 = sst [smem:[#allocation27_spill]] %s5937_s13  ;;  %s5951_s13 = smov [#allocation9]  }
  0x23   : > { %7796 = sst [smem:[#allocation28_spill]] %s5941_s14  ;;  %p5446_p4 = pneg %p6106_p3 }
  0x24   : > { %7797 = sst [smem:[#allocation29_spill]] %s5945_s15  ;;  %s380_s11 = sshll.u32 %s5951_s13, 4  ;;  %s381_s11 = int_to_ptr.vmem [resolvable:$true] %s380_s11 }
  0x25   : > { %s7798_s3 = sld [smem:[#allocation50_spill]]  ;;  %p6114_p5 = pnand %p5446_p4, %p68_p1 }
  0x26   : > { %s7799_s12 = scalar_select %p6106_p3, 1, 0 }
  0x27   : > { %s7704_s19 = smov 4   ;;  %s45_s8 = sadd.s32 1, %s5945_s15 }
  0x28   : > { %7800 = sst [smem:[#allocation30_spill]] %s7799_s12  ;;  %p62_p7 = scmp.eq.s32.totalorder %s5949_s16, 0 }
  0x29   : > { %s4600_s13 = sshll.u32 %s5941_s14, 3  ;;  %p97_p12 = scmp.ne.s32.totalorder %s5917_s26, %s5913_s25 }
  0x2a   : > { %s4601_s30 = sadd.s32 4294967295, %s4600_s13  ;;  %p103_p0 = scmp.ne.s32.totalorder %s5913_s25, %s5909_s24 }
  0x2b   : > { %s378_s20 = sshll.u32 %s7798_s3, 4  ;;  %s42_s3 = sadd.s32 1, %s5941_s14  ;;  %s379_s20 = int_to_ptr.hbm [resolvable:$true] %s378_s20 }
  0x2c   : > { %5449 = dma.hbm_to_vmem [thread:$0]  (!%p6114_p5), %s379_s20, 1024, %s381_s11, [#allocation10], %s7702_s18, %s7702_s18, %s7704_s19  }
  0x2d   : > { %p43_p6 = scmp.ge.s32.totalorder %s42_s3, 2  ;;  %p79_p9 = scmp.gt.s32.totalorder %s4601_s30, 0 }
  0x2e   : > { %s90_s20 = sadd.s32 1, %s5917_s26  ;;  %p6148_p13 = por %p97_p12, %p62_p7 }
  0x2f   : > { %s8060_s3 = smov (%p43_p6, %s42_s3), 0  ;;  %s8062_s8 = smov (!%p43_p6, %s45_s8), %s5945_s15 }
  0x30   : > { %7802 = sst [smem:[#allocation31_spill]] %s8060_s3  ;;  %s50_s7 = ssub.s32 %s5941_s14, %s8060_s3 }
  0x31   : > { %p47_p8 = scmp.ge.s32.totalorder %s8062_s8, 2  ;;  %s4602_s11 = sshll.u32 %s8060_s3, 3 }
  0x32   : > { %s8066_s30 = smov (!%p79_p9, %s4601_s30), 0  ;;  %s4603_s19 = sadd.s32 4294967295, %s4602_s11 }
  0x33   : > { %s8064_s8 = smov (%p47_p8, %s8062_s8), 0  ;;  %p83_p10 = scmp.gt.s32.totalorder %s4603_s19, 0 }
  0x34   : > { %7803 = sst [smem:[#allocation32_spill]] %s8064_s8  ;;  %s6138_s18 = ssub.s32 %s5945_s15, %s8064_s8 }
  0x35   : > { %7804 = sst [smem:[#allocation33_spill]] %s6138_s18  ;;  %s6141_s5 = sor.u32 %s50_s7, %s6138_s18 }
  0x36   : > { %p52_p11 = scmp.eq.s32.totalorder %s6141_s5, 0  ;;  %s8068_s19 = smov (!%p83_p10, %s4603_s19), 0 }
  0x37   : > { %s86_s8 = ssub.s32 %s8066_s30, %s8068_s19  ;;  %s6154_s4 = sadd.s32 8, %s4600_s13 }
  0x38   : > { %7806 = sst [smem:[#allocation34_spill]] %s6154_s4  ;;  %s87_s7 = sor.u32 %s86_s8, %s6138_s18 }
  0x39   : > { %p6159_p2 = por %p103_p0, %p68_p1  ;;  %p88_p4 = scmp.eq.s32.totalorder %s87_s7, 0 }
  0x3a   : > { %p115_p6 = scmp.lt.s32.totalorder %s6154_s4, 15  ;;  %s6164_s2 = sadd.s32 8, %s4602_s11 }
  0x3b   : > { %s7807_s12 = scalar_select %p6159_p2, 1, 0 }
  0x3c   : > { %p7720_p8 = scmp.lt.s32.totalorder %s5949_s16, 4  ;;  %s6172_s24 = sshll.u32 %s5945_s15, 5 }
  0x3d   : > { %7808 = sst [smem:[#allocation35_spill]] %s7807_s12  ;;  %s465_s8 = sand.u32 1, %s5949_s16  }
  0x3e   : > { %s6168_s0 = scalar_select %p88_p4, %s5917_s26, %s90_s20  }
  0x3f   : > { %s467_s19 = sand.u32 1, %s5917_s26   ;;  %s4619_s25 = sshll.u32 %s8066_s30, 1 }
  0x40   : > { %7809 = sst [smem:[#allocation36_spill]] %s6168_s0  ;;  %s4616_s13 = sshll.u32 %s467_s19, 3 }
  0x41   : > { %s478_s18 = sadd.s32 %s4619_s25, %s6172_s24  ;;  %s469_s12 = scalar_lea.vmem [#allocation6], %s4616_s13 }
  0x42   : > { %s483_s7 = sshll.u32 %s469_s12, 4  ;;  %s4621_s21 = sshll.u32 %s478_s18, 2  ;;  %s484_s7 = int_to_ptr.vmem [resolvable:$true] %s483_s7 }
  0x43   : > { %s7810_s1 = sld [smem:[#allocation48_spill]]  ;;  %p5460_p10 = pnand %p7720_p8, %p6148_p13 }
  0x44   : > { %s7811_s6 = sld [smem:[#allocation53_spill]]  ;;  %s6187_s12 = scalar_lea.sflag [#allocation7], %s465_s8 }
  0x45   : > { %s7812_s25 = smov 4   ;;  %s7813_s18 = smov 64  }
  0x46   : > { %s5954_s0 = smov [#allocation11]   ;;  %s7814_s9 = sld [smem:[#allocation56_spill]] }
  0x47   : > { %s400_s3 = sshll.u32 %s5954_s0, 4  ;;  %s5955_s15 = smov [#allocation12]   ;;  %s401_s3 = int_to_ptr.vmem [resolvable:$true] %s400_s3 }
  0x48   : > { %s420_s8 = sshll.u32 %s5955_s15, 4  ;;  %s4599_s19 = sadd.s32 4294967294, %s5949_s16   ;;  %s421_s8 = int_to_ptr.vmem [resolvable:$true] %s420_s8 }
  0x49   : > { %s480_s4 = scalar_lea.hbm %s7810_s1, %s4621_s21  ;;  %s54_s13 = sadd.s32 1, %s5929_s29 }
  0x4a   : > { %s481_s20 = sshll.u32 %s480_s4, 4  ;;  %s398_s30 = sshll.u32 %s7811_s6, 4  ;;  %s482_s20 = int_to_ptr.hbm [resolvable:$true] %s481_s20  ;;  %s399_s30 = int_to_ptr.hbm [resolvable:$true] %s398_s30 }
  0x4b   : > { %5462 = dma.hbm_to_vmem [thread:$0]  (!%p5460_p10), %s482_s20, 128, %s484_s7, %s6187_s12, %s7813_s18, %s7813_s18, %s7812_s25  }
  0x4c   : > { %s418_s22 = sshll.u32 %s7814_s9, 4  ;;  %p61_p12 = scmp.ne.s32.totalorder %s5929_s29, %s5925_s28  ;;  %s419_s22 = int_to_ptr.hbm [resolvable:$true] %s418_s22 }
  0x4d   : > { %5452 = dma.hbm_to_vmem [thread:$0]  (!%p6114_p5), %s399_s30, 9216, %s401_s3, [#allocation10], %s7813_s18, %s7813_s18, %s7812_s25  }
  0x4e   : > { %5455 = dma.hbm_to_vmem [thread:$0]  (!%p6114_p5), %s419_s22, 1024, %s421_s8, [#allocation13], %s7813_s18, %s7813_s18, %s7812_s25  }
  0x4f   : > { %s6213_s7 = scalar_select %p52_p11, %s5929_s29, %s54_s13  }
  0x50   : > { %p6217_p13 = por %p62_p7, %p61_p12  ;;  %p67_p0 = scmp.ne.s32.totalorder %s5925_s28, %s5921_s27 }
  0x51   : > { %7815 = sst [smem:[#allocation37_spill]] %s6213_s7  ;;  %p354_p4 = scmp.eq.s32.totalorder %s6098_s17, 3 }
  0x52   : > { %p360_p10 = scmp.eq.s32.totalorder %s4599_s19, 3  ;;  %p6226_p9 = por %p68_p1, %p67_p0 }
  0x53   : > { %s440_s20 = sand.u32 1, %s5929_s29   ;;  %p6231_p5 = por %p354_p4, %p61_p12 }
  0x54   : > { %s7819_s30 = sld [smem:[#allocation34_spill]]  ;;  %p6235_p11 = por %p360_p10, %p67_p0 }
  0x55   : > { %s4611_s3 = sshll.u32 %s440_s20, 6  ;;  %s7821_s4 = sld [smem:[#allocation22_spill]] }
  0x56   : > { %s5136_s21 = sshll.u32 %s5941_s14, 4  ;;  %s7822_s22 = sld [smem:[#allocation21_spill]] }
  0x57   : > { %s450_s15 = sadd.s32 %s5136_s21, %s6172_s24  ;;  %s444_s8 = scalar_lea.vmem [#allocation3], %s4611_s3 }
  0x58   : > { %s455_s19 = sshll.u32 %s444_s8, 4  ;;  %s7823_s13 = sld [smem:[#allocation33_spill]]  ;;  %s456_s19 = int_to_ptr.vmem [resolvable:$true] %s455_s19 }
  0x59   : > { %s4615_s1 = sshll.u32 %s450_s15, 2  ;;  %s7824_s7 = sld [smem:[#allocation47_spill]] }
  0x5a   : > { %p5457_p12 = pnand %p7720_p8, %p6217_p13  ;;  %s441_s14 = scalar_lea.sflag [#allocation4], %s440_s20 }
  0x5b   : > { %s126_s3 = sadd.s32 1, %s5905_s23  ;;  %s8070_s30 = smov (!%p115_p6, %s7819_s30), 15 }
  0x5c   : > { %p7825_p0 = scmp.lt.s32.totalorder %s6164_s2, 15  ;;  %p133_p4 = scmp.ne.s32.totalorder %s5905_s23, %s7821_s4 }
  0x5d   : > { %p139_p10 = scmp.ne.s32.totalorder %s7821_s4, %s7822_s22  ;;  %s495_s6 = sand.u32 1, %s5905_s23  }
  0x5e   : > { %s8072_s2 = smov (!%p7825_p0, %s6164_s2), 15  ;;  %p6266_p13 = por %p133_p4, %p62_p7 }
  0x5f   : > { %s452_s29 = scalar_lea.hbm %s7824_s7, %s4615_s1  ;;  %s122_s1 = ssub.s32 %s8070_s30, %s8072_s2 }
  0x60   : > { %s453_s26 = sshll.u32 %s452_s29, 4  ;;  %s123_s9 = sor.u32 %s122_s1, %s7823_s13  ;;  %s454_s26 = int_to_ptr.hbm [resolvable:$true] %s453_s26 }
  0x61   : > { %5459 = dma.hbm_to_vmem [thread:$0]  (!%p5457_p12), %s454_s26, 1024, %s456_s19, %s441_s14, %s7813_s18, %s7813_s18, %s7812_s25  }
  0x62   : > { %p124_p8 = scmp.eq.s32.totalorder %s123_s9, 0  ;;  %p6272_p12 = por %p139_p10, %p68_p1 }
  0x63   : > { %s4622_s14 = sshll.u32 %s495_s6, 3  ;;  %s4624_s7 = sshll.u32 %s8070_s30, 1 }
  0x64   : > { %s6277_s11 = scalar_select %p124_p8, %s5905_s23, %s126_s3  }
  0x65   : > { %s506_s2 = sadd.s32 %s4624_s7, %s6172_s24  ;;  %s497_s4 = scalar_lea.vmem [#allocation8], %s4622_s14 }
  0x66   : > { %s4626_s20 = sshll.u32 %s506_s2, 2  ;;  %s511_s21 = sshll.u32 %s497_s4, 4  ;;  %s512_s21 = int_to_ptr.vmem [resolvable:$true] %s511_s21 }
  0x67   : > { %s7828_s8 = sld [smem:[#allocation49_spill]]  ;;  %p7829_p7 = scmp.lt.s32.totalorder %s5949_s16, 4 }
  0x69   : > { %p5463_p6 = pnand %p7829_p7, %p6266_p13 }
  0x6b   : > { %523 = sbr.rel (%p6106_p3) target bundleno = 1206 (0x4b6), region = 68 }
  0x6d   : > { %s508_s19 = scalar_lea.hbm %s7828_s8, %s4626_s20 }
  0x6e   : > { %s509_s13 = sshll.u32 %s508_s19, 4  ;;  %s510_s13 = int_to_ptr.hbm [resolvable:$true] %s509_s13 }
  0x6f   : > { %5465 = dma.hbm_to_vmem [thread:$0]  (!%p5463_p6), %s510_s13, 128, %s512_s21, %s6187_s12, %s7813_s18, %s7813_s18, %s7812_s25  }
  0x70   : > { %s6294_s24 = sand.u32 1, %s5925_s28  }
  0x71   : > { %s4628_s3 = sshll.u32 %s6294_s24, 6  ;;  %s526_s1 = scalar_lea.sflag [#allocation4], %s6294_s24 }
  0x72   : > { %s6300_s6 = scalar_lea.vmem [#allocation3], %s4628_s3 }
  0x73   : > { %5872 = dma.done.wait (%p6226_p9), %s526_s1, 1024  }
  0x74   : > { %5874 = vsyncadd (%p6226_p9), %s526_s1, 4294966272  ;;  %s7831_s12 = sld [smem:[#allocation23_spill]]  ;;  %s535_s18 = sand.u32 1, %s6098_s17  }
  0x75   : > { %s536_s14 = scalar_lea.sflag [#allocation7], %s535_s18 }
  0x7a   : > { %s537_s9 = sand.u32 1, %s7831_s12  }
  0x7b   : > { %s6308_s29 = sshll.u32 %s537_s9, 3 }
  0x7c   : > { %s539_s7 = scalar_lea.vmem [#allocation6], %s6308_s29 }
  0x7d   : > { %5876 = dma.done.wait (%p6159_p2), %s536_s14, 128  }
  0x7e   : > { %5878 = vsyncadd (%p6159_p2), %s536_s14, 4294967168  ;;  %s7833_s2 = sld [smem:[#allocation22_spill]] }
  0x84   : > { %s547_s20 = sand.u32 1, %s7833_s2  }
  0x85   : > { %s6316_s10 = sshll.u32 %s547_s20, 3 }
  0x86   : > { %s549_s4 = scalar_lea.vmem [#allocation8], %s6316_s10 }
  0x87   : > { %5880 = dma.done.wait (%p6272_p12), %s536_s14, 128  }
  0x88   : > { %5882 = vsyncadd (%p6272_p12), %s536_s14, 4294967168 }
  0x89   : > { %5884 = dma.done.wait (%p68_p1), [#allocation10], 10240  }
  0x8a   : > { %5886 = vsyncadd (%p68_p1), [#allocation10], 4294957056 }
  0x8b   : > { %5888 = dma.done.wait (%p68_p1), [#allocation13], 1024  }
  0x8c   : > { %5890 = vsyncadd (%p68_p1), [#allocation13], 4294966272  ;;  %v7748_v0 = vmov 0   ;;  %v5156_v1 = vld [vmem:[#allocation9 + $0x38] sm:$0xff]  ;;  %v5155_v2 = vld [vmem:[#allocation9 + $0x30] sm:$0xff]  ;;  %s7834_s21 = sld [smem:[#allocation51_spill]] }
  0x8d   : > { %900 = vst [vmem:[#allocation2] sm:$0xf] %v7748_v0  ;;  %773 = vmatpush.bf16.msra.mxu0 %v5156_v1  ;;  %v5154_v3 = vld [vmem:[#allocation9 + $0x28] sm:$0xff]  ;;  %v5153_v4 = vld [vmem:[#allocation9 + $0x20] sm:$0xff]  ;;  %v5152_v5 = vld [vmem:[#allocation9 + $0x18] sm:$0xff]  ;;  %s7835_s8 = sld [smem:[#allocation52_spill]] }
  0x8e   : > { %901 = vst [vmem:[#allocation2 + $0x54] sm:$0xf] %v7748_v0  ;;  %v5151_v6 = vld [vmem:[#allocation9 + $0x10] sm:$0xff]  ;;  %v5150_v7 = vld [vmem:[#allocation9 + $0x8] sm:$0xff]  ;;  %v5149_v8 = vld [vmem:[#allocation9] sm:$0xff]  ;;  %s6395_s19 = scalar_lea.vmem [#allocation14], %s4628_s3 }
  0x8f   : > { %v5139_v9 = vld [vmem:[%s539_s7] sm:$0xff]  ;;  %v5142_v12 = vld [vmem:[%s6300_s6 + $0x10] sm:$0xff]  ;;  %v5143_v13 = vld [vmem:[%s6300_s6 + $0x18] sm:$0xff]  ;;  %s7836_s13 = sld [smem:[#allocation26_spill]] }
  0x90   : > { %v5140_v10 = vld [vmem:[%s6300_s6] sm:$0xff]  ;;  %v5141_v11 = vld [vmem:[%s6300_s6 + $0x8] sm:$0xff]  ;;  %v5146_v16 = vld [vmem:[%s6300_s6 + $0x30] sm:$0xff] }
  0x91   : > { %774 = vmatpush.bf16.msra.mxu0 %v5155_v2  ;;  %v5144_v14 = vld [vmem:[%s6300_s6 + $0x20] sm:$0xff]  ;;  %v5145_v15 = vld [vmem:[%s6300_s6 + $0x28] sm:$0xff]  ;;  %v5147_v19 = vld [vmem:[%s6300_s6 + $0x38] sm:$0xff] }
  0x92   : > { %v6343_v17 = vld [vmem:[%s7834_s21] ss:$0 sm:$0xff]  ;;  %v5148_v27 = vld [vmem:[%s549_s4] sm:$0xff] }
  0x93   : > { %v6348_v18 = vld [vmem:[%s7835_s8] ss:$0 sm:$0xff] }
  0x95   : > { %775 = vmatpush.bf16.msra.mxu0 %v5154_v3  ;;  %p4707_p1 = scmp.ne.s32.totalorder %s7836_s13, 0 }
  0x99   : > { %776 = vmatpush.bf16.msra.mxu0 %v5153_v4 }
  0x9d   : > { %777 = vmatpush.bf16.msra.mxu0 %v5152_v5 }
  0xa1   : > { %778 = vmatpush.bf16.msra.mxu0 %v5151_v6 }
  0xa5   : > { %779 = vmatpush.bf16.msra.mxu0 %v5150_v7 }
  0xa9   : > { %780 = vmatpush.bf16.msra.mxu0 %v5149_v8 }
  0xac   : > { %781 = vmatmul.bf16.vlgmr.msra.gmra.mxu0 %v5139_v9 }
  0xbc   : > { %786 = vmatmul.bf16.gmra.mxu0 %v5140_v10 }
  0xcc   : > { %791 = vmatmul.bf16.gmra.mxu0 %v5141_v11 }
  0xdc   : > { %796 = vmatmul.bf16.gmra.mxu0 %v5142_v12 }
  0xec   : > { %801 = vmatmul.bf16.gmra.mxu0 %v5143_v13 }
  0xfc   : > { %806 = vmatmul.bf16.gmra.mxu0 %v5144_v14 }
 0x10c   : > { %811 = vmatmul.bf16.gmra.mxu0 %v5145_v15 }
 0x11c   : > { %816 = vmatmul.bf16.gmra.mxu0 %v5146_v16 }
 0x129   : > { %v782_v20 = vpop.f32.mrf.mxu0 }
 0x12a   : > { %v836_v21 = vmul.f32 %v6343_v17, %v782_v20 }
 0x12c   : > { %v860_v22 = vadd.f32 %v6348_v18, %v836_v21  ;;  %821 = vmatmul.bf16.gmra.mxu0 %v5147_v19 }
 0x12e   : > { %v880_v23 = vmax.f32 %v860_v22, 0.0 }
 0x130   : > { %v902_v24 = vpack.c.bf16 %v880_v23, %v880_v23 }
 0x131   : > { %v784_v25 = vpop.f32.mrf.mxu0 }
 0x132   : > { %922 = vst [vmem:[#allocation2 + $0x4] sm:$0xf] %v902_v24  ;;  %v837_v26 = vmul.f32 %v6343_v17, %v784_v25 }
 0x134   : > { %v861_v29 = vadd.f32 %v6348_v18, %v837_v26 }
 0x136   : > { %v881_v32 = vmax.f32 %v861_v29, 0.0 }
 0x139   : > { %v787_v28 = vpop.f32.mrf.mxu0 }
 0x13a   : > { %v838_v30 = vmul.f32 %v6343_v17, %v787_v28 }
 0x13c   : > { %v862_v31 = vadd.f32 %v6348_v18, %v838_v30  ;;  %826 = vmatmul.bf16.gmra.mxu0 %v5148_v27 }
 0x13e   : > { %v882_v33 = vmax.f32 %v862_v31, 0.0 }
 0x140   : > { %v5265_v34 = vpack.c.bf16 %v882_v33, %v881_v32 }
 0x141   : > { %v789_v35 = vpop.f32.mrf.mxu0 }
 0x142   : > { %5379 = vst [vmem:[#allocation2 + $0x8] sm:$0xff] %v5265_v34   ;;  %v839_v36 = vmul.f32 %v6343_v17, %v789_v35 }
 0x144   : > { %v863_v38 = vadd.f32 %v6348_v18, %v839_v36 }
 0x146   : > { %v883_v41 = vmax.f32 %v863_v38, 0.0 }
 0x149   : > { %v792_v37 = vpop.f32.mrf.mxu0 }
 0x14a   : > { %v840_v39 = vmul.f32 %v6343_v17, %v792_v37 }
 0x14c   : > { %v864_v40 = vadd.f32 %v6348_v18, %v840_v39 }
 0x14e   : > { %v884_v42 = vmax.f32 %v864_v40, 0.0 }
 0x150   : > { %v5270_v43 = vpack.c.bf16 %v884_v42, %v883_v41 }
 0x151   : > { %v794_v44 = vpop.f32.mrf.mxu0 }
 0x152   : > { %5380 = vst [vmem:[#allocation2 + $0x10] sm:$0xff] %v5270_v43   ;;  %v841_v45 = vmul.f32 %v6343_v17, %v794_v44 }
 0x154   : > { %v865_v47 = vadd.f32 %v6348_v18, %v841_v45 }
 0x156   : > { %v885_v50 = vmax.f32 %v865_v47, 0.0 }
 0x159   : > { %v797_v46 = vpop.f32.mrf.mxu0 }
 0x15a   : > { %v842_v48 = vmul.f32 %v6343_v17, %v797_v46 }
 0x15c   : > { %v866_v49 = vadd.f32 %v6348_v18, %v842_v48 }
 0x15e   : > { %v886_v51 = vmax.f32 %v866_v49, 0.0 }
 0x160   : > { %v5275_v52 = vpack.c.bf16 %v886_v51, %v885_v50 }
 0x161   : > { %v799_v53 = vpop.f32.mrf.mxu0 }
 0x162   : > { %5381 = vst [vmem:[#allocation2 + $0x18] sm:$0xff] %v5275_v52   ;;  %v843_v54 = vmul.f32 %v6343_v17, %v799_v53 }
 0x164   : > { %v867_v56 = vadd.f32 %v6348_v18, %v843_v54 }
 0x166   : > { %v887_v59 = vmax.f32 %v867_v56, 0.0 }
 0x169   : > { %v802_v55 = vpop.f32.mrf.mxu0 }
 0x16a   : > { %v844_v57 = vmul.f32 %v6343_v17, %v802_v55 }
 0x16c   : > { %v868_v58 = vadd.f32 %v6348_v18, %v844_v57 }
 0x16e   : > { %v888_v60 = vmax.f32 %v868_v58, 0.0 }
 0x170   : > { %v5280_v61 = vpack.c.bf16 %v888_v60, %v887_v59 }
 0x171   : > { %v804_v62 = vpop.f32.mrf.mxu0 }
 0x172   : > { %5382 = vst [vmem:[#allocation2 + $0x20] sm:$0xff] %v5280_v61   ;;  %v845_v63 = vmul.f32 %v6343_v17, %v804_v62 }
 0x174   : > { %v869_v2 = vadd.f32 %v6348_v18, %v845_v63 }
 0x176   : > { %v889_v5 = vmax.f32 %v869_v2, 0.0 }
 0x179   : > { %v807_v1 = vpop.f32.mrf.mxu0 }
 0x17a   : > { %v846_v3 = vmul.f32 %v6343_v17, %v807_v1 }
 0x17c   : > { %v870_v4 = vadd.f32 %v6348_v18, %v846_v3 }
 0x17e   : > { %v890_v6 = vmax.f32 %v870_v4, 0.0 }
 0x180   : > { %v5285_v7 = vpack.c.bf16 %v890_v6, %v889_v5 }
 0x181   : > { %v809_v8 = vpop.f32.mrf.mxu0 }
 0x182   : > { %5383 = vst [vmem:[#allocation2 + $0x28] sm:$0xff] %v5285_v7   ;;  %v847_v9 = vmul.f32 %v6343_v17, %v809_v8 }
 0x184   : > { %v871_v11 = vadd.f32 %v6348_v18, %v847_v9 }
 0x186   : > { %v891_v14 = vmax.f32 %v871_v11, 0.0 }
 0x189   : > { %v812_v10 = vpop.f32.mrf.mxu0 }
 0x18a   : > { %v848_v12 = vmul.f32 %v6343_v17, %v812_v10 }
 0x18c   : > { %v872_v13 = vadd.f32 %v6348_v18, %v848_v12 }
 0x18e   : > { %v892_v15 = vmax.f32 %v872_v13, 0.0 }
 0x190   : > { %v5290_v16 = vpack.c.bf16 %v892_v15, %v891_v14 }
 0x191   : > { %v814_v19 = vpop.f32.mrf.mxu0 }
 0x192   : > { %5384 = vst [vmem:[#allocation2 + $0x30] sm:$0xff] %v5290_v16   ;;  %v849_v20 = vmul.f32 %v6343_v17, %v814_v19 }
 0x194   : > { %v873_v22 = vadd.f32 %v6348_v18, %v849_v20 }
 0x196   : > { %v893_v25 = vmax.f32 %v873_v22, 0.0 }
 0x199   : > { %v817_v21 = vpop.f32.mrf.mxu0 }
 0x19a   : > { %v850_v23 = vmul.f32 %v6343_v17, %v817_v21 }
 0x19c   : > { %v874_v24 = vadd.f32 %v6348_v18, %v850_v23 }
 0x19e   : > { %v894_v26 = vmax.f32 %v874_v24, 0.0 }
 0x1a0   : > { %v5295_v27 = vpack.c.bf16 %v894_v26, %v893_v25 }
 0x1a1   : > { %v819_v28 = vpop.f32.mrf.mxu0 }
 0x1a2   : > { %5385 = vst [vmem:[#allocation2 + $0x38] sm:$0xff] %v5295_v27   ;;  %v851_v29 = vmul.f32 %v6343_v17, %v819_v28 }
 0x1a4   : > { %v875_v31 = vadd.f32 %v6348_v18, %v851_v29 }
 0x1a6   : > { %v895_v34 = vmax.f32 %v875_v31, 0.0 }
 0x1a9   : > { %v822_v30 = vpop.f32.mrf.mxu0 }
 0x1aa   : > { %v852_v32 = vmul.f32 %v6343_v17, %v822_v30 }
 0x1ac   : > { %v876_v33 = vadd.f32 %v6348_v18, %v852_v32 }
 0x1ae   : > { %v896_v35 = vmax.f32 %v876_v33, 0.0 }
 0x1b0   : > { %v5300_v36 = vpack.c.bf16 %v896_v35, %v895_v34 }
 0x1b1   : > { %v824_v37 = vpop.f32.mrf.mxu0 }
 0x1b2   : > { %5386 = vst [vmem:[#allocation2 + $0x40] sm:$0xff] %v5300_v36   ;;  %v853_v38 = vmul.f32 %v6343_v17, %v824_v37 }
 0x1b4   : > { %v877_v40 = vadd.f32 %v6348_v18, %v853_v38 }
 0x1b6   : > { %v897_v43 = vmax.f32 %v877_v40, 0.0 }
 0x1b9   : > { %v827_v39 = vpop.f32.mrf.mxu0 }
 0x1ba   : > { %v854_v41 = vmul.f32 %v6343_v17, %v827_v39 }
 0x1bc   : > { %v878_v42 = vadd.f32 %v6348_v18, %v854_v41 }
 0x1be   : > { %v898_v44 = vmax.f32 %v878_v42, 0.0 }
 0x1c0   : > { %v5305_v45 = vpack.c.bf16 %v898_v44, %v897_v43 }
 0x1c1   : > { %v829_v46 = vpop.f32.mrf.mxu0 }
 0x1c2   : > { %5387 = vst [vmem:[#allocation2 + $0x48] sm:$0xff] %v5305_v45   ;;  %v855_v47 = vmul.f32 %v6343_v17, %v829_v46 }
 0x1c4   : > { %v879_v48 = vadd.f32 %v6348_v18, %v855_v47 }
 0x1c6   : > { %v899_v49 = vmax.f32 %v879_v48, 0.0  ;;  %945 = sbr.rel (%p4707_p1) target bundleno = 462 (0x1ce), region = 96 }
 0x1c8   : > { %v921_v50 = vpack.c.bf16 %v899_v49, %v899_v49 }
 0x1ca   : > { %941 = vst [vmem:[#allocation2 + $0x50] sm:$0xf] %v921_v50 }
 0x1cb   : > { %v5957_v51 = vmov 0  }
 0x1cc   : > { %946 = vst [vmem:[#allocation2 + $0x4] sm:$0xf] %v5957_v51 }
 0x1cd   : > { %947 = vst [vmem:[#allocation2 + $0x8] sm:$0xf] %v5957_v51 }
 0x1ce PF: > { %s7837_s30 = sld [smem:[#allocation26_spill]] }
 0x1d4   : > { %p4708_p3 = scmp.ne.s32.totalorder %s7837_s30, 1 }
 0x1d6   : > { %951 = sbr.rel (%p4708_p3) target bundleno = 478 (0x1de), region = 100 }
 0x1db   : > { %v5958_v52 = vmov 0  }
 0x1dc   : > { %952 = vst [vmem:[#allocation2 + $0x4c] sm:$0xf] %v5958_v52 }
 0x1dd   : > { %953 = vst [vmem:[#allocation2 + $0x50] sm:$0xf] %v5958_v52 }
 0x1de PF: > { %v5180_v17 = vld [vmem:[#allocation11 + $0x78] sm:$0xff]  ;;  %v954_v54 = vlaneseq  ;;  %v5179_v56 = vld [vmem:[#allocation11 + $0x70] sm:$0xff]  ;;  %v5178_v1 = vld [vmem:[#allocation11 + $0x68] sm:$0xff]  ;;  %vm1276_vm3 = vsmask.f32 3328  ;;  %v6417_v15 = vunpack.c.l.b16 %v7748_v0  ;;  %vm5959_vm5 = vmmov 1  }
 0x1df   : > { %v5172_v18 = vld [vmem:[#allocation11 + $0x38] sm:$0xff]  ;;  %1702 = vmatpush.bf16.msra.mxu1 %v5180_v17  ;;  %v5171_v57 = vld [vmem:[#allocation11 + $0x30] sm:$0xff]  ;;  %v5170_v2 = vld [vmem:[#allocation11 + $0x28] sm:$0xff]  ;;  %vm1277_vm4 = vsmask.f32 7440  ;;  %v6440_v33 = vunpack.c.h.b16 %v7748_v0  ;;  %s8022_s12 = sld [smem:[#allocation54_spill]] }
 0x1e0   : > { %v5236_v53 = vld [vmem:[#allocation11 + $0x1b8] sm:$0xff]  ;;  %1931 = vmatpush.bf16.msra.mxu2 %v5172_v18  ;;  %v6399_v58 = vshrl.u32 %v954_v54, 7  ;;  %v5235_v59 = vld [vmem:[#allocation11 + $0x1b0] sm:$0xff]  ;;  %v5234_v4 = vld [vmem:[#allocation11 + $0x1a8] sm:$0xff]  ;;  %vm2061_vm13 = vsmask.f32 256 }
 0x1e1   : > { %v5188_v55 = vld [vmem:[#allocation11 + $0xb8] sm:$0xff]  ;;  %3574 = vmatpush.bf16.msrb.mxu0 %v5236_v53  ;;  %v5187_v60 = vld [vmem:[#allocation11 + $0xb0] sm:$0xff]  ;;  %v5186_v5 = vld [vmem:[#allocation11 + $0xa8] sm:$0xff]  ;;  %vm2062_vm14 = vsmask.f32 4368  ;;  %s8023_s9 = sld [smem:[#allocation55_spill]] }
 0x1e2   : > { %2527 = vmatpush.bf16.msra.mxu3 %v5188_v55  ;;  %v957_v61 = vadd.s32 16, %v6399_v58  ;;  %v975_v62 = vand.u32 15, %v6399_v58  ;;  %v956_v63 = vadd.s32 8, %v6399_v58  ;;  %v958_v3 = vadd.s32 24, %v6399_v58  ;;  %v5177_v9 = vld [vmem:[#allocation11 + $0x60] sm:$0xff]  ;;  %vm1245_vm6 = vmpackc.low %vm5959_vm5, %vm5959_vm5  ;;  %v5176_v22 = vld [vmem:[#allocation11 + $0x58] sm:$0xff] }
 0x1e3   : > { %1703 = vmatpush.bf16.msra.mxu1 %v5179_v56  ;;  %v5169_v10 = vld [vmem:[#allocation11 + $0x20] sm:$0xff]  ;;  %v6425_v20 = vadd.s32 32, %v6399_v58  ;;  %v6428_v21 = vadd.s32 40, %v6399_v58  ;;  %v5168_v23 = vld [vmem:[#allocation11 + $0x18] sm:$0xff]  ;;  %v1261_v24 = vsel %vm1245_vm6, 65537, %v7748_v0  ;;  %v5175_v38 = vld [vmem:[#allocation11 + $0x50] sm:$0xff] }
 0x1e4   : > { %1932 = vmatpush.bf16.msra.mxu2 %v5171_v57  ;;  %v989_v6 = vand.u32 15, %v957_v61  ;;  %vm6405_vm0 = vcmp.gt.s32.totalorder %v975_v62, 0  ;;  %v982_v8 = vand.u32 15, %v956_v63  ;;  %v996_v11 = vand.u32 15, %v958_v3  ;;  %v5233_v12 = vld [vmem:[#allocation11 + $0x1a0] sm:$0xff]  ;;  %v5232_v28 = vld [vmem:[#allocation11 + $0x198] sm:$0xff]  ;;  %vm6454_vm12 = vmor %vm1276_vm3, %vm1277_vm4 }
 0x1e5   : > { %3575 = vmatpush.bf16.msrb.mxu0 %v5235_v59  ;;  %v5185_v13 = vld [vmem:[#allocation11 + $0xa0] sm:$0xff]  ;;  %vm1244_vm2 = vmpackc.low %vm6405_vm0, %vm6405_vm0  ;;  %v5184_v29 = vld [vmem:[#allocation11 + $0x98] sm:$0xff]  ;;  %v1289_v31 = vshll.u32 %v1261_v24, 16  ;;  %v1293_v32 = vshrl.u32 %v1261_v24, 16  ;;  %v1003_v42 = vand.u32 15, %v6425_v20  ;;  %v1010_v43 = vand.u32 15, %v6428_v21 }
 0x1e6   : > { %2528 = vmatpush.bf16.msra.mxu3 %v5187_v60  ;;  %vm6409_vm1 = vcmp.gt.s32.totalorder %v989_v6, 0  ;;  %v1260_v16 = vsel %vm1244_vm2, 65537, %v7748_v0  ;;  %vm6420_vm7 = vcmp.lt.s32.totalorder %v982_v8, 15  ;;  %vm6434_vm9 = vcmp.lt.s32.totalorder %v996_v11, 15  ;;  %v5167_v39 = vld [vmem:[#allocation11 + $0x10] sm:$0xff]  ;;  %v5174_v61 = vld [vmem:[#allocation11 + $0x48] sm:$0xff] }
 0x1e7   : > { %1704 = vmatpush.bf16.msra.mxu1 %v5178_v1  ;;  %vm1246_vm8 = vmpackc.low %vm6409_vm1, %vm6409_vm1  ;;  %v1280_v25 = vshll.u32 %v1260_v16, 16  ;;  %v1283_v26 = vshrl.u32 %v1260_v16, 16  ;;  %v6445_v40 = vrot.slane %v1289_v31, 5  ;;  %v1295_v41 = vrot.slane %v1293_v32, 4  ;;  %v5231_v44 = vld [vmem:[#allocation11 + $0x190] sm:$0xff]  ;;  %v5166_v62 = vld [vmem:[#allocation11 + $0x8] sm:$0xff] }
 0x1e8   : > { %1933 = vmatpush.bf16.msra.mxu2 %v5170_v2  ;;  %v1262_v30 = vsel %vm1246_vm8, 65537, %v7748_v0  ;;  %vm2030_vm10 = vmpackc.low %vm6420_vm7, %vm6420_vm7  ;;  %v5183_v45 = vld [vmem:[#allocation11 + $0x90] sm:$0xff]  ;;  %v1195_v53 = vld [vmem:[#allocation2] sm:$0x8]  ;;  %v2067_v56 = vrot.slane %v1293_v32, 7  ;;  %s8029_s7 = sld [smem:[#allocation57_spill]] }
 0x1e9   : > { %3576 = vmatpush.bf16.msrb.mxu0 %v5234_v4  ;;  %v1282_v34 = vrot.slane %v1280_v25, 5  ;;  %v1285_v35 = vrot.slane %v1283_v26, 4  ;;  %v1299_v36 = vshll.u32 %v1262_v30, 16  ;;  %v1303_v37 = vshrl.u32 %v1262_v30, 16  ;;  %vm2032_vm11 = vmpackc.low %vm6434_vm9, %vm6434_vm9  ;;  %v5182_v6 = vld [vmem:[#allocation11 + $0x88] sm:$0xff]  ;;  %v5165_v24 = vld [vmem:[#allocation11] sm:$0xff] }
 0x1ea   : > { %2529 = vmatpush.bf16.msra.mxu3 %v5186_v5  ;;  %v1296_v51 = vor.u32 %v1295_v41, %v6445_v40  ;;  %v6465_v17 = vsel %vm2030_vm10, 65537, %v7748_v0  ;;  %v6473_v18 = vsel %vm2032_vm11, 65537, %v7748_v0  ;;  %v6488_v3 = vor.u32 %v2067_v56, %v1289_v31  ;;  %v5230_v5 = vld [vmem:[#allocation11 + $0x188] sm:$0xff]  ;;  %v3345_v11 = vld [vmem:[#allocation2 + $0x10] sm:$0x8]  ;;  %s8030_s10 = sld [smem:[#allocation58_spill]] }
 0x1eb   : > { %1705 = vmatpush.bf16.msra.mxu1 %v5177_v9  ;;  %v1286_v46 = vor.u32 %v1285_v35, %v1282_v34  ;;  %v1301_v47 = vrot.slane %v1299_v36, 5  ;;  %v1305_v48 = vrot.slane %v1303_v37, 4  ;;  %v1438_v49 = vunpack.c.l.b16 %v1282_v34  ;;  %v1197_v25 = vld [vmem:[#allocation2 + $0x8] sm:$0xf]  ;;  %v3348_v31 = vld [vmem:[#allocation2 + $0x1c] sm:$0xf] }
 0x1ec   : > { %1934 = vmatpush.bf16.msra.mxu2 %v5169_v10  ;;  %v1439_v52 = vunpack.c.h.b16 %v1282_v34  ;;  %v6476_v57 = vrot.slane %v1296_v51, 4  ;;  %v2073_v59 = vshrl.u32 %v6465_v17, 16  ;;  %v2076_v60 = vshll.u32 %v6465_v17, 16  ;;  %v5229_v35 = vld [vmem:[#allocation11 + $0x180] sm:$0xff]  ;;  %v5157_v51 = vld [vmem:[#allocation2 + $0x4] sm:$0xff]  ;;  %s8040_s4 = sld [smem:[#allocation26_spill]] }
 0x1ed   : > { %3577 = vmatpush.bf16.msrb.mxu0 %v5233_v12  ;;  %v1287_v54 = vrot.slane %v1286_v46, 4  ;;  %v1306_v55 = vor.u32 %v1305_v48, %v1301_v47  ;;  %vm1442_vm15 = vcmp.ne.s32.totalorder %v1438_v49, %v6417_v15  ;;  %v6490_v4 = vrot.slane %v2067_v56, 4  ;;  %v5173_v12 = vld [vmem:[#allocation11 + $0x40] sm:$0xff]  ;;  %v5212_v46 = vld [vmem:[#allocation11 + $0x138] sm:$0xff]  ;;  %s8041_s17 = sld [smem:[#allocation27_spill]]  ;;  %s4412_s25 = scalar_lea.sflag [#allocation5], %s6294_s24 }
 0x1ee   : > { %2530 = vmatpush.bf16.msra.mxu3 %v5185_v13  ;;  %vm1443_vm0 = vcmp.ne.s32.totalorder %v1439_v52, %v6440_v33  ;;  %v1302_v7 = vsel %vm6454_vm12, %v6476_v57, %v1301_v47  ;;  %v1196_v13 = vld [vmem:[#allocation2 + $0x4] sm:$0xf]  ;;  %v2075_v34 = vrot.slane %v2073_v59, 7  ;;  %v5181_v36 = vld [vmem:[#allocation11 + $0x80] sm:$0xff]  ;;  %v5204_v49 = vld [vmem:[#allocation11 + $0xf8] sm:$0xff]  ;;  %s8042_s30 = sld [smem:[#allocation59_spill]] }
 0x1ef   : > { %1706 = vmatpush.bf16.msra.mxu1 %v5176_v22  ;;  %v1292_v63 = vsel %vm6454_vm12, %v1287_v54, %v6445_v40  ;;  %v1307_v1 = vrot.slane %v1306_v55, 4  ;;  %vm6484_vm1 = vmpackc.low %vm1443_vm0, %vm1442_vm15  ;;  %v1452_v16 = vunpack.c.l.b16 %v1302_v7  ;;  %v1453_v19 = vunpack.c.h.b16 %v1302_v7  ;;  %v1994_v50 = vld [vmem:[#allocation2 + $0x3c] sm:$0xf]  ;;  %v3064_v37 = vld [vmem:[#allocation2 + $0x10] sm:$0xf] }
 0x1f0   : > { %1935 = vmatpush.bf16.msra.mxu2 %v5168_v23  ;;  %v1445_v8 = vunpack.c.l.b16 %v1292_v63  ;;  %v1446_v9 = vunpack.c.h.b16 %v1292_v63  ;;  %v1557_v10 = vsel %vm6484_vm1, %v1195_v53, 0  ;;  %v3346_v23 = vld [vmem:[#allocation2 + $0x14] sm:$0xf]  ;;  %v3362_v32 = vsel %vm6484_vm1, %v3345_v11, 0  ;;  %vm6540_vm0 = vmor %vm2061_vm13, %vm2062_vm14 }
 0x1f1   : > { %3578 = vmatpush.bf16.msrb.mxu0 %v5232_v28  ;;  %v1312_v14 = vsel %vm6454_vm12, %v1307_v1, %v6445_v40  ;;  %v1768_v22 = vunpack.c.l.b16 %v1557_v10  ;;  %v3347_v28 = vld [vmem:[#allocation2 + $0x18] sm:$0xf]  ;;  %vm1456_vm5 = vcmp.ne.s32.totalorder %v1452_v16, %v6417_v15  ;;  %vm1457_vm6 = vcmp.ne.s32.totalorder %v1453_v19, %v6440_v33 }
 0x1f2   : > { %2531 = vmatpush.bf16.msra.mxu3 %v5184_v29  ;;  %vm1449_vm2 = vcmp.ne.s32.totalorder %v1445_v8, %v6417_v15  ;;  %vm1450_vm3 = vcmp.ne.s32.totalorder %v1446_v9, %v6440_v33  ;;  %v1459_v26 = vunpack.c.l.b16 %v1312_v14  ;;  %v1460_v27 = vunpack.c.h.b16 %v1312_v14  ;;  %v1198_v29 = vld [vmem:[#allocation2 + $0xc] sm:$0xf]  ;;  %vm6510_vm7 = vmpackc.low %vm1457_vm6, %vm1456_vm5  ;;  %s5261_s26 = sshll.u32 %s8040_s4, 4 }
 0x1f3   : > { %1707 = vmatpush.bf16.msra.mxu1 %v5175_v38  ;;  %vm6502_vm4 = vmpackc.low %vm1450_vm3, %vm1449_vm2  ;;  %v3364_v47 = vsel %vm6510_vm7, %v3347_v28, 0  ;;  %v3412_v48 = vunpack.c.l.b16 %v3362_v32  ;;  %vm7721_vm11 = vsmask.f32 4352  ;;  %vm6534_vm15 = vcmp.gt.s32.totalorder %v1003_v42, 0  ;;  %s5128_s21 = sshll.u32 %s8041_s17, 5 }
 0x1f4   : > { %1936 = vmatpush.bf16.msra.mxu2 %v5167_v39  ;;  %vm1463_vm8 = vcmp.ne.s32.totalorder %v1459_v26, %v6417_v15  ;;  %vm1464_vm9 = vcmp.ne.s32.totalorder %v1460_v27, %v6440_v33  ;;  %v1558_v38 = vsel %vm6502_vm4, %v1196_v13, 0  ;;  %v3363_v39 = vsel %vm6502_vm4, %v3346_v23, 0  ;;  %vm1248_vm3 = vmpackc.low %vm6534_vm15, %vm6534_vm15  ;;  %s4424_s22 = sadd.s32 %s5261_s26, %s5128_s21  ;;  %s8043_s3 = smov %s8042_s30 }
 0x1f5   : > { %3579 = vmatpush.bf16.msrb.mxu0 %v5231_v44  ;;  %vm6520_vm10 = vmpackc.low %vm1464_vm9, %vm1463_vm8  ;;  %v1559_v44 = vsel %vm6510_vm7, %v1197_v25, 0  ;;  %v3413_v55 = vunpack.c.l.b16 %v3363_v39  ;;  %v2078_v20 = vor.u32 %v2076_v60, %v2075_v34  ;;  %v2080_v42 = vrot.slane %v2075_v34, 4  ;;  %s5129_s15 = sshll.u32 %s4424_s22, 2 }
 0x1f6   : > { %2532 = vmatpush.bf16.msra.mxu3 %v5183_v45  ;;  %v1769_v45 = vunpack.c.l.b16 %v1558_v38  ;;  %v1560_v52 = vsel %vm6520_vm10, %v1198_v29, 0  ;;  %v1770_v53 = vunpack.c.l.b16 %v1559_v44  ;;  %v3365_v54 = vsel %vm6520_vm10, %v3348_v31, 0  ;;  %s4426_s1 = scalar_lea.hbm %s8042_s30, %s5129_s15 }
 0x1f7   : > { %1708 = vmatpush.bf16.msra.mxu1 %v5174_v61  ;;  %v1771_v59 = vunpack.c.l.b16 %v1560_v52  ;;  %v3415_v63 = vunpack.c.l.b16 %v3365_v54  ;;  %v2079_v13 = vsel %vm6540_vm0, %v6490_v4, %v2078_v20  ;;  %v2088_v17 = vsel %vm6540_vm0, %v2080_v42, %v6488_v3 }
 0x1f8   : > { %1937 = vmatpush.bf16.msra.mxu2 %v5166_v62  ;;  %v1785_v61 = vpack.c.b16 %v1769_v45, %v1768_v22  ;;  %v3414_v62 = vunpack.c.l.b16 %v3364_v47  ;;  %v2207_v38 = vunpack.c.l.b16 %v6488_v3  ;;  %v2208_v39 = vunpack.c.h.b16 %v6488_v3  ;;  %v5211_v45 = vld [vmem:[#allocation11 + $0x130] sm:$0xff]  ;;  %v1980_v47 = vld [vmem:[#allocation2 + $0x4] sm:$0xf] }
 0x1f9   : > { %3580 = vmatpush.bf16.msrb.mxu0 %v5230_v5  ;;  %v3429_v5 = vpack.c.b16 %v3413_v55, %v3412_v48  ;;  %v1786_v7 = vpack.c.b16 %v1771_v59, %v1770_v53  ;;  %v2214_v44 = vunpack.c.l.b16 %v2079_v13  ;;  %v1981_v53 = vld [vmem:[#allocation2 + $0x8] sm:$0xf]  ;;  %v7860_v59 = vmov 0 }
 0x1fa   : > { %2533 = vmatpush.bf16.msra.mxu3 %v5182_v6  ;;  %v2091_v6 = vshrl.u32 %v6473_v18, 16  ;;  %v1796_v8 = vshrl.u32 %v1785_v61, 16  ;;  %v1799_v9 = vshll.u32 %v1785_v61, 16  ;;  %v3430_v10 = vpack.c.b16 %v3415_v63, %v3414_v62  ;;  %v1982_v62 = vld [vmem:[#allocation2 + $0xc] sm:$0xf] }
 0x1fb   : > { %1709 = vmatpush.bf16.msra.mxu1 %v5173_v12  ;;  %v3439_v11 = vshrl.u32 %v3429_v5, 16  ;;  %v3442_v12 = vshll.u32 %v3429_v5, 16  ;;  %v1804_v16 = vshrl.u32 %v1786_v7, 16  ;;  %v1807_v19 = vshll.u32 %v1786_v7, 16 }
 0x1fc   : > { %1938 = vmatpush.bf16.msra.mxu2 %v5165_v24  ;;  %v1798_v60 = vrot.slane %v1796_v8, 3  ;;  %v1801_v14 = vrot.slane %v1799_v9, 4  ;;  %v3447_v24 = vshrl.u32 %v3430_v10, 16  ;;  %v3450_v25 = vshll.u32 %v3430_v10, 16 }
 0x1fd   : > { %3581 = vmatpush.bf16.msrb.mxu0 %v5229_v35  ;;  %v3441_v22 = vrot.slane %v3439_v11, 3  ;;  %v3444_v23 = vrot.slane %v3442_v12, 4  ;;  %v1806_v27 = vrot.slane %v1804_v16, 3  ;;  %v1809_v28 = vrot.slane %v1807_v19, 4 }
 0x1fe   : > { %2534 = vmatpush.bf16.msra.mxu3 %v5181_v36  ;;  %1710 = vmatmul.bf16.vlgmr.msra.gmra.mxu1 %v5157_v51  ;;  %v1802_v26 = vor.u32 %v1801_v14, %v1798_v60  ;;  %v6553_v29 = vrot.slane %v2091_v6, 7  ;;  %v3449_v32 = vrot.slane %v3447_v24, 3  ;;  %v3452_v34 = vrot.slane %v3450_v25, 4  ;;  %v1983_v6 = vld [vmem:[#allocation2 + $0x10] sm:$0xf] }
 0x1ff   : > { %2821 = vmatpush.bf16.msrb.mxu1 %v5204_v49  ;;  %v3445_v31 = vor.u32 %v3444_v23, %v3441_v22  ;;  %v2094_v35 = vshll.u32 %v6473_v18, 16  ;;  %v6556_v36 = vor.u32 %v1809_v28, %v1806_v27  ;;  %v2215_v49 = vunpack.c.h.b16 %v2079_v13  ;;  %v5203_v18 = vld [vmem:[#allocation11 + $0xf0] sm:$0xff] }
 0x200   : > { %2998 = vmatpush.bf16.msrb.mxu2 %v5212_v46  ;;  %v6560_v46 = vor.u32 %v3452_v34, %v3449_v32  ;;  %v2221_v51 = vunpack.c.l.b16 %v2088_v17  ;;  %vm2211_vm13 = vcmp.ne.s32.totalorder %v2207_v38, %v6417_v15  ;;  %vm2212_vm14 = vcmp.ne.s32.totalorder %v2208_v39, %v6440_v33 }
 0x201   : > { %v2096_v48 = vor.u32 %v2094_v35, %v6553_v29  ;;  %v1811_v52 = vsel %vm7721_vm11, %v1802_v26, %v6556_v36  ;;  %vm2218_vm2 = vcmp.ne.s32.totalorder %v2214_v44, %v6417_v15  ;;  %vm6576_vm5 = vmpackc.low %vm2212_vm14, %vm2211_vm13  ;;  %vm2219_vm6 = vcmp.ne.s32.totalorder %v2215_v49, %v6440_v33  ;;  %v3349_v49 = vld [vmem:[#allocation2 + $0x20] sm:$0xf] }
 0x202   : > { %1939 = vmatmul.bf16.vlgmr.msra.gmra.mxu2 %v1811_v52  ;;  %v3454_v54 = vsel %vm7721_vm11, %v3445_v31, %v6560_v46  ;;  %v7861_v59 = vsel %vm6576_vm5, 4294967295, %v7860_v59  ;;  %v2222_v61 = vunpack.c.h.b16 %v2088_v17  ;;  %vm6581_vm8 = vmpackc.low %vm2219_vm6, %vm2218_vm2  ;;  %vm2225_vm9 = vcmp.ne.s32.totalorder %v2221_v51, %v6417_v15  ;;  %v5158_v17 = vld [vmem:[#allocation2 + $0xc] sm:$0xff] }
 0x203   : > { %v2097_v55 = vsel %vm6540_vm0, %v6490_v4, %v2096_v48  ;;  %3582 = vmatmul.bf16.vlgmr.msrb.gmra.mxu0 %v3454_v54  ;;  %v2326_v42 = vsel %vm6576_vm5, %v1980_v47, 0  ;;  %2822 = vmatpush.bf16.msrb.mxu1 %v5203_v18  ;;  %v2327_v7 = vsel %vm6581_vm8, %v1981_v53, 0  ;;  %v7864_v9 = vmov 0  ;;  %v1199_v47 = vld [vmem:[#allocation2 + $0x10] sm:$0xf] }
 0x204   : > { %2999 = vmatpush.bf16.msrb.mxu2 %v5211_v45  ;;  %v2228_v5 = vunpack.c.l.b16 %v2097_v55  ;;  %v2229_v20 = vunpack.c.h.b16 %v2097_v55  ;;  %vm2226_vm13 = vcmp.ne.s32.totalorder %v2222_v61, %v6440_v33  ;;  %v2376_v8 = vunpack.c.l.b16 %v2326_v42  ;;  %v3819_v61 = vld [vmem:[#allocation2 + $0x20] sm:$0xf] }
 0x205   : > { %vm6591_vm14 = vmpackc.low %vm2226_vm13, %vm2225_vm9  ;;  %v2377_v10 = vunpack.c.l.b16 %v2327_v7  ;;  %vm7724_vm11 = vsmask.f32 7424  ;;  %v1264_v11 = vsel %vm1248_vm3, 65537, %v7748_v0  ;;  %v7866_v12 = vmov 0 }
 0x206   : > { %v7865_v9 = vsel %vm6591_vm14, 4294967295, %v7864_v9  ;;  %vm2232_vm2 = vcmp.ne.s32.totalorder %v2228_v5, %v6417_v15  ;;  %vm2233_vm6 = vcmp.ne.s32.totalorder %v2229_v20, %v6440_v33  ;;  %v2328_v13 = vsel %vm6591_vm14, %v1982_v62, 0 }
 0x207   : > { %vm6603_vm5 = vmpackc.low %vm2233_vm6, %vm2232_vm2  ;;  %v1319_v60 = vshll.u32 %v1264_v11, 16  ;;  %v1323_v14 = vshrl.u32 %v1264_v11, 16  ;;  %vm1184_vm9 = vcmp.lt.s32.totalorder %v1010_v43, 15  ;;  %v2378_v19 = vunpack.c.l.b16 %v2328_v13  ;;  %v3350_v13 = vld [vmem:[#allocation2 + $0x24] sm:$0xf] }
 0x208   : > { %v7867_v12 = vsel %vm6603_vm5, 4294967295, %v7866_v12  ;;  %v2329_v16 = vsel %vm6603_vm5, %v1983_v6, 0  ;;  %v2393_v56 = vpack.c.b16 %v2377_v10, %v2376_v8  ;;  %vm2034_vm15 = vmpackc.low %vm1184_vm9, %vm1184_vm9  ;;  %v2098_v22 = vrot.slane %v6553_v29, 4  ;;  %v1984_v6 = vld [vmem:[#allocation2 + $0x14] sm:$0xf] }
 0x209   : > { %v2379_v23 = vunpack.c.l.b16 %v2329_v16  ;;  %v1321_v24 = vrot.slane %v1319_v60, 5  ;;  %v1325_v25 = vrot.slane %v1323_v14, 4  ;;  %v2050_v26 = vsel %vm2034_vm15, 65537, %v7748_v0  ;;  %v1200_v10 = vld [vmem:[#allocation2 + $0x14] sm:$0xf] }
 0x20a   : > { %v2404_v27 = vshrl.u32 %v2393_v56, 16  ;;  %v2406_v28 = vshll.u32 %v2393_v56, 16  ;;  %v2106_v21 = vsel %vm6540_vm0, %v2098_v22, %v6488_v3  ;;  %v2109_v43 = vshrl.u32 %v2050_v26, 16  ;;  %v1985_v56 = vld [vmem:[#allocation2 + $0x18] sm:$0xf] }
 0x20b   : > { %v2394_v31 = vpack.c.b16 %v2379_v23, %v2378_v19  ;;  %v1322_v32 = vsel %vm6454_vm12, %v6476_v57, %v1321_v24  ;;  %v1326_v34 = vor.u32 %v1325_v25, %v1321_v24  ;;  %v2112_v29 = vshll.u32 %v2050_v26, 16 }
 0x20c   : > { %v2408_v35 = vrot.slane %v2406_v28, 1  ;;  %v1466_v38 = vunpack.c.l.b16 %v1322_v32  ;;  %v1467_v39 = vunpack.c.h.b16 %v1322_v32  ;;  %v6621_v44 = vrot.slane %v2109_v43, 7  ;;  %v5210_v43 = vld [vmem:[#allocation11 + $0x128] sm:$0xff] }
 0x20d   : > { %v2411_v45 = vshll.u32 %v2394_v31, 16  ;;  %v1327_v48 = vrot.slane %v1326_v34, 4  ;;  %v2235_v51 = vunpack.c.l.b16 %v2106_v21  ;;  %v2236_v52 = vunpack.c.h.b16 %v2106_v21  ;;  %3000 = vmatpush.bf16.msrb.mxu2 %v5210_v43 }
 0x20e   : > { %1715 = vmatmul.bf16.gmra.mxu1 %v5158_v17  ;;  %v2409_v53 = vor.u32 %v2408_v35, %v2404_v27  ;;  %vm1470_vm3 = vcmp.ne.s32.totalorder %v1466_v38, %v6417_v15  ;;  %vm1471_vm13 = vcmp.ne.s32.totalorder %v1467_v39, %v6440_v33  ;;  %v2114_v18 = vor.u32 %v2112_v29, %v6621_v44  ;;  %v5202_v29 = vld [vmem:[#allocation11 + $0xe8] sm:$0xff] }
 0x20f   : > { %v2413_v54 = vrot.slane %v2411_v45, 1  ;;  %v1332_v55 = vsel %vm6454_vm12, %v1327_v48, %v6445_v40  ;;  %vm6629_vm2 = vmpackc.low %vm1471_vm13, %vm1470_vm3  ;;  %vm2239_vm6 = vcmp.ne.s32.totalorder %v2235_v51, %v6417_v15  ;;  %vm2240_vm9 = vcmp.ne.s32.totalorder %v2236_v52, %v6440_v33  ;;  %2823 = vmatpush.bf16.msrb.mxu1 %v5202_v29 }
 0x210   : > { %v1473_v62 = vunpack.c.l.b16 %v1332_v55  ;;  %v1474_v5 = vunpack.c.h.b16 %v1332_v55  ;;  %v1561_v20 = vsel %vm6629_vm2, %v1199_v47, 0  ;;  %v3366_v42 = vsel %vm6629_vm2, %v3349_v49, 0  ;;  %vm6639_vm15 = vmpackc.low %vm2240_vm9, %vm2239_vm6  ;;  %v5159_v47 = vld [vmem:[#allocation2 + $0x14] sm:$0xff] }
 0x211   : > { %v7870_v7 = vmov 0  ;;  %v2414_v8 = vsel %vm7724_vm11, %v2409_v53, %v2413_v54  ;;  %v1772_v11 = vunpack.c.l.b16 %v1561_v20  ;;  %v2115_v17 = vsel %vm6540_vm0, %v6490_v4, %v2114_v18 }
 0x212   : > { %v7871_v7 = vsel %vm6639_vm15, 4294967295, %v7870_v7  ;;  %2535 = vmatmul.bf16.vlgmr.msra.gmra.mxu3 %v2414_v8  ;;  %vm1477_vm3 = vcmp.ne.s32.totalorder %v1473_v62, %v6417_v15  ;;  %vm1478_vm13 = vcmp.ne.s32.totalorder %v1474_v5, %v6440_v33  ;;  %v2242_v60 = vunpack.c.l.b16 %v2115_v17 }
 0x213   : > { %v2243_v14 = vunpack.c.h.b16 %v2115_v17  ;;  %vm6649_vm6 = vmpackc.low %vm1478_vm13, %vm1477_vm3  ;;  %v7872_v16 = vmov 0  ;;  %v3416_v19 = vunpack.c.l.b16 %v3366_v42  ;;  %v2330_v22 = vsel %vm6639_vm15, %v1984_v6, 0 }
 0x214   : > { %v7873_v16 = vsel %vm6649_vm6, 4294967295, %v7872_v16  ;;  %v2415_v23 = vshrl.u32 %v2394_v31, 16  ;;  %v961_v24 = vadd.s32 48, %v6399_v58  ;;  %v1562_v25 = vsel %vm6649_vm6, %v1200_v10, 0 }
 0x215   : > { %v3367_v26 = vsel %vm6649_vm6, %v3350_v13, 0  ;;  %vm2246_vm9 = vcmp.ne.s32.totalorder %v2242_v60, %v6417_v15  ;;  %vm2247_vm3 = vcmp.ne.s32.totalorder %v2243_v14, %v6440_v33  ;;  %v1773_v27 = vunpack.c.l.b16 %v1562_v25 }
 0x216   : > { %v3417_v28 = vunpack.c.l.b16 %v3367_v26  ;;  %vm6662_vm13 = vmpackc.low %vm2247_vm3, %vm2246_vm9  ;;  %v7874_v21 = vmov 0  ;;  %v2380_v32 = vunpack.c.l.b16 %v2330_v22  ;;  %v1017_v34 = vand.u32 15, %v961_v24 }
 0x217   : > { %v7875_v21 = vsel %vm6662_vm13, 4294967295, %v7874_v21  ;;  %v2331_v31 = vsel %vm6662_vm13, %v1985_v56, 0  ;;  %v1787_v35 = vpack.c.b16 %v1773_v27, %v1772_v11  ;;  %v2417_v45 = vor.u32 %v2415_v23, %v2413_v54 }
 0x218   : > { %v3431_v38 = vpack.c.b16 %v3417_v28, %v3416_v19  ;;  %v2381_v39 = vunpack.c.l.b16 %v2331_v31  ;;  %vm1169_vm11 = vcmp.gt.s32.totalorder %v1017_v34, 0  ;;  %v962_v48 = vadd.s32 56, %v6399_v58 }
 0x219   : > { %v2116_v49 = vrot.slane %v6621_v44, 4  ;;  %v963_v51 = vadd.s32 64, %v6399_v58  ;;  %v1813_v52 = vshrl.u32 %v1787_v35, 16  ;;  %v1816_v53 = vshll.u32 %v1787_v35, 16  ;;  %vm1250_vm9 = vmpackc.low %vm1169_vm11, %vm1169_vm11 }
 0x21a   : > { %v3456_v18 = vshrl.u32 %v3431_v38, 16  ;;  %v3459_v55 = vshll.u32 %v3431_v38, 16  ;;  %v2395_v62 = vpack.c.b16 %v2381_v39, %v2380_v32  ;;  %v1266_v5 = vsel %vm1250_vm9, 65537, %v7748_v0  ;;  %v1986_v38 = vld [vmem:[#allocation2 + $0x1c] sm:$0xf] }
 0x21b   : > { %v1024_v20 = vand.u32 15, %v962_v48  ;;  %v2124_v54 = vsel %vm6540_vm0, %v2116_v49, %v6488_v3  ;;  %v1815_v42 = vrot.slane %v1813_v52, 3  ;;  %v1818_v6 = vrot.slane %v1816_v53, 4 }
 0x21c   : > { %v3458_v8 = vrot.slane %v3456_v18, 3  ;;  %v3461_v44 = vrot.slane %v3459_v55, 4  ;;  %v2419_v10 = vshll.u32 %v2395_v62, 16  ;;  %v1339_v11 = vshll.u32 %v1266_v5, 16 }
 0x21d   : > { %v1343_v13 = vshrl.u32 %v1266_v5, 16  ;;  %vm1186_vm3 = vcmp.lt.s32.totalorder %v1024_v20, 15  ;;  %v6675_v17 = vor.u32 %v1818_v6, %v1815_v42  ;;  %v2249_v14 = vunpack.c.l.b16 %v2124_v54 }
 0x21e   : > { %1720 = vmatmul.bf16.gmra.mxu1 %v5159_v47  ;;  %v6677_v60 = vor.u32 %v3461_v44, %v3458_v8  ;;  %vm2036_vm11 = vmpackc.low %vm1186_vm3, %vm1186_vm3  ;;  %v2250_v19 = vunpack.c.h.b16 %v2124_v54  ;;  %v2421_v56 = vrot.slane %v2419_v10, 1  ;;  %v1341_v22 = vrot.slane %v1339_v11, 5  ;;  %v3351_v47 = vld [vmem:[#allocation2 + $0x28] sm:$0xf]  ;;  %v5209_v8 = vld [vmem:[#allocation11 + $0x120] sm:$0xff] }
 0x21f   : > { %v1345_v23 = vrot.slane %v1343_v13, 4  ;;  %v2052_v24 = vsel %vm2036_vm11, 65537, %v7748_v0  ;;  %vm7876_vm9 = vsmask.f32 4352  ;;  %vm7878_vm3 = vsmask.f32 7424  ;;  %3001 = vmatpush.bf16.msrb.mxu2 %v5209_v8 }
 0x220   : > { %v1820_v25 = vsel %vm7876_vm9, %v6556_v36, %v6675_v17  ;;  %vm7877_vm13 = vmmov %vm7876_vm9  ;;  %v2127_v27 = vshrl.u32 %v2052_v24, 16  ;;  %v2130_v28 = vshll.u32 %v2052_v24, 16  ;;  %v2422_v43 = vsel %vm7878_vm3, %v2417_v45, %v2421_v56  ;;  %v1202_v44 = vld [vmem:[#allocation2 + $0x1c] sm:$0xf]  ;;  %v3352_v11 = vld [vmem:[#allocation2 + $0x2c] sm:$0xf] }
 0x221   : > { %v3463_v26 = vsel %vm7877_vm13, %v6560_v46, %v6677_v60  ;;  %1944 = vmatmul.bf16.gmra.mxu2 %v1820_v25  ;;  %v1342_v31 = vsel %vm6454_vm12, %v6476_v57, %v1341_v22  ;;  %v1346_v32 = vor.u32 %v1345_v23, %v1341_v22  ;;  %v2423_v34 = vshrl.u32 %v2395_v62, 16  ;;  %v1201_v46 = vld [vmem:[#allocation2 + $0x18] sm:$0xf]  ;;  %v5160_v23 = vld [vmem:[#allocation2 + $0x1c] sm:$0xff] }
 0x222   : > { %3587 = vmatmul.bf16.gmra.mxu0 %v3463_v26  ;;  %v1480_v29 = vunpack.c.l.b16 %v1342_v31  ;;  %v1481_v35 = vunpack.c.h.b16 %v1342_v31  ;;  %v2129_v36 = vrot.slane %v2127_v27, 7  ;;  %vm2253_vm11 = vcmp.ne.s32.totalorder %v2249_v14, %v6417_v15  ;;  %2540 = vmatmul.bf16.gmra.mxu3 %v2422_v43  ;;  %v5201_v24 = vld [vmem:[#allocation11 + $0xe0] sm:$0xff]  ;;  %v1987_v26 = vld [vmem:[#allocation2 + $0x20] sm:$0xf] }
 0x223   : > { %v1347_v39 = vrot.slane %v1346_v32, 4  ;;  %vm2254_vm13 = vcmp.ne.s32.totalorder %v2250_v19, %v6440_v33  ;;  %v6692_v48 = vor.u32 %v2423_v34, %v2421_v56  ;;  %v1031_v45 = vand.u32 15, %v963_v51  ;;  %2824 = vmatpush.bf16.msrb.mxu1 %v5201_v24 }
 0x224   : > { %vm1484_vm9 = vcmp.ne.s32.totalorder %v1480_v29, %v6417_v15  ;;  %vm1485_vm3 = vcmp.ne.s32.totalorder %v1481_v35, %v6440_v33  ;;  %v2132_v49 = vor.u32 %v2130_v28, %v2129_v36  ;;  %vm6696_vm15 = vmpackc.low %vm2254_vm13, %vm2253_vm11  ;;  %v7879_v52 = vmov 0 }
 0x225   : > { %v7880_v52 = vsel %vm6696_vm15, 4294967295, %v7879_v52  ;;  %v964_v53 = vadd.s32 72, %v6399_v58  ;;  %v1352_v18 = vsel %vm6454_vm12, %v1347_v39, %v6445_v40  ;;  %vm6704_vm6 = vmpackc.low %vm1485_vm3, %vm1484_vm9  ;;  %v7881_v55 = vmov 0 }
 0x226   : > { %v7882_v55 = vsel %vm6704_vm6, 4294967295, %v7881_v55  ;;  %v2332_v51 = vsel %vm6696_vm15, %v1986_v38, 0  ;;  %vm6710_vm5 = vcmp.gt.s32.totalorder %v1031_v45, 0  ;;  %v2134_v5 = vrot.slane %v2129_v36, 4 }
 0x227   : > { %v1487_v20 = vunpack.c.l.b16 %v1352_v18  ;;  %v1488_v54 = vunpack.c.h.b16 %v1352_v18  ;;  %v1563_v42 = vsel %vm6704_vm6, %v1201_v46, 0  ;;  %v3368_v6 = vsel %vm6704_vm6, %v3351_v47, 0  ;;  %vm1252_vm11 = vmpackc.low %vm6710_vm5, %vm6710_vm5 }
 0x228   : > { %v1774_v10 = vunpack.c.l.b16 %v1563_v42  ;;  %v3418_v13 = vunpack.c.l.b16 %v3368_v6  ;;  %v2133_v14 = vsel %vm6540_vm0, %v6490_v4, %v2132_v49  ;;  %v2382_v19 = vunpack.c.l.b16 %v2332_v51 }
 0x229   : > { %vm1491_vm13 = vcmp.ne.s32.totalorder %v1487_v20, %v6417_v15  ;;  %vm1492_vm9 = vcmp.ne.s32.totalorder %v1488_v54, %v6440_v33  ;;  %v2256_v56 = vunpack.c.l.b16 %v2133_v14  ;;  %v2257_v22 = vunpack.c.h.b16 %v2133_v14  ;;  %v1204_v20 = vld [vmem:[#allocation2 + $0x24] sm:$0xf]  ;;  %v3354_v54 = vld [vmem:[#allocation2 + $0x34] sm:$0xf] }
 0x22a   : > { %vm6726_vm3 = vmpackc.low %vm1492_vm9, %vm1491_vm13  ;;  %v7885_v25 = vmov 0  ;;  %v1268_v27 = vsel %vm1252_vm11, 65537, %v7748_v0  ;;  %v1038_v28 = vand.u32 15, %v964_v53  ;;  %v2142_v43 = vsel %vm6540_vm0, %v2134_v5, %v6488_v3 }
 0x22b   : > { %v7886_v25 = vsel %vm6726_vm3, 4294967295, %v7885_v25  ;;  %v6740_v31 = vadd.s32 80, %v6399_v58  ;;  %v1564_v32 = vsel %vm6726_vm3, %v1202_v44, 0  ;;  %v3369_v34 = vsel %vm6726_vm3, %v3352_v11, 0 }
 0x22c   : > { %vm2260_vm13 = vcmp.ne.s32.totalorder %v2256_v56, %v6417_v15  ;;  %vm2261_vm9 = vcmp.ne.s32.totalorder %v2257_v22, %v6440_v33  ;;  %v1775_v29 = vunpack.c.l.b16 %v1564_v32  ;;  %v3419_v35 = vunpack.c.l.b16 %v3369_v34 }
 0x22d   : > { %vm6748_vm5 = vmpackc.low %vm2261_vm9, %vm2260_vm13  ;;  %v7887_v38 = vmov 0  ;;  %v1359_v36 = vshll.u32 %v1268_v27, 16  ;;  %v1363_v46 = vshrl.u32 %v1268_v27, 16  ;;  %vm1188_vm11 = vcmp.lt.s32.totalorder %v1038_v28, 15 }
 0x22e   : > { %v7888_v38 = vsel %vm6748_vm5, 4294967295, %v7887_v38  ;;  %v2333_v39 = vsel %vm6748_vm5, %v1987_v26, 0  ;;  %1725 = vmatmul.bf16.gmra.mxu1 %v5160_v23  ;;  %v2263_v47 = vunpack.c.l.b16 %v2142_v43  ;;  %v2264_v45 = vunpack.c.h.b16 %v2142_v43  ;;  %vm2038_vm15 = vmpackc.low %vm1188_vm11, %vm1188_vm11 }
 0x22f   : > { %v1788_v49 = vpack.c.b16 %v1775_v29, %v1774_v10  ;;  %v3432_v53 = vpack.c.b16 %v3419_v35, %v3418_v13  ;;  %v2383_v18 = vunpack.c.l.b16 %v2333_v39  ;;  %v1361_v51 = vrot.slane %v1359_v36, 5  ;;  %v3353_v29 = vld [vmem:[#allocation2 + $0x30] sm:$0xf] }
 0x230   : > { %v1365_v62 = vrot.slane %v1363_v46, 4  ;;  %v2054_v5 = vsel %vm2038_vm15, 65537, %v7748_v0  ;;  %vm6756_vm13 = vcmp.ne.s32.totalorder %v2263_v47, %v6417_v15  ;;  %vm6761_vm9 = vcmp.ne.s32.totalorder %v2264_v45, %v6440_v33 }
 0x231   : > { %v1822_v42 = vshrl.u32 %v1788_v49, 16  ;;  %v1825_v6 = vshll.u32 %v1788_v49, 16  ;;  %v3465_v8 = vshrl.u32 %v3432_v53, 16  ;;  %v3468_v44 = vshll.u32 %v3432_v53, 16  ;;  %vm6786_vm5 = vmpackc.low %vm6761_vm9, %vm6756_vm13 }
 0x232   : > { %v6765_v10 = vpack.c.b16 %v2383_v18, %v2382_v19  ;;  %v1362_v11 = vsel %vm6454_vm12, %v6476_v57, %v1361_v51  ;;  %v1366_v13 = vor.u32 %v1365_v62, %v1361_v51  ;;  %v2145_v14 = vshrl.u32 %v2054_v5, 16  ;;  %v1203_v19 = vld [vmem:[#allocation2 + $0x20] sm:$0xf]  ;;  %v1988_v62 = vld [vmem:[#allocation2 + $0x24] sm:$0xf] }
 0x233   : > { %v1824_v56 = vrot.slane %v1822_v42, 3  ;;  %v1827_v22 = vrot.slane %v1825_v6, 4  ;;  %v3467_v23 = vrot.slane %v3465_v8, 3  ;;  %v3470_v24 = vrot.slane %v3468_v44, 4 }
 0x234   : > { %v2427_v26 = vshll.u32 %v6765_v10, 16  ;;  %v1367_v27 = vrot.slane %v1366_v13, 4  ;;  %v1494_v28 = vunpack.c.l.b16 %v1362_v11  ;;  %v1495_v43 = vunpack.c.h.b16 %v1362_v11 }
 0x235   : > { %v6771_v32 = vor.u32 %v1827_v22, %v1824_v56  ;;  %v6773_v34 = vor.u32 %v3470_v24, %v3467_v23  ;;  %v6775_v35 = vrot.slane %v2145_v14, 7  ;;  %v2148_v36 = vshll.u32 %v2054_v5, 16  ;;  %v5161_v14 = vld [vmem:[#allocation2 + $0x24] sm:$0xff] }
 0x236   : > { %v2429_v46 = vrot.slane %v2427_v26, 1  ;;  %v1372_v39 = vsel %vm6454_vm12, %v1367_v27, %v6445_v40  ;;  %vm1498_vm15 = vcmp.ne.s32.totalorder %v1494_v28, %v6417_v15  ;;  %vm1499_vm11 = vcmp.ne.s32.totalorder %v1495_v43, %v6440_v33  ;;  %v1989_v43 = vld [vmem:[#allocation2 + $0x28] sm:$0xf] }
 0x237   : > { %v7893_v47 = vmov 0  ;;  %vm7895_vm3 = vsmask.f32 4352  ;;  %vm6796_vm14 = vmpackc.low %vm1499_vm11, %vm1498_vm15  ;;  %v1501_v18 = vunpack.c.l.b16 %v1372_v39  ;;  %v1502_v51 = vunpack.c.h.b16 %v1372_v39 }
 0x238   : > { %v7894_v47 = vsel %vm6786_vm5, 4294967295, %v7893_v47  ;;  %v1829_v45 = vsel %vm7895_vm3, %v6675_v17, %v6771_v32  ;;  %vm7896_vm6 = vmmov %vm7895_vm3  ;;  %vm7899_vm13 = vsmask.f32 7424  ;;  %v1565_v17 = vsel %vm6796_vm14, %v1203_v19, 0  ;;  %v5208_v19 = vld [vmem:[#allocation11 + $0x118] sm:$0xff] }
 0x239   : > { %v3472_v49 = vsel %vm7896_vm6, %v6677_v60, %v6773_v34  ;;  %1949 = vmatmul.bf16.gmra.mxu2 %v1829_v45  ;;  %v2430_v5 = vsel %vm7899_vm13, %v6692_v48, %v2429_v46  ;;  %v3370_v60 = vsel %vm6796_vm14, %v3353_v29, 0  ;;  %v2150_v42 = vor.u32 %v2148_v36, %v6775_v35  ;;  %v5200_v29 = vld [vmem:[#allocation11 + $0xd8] sm:$0xff] }
 0x23a   : > { %3592 = vmatmul.bf16.gmra.mxu0 %v3472_v49  ;;  %2545 = vmatmul.bf16.gmra.mxu3 %v2430_v5  ;;  %vm1505_vm6 = vcmp.ne.s32.totalorder %v1501_v18, %v6417_v15  ;;  %vm1506_vm3 = vcmp.ne.s32.totalorder %v1502_v51, %v6440_v33  ;;  %v1776_v6 = vunpack.c.l.b16 %v1565_v17  ;;  %v3420_v8 = vunpack.c.l.b16 %v3370_v60 }
 0x23b   : > { %vm6809_vm9 = vmpackc.low %vm1506_vm3, %vm1505_vm6  ;;  %v7900_v44 = vmov 0  ;;  %v2151_v48 = vsel %vm6540_vm0, %v6490_v4, %v2150_v42  ;;  %v2334_v11 = vsel %vm6786_vm5, %v1988_v62, 0  ;;  %v2431_v13 = vshrl.u32 %v6765_v10, 16  ;;  %3002 = vmatpush.bf16.msrb.mxu2 %v5208_v19  ;;  %2825 = vmatpush.bf16.msrb.mxu1 %v5200_v29 }
 0x23c   : > { %v7901_v44 = vsel %vm6809_vm9, 4294967295, %v7900_v44  ;;  %v1045_v56 = vand.u32 15, %v6740_v31  ;;  %v1566_v22 = vsel %vm6809_vm9, %v1204_v20, 0  ;;  %v3371_v23 = vsel %vm6809_vm9, %v3354_v54, 0 }
 0x23d   : > { %v2270_v24 = vunpack.c.l.b16 %v2151_v48  ;;  %v2271_v26 = vunpack.c.h.b16 %v2151_v48  ;;  %v1777_v27 = vunpack.c.l.b16 %v1566_v22  ;;  %v3421_v28 = vunpack.c.l.b16 %v3371_v23 }
 0x23e   : > { %vm6826_vm13 = vcmp.gt.s32.totalorder %v1045_v56, 0  ;;  %v966_v31 = vadd.s32 88, %v6399_v58  ;;  %v7904_v45 = vmov 0  ;;  %v2384_v49 = vunpack.c.l.b16 %v2334_v11  ;;  %1730 = vmatmul.bf16.gmra.mxu1 %v5161_v14 }
 0x23f   : > { %vm2274_vm15 = vcmp.ne.s32.totalorder %v2270_v24, %v6417_v15  ;;  %vm2275_vm11 = vcmp.ne.s32.totalorder %v2271_v26, %v6440_v33  ;;  %v1789_v36 = vpack.c.b16 %v1777_v27, %v1776_v6  ;;  %v3433_v39 = vpack.c.b16 %v3421_v28, %v3420_v8  ;;  %vm1254_vm3 = vmpackc.low %vm6826_vm13, %vm6826_vm13 }
 0x240   : > { %vm6831_vm6 = vmpackc.low %vm2275_vm11, %vm2274_vm15  ;;  %v2152_v18 = vrot.slane %v6775_v35, 4  ;;  %v2433_v62 = vor.u32 %v2431_v13, %v2429_v46  ;;  %v1052_v5 = vand.u32 15, %v966_v31  ;;  %v6842_v20 = vadd.s32 96, %v6399_v58 }
 0x241   : > { %v7905_v45 = vsel %vm6831_vm6, 4294967295, %v7904_v45  ;;  %v2335_v51 = vsel %vm6831_vm6, %v1989_v43, 0  ;;  %v1831_v17 = vshrl.u32 %v1789_v36, 16  ;;  %v1834_v54 = vshll.u32 %v1789_v36, 16 }
 0x242   : > { %v3474_v60 = vshrl.u32 %v3433_v39, 16  ;;  %v3477_v42 = vshll.u32 %v3433_v39, 16  ;;  %v2385_v6 = vunpack.c.l.b16 %v2335_v51  ;;  %v1270_v35 = vsel %vm1254_vm3, 65537, %v7748_v0 }
 0x243   : > { %vm1190_vm15 = vcmp.lt.s32.totalorder %v1052_v5, 15  ;;  %v2160_v46 = vsel %vm6540_vm0, %v2152_v18, %v6488_v3  ;;  %v1833_v8 = vrot.slane %v1831_v17, 3  ;;  %v1836_v48 = vrot.slane %v1834_v54, 4  ;;  %v1990_v17 = vld [vmem:[#allocation2 + $0x2c] sm:$0xf] }
 0x244   : > { %v3476_v11 = vrot.slane %v3474_v60, 3  ;;  %v3479_v13 = vrot.slane %v3477_v42, 4  ;;  %vm2040_vm11 = vmpackc.low %vm1190_vm15, %vm1190_vm15  ;;  %v2397_v14 = vpack.c.b16 %v2385_v6, %v2384_v49  ;;  %v1379_v56 = vshll.u32 %v1270_v35, 16  ;;  %v1205_v54 = vld [vmem:[#allocation2 + $0x28] sm:$0xf] }
 0x245   : > { %v1383_v22 = vshrl.u32 %v1270_v35, 16  ;;  %v2056_v23 = vsel %vm2040_vm11, 65537, %v7748_v0  ;;  %v6849_v24 = vor.u32 %v1836_v48, %v1833_v8  ;;  %v2277_v10 = vunpack.c.l.b16 %v2160_v46  ;;  %v3355_v35 = vld [vmem:[#allocation2 + $0x38] sm:$0xf] }
 0x246   : > { %v6851_v26 = vor.u32 %v3479_v13, %v3476_v11  ;;  %v2163_v27 = vshrl.u32 %v2056_v23, 16  ;;  %v2166_v28 = vshll.u32 %v2056_v23, 16  ;;  %v2435_v43 = vshll.u32 %v2397_v14, 16  ;;  %v5162_v13 = vld [vmem:[#allocation2 + $0x2c] sm:$0xff] }
 0x247   : > { %v1381_v19 = vrot.slane %v1379_v56, 5  ;;  %v1385_v29 = vrot.slane %v1383_v22, 4  ;;  %vm7906_vm13 = vsmask.f32 4352  ;;  %v2278_v49 = vunpack.c.h.b16 %v2160_v46 }
 0x248   : > { %v1838_v31 = vsel %vm7906_vm13, %v6771_v32, %v6849_v24  ;;  %vm7907_vm3 = vmmov %vm7906_vm13  ;;  %v6859_v39 = vrot.slane %v2163_v27, 7  ;;  %v2437_v18 = vrot.slane %v2435_v43, 1  ;;  %vm2281_vm15 = vcmp.ne.s32.totalorder %v2277_v10, %v6417_v15  ;;  %v5207_v10 = vld [vmem:[#allocation11 + $0x110] sm:$0xff] }
 0x249   : > { %v3481_v36 = vsel %vm7907_vm3, %v6773_v34, %v6851_v26  ;;  %v1382_v51 = vsel %vm6454_vm12, %v6476_v57, %v1381_v19  ;;  %v1386_v5 = vor.u32 %v1385_v29, %v1381_v19  ;;  %1954 = vmatmul.bf16.gmra.mxu2 %v1838_v31  ;;  %vm2282_vm11 = vcmp.ne.s32.totalorder %v2278_v49, %v6440_v33  ;;  %v1991_v29 = vld [vmem:[#allocation2 + $0x30] sm:$0xf]  ;;  %v1206_v31 = vld [vmem:[#allocation2 + $0x2c] sm:$0xf]  ;;  %v3356_v49 = vld [vmem:[#allocation2 + $0x3c] sm:$0xf] }
 0x24a   : > { %3597 = vmatmul.bf16.gmra.mxu0 %v3481_v36  ;;  %v1508_v32 = vunpack.c.l.b16 %v1382_v51  ;;  %v1509_v60 = vunpack.c.h.b16 %v1382_v51  ;;  %v2168_v42 = vor.u32 %v2166_v28, %v6859_v39  ;;  %vm7908_vm13 = vsmask.f32 7424  ;;  %vm6868_vm3 = vmpackc.low %vm2282_vm11, %vm2281_vm15  ;;  %3003 = vmatpush.bf16.msrb.mxu2 %v5207_v10 }
 0x24b   : > { %v2438_v34 = vsel %vm7908_vm13, %v2433_v62, %v2437_v18  ;;  %v1387_v6 = vrot.slane %v1386_v5, 4  ;;  %v7909_v46 = vmov 0  ;;  %v2439_v8 = vshrl.u32 %v2397_v14, 16 }
 0x24c   : > { %v7910_v46 = vsel %vm6868_vm3, 4294967295, %v7909_v46  ;;  %v1059_v48 = vand.u32 15, %v6842_v20  ;;  %2550 = vmatmul.bf16.gmra.mxu3 %v2438_v34  ;;  %vm1512_vm6 = vcmp.ne.s32.totalorder %v1508_v32, %v6417_v15  ;;  %vm1513_vm5 = vcmp.ne.s32.totalorder %v1509_v60, %v6440_v33 }
 0x24d   : > { %7911 = vst [vmem:[#allocation38_spill] sm:$0xff] %v7910_v46  ;;  %v2169_v11 = vsel %vm6540_vm0, %v6490_v4, %v2168_v42  ;;  %v2336_v62 = vsel %vm6868_vm3, %v1990_v17, 0  ;;  %v1392_v56 = vsel %vm6454_vm12, %v1387_v6, %v6445_v40  ;;  %vm6883_vm15 = vmpackc.low %vm1513_vm5, %vm1512_vm6  ;;  %v7912_v14 = vmov 0 }
 0x24e   : > { %v7913_v14 = vsel %vm6883_vm15, 4294967295, %v7912_v14  ;;  %v2284_v20 = vunpack.c.l.b16 %v2169_v11  ;;  %v2285_v22 = vunpack.c.h.b16 %v2169_v11  ;;  %v2386_v23 = vunpack.c.l.b16 %v2336_v62  ;;  %1735 = vmatmul.bf16.gmra.mxu1 %v5162_v13  ;;  %v6921_v11 = vld [vmem:[#allocation11 + $0x1f8] sm:$0xff] }
 0x24f   : > { %v1515_v27 = vunpack.c.l.b16 %v1392_v56  ;;  %v1516_v28 = vunpack.c.h.b16 %v1392_v56  ;;  %v1567_v43 = vsel %vm6883_vm15, %v1205_v54, 0  ;;  %v3372_v19 = vsel %vm6883_vm15, %v3355_v35, 0  ;;  %3751 = vmatpush.bf16.msra.mxu0 %v6921_v11 }
 0x250   : > { %v1778_v36 = vunpack.c.l.b16 %v1567_v43  ;;  %v3422_v51 = vunpack.c.l.b16 %v3372_v19  ;;  %vm2288_vm5 = vcmp.ne.s32.totalorder %v2284_v20, %v6417_v15  ;;  %vm2289_vm6 = vcmp.ne.s32.totalorder %v2285_v22, %v6440_v33  ;;  %v6933_v19 = vld [vmem:[#allocation11 + $0x1f0] sm:$0xff] }
 0x251   : > { %vm1519_vm11 = vcmp.ne.s32.totalorder %v1515_v27, %v6417_v15  ;;  %vm1520_vm13 = vcmp.ne.s32.totalorder %v1516_v28, %v6440_v33  ;;  %vm6895_vm3 = vmpackc.low %vm2289_vm6, %vm2288_vm5  ;;  %v7914_v5 = vmov 0  ;;  %v2441_v17 = vor.u32 %v2439_v8, %v2437_v18 }
 0x252   : > { %v7915_v5 = vsel %vm6895_vm3, 4294967295, %v7914_v5  ;;  %vm6899_vm15 = vcmp.gt.s32.totalorder %v1059_v48, 0  ;;  %vm6903_vm9 = vmpackc.low %vm1520_vm13, %vm1519_vm11  ;;  %v7919_v32 = vmov 0  ;;  %v2337_v60 = vsel %vm6895_vm3, %v1991_v29, 0  ;;  %v5199_v48 = vld [vmem:[#allocation11 + $0xd0] sm:$0xff] }
 0x253   : > { %7916 = vst [vmem:[#allocation39_spill] sm:$0xff] %v7915_v5  ;;  %v7920_v32 = vsel %vm6903_vm9, 4294967295, %v7919_v32  ;;  %v968_v42 = vadd.s32 104, %v6399_v58  ;;  %v2170_v34 = vrot.slane %v6859_v39, 4  ;;  %v6912_v6 = vadd.s32 112, %v6399_v58  ;;  %vm1256_vm5 = vmpackc.low %vm6899_vm15, %vm6899_vm15  ;;  %2826 = vmatpush.bf16.msrb.mxu1 %v5199_v48  ;;  %3752 = vmatpush.bf16.msra.mxu0 %v6933_v19 }
 0x254   : > { %v1568_v18 = vsel %vm6903_vm9, %v1206_v31, 0  ;;  %v3373_v35 = vsel %vm6903_vm9, %v3356_v49, 0  ;;  %v2387_v8 = vunpack.c.l.b16 %v2337_v60  ;;  %v6924_v62 = vadd.s32 120, %v6399_v58 }
 0x255   : > { %v1779_v39 = vunpack.c.l.b16 %v1568_v18  ;;  %v3423_v13 = vunpack.c.l.b16 %v3373_v35  ;;  %v1272_v56 = vsel %vm1256_vm5, 65537, %v7748_v0  ;;  %v1066_v20 = vand.u32 15, %v968_v42 }
 0x256   : > { %v6927_v22 = vpack.c.b16 %v2387_v8, %v2386_v23  ;;  %v1399_v27 = vshll.u32 %v1272_v56, 16  ;;  %v1403_v28 = vshrl.u32 %v1272_v56, 16  ;;  %v2178_v43 = vsel %vm6540_vm0, %v2170_v34, %v6488_v3 }
 0x257   : > { %v1790_v58 = vpack.c.b16 %v1779_v39, %v1778_v36  ;;  %v3434_v29 = vpack.c.b16 %v3423_v13, %v3422_v51  ;;  %vm1192_vm15 = vcmp.lt.s32.totalorder %v1066_v20, 15  ;;  %v2291_v10 = vunpack.c.l.b16 %v2178_v43  ;;  %v6943_v20 = vld [vmem:[#allocation11 + $0x1e8] sm:$0xff] }
 0x258   : > { %v2443_v31 = vshll.u32 %v6927_v22, 16  ;;  %v1401_v49 = vrot.slane %v1399_v27, 5  ;;  %v1405_v23 = vrot.slane %v1403_v28, 4  ;;  %vm2042_vm6 = vmpackc.low %vm1192_vm15, %vm1192_vm15  ;;  %v2292_v54 = vunpack.c.h.b16 %v2178_v43  ;;  %3753 = vmatpush.bf16.msra.mxu0 %v6943_v20 }
 0x259   : > { %v1840_v60 = vshrl.u32 %v1790_v58, 16  ;;  %v1843_v42 = vshll.u32 %v1790_v58, 16  ;;  %v3483_v18 = vshrl.u32 %v3434_v29, 16  ;;  %v3486_v35 = vshll.u32 %v3434_v29, 16 }
 0x25a   : > { %v6936_v34 = vrot.slane %v2443_v31, 1  ;;  %v1402_v8 = vsel %vm6454_vm12, %v6476_v57, %v1401_v49  ;;  %v1406_v36 = vor.u32 %v1405_v23, %v1401_v49  ;;  %v2058_v51 = vsel %vm2042_vm6, 65537, %v7748_v0  ;;  %v1207_v49 = vld [vmem:[#allocation2 + $0x30] sm:$0xf]  ;;  %v3357_v23 = vld [vmem:[#allocation2 + $0x40] sm:$0xf] }
 0x25b   : > { %v1842_v48 = vrot.slane %v1840_v60, 3  ;;  %v1845_v39 = vrot.slane %v1843_v42, 4  ;;  %v3485_v13 = vrot.slane %v3483_v18, 3  ;;  %v3488_v56 = vrot.slane %v3486_v35, 4  ;;  %v5163_v42 = vld [vmem:[#allocation2 + $0x34] sm:$0xff] }
 0x25c   : > { %vm7921_vm11 = vsmask.f32 7424  ;;  %v1407_v28 = vrot.slane %v1406_v36, 4  ;;  %v1522_v43 = vunpack.c.l.b16 %v1402_v8  ;;  %v1523_v58 = vunpack.c.h.b16 %v1402_v8  ;;  %v1208_v8 = vld [vmem:[#allocation2 + $0x34] sm:$0xf] }
 0x25d   : > { %v2446_v27 = vsel %vm7921_vm11, %v2441_v17, %v6936_v34  ;;  %v6947_v29 = vor.u32 %v1845_v39, %v1842_v48  ;;  %v6949_v31 = vor.u32 %v3488_v56, %v3485_v13  ;;  %v2181_v0 = vshrl.u32 %v2058_v51, 16  ;;  %v6979_v56 = vld [vmem:[#allocation11 + $0x1e0] sm:$0xff]  ;;  %v3073_v36 = vld [vmem:[#allocation2 + $0x34] sm:$0xf] }
 0x25e   : > { %v2184_v5 = vshll.u32 %v2058_v51, 16  ;;  %2555 = vmatmul.bf16.gmra.mxu3 %v2446_v27  ;;  %v1412_v60 = vsel %vm6454_vm12, %v1407_v28, %v6445_v40  ;;  %vm1526_vm13 = vcmp.ne.s32.totalorder %v1522_v43, %v6417_v15  ;;  %vm1527_vm5 = vcmp.ne.s32.totalorder %v1523_v58, %v6440_v33  ;;  %1740 = vmatmul.bf16.gmra.mxu1 %v5163_v42 }
 0x25f   : > { %vm6957_vm15 = vcmp.ne.s32.totalorder %v2291_v10, %v6417_v15  ;;  %vm7924_vm6 = vsmask.f32 4352  ;;  %vm6967_vm3 = vmpackc.low %vm1527_vm5, %vm1526_vm13  ;;  %v1529_v51 = vunpack.c.l.b16 %v1412_v60  ;;  %v1530_v48 = vunpack.c.h.b16 %v1412_v60  ;;  %v1992_v10 = vld [vmem:[#allocation2 + $0x34] sm:$0xf]  ;;  %v5206_v60 = vld [vmem:[#allocation11 + $0x108] sm:$0xff]  ;;  %3754 = vmatpush.bf16.msra.mxu0 %v6979_v56 }
 0x260   : > { %v1847_v18 = vsel %vm7924_vm6, %v6849_v24, %v6947_v29  ;;  %vm7925_vm11 = vmmov %vm7924_vm6  ;;  %v1569_v39 = vsel %vm6967_vm3, %v1207_v49, 0  ;;  %v3358_v24 = vld [vmem:[#allocation2 + $0x44] sm:$0xf]  ;;  %v3374_v13 = vsel %vm6967_vm3, %v3357_v23, 0  ;;  %vm2296_vm13 = vcmp.ne.s32.totalorder %v2292_v54, %v6440_v33  ;;  %3004 = vmatpush.bf16.msrb.mxu2 %v5206_v60 }
 0x261   : > { %v3490_v35 = vsel %vm7925_vm11, %v6851_v26, %v6949_v31  ;;  %1959 = vmatmul.bf16.gmra.mxu2 %v1847_v18  ;;  %v6976_v26 = vrot.slane %v2181_v0, 7  ;;  %vm1533_vm5 = vcmp.ne.s32.totalorder %v1529_v51, %v6417_v15  ;;  %vm1534_vm6 = vcmp.ne.s32.totalorder %v1530_v48, %v6440_v33  ;;  %vm6985_vm11 = vmpackc.low %vm2296_vm13, %vm6957_vm15 }
 0x262   : > { %3602 = vmatmul.bf16.gmra.mxu0 %v3490_v35  ;;  %v1780_v27 = vunpack.c.l.b16 %v1569_v39  ;;  %v3424_v28 = vunpack.c.l.b16 %v3374_v13  ;;  %v7928_v43 = vmov 0  ;;  %vm6989_vm9 = vmpackc.low %vm1534_vm6, %vm1533_vm5  ;;  %v7931_v58 = vmov 0 }
 0x263   : > { %v7929_v43 = vsel %vm6985_vm11, 4294967295, %v7928_v43  ;;  %v7932_v58 = vsel %vm6989_vm9, 4294967295, %v7931_v58  ;;  %v2186_v0 = vor.u32 %v2184_v5, %v6976_v26  ;;  %v2338_v54 = vsel %vm6985_vm11, %v1992_v10, 0  ;;  %v5220_v5 = vld [vmem:[#allocation11 + $0x178] sm:$0xff] }
 0x264   : > { %7930 = vst [vmem:[#allocation40_spill] sm:$0xff] %v7929_v43  ;;  %v2447_v49 = vshrl.u32 %v6927_v22, 16  ;;  %v1073_v23 = vand.u32 15, %v6912_v6  ;;  %v1570_v17 = vsel %vm6989_vm9, %v1208_v8, 0  ;;  %v3375_v18 = vsel %vm6989_vm9, %v3358_v24, 0  ;;  %v5198_v6 = vld [vmem:[#allocation11 + $0xc8] sm:$0xff]  ;;  %3280 = vmatpush.bf16.msrb.mxu3 %v5220_v5 }
 0x265   : > { %7933 = vst [vmem:[#allocation41_spill] sm:$0xff] %v7932_v58  ;;  %v1080_v35 = vand.u32 15, %v6924_v62  ;;  %v1781_v51 = vunpack.c.l.b16 %v1570_v17  ;;  %v3425_v48 = vunpack.c.l.b16 %v3375_v18  ;;  %v2187_v22 = vsel %vm6540_vm0, %v6490_v4, %v2186_v0  ;;  %v7007_v10 = vld [vmem:[#allocation11 + $0x1d8] sm:$0xff]  ;;  %v5219_v62 = vld [vmem:[#allocation11 + $0x170] sm:$0xff]  ;;  %v1993_v18 = vld [vmem:[#allocation2 + $0x38] sm:$0xf]  ;;  %2827 = vmatpush.bf16.msrb.mxu1 %v5198_v6 }
 0x266   : > { %v2388_v42 = vunpack.c.l.b16 %v2338_v54  ;;  %v2298_v8 = vunpack.c.l.b16 %v2187_v22  ;;  %v2299_v39 = vunpack.c.h.b16 %v2187_v22  ;;  %vm1177_vm15 = vcmp.gt.s32.totalorder %v1073_v23, 0  ;;  %3755 = vmatpush.bf16.msra.mxu0 %v7007_v10  ;;  %v5218_v6 = vld [vmem:[#allocation11 + $0x168] sm:$0xff] }
 0x267   : > { %vm7009_vm13 = vcmp.lt.s32.totalorder %v1080_v35, 15  ;;  %v1791_v13 = vpack.c.b16 %v1781_v51, %v1780_v27  ;;  %v3435_v17 = vpack.c.b16 %v3425_v48, %v3424_v28  ;;  %v7014_v43 = vor.u32 %v2447_v49, %v6936_v34  ;;  %vm1258_vm5 = vmpackc.low %vm1177_vm15, %vm1177_vm15  ;;  %v7024_v27 = vld [vmem:[#allocation11 + $0x1d0] sm:$0xff] }
 0x268   : > { %v2188_v0 = vrot.slane %v6976_v26, 4  ;;  %vm2302_vm6 = vcmp.ne.s32.totalorder %v2298_v8, %v6417_v15  ;;  %vm2303_vm11 = vcmp.ne.s32.totalorder %v2299_v39, %v6440_v33  ;;  %v7936_v54 = vmov 0   ;;  %vm2044_vm9 = vmpackc.low %vm7009_vm13, %vm7009_vm13  ;;  %3281 = vmatpush.bf16.msrb.mxu3 %v5219_v62 }
 0x269   : > { %v1274_v23 = vsel %vm1258_vm5, 65537, %v7936_v54  ;;  %v1849_v28 = vshrl.u32 %v1791_v13, 16  ;;  %v1852_v49 = vshll.u32 %v1791_v13, 16  ;;  %v3492_v26 = vshrl.u32 %v3435_v17, 16  ;;  %vm7027_vm15 = vmpackc.low %vm2303_vm11, %vm2302_vm6 }
 0x26a   : > { %v3495_v60 = vshll.u32 %v3435_v17, 16  ;;  %v7937_v35 = vmov 0  ;;  %v2339_v5 = vsel %vm7027_vm15, %v1993_v18, 0  ;;  %v1419_v51 = vshll.u32 %v1274_v23, 16  ;;  %3756 = vmatpush.bf16.msra.mxu0 %v7024_v27  ;;  %v7038_v18 = vld [vmem:[#allocation11 + $0x1c8] sm:$0xff] }
 0x26b   : > { %v7938_v35 = vsel %vm7027_vm15, 4294967295, %v7937_v35  ;;  %v1423_v48 = vshrl.u32 %v1274_v23, 16  ;;  %v2060_v22 = vsel %vm2044_vm9, 65537, %v7936_v54  ;;  %v1851_v8 = vrot.slane %v1849_v28, 3 }
 0x26c   : > { %7939 = vst [vmem:[#allocation42_spill] sm:$0xff] %v7938_v35  ;;  %v1854_v39 = vrot.slane %v1852_v49, 4  ;;  %v3494_v24 = vrot.slane %v3492_v26, 3  ;;  %v3497_v34 = vrot.slane %v3495_v60, 4  ;;  %v2389_v13 = vunpack.c.l.b16 %v2339_v5  ;;  %3282 = vmatpush.bf16.msrb.mxu3 %v5218_v6 }
 0x26d   : > { %v1421_v46 = vrot.slane %v1419_v51, 5  ;;  %v1425_v17 = vrot.slane %v1423_v48, 4  ;;  %v2196_v58 = vsel %vm6540_vm0, %v2188_v0, %v6488_v3  ;;  %v2199_v62 = vshrl.u32 %v2060_v22, 16  ;;  %v5217_v3 = vld [vmem:[#allocation11 + $0x160] sm:$0xff] }
 0x26e   : > { %v7040_v23 = vor.u32 %v1854_v39, %v1851_v8  ;;  %v7042_v54 = vor.u32 %v3497_v34, %v3494_v24  ;;  %v2202_v28 = vshll.u32 %v2060_v22, 16  ;;  %v7044_v49 = vpack.c.b16 %v2389_v13, %v2388_v42  ;;  %v1209_v51 = vld [vmem:[#allocation2 + $0x38] sm:$0xf]  ;;  %v5164_v22 = vld [vmem:[#allocation2 + $0x3c] sm:$0xff]  ;;  %v3359_v24 = vld [vmem:[#allocation2 + $0x48] sm:$0xf]  ;;  %3757 = vmatpush.bf16.msra.mxu0 %v7038_v18 }
 0x26f   : > { %v1422_v26 = vsel %vm6454_vm12, %v6476_v57, %v1421_v46  ;;  %v1426_v60 = vor.u32 %v1425_v17, %v1421_v46  ;;  %v2305_v5 = vunpack.c.l.b16 %v2196_v58  ;;  %vm7940_vm9 = vsmask.f32 4352  ;;  %v7067_v13 = vld [vmem:[#allocation11 + $0x1c0] sm:$0xff]  ;;  %1745 = vmatmul.bf16.gmra.mxu1 %v5164_v22 }
 0x270   : > { %v1856_v0 = vsel %vm7940_vm9, %v6947_v29, %v7040_v23  ;;  %vm7941_vm11 = vmmov %vm7940_vm9  ;;  %v1536_v48 = vunpack.c.l.b16 %v1422_v26  ;;  %v1537_v42 = vunpack.c.h.b16 %v1422_v26  ;;  %v2451_v8 = vshll.u32 %v7044_v49, 16  ;;  %3283 = vmatpush.bf16.msrb.mxu3 %v5217_v3 }
 0x271   : > { %v3499_v34 = vsel %vm7941_vm11, %v6949_v31, %v7042_v54  ;;  %v1427_v39 = vrot.slane %v1426_v60, 4  ;;  %v7056_v46 = vrot.slane %v2199_v62, 7  ;;  %v2306_v6 = vunpack.c.h.b16 %v2196_v58  ;;  %1964 = vmatmul.bf16.gmra.mxu2 %v1856_v0  ;;  %v1210_v58 = vld [vmem:[#allocation2 + $0x3c] sm:$0xf] }
 0x272   : > { %3607 = vmatmul.bf16.gmra.mxu0 %v3499_v34  ;;  %vm1540_vm13 = vcmp.ne.s32.totalorder %v1536_v48, %v6417_v15  ;;  %vm1541_vm5 = vcmp.ne.s32.totalorder %v1537_v42, %v6440_v33  ;;  %vm7062_vm6 = vcmp.ne.s32.totalorder %v2305_v5, %v6417_v15  ;;  %v1551_v31 = vunpack.c.h.b16 %v6476_v57  ;;  %v5252_v5 = vld [vmem:[#allocation11 + $0x238] sm:$0xff] }
 0x273   : > { %v7069_v17 = vrot.slane %v2451_v8, 1  ;;  %v1432_v62 = vsel %vm6454_vm12, %v1427_v39, %v6445_v40  ;;  %vm7074_vm9 = vmpackc.low %vm1541_vm5, %vm1540_vm13  ;;  %v2204_v60 = vor.u32 %v2202_v28, %v7056_v46  ;;  %vm2310_vm11 = vcmp.ne.s32.totalorder %v2306_v6, %v6440_v33  ;;  %v5205_v28 = vld [vmem:[#allocation11 + $0x100] sm:$0xff]  ;;  %v3360_v39 = vld [vmem:[#allocation2 + $0x4c] sm:$0xf]  ;;  %3758 = vmatpush.bf16.msra.mxu0 %v7067_v13 }
 0x274   : > { %v1543_v0 = vunpack.c.l.b16 %v1432_v62  ;;  %v1544_v34 = vunpack.c.h.b16 %v1432_v62  ;;  %v1571_v48 = vsel %vm7074_vm9, %v1209_v51, 0  ;;  %v3376_v42 = vsel %vm7074_vm9, %v3359_v24, 0  ;;  %vm7086_vm12 = vmpackc.low %vm2310_vm11, %vm7062_vm6  ;;  %v1995_v6 = vld [vmem:[#allocation2 + $0x40] sm:$0xf]  ;;  %v5216_v24 = vld [vmem:[#allocation11 + $0x158] sm:$0xff]  ;;  %3005 = vmatpush.bf16.msrb.mxu2 %v5205_v28 }
 0x275   : > { %v7946_v40 = vmov 0  ;;  %vm7949_vm13 = vsmask.f32 7424  ;;  %v1782_v8 = vunpack.c.l.b16 %v1571_v48  ;;  %v2205_v51 = vsel %vm6540_vm0, %v6490_v4, %v2204_v60  ;;  %v1211_v62 = vld [vmem:[#allocation2 + $0x40] sm:$0xf]  ;;  %v5197_v48 = vld [vmem:[#allocation11 + $0xc0] sm:$0xff]  ;;  %3284 = vmatpush.bf16.msrb.mxu3 %v5216_v24 }
 0x276   : > { %v7947_v40 = vsel %vm7086_vm12, 4294967295, %v7946_v40  ;;  %v2454_v3 = vsel %vm7949_vm13, %v7014_v43, %v7069_v17  ;;  %vm1547_vm5 = vcmp.ne.s32.totalorder %v1543_v0, %v6417_v15  ;;  %vm1548_vm6 = vcmp.ne.s32.totalorder %v1544_v34, %v6440_v33  ;;  %v3361_v43 = vld [vmem:[#allocation2 + $0x50] sm:$0xf]  ;;  %v5251_v0 = vld [vmem:[#allocation11 + $0x230] sm:$0xff]  ;;  %2828 = vmatpush.bf16.msrb.mxu1 %v5197_v48 }
 0x277   : > { %7948 = vst [vmem:[#allocation43_spill] sm:$0xff] %v7947_v40  ;;  %2560 = vmatmul.bf16.gmra.mxu3 %v2454_v3  ;;  %v2312_v22 = vunpack.c.l.b16 %v2205_v51  ;;  %v2313_v29 = vunpack.c.h.b16 %v2205_v51  ;;  %vm7099_vm11 = vmpackc.low %vm1548_vm6, %vm1547_vm5  ;;  %v3426_v1 = vunpack.c.l.b16 %v3376_v42  ;;  %v2340_v4 = vsel %vm7086_vm12, %v1994_v50, 0  ;;  %4033 = vmatpush.bf16.msrb.mxu0 %v5252_v5  ;;  %v5215_v34 = vld [vmem:[#allocation11 + $0x150] sm:$0xff] }
 0x278   : > { %v7952_v60 = vunpack.c.l.b16 %v6476_v57  ;;  %vm1555_vm13 = vcmp.ne.s32.totalorder %v1551_v31, %v6440_v33  ;;  %v1572_v28 = vsel %vm7099_vm11, %v1210_v58, 0  ;;  %v3377_v3 = vsel %vm7099_vm11, %v3360_v39, 0  ;;  %5410 = vmatpush.bf16.msra.mxu2 %v5252_v5 }
 0x279   : > { %vm2316_vm5 = vcmp.ne.s32.totalorder %v2312_v22, %v6417_v15  ;;  %vm2317_vm6 = vcmp.ne.s32.totalorder %v2313_v29, %v6440_v33  ;;  %v7953_v42 = vmov 0  ;;  %v1783_v57 = vunpack.c.l.b16 %v1572_v28  ;;  %3285 = vmatpush.bf16.msrb.mxu3 %v5215_v34 }
 0x27a   : > { %vm1554_vm0 = vcmp.ne.s32.totalorder %v7952_v60, %v6417_v15  ;;  %v3427_v31 = vunpack.c.l.b16 %v3377_v3  ;;  %vm7119_vm15 = vmpackc.low %vm2317_vm6, %vm2316_vm5  ;;  %v7956_v50 = vmov 0  ;;  %v2390_v58 = vunpack.c.l.b16 %v2340_v4  ;;  %5402 = vmatpush.bf16.msra.mxu1 %v6921_v11  ;;  %v5250_v4 = vld [vmem:[#allocation11 + $0x228] sm:$0xff] }
 0x27b   : > { %vm7115_vm12 = vmpackc.low %vm1555_vm13, %vm1554_vm0  ;;  %v7957_v50 = vsel %vm7119_vm15, 4294967295, %v7956_v50  ;;  %v2341_v51 = vsel %vm7119_vm15, %v1995_v6, 0  ;;  %v2206_v5 = vrot.slane %v7056_v46, 4  ;;  %v1792_v29 = vpack.c.b16 %v1783_v57, %v1782_v8  ;;  %4034 = vmatpush.bf16.msrb.mxu0 %v5251_v0  ;;  %v5214_v3 = vld [vmem:[#allocation11 + $0x148] sm:$0xff] }
 0x27c   : > { %v7954_v42 = vsel %vm7115_vm12, 4294967295, %v7953_v42  ;;  %7958 = vst [vmem:[#allocation45_spill] sm:$0xff] %v7957_v50  ;;  %v1573_v39 = vsel %vm7115_vm12, %v1211_v62, 0  ;;  %v3378_v22 = vsel %vm7115_vm12, %v3361_v43, 0  ;;  %v3436_v48 = vpack.c.b16 %v3427_v31, %v3426_v1  ;;  %5411 = vmatpush.bf16.msra.mxu2 %v5251_v0 }
 0x27d   : > { %7955 = vst [vmem:[#allocation44_spill] sm:$0xff] %v7954_v42  ;;  %v1784_v24 = vunpack.c.l.b16 %v1573_v39  ;;  %v2391_v60 = vunpack.c.l.b16 %v2341_v51  ;;  %v3428_v28 = vunpack.c.l.b16 %v3378_v22  ;;  %v2455_v62 = vshrl.u32 %v7044_v49, 16  ;;  %3286 = vmatpush.bf16.msrb.mxu3 %v5214_v3  ;;  %v5249_v49 = vld [vmem:[#allocation11 + $0x220] sm:$0xff]  ;;  %v2594_v3 = vld [vmem:[#allocation2 + $0x10] sm:$0xf] }
 0x27e   : > { %v2319_v40 = vunpack.c.l.b16 %v2206_v5  ;;  %v1858_v6 = vshrl.u32 %v1792_v29, 16  ;;  %v1861_v39 = vshll.u32 %v1792_v29, 16  ;;  %v3501_v50 = vshrl.u32 %v3436_v48, 16  ;;  %5403 = vmatpush.bf16.msra.mxu1 %v6933_v19  ;;  %v2592_v19 = vld [vmem:[#allocation2 + $0x8] sm:$0x8] }
 0x27f   : > { %v1793_v11 = vpack.c.b16 %v1784_v24, %v1784_v24  ;;  %v3504_v42 = vshll.u32 %v3436_v48, 16  ;;  %v7133_v46 = vpack.c.b16 %v2391_v60, %v2390_v58  ;;  %v3437_v43 = vpack.c.b16 %v3428_v28, %v3428_v28  ;;  %4035 = vmatpush.bf16.msrb.mxu0 %v5250_v4  ;;  %v5213_v24 = vld [vmem:[#allocation11 + $0x140] sm:$0xff]  ;;  %v1996_v28 = vld [vmem:[#allocation2 + $0x44] sm:$0x1] }
 0x280   : > { %v2320_v1 = vunpack.c.h.b16 %v2206_v5  ;;  %v1860_v57 = vrot.slane %v1858_v6, 3  ;;  %v1863_v34 = vrot.slane %v1861_v39, 4  ;;  %v3503_v31 = vrot.slane %v3501_v50, 3  ;;  %5412 = vmatpush.bf16.msra.mxu2 %v5250_v4  ;;  %v2593_v50 = vld [vmem:[#allocation2 + $0xc] sm:$0xf] }
 0x281   : > { %v1867_v8 = vshrl.u32 %v1793_v11, 16  ;;  %v3506_v51 = vrot.slane %v3504_v42, 4  ;;  %v2457_v0 = vor.u32 %v2455_v62, %v7069_v17  ;;  %v2459_v22 = vshll.u32 %v7133_v46, 16  ;;  %v7142_v42 = vpop.f32.mrf.mxu1  ;;  %3287 = vmatpush.bf16.msrb.mxu3 %v5213_v24 }
 0x282   : > { %v1870_v29 = vshll.u32 %v1793_v11, 16  ;;  %v3510_v48 = vshrl.u32 %v3437_v43, 16  ;;  %v7137_v58 = vor.u32 %v1863_v34, %v1860_v57  ;;  %v3513_v5 = vshll.u32 %v3437_v43, 16  ;;  %5404 = vmatpush.bf16.msra.mxu1 %v6943_v20  ;;  %v2595_v20 = vld [vmem:[#allocation2 + $0x14] sm:$0xf] }
 0x283   : > { %v7139_v60 = vor.u32 %v3506_v51, %v3503_v31  ;;  %vm2323_vm0 = vcmp.ne.s32.totalorder %v2319_v40, %v6417_v15  ;;  %v2461_v17 = vrot.slane %v2459_v22, 1  ;;  %vm2324_vm13 = vcmp.ne.s32.totalorder %v2320_v1, %v6440_v33  ;;  %4036 = vmatpush.bf16.msrb.mxu0 %v5249_v49  ;;  %v5248_v40 = vld [vmem:[#allocation11 + $0x218] sm:$0xff]  ;;  %v5247_v22 = vld [vmem:[#allocation11 + $0x210] sm:$0xff] }
 0x284   : > { %vm7959_vm5 = vsmask.f32 4352  ;;  %v7152_v11 = vrot.slane %v1867_v8, 3  ;;  %vm7154_vm15 = vmpackc.low %vm2324_vm13, %vm2323_vm0  ;;  %v2609_v33 = vsel %vm6484_vm1, %v2592_v19, 0  ;;  %v7161_v6 = vrot.slane %v1870_v29, 4  ;;  %5413 = vmatpush.bf16.msra.mxu2 %v5249_v49 }
 0x285   : > { %v1865_v4 = vsel %vm7959_vm5, %v7040_v23, %v7137_v58  ;;  %vm7960_vm6 = vmmov %vm7959_vm5  ;;  %vm7963_vm5 = vsmask.f32 7424  ;;  %v2610_v39 = vsel %vm6502_vm4, %v2593_v50, 0  ;;  %v7167_v8 = vrot.slane %v3510_v48, 3  ;;  %v3065_v19 = vld [vmem:[#allocation2 + $0x14] sm:$0xf] }
 0x286   : > { %v3508_v62 = vsel %vm7960_vm6, %v7042_v54, %v7139_v60  ;;  %1969 = vmatmul.bf16.gmra.mxu2 %v1865_v4  ;;  %v2462_v23 = vsel %vm7963_vm5, %v2457_v0, %v2461_v17  ;;  %v2342_v54 = vsel %vm7154_vm15, %v1996_v28, 0  ;;  %v7169_v43 = vrot.slane %v3513_v5, 4  ;;  %5405 = vmatpush.bf16.msra.mxu1 %v6979_v56  ;;  %v3063_v0 = vld [vmem:[#allocation2 + $0xc] sm:$0xf]  ;;  %v3066_v5 = vld [vmem:[#allocation2 + $0x18] sm:$0xf] }
 0x287   : > { %3612 = vmatmul.bf16.gmra.mxu0 %v3508_v62  ;;  %v2392_v2 = vunpack.c.l.b16 %v2342_v54  ;;  %v2611_v1 = vsel %vm6510_vm7, %v2594_v3, 0  ;;  %2565 = vmatmul.bf16.gmra.mxu3 %v2462_v23  ;;  %v2612_v57 = vsel %vm6520_vm10, %v2595_v20, 0  ;;  %v2659_v34 = vunpack.c.l.b16 %v2609_v33  ;;  %v2596_v28 = vld [vmem:[#allocation2 + $0x18] sm:$0xf]  ;;  %v2597_v62 = vld [vmem:[#allocation2 + $0x1c] sm:$0xf] }
 0x288   : > { %v2660_v31 = vunpack.c.l.b16 %v2610_v39  ;;  %v2661_v51 = vunpack.c.l.b16 %v2611_v1  ;;  %v2662_v24 = vunpack.c.l.b16 %v2612_v57  ;;  %4037 = vmatpush.bf16.msrb.mxu0 %v5248_v40  ;;  %v2463_v29 = vshrl.u32 %v7133_v46, 16  ;;  %5414 = vmatpush.bf16.msra.mxu2 %v5248_v40 }
 0x289   : > { %v2401_v30 = vpack.c.b16 %v2392_v2, %v2392_v2  ;;  %v1873_v49 = vor.u32 %v7161_v6, %v7152_v11  ;;  %v7179_v41 = vpop.f32.mrf.mxu1  ;;  %v3516_v50 = vor.u32 %v7169_v43, %v7167_v8  ;;  %vm7964_vm1 = vnez %v7861_v59  ;;  %v5246_v6 = vld [vmem:[#allocation11 + $0x208] sm:$0xff] }
 0x28a   : > { %v2676_v48 = vpack.c.b16 %v2660_v31, %v2659_v34  ;;  %v2677_v56 = vpack.c.b16 %v2662_v24, %v2661_v51  ;;  %5406 = vmatpush.bf16.msra.mxu1 %v7007_v10  ;;  %v3080_v46 = vsel %vm7964_vm1, %v3063_v0, 0  ;;  %v3081_v23 = vsel %vm6581_vm8, %v3064_v37, 0  ;;  %v3818_v51 = vld [vmem:[#allocation2 + $0x1c] sm:$0xf]  ;;  %v1940_v0 = vpop.f32.mrf.mxu2 }
 0x28b   : > { %v2467_v20 = vshll.u32 %v2401_v30, 16  ;;  %v2465_v40 = vor.u32 %v2463_v29, %v2461_v17  ;;  %v2613_v39 = vsel %vm6629_vm2, %v2596_v28, 0  ;;  %vm7965_vm4 = vnez %v7865_v9  ;;  %v5245_v29 = vld [vmem:[#allocation11 + $0x200] sm:$0xff]  ;;  %vm7968_vm2 = vmmov %vm7960_vm6 }
 0x28c   : > { %v2686_v3 = vshrl.u32 %v2676_v48, 16  ;;  %v2689_v4 = vshll.u32 %v2676_v48, 16  ;;  %v2694_v11 = vshrl.u32 %v2677_v56, 16  ;;  %v2697_v33 = vshll.u32 %v2677_v56, 16  ;;  %4038 = vmatpush.bf16.msrb.mxu0 %v5247_v22  ;;  %5415 = vmatpush.bf16.msra.mxu2 %v5247_v22  ;;  %vm7969_vm0 = vmmov %vm7968_vm2 }
 0x28d   : > { %v3082_v2 = vsel %vm7965_vm4, %v3065_v19, 0  ;;  %vm7966_vm7 = vnez %v7867_v12  ;;  %v3130_v34 = vunpack.c.l.b16 %v3080_v46  ;;  %v3131_v31 = vunpack.c.l.b16 %v3081_v23  ;;  %vm7970_vm13 = vmmov %vm7969_vm0  ;;  %v3816_v23 = vld [vmem:[#allocation2 + $0x14] sm:$0xf] }
 0x28e   : > { %v2688_v54 = vrot.slane %v2686_v3, 3  ;;  %v2691_v10 = vrot.slane %v2689_v4, 4  ;;  %v2696_v8 = vrot.slane %v2694_v11, 3  ;;  %v2699_v43 = vrot.slane %v2697_v33, 4  ;;  %5407 = vmatpush.bf16.msra.mxu1 %v7024_v27  ;;  %vm7971_vm6 = vmmov %vm7963_vm5  ;;  %v7214_v4 = vpop.f32.mrf.mxu0  ;;  %v2599_v11 = vld [vmem:[#allocation2 + $0x24] sm:$0xf] }
 0x28f   : > { %v3083_v1 = vsel %vm7966_vm7, %v3066_v5, 0  ;;  %vm7967_vm10 = vnez %v7873_v16  ;;  %v2469_v30 = vrot.slane %v2467_v20, 1  ;;  %v2663_v48 = vunpack.c.l.b16 %v2613_v39  ;;  %v2598_v20 = vld [vmem:[#allocation2 + $0x20] sm:$0xf] }
 0x290   : > { %v2692_v57 = vor.u32 %v2691_v10, %v2688_v54  ;;  %v2614_v17 = vsel %vm7967_vm10, %v2597_v62, 0  ;;  %v7197_v24 = vor.u32 %v2699_v43, %v2696_v8  ;;  %4039 = vmatpush.bf16.msrb.mxu0 %v5246_v6  ;;  %v1874_v22 = vsel %vm7968_vm2, %v7137_v58, %v1873_v49  ;;  %5416 = vmatpush.bf16.msra.mxu2 %v5246_v6  ;;  %v3817_v54 = vld [vmem:[#allocation2 + $0x18] sm:$0xf]  ;;  %vm7977_vm10 = vmmov %vm7971_vm6 }
 0x291   : > { %v2664_v37 = vunpack.c.l.b16 %v2614_v17  ;;  %v3517_v27 = vsel %vm7969_vm0, %v7139_v60, %v3516_v50  ;;  %v1941_v56 = vadd.f32 %v1940_v0, %v7142_v42  ;;  %v7206_v19 = vpop.f32.mrf.mxu1  ;;  %v3835_v28 = vsel %vm7965_vm4, %v3818_v51, 0  ;;  %v3068_v0 = vld [vmem:[#allocation2 + $0x20] sm:$0xf] }
 0x292   : > { %v2701_v16 = vsel %vm7970_vm13, %v2692_v57, %v7197_v24  ;;  %v3836_v3 = vsel %vm7966_vm7, %v3819_v61, 0  ;;  %5408 = vmatpush.bf16.msra.mxu1 %v7038_v18  ;;  %v3132_v58 = vunpack.c.l.b16 %v3082_v2  ;;  %v3133_v60 = vunpack.c.l.b16 %v3083_v1 }
 0x293   : > { %v2678_v5 = vpack.c.b16 %v2664_v37, %v2663_v48  ;;  %2829 = vmatmul.bf16.vlgmr.msrb.gmra.mxu1 %v2701_v16  ;;  %v3147_v49 = vpack.c.b16 %v3131_v31, %v3130_v34  ;;  %v3885_v42 = vunpack.c.l.b16 %v3835_v28  ;;  %v2470_v50 = vsel %vm7971_vm6, %v2465_v40, %v2469_v30 }
 0x294   : > { %4040 = vmatpush.bf16.msrb.mxu0 %v5245_v29  ;;  %v3886_v9 = vunpack.c.l.b16 %v3836_v3  ;;  %5417 = vmatpush.bf16.msra.mxu2 %v5245_v29  ;;  %v7217_v18 = vpack.c.b16 %v3133_v60, %v3132_v58  ;;  %vm7972_vm5 = vnez %v7882_v55  ;;  %vm7973_vm4 = vnez %v7886_v25  ;;  %v3067_v25 = vld [vmem:[#allocation2 + $0x1c] sm:$0xf]  ;;  %v5189_v58 = vld [vmem:[#allocation2 + $0xc] sm:$0xff]  ;;  %v5221_v60 = vld [vmem:[#allocation2 + $0x14] sm:$0xff] }
 0x295   : > { %v2703_v46 = vshrl.u32 %v2678_v5, 16  ;;  %v2706_v62 = vshll.u32 %v2678_v5, 16  ;;  %v3159_v33 = vshll.u32 %v3147_v49, 16  ;;  %v2615_v8 = vsel %vm7972_vm5, %v2598_v20, 0  ;;  %v2536_v16 = vpop.f32.mrf.mxu3  ;;  %v2600_v20 = vld [vmem:[#allocation2 + $0x28] sm:$0xf]  ;;  %vm7981_vm5 = vmmov %vm7971_vm6 }
 0x296   : > { %1974 = vmatmul.bf16.gmra.mxu2 %v1874_v22  ;;  %v3901_v12 = vpack.c.b16 %v3886_v9, %v3885_v42  ;;  %5409 = vmatpush.bf16.msra.mxu1 %v7067_v13  ;;  %v2616_v43 = vsel %vm7973_vm4, %v2599_v11, 0  ;;  %v3157_v2 = vshrl.u32 %v3147_v49, 16  ;;  %v3164_v34 = vshll.u32 %v7217_v18, 16  ;;  %v7235_v29 = vpop.f32.mrf.mxu0  ;;  %v2601_v11 = vld [vmem:[#allocation2 + $0x2c] sm:$0xf] }
 0x297   : > { %3617 = vmatmul.bf16.gmra.mxu0 %v3517_v27  ;;  %2570 = vmatmul.bf16.gmra.mxu3 %v2470_v50  ;;  %v2705_v6 = vrot.slane %v2703_v46, 3  ;;  %v2708_v40 = vrot.slane %v2706_v62, 4  ;;  %v3161_v57 = vrot.slane %v3159_v33, 1  ;;  %v3833_v31 = vsel %vm7964_vm1, %v3816_v23, 0  ;;  %v7247_v50 = vpop.f32.mrf.mxu2 }
 0x298   : > { %v3917_v10 = vshll.u32 %v3901_v12, 16  ;;  %v3921_v39 = vshrl.u32 %v3901_v12, 16  ;;  %v3834_v17 = vsel %vm6581_vm8, %v3817_v54, 0  ;;  %v2665_v61 = vunpack.c.l.b16 %v2615_v8  ;;  %vm7975_vm8 = vmmov %vm7969_vm0 }
 0x299   : > { %v7225_v13 = vpop.f32.mrf.mxu1  ;;  %v2709_v51 = vor.u32 %v2708_v40, %v2705_v6  ;;  %v2666_v30 = vunpack.c.l.b16 %v2616_v43  ;;  %v3883_v48 = vunpack.c.l.b16 %v3833_v31  ;;  %v3884_v37 = vunpack.c.l.b16 %v3834_v17  ;;  %v3069_v17 = vld [vmem:[#allocation2 + $0x24] sm:$0xf] }
 0x29a   : > { %v7223_v1 = vrot.slane %v3917_v10, 1  ;;  %v3162_v22 = vor.u32 %v3161_v57, %v3157_v2  ;;  %v3166_v27 = vrot.slane %v3164_v34, 1  ;;  %vm7974_vm1 = vnez %v7871_v7 }
 0x29b   : > { %v3084_v59 = vsel %vm7974_vm1, %v3067_v25, 0  ;;  %v7239_v63 = vadd.f32 %v2536_v16, %v1941_v56  ;;  %v2710_v5 = vsel %vm7975_vm8, %v7197_v24, %v2709_v51  ;;  %vm7976_vm7 = vnez %v7875_v21  ;;  %v5256_v21 = vld [vmem:[#allocation12 + $0x18] sm:$0xff] }
 0x29c   : > { %v7233_v55 = vor.u32 %v3921_v39, %v7223_v1  ;;  %v3085_v28 = vsel %vm7976_vm7, %v3068_v0, 0  ;;  %v2679_v3 = vpack.c.b16 %v2666_v30, %v2665_v61  ;;  %v3900_v49 = vpack.c.b16 %v3884_v37, %v3883_v48  ;;  %v3070_v0 = vld [vmem:[#allocation2 + $0x28] sm:$0xf] }
 0x29d   : > { %v3134_v46 = vunpack.c.l.b16 %v3084_v59  ;;  %v3135_v62 = vunpack.c.l.b16 %v3085_v28  ;;  %v3167_v56 = vsel %vm7977_vm10, %v3162_v22, %v3166_v27  ;;  %v7250_v33 = vpop.f32.mrf.mxu3  ;;  %v2617_v10 = vsel %vm6796_vm14, %v2600_v20, 0  ;;  %vm7984_vm10 = vmmov %vm7969_vm0 }
 0x29e   : > { %v2712_v9 = vshrl.u32 %v2679_v3, 16  ;;  %v2715_v12 = vshll.u32 %v2679_v3, 16  ;;  %v3912_v24 = vshll.u32 %v3900_v49, 16  ;;  %vm7978_vm2 = vnez %v7901_v44  ;;  %v5190_v3 = vld [vmem:[#allocation2 + $0x14] sm:$0xff] }
 0x29f   : > { %v3149_v23 = vpack.c.b16 %v3135_v62, %v3134_v46  ;;  %v7252_v6 = vpop.f32.mrf.mxu0  ;;  %v2618_v39 = vsel %vm7978_vm2, %v2601_v11, 0  ;;  %v3910_v8 = vshrl.u32 %v3900_v49, 16  ;;  %v3168_v57 = vshrl.u32 %v7217_v18, 16 }
 0x2a0   : > { %v2714_v40 = vrot.slane %v2712_v9, 3  ;;  %v2717_v54 = vrot.slane %v2715_v12, 4  ;;  %v3914_v43 = vrot.slane %v3912_v24, 1  ;;  %v2667_v25 = vunpack.c.l.b16 %v2617_v10  ;;  %v2602_v12 = vld [vmem:[#allocation2 + $0x30] sm:$0xf] }
 0x2a1   : > { %v7245_v42 = vpop.f32.mrf.mxu1  ;;  %v3172_v34 = vshll.u32 %v3149_v23, 16  ;;  %v2668_v61 = vunpack.c.l.b16 %v2618_v39  ;;  %v3170_v37 = vor.u32 %v3168_v57, %v3166_v27  ;;  %vm7979_vm14 = vnez %v7880_v52  ;;  %v2603_v24 = vld [vmem:[#allocation2 + $0x34] sm:$0xf] }
 0x2a2   : > { %v2718_v31 = vor.u32 %v2717_v54, %v2714_v40  ;;  %v3915_v48 = vor.u32 %v3914_v43, %v3910_v8  ;;  %v3086_v16 = vsel %vm7979_vm14, %v3069_v17, 0  ;;  %vm7980_vm13 = vnez %v7888_v38 }
 0x2a3   : > { %2834 = vmatmul.bf16.gmra.mxu1 %v2710_v5  ;;  %v3174_v22 = vrot.slane %v3172_v34, 1  ;;  %v3087_v5 = vsel %vm7980_vm13, %v3070_v0, 0  ;;  %v2680_v28 = vpack.c.b16 %v2668_v61, %v2667_v25  ;;  %v3136_v27 = vunpack.c.l.b16 %v3086_v16  ;;  %v3071_v61 = vld [vmem:[#allocation2 + $0x2c] sm:$0xf] }
 0x2a4   : > { %v1945_v30 = vpop.f32.mrf.mxu2  ;;  %v2719_v18 = vsel %vm7969_vm0, %v2709_v51, %v2718_v31  ;;  %v3137_v49 = vunpack.c.l.b16 %v3087_v5  ;;  %vm7982_vm4 = vnez %v7913_v14  ;;  %vm7983_vm8 = vnez %v7920_v32 }
 0x2a5   : > { %v1946_v53 = vadd.f32 %v1945_v30, %v7206_v19  ;;  %v2541_v44 = vpop.f32.mrf.mxu3  ;;  %v3175_v46 = vsel %vm7981_vm5, %v3170_v37, %v3174_v22  ;;  %v2721_v62 = vshrl.u32 %v2680_v28, 16  ;;  %v2619_v10 = vsel %vm7982_vm4, %v2602_v12, 0  ;;  %v3072_v30 = vld [vmem:[#allocation2 + $0x30] sm:$0xf] }
 0x2a6   : > { %3006 = vmatmul.bf16.vlgmr.msrb.gmra.mxu2 %v5189_v58  ;;  %v3920_v58 = vsel %vm7971_vm6, %v3915_v48, %v7223_v1  ;;  %v3150_v20 = vpack.c.b16 %v3137_v49, %v3136_v27  ;;  %v2620_v39 = vsel %vm7983_vm8, %v2603_v24, 0  ;;  %v3176_v43 = vshrl.u32 %v3149_v23, 16  ;;  %v5191_v23 = vld [vmem:[#allocation2 + $0x1c] sm:$0xff]  ;;  %vm7987_vm6 = vmmov %vm7981_vm5  ;;  %v7988_v12 = vld [vmem:[#allocation41_spill] sm:$0xff] }
 0x2a7   : > { %3759 = vmatmul.bf16.vlgmr.msra.gmra.mxu0 %v5221_v60  ;;  %3288 = vmatmul.bf16.vlgmr.msrb.gmra.mxu3 %v3167_v56  ;;  %v7264_v59 = vadd.f32 %v2541_v44, %v1946_v53  ;;  %v7271_v60 = vpop.f32.mrf.mxu0  ;;  %v2724_v56 = vshll.u32 %v2680_v28, 16  ;;  %v2723_v40 = vrot.slane %v2721_v62, 3  ;;  %v2669_v17 = vunpack.c.l.b16 %v2619_v10  ;;  %v2605_v62 = vld [vmem:[#allocation2 + $0x3c] sm:$0xf] }
 0x2a8   : > { %v3180_v57 = vshll.u32 %v3150_v20, 16  ;;  %v2670_v25 = vunpack.c.l.b16 %v2620_v39  ;;  %v3178_v0 = vor.u32 %v3176_v43, %v3174_v22  ;;  %vm7985_vm2 = vnez %v7894_v47 }
 0x2a9   : > { %v7258_v2 = vpop.f32.mrf.mxu1  ;;  %v2726_v54 = vrot.slane %v2724_v56, 4  ;;  %v3088_v14 = vsel %vm7985_vm2, %v3071_v61, 0  ;;  %vm7986_vm0 = vnez %v7905_v45  ;;  %vm7989_vm5 = vnez %v7988_v12  ;;  %v7429_v45 = vld [vmem:[%s8022_s12] ss:$0 sm:$0xff]  ;;  %s4429_s12 = sshll.u32 %s4426_s1, 4  ;;  %s4430_s12 = int_to_ptr.hbm [resolvable:$true] %s4429_s12 }
 0x2aa   : > { %v3182_v48 = vrot.slane %v3180_v57, 1  ;;  %v3089_v32 = vsel %vm7986_vm0, %v3072_v30, 0  ;;  %v2681_v37 = vpack.c.b16 %v2670_v25, %v2669_v17  ;;  %v3138_v28 = vunpack.c.l.b16 %v3088_v14  ;;  %s5801_s18 = sshra.s32 %s4430_s12, 4  ;;  %s5802_s18 = int_to_ptr.hbm [resolvable:$true] %s5801_s18 }
 0x2ab   : > { %v2727_v34 = vor.u32 %v2726_v54, %v2723_v40  ;;  %v3139_v22 = vunpack.c.l.b16 %v3089_v32  ;;  %v2622_v24 = vsel %vm7989_vm5, %v2605_v62, 0  ;;  %v3184_v39 = vshrl.u32 %v3150_v20, 16  ;;  %p5808_p0 = scmp.lt.s32.totalorder %s5802_s18, %s8043_s3 }
 0x2ac   : > { %v1947_v51 = vpop.f32.mrf.mxu2  ;;  %v2733_v27 = vshll.u32 %v2681_v37, 16  ;;  %v2672_v61 = vunpack.c.l.b16 %v2622_v24 }
 0x2ad   : > { %v1948_v9 = vadd.f32 %v1947_v51, %v7225_v13  ;;  %v2543_v1 = vpop.f32.mrf.mxu3  ;;  %v2728_v53 = vsel %vm7984_vm10, %v2718_v31, %v2727_v34  ;;  %v3151_v56 = vpack.c.b16 %v3139_v22, %v3138_v28 }
 0x2af   : > { %v7277_v11 = vadd.f32 %v2543_v1, %v1948_v9  ;;  %v2735_v9 = vrot.slane %v2733_v27, 4  ;;  %v3188_v43 = vshll.u32 %v3151_v56, 16 }
 0x2b1   : > { %v7273_v19 = vpop.f32.mrf.mxu1  ;;  %v3190_v14 = vrot.slane %v3188_v43, 1  ;;  %v3192_v43 = vshrl.u32 %v3151_v56, 16  ;;  %v8001_v56 = vld [vmem:[#allocation42_spill] sm:$0xff] }
 0x2b3   : > { %2839 = vmatmul.bf16.gmra.mxu1 %v2719_v18  ;;  %v3194_v26 = vor.u32 %v3192_v43, %v3190_v14 }
 0x2b6   : > { %3011 = vmatmul.bf16.gmra.mxu2 %v5190_v3  ;;  %v3183_v3 = vsel %vm7987_vm6, %v3178_v0, %v3182_v48  ;;  %v3074_v0 = vld [vmem:[#allocation2 + $0x38] sm:$0xf] }
 0x2b7   : > { %4041 = vmatmul.bf16.vlgmr.msrb.gmra.mxu0 %v3920_v58  ;;  %3293 = vmatmul.bf16.gmra.mxu3 %v3175_v46  ;;  %v7285_v13 = vpop.f32.mrf.mxu0  ;;  %v2730_v58 = vshrl.u32 %v2681_v37, 16  ;;  %v2604_v46 = vld [vmem:[#allocation2 + $0x38] sm:$0xf] }
 0x2b8   : > { %v7991_v37 = vld [vmem:[#allocation38_spill] sm:$0xff] }
 0x2b9   : > { %v7283_v8 = vpop.f32.mrf.mxu1  ;;  %v2732_v51 = vrot.slane %v2730_v58, 3  ;;  %vm7992_vm4 = vnez %v7991_v37 }
 0x2bb   : > { %v2736_v17 = vor.u32 %v2735_v9, %v2732_v51  ;;  %v2606_v9 = vld [vmem:[#allocation2 + $0x40] sm:$0xf] }
 0x2bc   : > { %v1950_v44 = vpop.f32.mrf.mxu2 }
 0x2bd   : > { %v1951_v18 = vadd.f32 %v1950_v44, %v7245_v42  ;;  %v2546_v5 = vpop.f32.mrf.mxu3  ;;  %v2621_v42 = vsel %vm6967_vm3, %v2604_v46, 0  ;;  %vm7990_vm3 = vmmov %vm7984_vm10 }
 0x2be   : > { %v2671_v25 = vunpack.c.l.b16 %v2621_v42  ;;  %v2737_v32 = vsel %vm7990_vm3, %v2727_v34, %v2736_v17  ;;  %vm7995_vm10 = vmmov %vm7987_vm6  ;;  %v2607_v42 = vld [vmem:[#allocation2 + $0x44] sm:$0xf]  ;;  %vm8002_vm6 = vnez %v8001_v56 }
 0x2bf   : > { %v7296_v31 = vpop.f32.mrf.mxu0  ;;  %v7298_v49 = vadd.f32 %v2546_v5, %v1951_v18  ;;  %v5192_v18 = vld [vmem:[#allocation2 + $0x24] sm:$0xff]  ;;  %vm8003_vm5 = vmmov %vm7995_vm10 }
 0x2c0   : > { %v2682_v44 = vpack.c.b16 %v2672_v61, %v2671_v25 }
 0x2c1   : > { %v7292_v16 = vpop.f32.mrf.mxu1 }
 0x2c2   : > { %v2739_v34 = vshrl.u32 %v2682_v44, 16  ;;  %v2742_v46 = vshll.u32 %v2682_v44, 16 }
 0x2c3   : > { %2844 = vmatmul.bf16.gmra.mxu1 %v2728_v53  ;;  %v3186_v53 = vor.u32 %v3184_v39, %v3182_v48 }
 0x2c4   : > { %v1952_v1 = vpop.f32.mrf.mxu2  ;;  %v2744_v24 = vrot.slane %v2742_v46, 4 }
 0x2c5   : > { %v1953_v54 = vadd.f32 %v1952_v1, %v7258_v2  ;;  %v2548_v10 = vpop.f32.mrf.mxu3  ;;  %v7993_v2 = vld [vmem:[#allocation39_spill] sm:$0xff]  ;;  %v3191_v58 = vsel %vm7995_vm10, %v3186_v53, %v3190_v14  ;;  %v2623_v1 = vsel %vm7074_vm9, %v2606_v9, 0  ;;  %vm7998_vm9 = vmmov %vm7990_vm3 }
 0x2c6   : > { %3016 = vmatmul.bf16.gmra.mxu2 %v5191_v23  ;;  %v3090_v23 = vsel %vm7992_vm4, %v3073_v36, 0  ;;  %vm7994_vm8 = vnez %v7993_v2 }
 0x2c7   : > { %3298 = vmatmul.bf16.gmra.mxu3 %v3183_v3  ;;  %v7307_v57 = vpop.f32.mrf.mxu0  ;;  %v7309_v30 = vadd.f32 %v2548_v10, %v1953_v54  ;;  %v3091_v20 = vsel %vm7994_vm8, %v3074_v0, 0  ;;  %v3140_v22 = vunpack.c.l.b16 %v3090_v23  ;;  %v2624_v54 = vsel %vm7099_vm11, %v2607_v42, 0  ;;  %v3075_v23 = vld [vmem:[#allocation2 + $0x3c] sm:$0xf] }
 0x2c8   : > { %v3141_v3 = vunpack.c.l.b16 %v3091_v20  ;;  %v2673_v0 = vunpack.c.l.b16 %v2623_v1  ;;  %v2674_v53 = vunpack.c.l.b16 %v2624_v54  ;;  %v3076_v20 = vld [vmem:[#allocation2 + $0x40] sm:$0xf] }
 0x2c9   : > { %v7304_v40 = vpop.f32.mrf.mxu1 }
 0x2ca   : > { %v3152_v12 = vpack.c.b16 %v3141_v3, %v3140_v22  ;;  %v3093_v22 = vsel %vm8002_vm6, %v3076_v20, 0  ;;  %v2683_v3 = vpack.c.b16 %v2674_v53, %v2673_v0 }
 0x2cc   : > { %v1955_v5 = vpop.f32.mrf.mxu2  ;;  %v3196_v25 = vshll.u32 %v3152_v12, 16  ;;  %v2748_v9 = vshrl.u32 %v2683_v3, 16  ;;  %v2751_v14 = vshll.u32 %v2683_v3, 16  ;;  %v3200_v53 = vshrl.u32 %v3152_v12, 16 }
 0x2cd   : > { %v1956_v28 = vadd.f32 %v1955_v5, %v7273_v19  ;;  %v2741_v19 = vrot.slane %v2739_v34, 3  ;;  %v3143_v34 = vunpack.c.l.b16 %v3093_v22 }
 0x2ce   : > { %v2753_v43 = vrot.slane %v2751_v14, 4  ;;  %v8007_v14 = vld [vmem:[#allocation43_spill] sm:$0xff] }
 0x2cf   : > { %v2551_v48 = vpop.f32.mrf.mxu3  ;;  %v7322_v51 = vpop.f32.mrf.mxu0  ;;  %v2745_v36 = vor.u32 %v2744_v24, %v2741_v19  ;;  %v2608_v24 = vld [vmem:[#allocation2 + $0x48] sm:$0xf] }
 0x2d0   : > { %v7320_v62 = vadd.f32 %v2551_v48, %v1956_v28  ;;  %7996 = vst [vmem:[#allocation41_spill] sm:$0xff] %v7322_v51  ;;  %v7999_v28 = vld [vmem:[#allocation40_spill] sm:$0xff]  ;;  %v2625_v0 = vsel %vm7115_vm12, %v2608_v24, 0  ;;  %vm8008_vm12 = vnez %v8007_v14  ;;  %v3824_v51 = vld [vmem:[#allocation2 + $0x34] sm:$0xf] }
 0x2d1   : > { %v7318_v27 = vpop.f32.mrf.mxu1  ;;  %v2746_v35 = vsel %vm7998_vm9, %v2736_v17, %v2745_v36  ;;  %vm8000_vm11 = vnez %v7999_v28  ;;  %vm8011_vm9 = vmmov %vm8003_vm5 }
 0x2d3   : > { %2849 = vmatmul.bf16.gmra.mxu1 %v2737_v32 }
 0x2d4   : > { %v1957_v10 = vpop.f32.mrf.mxu2 }
 0x2d5   : > { %v1958_v39 = vadd.f32 %v1957_v10, %v7283_v8  ;;  %v3092_v8 = vsel %vm8000_vm11, %v3075_v23, 0 }
 0x2d6   : > { %3021 = vmatmul.bf16.gmra.mxu2 %v5192_v18  ;;  %v3198_v18 = vrot.slane %v3196_v25, 1  ;;  %v3142_v48 = vunpack.c.l.b16 %v3092_v8  ;;  %v3077_v8 = vld [vmem:[#allocation2 + $0x44] sm:$0xf] }
 0x2d7   : > { %3303 = vmatmul.bf16.gmra.mxu3 %v3191_v58  ;;  %v2553_v61 = vpop.f32.mrf.mxu3  ;;  %v5193_v58 = vld [vmem:[#allocation2 + $0x2c] sm:$0xff]  ;;  %v3094_v12 = vsel %vm8008_vm12, %v3077_v8, 0 }
 0x2d8   : > { %v7329_v32 = vadd.f32 %v2553_v61, %v1958_v39  ;;  %v3199_v46 = vsel %vm8003_vm5, %v3194_v26, %v3198_v18  ;;  %v3153_v1 = vpack.c.b16 %v3143_v34, %v3142_v48  ;;  %v2750_v39 = vrot.slane %v2748_v9, 3  ;;  %v5194_v9 = vld [vmem:[#allocation2 + $0x34] sm:$0xff]  ;;  %vm8013_vm5 = vmmov %vm7990_vm3 }
 0x2d9   : > { %v7331_v44 = vpop.f32.mrf.mxu1  ;;  %v2675_v26 = vunpack.c.l.b16 %v2625_v0  ;;  %v3202_v22 = vor.u32 %v3200_v53, %v3198_v18  ;;  %v3144_v18 = vunpack.c.l.b16 %v3094_v12 }
 0x2da   : > { %v3204_v23 = vshll.u32 %v3153_v1, 16  ;;  %v2754_v20 = vor.u32 %v2753_v43, %v2750_v39 }
 0x2dc   : > { %v3206_v3 = vrot.slane %v3204_v23, 1  ;;  %v2755_v34 = vsel %vm7990_vm3, %v2745_v36, %v2754_v20  ;;  %vm8015_vm3 = vmmov %vm8011_vm9 }
 0x2df   : > { %v7333_v5 = vpop.f32.mrf.mxu0 }
 0x2e0   : > { %7997 = vst [vmem:[#allocation38_spill] sm:$0xff] %v7333_v5 }
 0x2e1   : > { %v2556_v19 = vpop.f32.mrf.mxu3  ;;  %v7344_v10 = vpop.f32.mrf.mxu1 }
 0x2e3   : > { %2854 = vmatmul.bf16.gmra.mxu1 %v2746_v35 }
 0x2e4   : > { %v1960_v42 = vpop.f32.mrf.mxu2 }
 0x2e5   : > { %v1961_v17 = vadd.f32 %v1960_v42, %v7292_v16  ;;  %v3078_v16 = vld [vmem:[#allocation2 + $0x48] sm:$0xf]  ;;  %v8009_v42 = vld [vmem:[#allocation45_spill] sm:$0xff] }
 0x2e6   : > { %3026 = vmatmul.bf16.gmra.mxu2 %v5193_v58  ;;  %vm8010_vm10 = vnez %v8009_v42 }
 0x2e7   : > { %3308 = vmatmul.bf16.gmra.mxu3 %v3199_v46  ;;  %v7342_v54 = vpop.f32.mrf.mxu0  ;;  %v7346_v25 = vadd.f32 %v2556_v19, %v1961_v17  ;;  %v2684_v46 = vpack.c.b16 %v2675_v26, %v2675_v26  ;;  %v3095_v19 = vsel %vm8010_vm10, %v3078_v16, 0  ;;  %v3207_v17 = vsel %vm8011_vm9, %v3202_v22, %v3206_v3 }
 0x2e8   : > { %8004 = vst [vmem:[#allocation39_spill] sm:$0xff] %v7342_v54  ;;  %v3145_v39 = vunpack.c.l.b16 %v3095_v19  ;;  %v3208_v54 = vshrl.u32 %v3153_v1, 16 }
 0x2e9   : > { %v7352_v58 = vpop.f32.mrf.mxu3  ;;  %v7361_v24 = vpop.f32.mrf.mxu1  ;;  %v2757_v43 = vshrl.u32 %v2684_v46, 16  ;;  %v2760_v61 = vshll.u32 %v2684_v46, 16  ;;  %v3079_v46 = vld [vmem:[#allocation2 + $0x4c] sm:$0x1] }
 0x2ea   : > { %v3154_v23 = vpack.c.b16 %v3145_v39, %v3144_v18  ;;  %v3096_v18 = vsel %vm7154_vm15, %v3079_v46, 0  ;;  %v3821_v46 = vld [vmem:[#allocation2 + $0x28] sm:$0xf] }
 0x2eb   : > { %v2759_v26 = vrot.slane %v2757_v43, 3  ;;  %v2762_v8 = vrot.slane %v2760_v61, 4  ;;  %v3146_v61 = vunpack.c.l.b16 %v3096_v18 }
 0x2ec   : > { %v7350_v35 = vpop.f32.mrf.mxu2  ;;  %v3212_v22 = vshll.u32 %v3154_v23, 16 }
 0x2ed   : > { %v2763_v12 = vor.u32 %v2762_v8, %v2759_v26 }
 0x2ee   : > { %v3214_v5 = vrot.slane %v3212_v22, 1  ;;  %v3820_v22 = vld [vmem:[#allocation2 + $0x24] sm:$0xf] }
 0x2ef   : > { %v7354_v48 = vpop.f32.mrf.mxu0  ;;  %v3837_v18 = vsel %vm7974_vm1, %v3820_v22, 0  ;;  %vm8018_vm1 = vmmov %vm8015_vm3 }
 0x2f0   : > { %8006 = vst [vmem:[#allocation40_spill] sm:$0xff] %v7354_v48 }
 0x2f3   : > { %2859 = vmatmul.bf16.gmra.mxu1 %v2755_v34  ;;  %v1746_v34 = vpop.f32.mrf.mxu1 }
 0x2f4   : > { %v1965_v0 = vpop.f32.mrf.mxu2 }
 0x2f5   : > { %v1966_v36 = vadd.f32 %v1965_v0, %v7318_v27  ;;  %v5195_v27 = vld [vmem:[#allocation2 + $0x3c] sm:$0xff]  ;;  %v5260_v0 = vld [vmem:[#allocation12 + $0x38] sm:$0xff] }
 0x2f6   : > { %3031 = vmatmul.bf16.gmra.mxu2 %v5194_v9  ;;  %v3210_v9 = vor.u32 %v3208_v54, %v3206_v3  ;;  %4226 = vmatpush.bf16.msra.mxu0 %v5260_v0  ;;  %v5259_v3 = vld [vmem:[#allocation12 + $0x30] sm:$0xff] }
 0x2f7   : > { %3313 = vmatmul.bf16.gmra.mxu3 %v3207_v17  ;;  %v7365_v53 = vpop.f32.mrf.mxu0  ;;  %v2764_v17 = vsel %vm8013_vm5, %v2754_v20, %v2763_v12  ;;  %v3155_v20 = vpack.c.b16 %v3146_v61, %v3146_v61 }
 0x2f8   : > { %8012 = vst [vmem:[#allocation42_spill] sm:$0xff] %v7365_v53  ;;  %v3215_v1 = vsel %vm8015_vm3, %v3210_v9, %v3214_v5  ;;  %5418 = vmatpush.bf16.msra.mxu3 %v5260_v0  ;;  %v3216_v9 = vshrl.u32 %v3154_v23, 16 }
 0x2fa   : > { %v2561_v16 = vpop.f32.mrf.mxu3  ;;  %4227 = vmatpush.bf16.msra.mxu0 %v5259_v3  ;;  %v3218_v0 = vor.u32 %v3216_v9, %v3214_v5  ;;  %v5255_v9 = vld [vmem:[#allocation12 + $0x10] sm:$0xff] }
 0x2fb   : > { %v7367_v48 = vadd.f32 %v2561_v16, %v1966_v36  ;;  %v7379_v36 = vpop.f32.mrf.mxu1 }
 0x2fc   : > { %v7369_v19 = vpop.f32.mrf.mxu2  ;;  %5419 = vmatpush.bf16.msra.mxu3 %v5259_v3 }
 0x302   : > { %v7374_v39 = vpop.f32.mrf.mxu3 }
 0x303   : > { %2864 = vmatmul.bf16.gmra.mxu1 %v2764_v17  ;;  %v3220_v17 = vshll.u32 %v3155_v20, 16 }
 0x304   : > { %v7376_v43 = vpop.f32.mrf.mxu0 }
 0x305   : > { %8014 = vst [vmem:[#allocation44_spill] sm:$0xff] %v7376_v43 }
 0x306   : > { %3036 = vmatmul.bf16.gmra.mxu2 %v5195_v27  ;;  %v5258_v27 = vld [vmem:[#allocation12 + $0x28] sm:$0xff] }
 0x307   : > { %3318 = vmatmul.bf16.gmra.mxu3 %v3215_v1  ;;  %4228 = vmatpush.bf16.msra.mxu0 %v5258_v27  ;;  %v5222_v1 = vld [vmem:[#allocation2 + $0x1c] sm:$0xff] }
 0x308   : > { %5420 = vmatpush.bf16.msra.mxu3 %v5258_v27 }
 0x309   : > { %v1970_v54 = vpop.f32.mrf.mxu2 }
 0x30a   : > { %v1971_v26 = vadd.f32 %v1970_v54, %v7344_v10  ;;  %v2566_v8 = vpop.f32.mrf.mxu3  ;;  %v3838_v10 = vsel %vm7976_vm7, %v3821_v46, 0  ;;  %v3222_v54 = vrot.slane %v3220_v17, 1  ;;  %vm8020_vm7 = vmmov %vm8018_vm1 }
 0x30b   : > { %v3888_v23 = vunpack.c.l.b16 %v3838_v10 }
 0x30c   : > { %v7382_v16 = vpop.f32.mrf.mxu0  ;;  %v7384_v12 = vadd.f32 %v2566_v8, %v1971_v26  ;;  %v5257_v26 = vld [vmem:[#allocation12 + $0x20] sm:$0xff]  ;;  %v5196_v8 = vld [vmem:[#allocation2 + $0x44] sm:$0xff]  ;;  %v3223_v7 = vsel %vm8018_vm1, %v3218_v0, %v3222_v54  ;;  %v3823_v0 = vld [vmem:[#allocation2 + $0x30] sm:$0xf] }
 0x30d   : > { %8016 = vst [vmem:[#allocation43_spill] sm:$0xff] %v7382_v16  ;;  %v3887_v16 = vunpack.c.l.b16 %v3837_v18  ;;  %4229 = vmatpush.bf16.msra.mxu0 %v5257_v26  ;;  %5421 = vmatpush.bf16.msra.mxu3 %v5257_v26  ;;  %v5254_v54 = vld [vmem:[#allocation12 + $0x8] sm:$0xff] }
 0x30f   : > { %v3902_v22 = vpack.c.b16 %v3888_v23, %v3887_v16  ;;  %v5223_v16 = vld [vmem:[#allocation2 + $0x24] sm:$0xff] }
 0x310   : > { %v2830_v3 = vpop.f32.mrf.mxu1 }
 0x311   : > { %v7390_v61 = vpop.f32.mrf.mxu2  ;;  %4230 = vmatpush.bf16.msra.mxu0 %v5256_v21  ;;  %5422 = vmatpush.bf16.msra.mxu3 %v5256_v21  ;;  %v3925_v10 = vshll.u32 %v3902_v22, 16 }
 0x312   : > { %v7392_v20 = vpop.f32.mrf.mxu3 }
 0x313   : > { %3764 = vmatmul.bf16.vlgmr.msra.gmra.mxu1 %v5222_v1  ;;  %v3822_v1 = vld [vmem:[#allocation2 + $0x2c] sm:$0xf] }
 0x314   : > { %v7394_v43 = vpop.f32.mrf.mxu0  ;;  %v3839_v23 = vsel %vm7979_vm14, %v3822_v1, 0  ;;  %v2870_v1 = vadd.f32 %v2830_v3, %v7239_v63  ;;  %vm8021_vm14 = vmmov %vm8018_vm1 }
 0x315   : > { %8017 = vst [vmem:[#allocation45_spill] sm:$0xff] %v7394_v43  ;;  %4231 = vmatpush.bf16.msra.mxu0 %v5255_v9  ;;  %5423 = vmatpush.bf16.msra.mxu3 %v5255_v9 }
 0x316   : > { %3041 = vmatmul.bf16.gmra.mxu2 %v5196_v8  ;;  %v3927_v8 = vrot.slane %v3925_v10, 1 }
 0x317   : > { %3323 = vmatmul.bf16.gmra.mxu3 %v3223_v7 }
 0x318   : > { %v2832_v46 = vpop.f32.mrf.mxu1 }
 0x319   : > { %v1975_v5 = vpop.f32.mrf.mxu2  ;;  %4232 = vmatpush.bf16.msra.mxu0 %v5254_v54  ;;  %5424 = vmatpush.bf16.msra.mxu3 %v5254_v54  ;;  %v3928_v54 = vsel %vm8020_vm7, %v7233_v55, %v3927_v8  ;;  %v3929_v55 = vshrl.u32 %v3902_v22, 16 }
 0x31a   : > { %v1976_v17 = vadd.f32 %v1975_v5, %v1746_v34  ;;  %v2571_v27 = vpop.f32.mrf.mxu3  ;;  %v3840_v34 = vsel %vm7980_vm13, %v3823_v0, 0  ;;  %v5253_v5 = vld [vmem:[#allocation12] sm:$0xff]  ;;  %vm8024_vm13 = vmmov %vm8018_vm1 }
 0x31b   : > { %v3890_v52 = vunpack.c.l.b16 %v3840_v34 }
 0x31c   : > { %v7397_v18 = vpop.f32.mrf.mxu0  ;;  %v7399_v26 = vadd.f32 %v2571_v27, %v1976_v17 }
 0x31d   : > { %8019 = vst [vmem:[#allocation46_spill] sm:$0xff] %v7397_v18  ;;  %v3889_v18 = vunpack.c.l.b16 %v3839_v23  ;;  %4233 = vmatpush.bf16.msra.mxu0 %v5253_v5  ;;  %5425 = vmatpush.bf16.msra.mxu3 %v5253_v5  ;;  %v3825_v5 = vld [vmem:[#allocation2 + $0x38] sm:$0xf] }
 0x31f   : > { %v3903_v38 = vpack.c.b16 %v3890_v52, %v3889_v18  ;;  %v3931_v18 = vor.u32 %v3929_v55, %v3927_v8  ;;  %v5224_v52 = vld [vmem:[#allocation2 + $0x2c] sm:$0xff] }
 0x320   : > { %v2835_v21 = vpop.f32.mrf.mxu1 }
 0x321   : > { %v1977_v7 = vpop.f32.mrf.mxu2  ;;  %v2872_v17 = vadd.f32 %v2835_v21, %v7264_v59  ;;  %v1943_v59 = vadd.f32 %v7247_v50, %v7179_v41  ;;  %v3933_v23 = vshll.u32 %v3903_v38, 16  ;;  %v3841_v41 = vsel %vm7985_vm2, %v3824_v51, 0  ;;  %vm8025_vm2 = vmmov %vm8018_vm1 }
 0x322   : > { %v7406_v9 = vadd.f32 %v1977_v7, %v7379_v36  ;;  %v7409_v27 = vpop.f32.mrf.mxu3  ;;  %v3842_v50 = vsel %vm7986_vm0, %v3825_v5, 0  ;;  %v3891_v8 = vunpack.c.l.b16 %v3841_v41  ;;  %v3827_v41 = vld [vmem:[#allocation2 + $0x40] sm:$0xf]  ;;  %vm8026_vm0 = vmmov %vm8018_vm1 }
 0x323   : > { %3769 = vmatmul.bf16.gmra.mxu1 %v5223_v16  ;;  %v2577_v16 = vadd.f32 %v7250_v33, %v1943_v59 }
 0x324   : > { %v3760_v10 = vpop.f32.mrf.mxu0 }
 0x325   : > { %v2871_v63 = vadd.f32 %v2832_v46, %v2577_v16  ;;  %v3892_v46 = vunpack.c.l.b16 %v3842_v50 }
 0x326   : > { %4046 = vmatmul.bf16.vlgmr.msra.gmra.mxu2 %v3928_v54  ;;  %v3935_v54 = vrot.slane %v3933_v23, 1 }
 0x328   : > { %v2837_v36 = vpop.f32.mrf.mxu1  ;;  %v3936_v33 = vsel %vm8021_vm14, %v3931_v18, %v3935_v54  ;;  %v3937_v18 = vshrl.u32 %v3903_v38, 16 }
 0x329   : > { %v3007_v0 = vpop.f32.mrf.mxu2  ;;  %v2873_v21 = vadd.f32 %v2837_v36, %v7277_v11 }
 0x32a   : > { %v3047_v7 = vadd.f32 %v3007_v0, %v2870_v1  ;;  %v3289_v43 = vpop.f32.mrf.mxu3 }
 0x32c   : > { %v3762_v53 = vpop.f32.mrf.mxu0  ;;  %v3329_v34 = vadd.f32 %v3289_v43, %v3047_v7  ;;  %v3904_v7 = vpack.c.b16 %v3892_v46, %v3891_v8 }
 0x32e   : > { %v3623_v3 = vadd.f32 %v7214_v4, %v3329_v34  ;;  %v7435_v34 = vld [vmem:[%s8023_s9] ss:$0 sm:$0xff]  ;;  %s5803_s9 = scalar_lea.hbm %s5802_s18, 64 }
 0x32f   : > { %p5804_p2 = scmp.ne.s32.totalorder %s5802_s18, %s5803_s9 }
 0x330   : > { %v2840_v22 = vpop.f32.mrf.mxu1  ;;  %v3800_v4 = vadd.f32 %v3760_v10, %v3623_v3 }
 0x331   : > { %v3009_v11 = vpop.f32.mrf.mxu2  ;;  %v2874_v43 = vadd.f32 %v2840_v22, %v7298_v49  ;;  %v3939_v22 = vor.u32 %v3937_v18, %v3935_v54  ;;  %v3829_v18 = vld [vmem:[#allocation2 + $0x48] sm:$0xf]  ;;  %p5805_p8 = pnand %p5804_p2, %p6231_p5 }
 0x332   : > { %v3048_v1 = vadd.f32 %v3009_v11, %v2871_v63  ;;  %v3291_v0 = vpop.f32.mrf.mxu3  ;;  %v3941_v63 = vshll.u32 %v3904_v7, 16 }
 0x333   : > { %3774 = vmatmul.bf16.gmra.mxu1 %v5224_v52  ;;  %v3826_v52 = vld [vmem:[#allocation2 + $0x3c] sm:$0xf]  ;;  %p5806_p9 = pneg %p5805_p8 }
 0x334   : > { %v4042_v36 = vpop.f32.mrf.mxu0  ;;  %v3330_v59 = vadd.f32 %v3291_v0, %v3048_v1  ;;  %v3943_v1 = vrot.slane %v3941_v63, 1 }
 0x335   : > { %v4082_v51 = vadd.f32 %v4042_v36, %v3800_v4  ;;  %v5225_v36 = vld [vmem:[#allocation2 + $0x34] sm:$0xff] }
 0x336   : > { %v3624_v47 = vadd.f32 %v7235_v29, %v3330_v59  ;;  %4051 = vmatmul.bf16.gmra.mxu2 %v3936_v33  ;;  %v3944_v54 = vsel %vm8024_vm13, %v3939_v22, %v3943_v1 }
 0x337   : > { %v4102_v23 = vmul.f32 %v7429_v45, %v4082_v51 }
 0x338   : > { %v2842_v55 = vpop.f32.mrf.mxu1  ;;  %v3801_v29 = vadd.f32 %v3762_v53, %v3624_v47  ;;  %v3843_v53 = vsel %vm7992_vm4, %v3826_v52, 0  ;;  %vm8027_vm4 = vmmov %vm8026_vm0 }
 0x339   : > { %v3012_v49 = vpop.f32.mrf.mxu2  ;;  %v2875_v5 = vadd.f32 %v2842_v55, %v7309_v30  ;;  %v4122_v50 = vadd.f32 %v7435_v34, %v4102_v23  ;;  %v3844_v30 = vsel %vm7994_vm8, %v3827_v41, 0  ;;  %v3893_v4 = vunpack.c.l.b16 %v3843_v53 }
 0x33a   : > { %v7437_v10 = vadd.f32 %v3012_v49, %v2872_v17  ;;  %v3894_v47 = vunpack.c.l.b16 %v3844_v30  ;;  %v3846_v41 = vsel %vm8002_vm6, %v3829_v18, 0 }
 0x33b   : > { %v4138_v33 = vmax.f32 %v4122_v50, 0.0 }
 0x33c   : > { %v4044_v16 = vpop.f32.mrf.mxu0  ;;  %v3905_v37 = vpack.c.b16 %v3894_v47, %v3893_v4  ;;  %v5227_v4 = vld [vmem:[#allocation2 + $0x44] sm:$0xff] }
 0x33d   : > { %v4083_v3 = vadd.f32 %v4044_v16, %v3801_v29  ;;  %v3945_v29 = vshrl.u32 %v3904_v7, 16  ;;  %v3828_v16 = vld [vmem:[#allocation2 + $0x44] sm:$0xf] }
 0x33e   : > { %v3845_v52 = vsel %vm8000_vm11, %v3828_v16, 0 }
 0x33f   : > { %v4103_v11 = vmul.f32 %v7429_v45, %v4083_v3  ;;  %v5226_v3 = vld [vmem:[#allocation2 + $0x3c] sm:$0xff]  ;;  %v3895_v7 = vunpack.c.l.b16 %v3845_v52 }
 0x340   : > { %v2845_v38 = vpop.f32.mrf.mxu1 }
 0x341   : > { %v4123_v0 = vadd.f32 %v7435_v34, %v4103_v11  ;;  %v3014_v17 = vpop.f32.mrf.mxu2  ;;  %v2876_v59 = vadd.f32 %v2845_v38, %v7320_v62  ;;  %v3947_v62 = vor.u32 %v3945_v29, %v3943_v1  ;;  %v1963_v1 = vadd.f32 %v7350_v35, %v7304_v40 }
 0x342   : > { %v7447_v46 = vadd.f32 %v3014_v17, %v2873_v21  ;;  %v3949_v21 = vshll.u32 %v3905_v37, 16  ;;  %v3953_v17 = vshrl.u32 %v3905_v37, 16  ;;  %v1968_v29 = vadd.f32 %v7369_v19, %v7331_v44 }
 0x343   : > { %v4139_v8 = vmax.f32 %v4123_v0, 0.0  ;;  %3779 = vmatmul.bf16.gmra.mxu1 %v5225_v36  ;;  %v3896_v0 = vunpack.c.l.b16 %v3846_v41  ;;  %v2585_v36 = vadd.f32 %v7352_v58, %v1963_v1  ;;  %v5228_v41 = vld [vmem:[#allocation2 + $0x4c] sm:$0xff] }
 0x344   : > { %v3951_v63 = vrot.slane %v3949_v21, 1  ;;  %v2587_v21 = vadd.f32 %v7374_v39, %v1968_v29 }
 0x345   : > { %v4154_v51 = vpack.c.bf16 %v4139_v8, %v4138_v33  ;;  %v3906_v28 = vpack.c.b16 %v3896_v0, %v3895_v7  ;;  %v3831_v33 = vld [vmem:[#allocation2 + $0x50] sm:$0xf]  ;;  %v1973_v7 = vadd.f32 %v7390_v61, %v7361_v24 }
 0x346   : > { %4056 = vmatmul.bf16.gmra.mxu2 %v3944_v54  ;;  %v3955_v8 = vor.u32 %v3953_v17, %v3951_v63  ;;  %v3848_v35 = vsel %vm8010_vm10, %v3831_v33, 0 }
 0x347   : > { %4234 = vmatmul.bf16.vlgmr.msra.gmra.mxu0 %v4154_v51  ;;  %v3957_v38 = vshll.u32 %v3906_v28, 16  ;;  %v2589_v1 = vadd.f32 %v7392_v20, %v1973_v7  ;;  %v2591_v20 = vadd.f32 %v7409_v27, %v7406_v9 }
 0x348   : > { %v2847_v2 = vpop.f32.mrf.mxu1 }
 0x349   : > { %v3017_v49 = vpop.f32.mrf.mxu2  ;;  %v2877_v23 = vadd.f32 %v2847_v2, %v7329_v32  ;;  %v3952_v32 = vsel %vm8025_vm2, %v3947_v62, %v3951_v63  ;;  %v3959_v54 = vrot.slane %v3957_v38, 1  ;;  %v3898_v2 = vunpack.c.l.b16 %v3848_v35 }
 0x34a   : > { %v7451_v55 = vadd.f32 %v3017_v49, %v2874_v43  ;;  %v3961_v62 = vshrl.u32 %v3906_v28, 16 }
 0x34b   : > { %v3960_v37 = vsel %vm8026_vm0, %v3955_v8, %v3959_v54  ;;  %v3294_v8 = vpop.f32.mrf.mxu3 }
 0x34c   : > { %v3331_v27 = vadd.f32 %v3294_v8, %v7437_v10 }
 0x350   : > { %v2850_v11 = vpop.f32.mrf.mxu1 }
 0x351   : > { %v3019_v50 = vpop.f32.mrf.mxu2  ;;  %v2878_v43 = vadd.f32 %v2850_v11, %v7346_v25  ;;  %v3830_v25 = vld [vmem:[#allocation2 + $0x4c] sm:$0xf] }
 0x352   : > { %v7458_v22 = vadd.f32 %v3019_v50, %v2875_v5  ;;  %v3847_v40 = vsel %vm8008_vm12, %v3830_v25, 0 }
 0x353   : > { %3784 = vmatmul.bf16.gmra.mxu1 %v5226_v3  ;;  %v3897_v49 = vunpack.c.l.b16 %v3847_v40  ;;  %v3963_v3 = vor.u32 %v3961_v62, %v3959_v54 }
 0x355   : > { %v3907_v14 = vpack.c.b16 %v3898_v2, %v3897_v49 }
 0x356   : > { %4061 = vmatmul.bf16.gmra.mxu2 %v3952_v32 }
 0x357   : > { %v3965_v63 = vshll.u32 %v3907_v14, 16 }
 0x358   : > { %v2852_v53 = vpop.f32.mrf.mxu1 }
 0x359   : > { %v3022_v56 = vpop.f32.mrf.mxu2  ;;  %v2879_v5 = vadd.f32 %v2852_v53, %v2585_v36  ;;  %v3967_v52 = vrot.slane %v3965_v63, 1  ;;  %v3969_v53 = vshrl.u32 %v3907_v14, 16 }
 0x35a   : > { %v7465_v30 = vadd.f32 %v3022_v56, %v2876_v59 }
 0x35b   : > { %v3968_v32 = vsel %vm8027_vm4, %v3963_v3, %v3967_v52  ;;  %v3971_v17 = vor.u32 %v3969_v53, %v3967_v52 }
 0x360   : > { %v2855_v58 = vpop.f32.mrf.mxu1 }
 0x361   : > { %v3024_v47 = vpop.f32.mrf.mxu2  ;;  %v2880_v59 = vadd.f32 %v2855_v58, %v7367_v48  ;;  %v3832_v48 = vld [vmem:[#allocation2 + $0x54] sm:$0x1] }
 0x362   : > { %v7471_v51 = vadd.f32 %v3024_v47, %v2877_v23  ;;  %v3849_v50 = vsel %vm7154_vm15, %v3832_v48, 0  ;;  %vm8028_vm15 = vmmov %vm8026_vm0  ;;  %v3296_v47 = vpop.f32.mrf.mxu3 }
 0x363   : > { %3789 = vmatmul.bf16.gmra.mxu1 %v5227_v4  ;;  %v3332_v63 = vadd.f32 %v3296_v47, %v7447_v46  ;;  %v5308_v47 = vld [vmem:[%s6300_s6] sm:$0xff]  }
 0x366   : > { %4066 = vmatmul.bf16.gmra.mxu2 %v3960_v37 }
 0x368   : > { %v2857_v16 = vpop.f32.mrf.mxu1 }
 0x369   : > { %v3027_v42 = vpop.f32.mrf.mxu2  ;;  %v2881_v23 = vadd.f32 %v2857_v16, %v2587_v21  ;;  %v3625_v16 = vadd.f32 %v7252_v6, %v3331_v27 }
 0x36a   : > { %v7478_v18 = vadd.f32 %v3027_v42, %v2878_v43  ;;  %v3899_v43 = vunpack.c.l.b16 %v3849_v50  ;;  %v3299_v49 = vpop.f32.mrf.mxu3 }
 0x36c   : > { %v3908_v0 = vpack.c.b16 %v3899_v43, %v3899_v43  ;;  %v3333_v43 = vadd.f32 %v3299_v49, %v7451_v55 }
 0x370   : > { %v2860_v19 = vpop.f32.mrf.mxu1 }
 0x371   : > { %v3029_v44 = vpop.f32.mrf.mxu2  ;;  %v2882_v39 = vadd.f32 %v2860_v19, %v7384_v12 }
 0x372   : > { %v7482_v11 = vadd.f32 %v3029_v44, %v2879_v5  ;;  %v3973_v5 = vshll.u32 %v3908_v0, 16  ;;  %v3301_v9 = vpop.f32.mrf.mxu3 }
 0x373   : > { %3794 = vmatmul.bf16.gmra.mxu1 %v5228_v41  ;;  %v3626_v41 = vadd.f32 %v7271_v60, %v3332_v63 }
 0x374   : > { %v3975_v12 = vrot.slane %v3973_v5, 1 }
 0x376   : > { %4071 = vmatmul.bf16.gmra.mxu2 %v3968_v32  ;;  %v3976_v61 = vsel %vm8028_vm15, %v3971_v17, %v3975_v12 }
 0x378   : > { %v2862_v15 = vpop.f32.mrf.mxu1 }
 0x379   : > { %v3032_v28 = vpop.f32.mrf.mxu2  ;;  %v2883_v56 = vadd.f32 %v2862_v15, %v2589_v1  ;;  %v3627_v1 = vadd.f32 %v7285_v13, %v3333_v43  ;;  %v3334_v15 = vadd.f32 %v3301_v9, %v7458_v22  ;;  %v7521_v13 = vld [vmem:[%s8029_s7] ss:$0 sm:$0xff]  ;;  %v5309_v9 = vunpack.c.l.bf16 %v5308_v47  ;;  %s5807_s7 = scalar_lea.hbm %s8043_s3, 256 }
 0x37a   : > { %v7489_v36 = vadd.f32 %v3032_v28, %v2880_v59  ;;  %v3304_v52 = vpop.f32.mrf.mxu3  ;;  %p5809_p4 = scmp.lt.s32.totalorder %s5807_s7, %s5803_s9 }
 0x37b   : > { %v3628_v17 = vadd.f32 %v7296_v31, %v3334_v15  ;;  %v3335_v8 = vadd.f32 %v3304_v52, %v7465_v30  ;;  %v8031_v52 = vld [vmem:[#allocation41_spill] sm:$0xff]  ;;  %v8032_v15 = vld [vmem:[#allocation38_spill] sm:$0xff] }
 0x37c   : > { %p5810_p10 = por %p5809_p4, %p5808_p0 }
 0x37d   : > { %v3629_v49 = vadd.f32 %v7307_v57, %v3335_v8 }
 0x37e   : > { %p5811_p13 = pnand %p5810_p10, %p5806_p9 }
 0x380   : > { %v2865_v25 = vpop.f32.mrf.mxu1 }
 0x381   : > { %v3034_v38 = vpop.f32.mrf.mxu2  ;;  %v2884_v24 = vadd.f32 %v2865_v25, %v7399_v26 }
 0x382   : > { %v7491_v33 = vadd.f32 %v3034_v38, %v2881_v23  ;;  %v3306_v46 = vpop.f32.mrf.mxu3 }
 0x383   : > { %v3336_v30 = vadd.f32 %v3306_v46, %v7471_v51 }
 0x385   : > { %v3630_v57 = vadd.f32 %v8031_v52, %v3336_v30 }
 0x386   : > { %4076 = vmatmul.bf16.gmra.mxu2 %v3976_v61 }
 0x388   : > { %v2867_v4 = vpop.f32.mrf.mxu1 }
 0x389   : > { %v3037_v54 = vpop.f32.mrf.mxu2  ;;  %v2885_v35 = vadd.f32 %v2867_v4, %v2591_v20 }
 0x38a   : > { %v7497_v40 = vadd.f32 %v3037_v54, %v2882_v39  ;;  %v3309_v25 = vpop.f32.mrf.mxu3 }
 0x390   : > { %v3765_v59 = vpop.f32.mrf.mxu1 }
 0x391   : > { %v3039_v58 = vpop.f32.mrf.mxu2  ;;  %v3802_v48 = vadd.f32 %v3765_v59, %v3625_v16 }
 0x392   : > { %v7499_v37 = vadd.f32 %v3039_v58, %v2883_v56  ;;  %v3311_v16 = vpop.f32.mrf.mxu3 }
 0x398   : > { %v3767_v26 = vpop.f32.mrf.mxu1 }
 0x399   : > { %v3042_v2 = vpop.f32.mrf.mxu2  ;;  %v3803_v50 = vadd.f32 %v3767_v26, %v3626_v41 }
 0x39a   : > { %v7501_v29 = vadd.f32 %v3042_v2, %v2884_v24 }
 0x3a0   : > { %v3770_v21 = vpop.f32.mrf.mxu1 }
 0x3a1   : > { %v3044_v14 = vpop.f32.mrf.mxu2  ;;  %v3804_v56 = vadd.f32 %v3770_v21, %v3627_v1  ;;  %v3314_v1 = vpop.f32.mrf.mxu3 }
 0x3a2   : > { %v7503_v42 = vadd.f32 %v3044_v14, %v2885_v35  ;;  %v7531_v35 = vld [vmem:[%s8030_s10] ss:$0 sm:$0xff] }
 0x3a8   : > { %v3772_v62 = vpop.f32.mrf.mxu1 }
 0x3a9   : > { %v4047_v23 = vpop.f32.mrf.mxu2  ;;  %v3805_v12 = vadd.f32 %v3772_v62, %v3628_v17 }
 0x3aa   : > { %v4084_v3 = vadd.f32 %v4047_v23, %v3802_v48  ;;  %v5310_v48 = vunpack.c.h.bf16 %v5308_v47 }
 0x3ac   : > { %v4104_v44 = vmul.f32 %v7429_v45, %v4084_v3 }
 0x3ae   : > { %v4124_v10 = vadd.f32 %v7435_v34, %v4104_v44 }
 0x3b0   : > { %v3775_v32 = vpop.f32.mrf.mxu1  ;;  %v4140_v0 = vmax.f32 %v4124_v10, 0.0 }
 0x3b1   : > { %v4049_v19 = vpop.f32.mrf.mxu2  ;;  %v3806_v14 = vadd.f32 %v3775_v32, %v3629_v49  ;;  %v8034_v49 = vld [vmem:[#allocation40_spill] sm:$0xff] }
 0x3b2   : > { %v4085_v39 = vadd.f32 %v4049_v19, %v3803_v50 }
 0x3b4   : > { %v4105_v6 = vmul.f32 %v7429_v45, %v4085_v39 }
 0x3b6   : > { %v4125_v7 = vadd.f32 %v7435_v34, %v4105_v6  ;;  %v3337_v6 = vadd.f32 %v3309_v25, %v7478_v18  ;;  %v8033_v25 = vld [vmem:[#allocation39_spill] sm:$0xff] }
 0x3b8   : > { %v4141_v28 = vmax.f32 %v4125_v7, 0.0  ;;  %v3777_v55 = vpop.f32.mrf.mxu1 }
 0x3b9   : > { %v4052_v60 = vpop.f32.mrf.mxu2  ;;  %v3807_v51 = vadd.f32 %v3777_v55, %v3630_v57  ;;  %v3338_v55 = vadd.f32 %v3311_v16, %v7482_v11 }
 0x3ba   : > { %v4155_v53 = vpack.c.bf16 %v4141_v28, %v4140_v0  ;;  %v4086_v5 = vadd.f32 %v4052_v60, %v3804_v56  ;;  %v3631_v56 = vadd.f32 %v8032_v15, %v3337_v6 }
 0x3bc   : > { %4239 = vmatmul.bf16.vlgmr.msra.gmra.mxu3 %v4155_v53  ;;  %v4106_v38 = vmul.f32 %v7429_v45, %v4086_v5 }
 0x3be   : > { %v4126_v20 = vadd.f32 %v7435_v34, %v4106_v38 }
 0x3c0   : > { %v3780_v58 = vpop.f32.mrf.mxu1  ;;  %v4142_v59 = vmax.f32 %v4126_v20, 0.0 }
 0x3c1   : > { %v4054_v24 = vpop.f32.mrf.mxu2  ;;  %v3808_v17 = vadd.f32 %v3780_v58, %v3631_v56 }
 0x3c2   : > { %v4087_v61 = vadd.f32 %v4054_v24, %v3805_v12  ;;  %v3632_v24 = vadd.f32 %v8033_v25, %v3338_v55  ;;  %v8038_v25 = vld [vmem:[#allocation45_spill] sm:$0xff] }
 0x3c4   : > { %v4235_v22 = vpop.f32.mrf.mxu0  ;;  %v4107_v54 = vmul.f32 %v7429_v45, %v4087_v61  ;;  %v3316_v61 = vpop.f32.mrf.mxu3 }
 0x3c5   : > { %v4279_v4 = vmul.f32 %v7521_v13, %v4235_v22 }
 0x3c6   : > { %v4127_v31 = vadd.f32 %v7435_v34, %v4107_v54 }
 0x3c7   : > { %v4299_v21 = vadd.f32 %v7531_v35, %v4279_v4 }
 0x3c8   : > { %v4143_v2 = vmax.f32 %v4127_v31, 0.0  ;;  %v3782_v39 = vpop.f32.mrf.mxu1  ;;  %v3339_v31 = vadd.f32 %v3314_v1, %v7489_v36  ;;  %v8035_v36 = vld [vmem:[#allocation42_spill] sm:$0xff] }
 0x3c9   : > { %v4057_v26 = vpop.f32.mrf.mxu2  ;;  %v4347_v3 = vadd.f32 %v5309_v9, %v4299_v21  ;;  %v3809_v22 = vadd.f32 %v3782_v39, %v3632_v24  ;;  %v3340_v21 = vadd.f32 %v3316_v61, %v7491_v33 }
 0x3ca   : > { %v4156_v27 = vpack.c.bf16 %v4143_v2, %v4142_v59  ;;  %v4088_v62 = vadd.f32 %v4057_v26, %v3806_v14  ;;  %v3633_v2 = vadd.f32 %v8034_v49, %v3339_v31 }
 0x3cb   : > { %v4363_v32 = vmax.f32 %v4347_v3, 0.0 }
 0x3cc   : > { %v4237_v23 = vpop.f32.mrf.mxu0  ;;  %4244 = vmatmul.bf16.gmra.mxu3 %v4156_v27  ;;  %v4108_v50 = vmul.f32 %v7429_v45, %v4088_v62  ;;  %v3319_v26 = vpop.f32.mrf.mxu3 }
 0x3cd   : > { %v4280_v63 = vmul.f32 %v7521_v13, %v4237_v23  ;;  %v3634_v23 = vadd.f32 %v8035_v36, %v3340_v21 }
 0x3ce   : > { %v4128_v7 = vadd.f32 %v7435_v34, %v4108_v50 }
 0x3cf   : > { %v4300_v41 = vadd.f32 %v7531_v35, %v4280_v63 }
 0x3d0   : > { %v4144_v60 = vmax.f32 %v4128_v7, 0.0  ;;  %v3785_v38 = vpop.f32.mrf.mxu1 }
 0x3d1   : > { %v4348_v44 = vadd.f32 %v5310_v48, %v4300_v41  ;;  %v4059_v19 = vpop.f32.mrf.mxu2  ;;  %v3810_v9 = vadd.f32 %v3785_v38, %v3633_v2  ;;  %v3341_v41 = vadd.f32 %v3319_v26, %v7497_v40  ;;  %v8037_v40 = vld [vmem:[#allocation43_spill] sm:$0xff] }
 0x3d2   : > { %v4089_v10 = vadd.f32 %v4059_v19, %v3807_v51  ;;  %v8036_v19 = vld [vmem:[#allocation44_spill] sm:$0xff] }
 0x3d3   : > { %v4364_v43 = vmax.f32 %v4348_v44, 0.0  ;;  %v3635_v39 = vadd.f32 %v8036_v19, %v3341_v41 }
 0x3d4   : > { %v4109_v0 = vmul.f32 %v7429_v45, %v4089_v10  ;;  %v3321_v57 = vpop.f32.mrf.mxu3 }
 0x3d5   : > { %v5342_v46 = vpack.c.bf16 %v4364_v43, %v4363_v32  ;;  %v3342_v6 = vadd.f32 %v3321_v57, %v7499_v37 }
 0x3d6   : > { %v4129_v28 = vadd.f32 %v7435_v34, %v4109_v0 }
 0x3d7   : > { %5343 = vst [vmem:[%s6395_s19] sm:$0xff] %v5342_v46  }
 0x3d8   : > { %v4145_v53 = vmax.f32 %v4129_v28, 0.0  ;;  %v3787_v11 = vpop.f32.mrf.mxu1  ;;  %v3636_v28 = vadd.f32 %v8037_v40, %v3342_v6 }
 0x3d9   : > { %v4062_v5 = vpop.f32.mrf.mxu2  ;;  %v3811_v63 = vadd.f32 %v3787_v11, %v3634_v23 }
 0x3da   : > { %v4157_v12 = vpack.c.bf16 %v4145_v53, %v4144_v60  ;;  %v4090_v18 = vadd.f32 %v4062_v5, %v3808_v17 }
 0x3dc   : > { %4249 = vmatmul.bf16.gmra.mxu3 %v4157_v12  ;;  %v4110_v8 = vmul.f32 %v7429_v45, %v4090_v18  ;;  %v3324_v1 = vpop.f32.mrf.mxu3 }
 0x3dd   : > { %v3343_v55 = vadd.f32 %v3324_v1, %v7501_v29 }
 0x3de   : > { %v4130_v4 = vadd.f32 %v7435_v34, %v4110_v8 }
 0x3df   : > { %v3637_v24 = vadd.f32 %v8038_v25, %v3343_v55 }
 0x3e0   : > { %v4146_v59 = vmax.f32 %v4130_v4, 0.0  ;;  %v3790_v62 = vpop.f32.mrf.mxu1  ;;  %v8039_v4 = vld [vmem:[#allocation46_spill] sm:$0xff] }
 0x3e1   : > { %v4064_v20 = vpop.f32.mrf.mxu2  ;;  %v3812_v7 = vadd.f32 %v3790_v62, %v3635_v39 }
 0x3e2   : > { %v4091_v54 = vadd.f32 %v4064_v20, %v3809_v22 }
 0x3e4   : > { %v4111_v47 = vmul.f32 %v7429_v45, %v4091_v54  ;;  %v3326_v38 = vpop.f32.mrf.mxu3 }
 0x3e5   : > { %v3344_v8 = vadd.f32 %v3326_v38, %v7503_v42 }
 0x3e6   : > { %v4131_v58 = vadd.f32 %v7435_v34, %v4111_v47 }
 0x3e7   : > { %v3638_v47 = vadd.f32 %v8039_v4, %v3344_v8 }
 0x3e8   : > { %v4147_v30 = vmax.f32 %v4131_v58, 0.0  ;;  %v3792_v43 = vpop.f32.mrf.mxu1 }
 0x3e9   : > { %v4067_v14 = vpop.f32.mrf.mxu2  ;;  %v3813_v60 = vadd.f32 %v3792_v43, %v3636_v28 }
 0x3ea   : > { %v4158_v27 = vpack.c.bf16 %v4147_v30, %v4146_v59  ;;  %v4092_v16 = vadd.f32 %v4067_v14, %v3810_v9 }
 0x3ec   : > { %4254 = vmatmul.bf16.gmra.mxu3 %v4158_v27  ;;  %v4112_v48 = vmul.f32 %v7429_v45, %v4092_v16  ;;  %v5388_v16 = vld [vmem:[%s6300_s6 + $0x8] sm:$0xff]  }
 0x3ed   : > { %v5313_v23 = vunpack.c.l.bf16 %v5388_v16 }
 0x3ee   : > { %v4132_v51 = vadd.f32 %v7435_v34, %v4112_v48  ;;  %v5314_v48 = vunpack.c.h.bf16 %v5388_v16 }
 0x3f0   : > { %v4148_v44 = vmax.f32 %v4132_v51, 0.0  ;;  %v3795_v5 = vpop.f32.mrf.mxu1 }
 0x3f1   : > { %v4069_v3 = vpop.f32.mrf.mxu2  ;;  %v3814_v20 = vadd.f32 %v3795_v5, %v3637_v24 }
 0x3f2   : > { %v4093_v52 = vadd.f32 %v4069_v3, %v3811_v63 }
 0x3f4   : > { %v4113_v50 = vmul.f32 %v7429_v45, %v4093_v52 }
 0x3f6   : > { %v4133_v33 = vadd.f32 %v7435_v34, %v4113_v50 }
 0x3f8   : > { %v4149_v32 = vmax.f32 %v4133_v33, 0.0  ;;  %v3797_v29 = vpop.f32.mrf.mxu1  ;;  %v5389_v33 = vld [vmem:[%s6300_s6 + $0x10] sm:$0xff]  }
 0x3f9   : > { %v4072_v10 = vpop.f32.mrf.mxu2  ;;  %v3815_v11 = vadd.f32 %v3797_v29, %v3638_v47  ;;  %v5317_v19 = vunpack.c.l.bf16 %v5389_v33  ;;  %v5318_v43 = vunpack.c.h.bf16 %v5389_v33 }
 0x3fa   : > { %v4159_v46 = vpack.c.bf16 %v4149_v32, %v4148_v44  ;;  %v4094_v0 = vadd.f32 %v4072_v10, %v3812_v7 }
 0x3fc   : > { %4259 = vmatmul.bf16.gmra.mxu3 %v4159_v46  ;;  %v4114_v15 = vmul.f32 %v7429_v45, %v4094_v0 }
 0x3fe   : > { %v4134_v17 = vadd.f32 %v7435_v34, %v4114_v15 }
 0x400   : > { %v4150_v18 = vmax.f32 %v4134_v17, 0.0 }
 0x401   : > { %v4074_v56 = vpop.f32.mrf.mxu2 }
 0x402   : > { %v4095_v53 = vadd.f32 %v4074_v56, %v3813_v60  ;;  %v5390_v60 = vld [vmem:[%s6300_s6 + $0x18] sm:$0xff]  }
 0x403   : > { %v5321_v56 = vunpack.c.l.bf16 %v5390_v60  ;;  %v5322_v55 = vunpack.c.h.bf16 %v5390_v60 }
 0x404   : > { %v4115_v12 = vmul.f32 %v7429_v45, %v4095_v53 }
 0x406   : > { %v4135_v37 = vadd.f32 %v7435_v34, %v4115_v12 }
 0x408   : > { %v4151_v61 = vmax.f32 %v4135_v37, 0.0 }
 0x409   : > { %v4077_v22 = vpop.f32.mrf.mxu2 }
 0x40a   : > { %v4160_v54 = vpack.c.bf16 %v4151_v61, %v4150_v18  ;;  %v4096_v31 = vadd.f32 %v4077_v22, %v3814_v20  ;;  %v5391_v22 = vld [vmem:[%s6300_s6 + $0x20] sm:$0xff]  }
 0x40b   : > { %v5325_v20 = vunpack.c.l.bf16 %v5391_v22  ;;  %v5326_v29 = vunpack.c.h.bf16 %v5391_v22 }
 0x40c   : > { %4264 = vmatmul.bf16.gmra.mxu3 %v4160_v54  ;;  %v4116_v58 = vmul.f32 %v7429_v45, %v4096_v31 }
 0x40e   : > { %v4136_v2 = vadd.f32 %v7435_v34, %v4116_v58 }
 0x410   : > { %v4152_v42 = vmax.f32 %v4136_v2, 0.0 }
 0x411   : > { %v4079_v59 = vpop.f32.mrf.mxu2 }
 0x412   : > { %v4097_v49 = vadd.f32 %v4079_v59, %v3815_v11 }
 0x414   : > { %v4117_v30 = vmul.f32 %v7429_v45, %v4097_v49 }
 0x416   : > { %v4137_v26 = vadd.f32 %v7435_v34, %v4117_v30 }
 0x418   : > { %v4153_v14 = vmax.f32 %v4137_v26, 0.0  ;;  %v5392_v26 = vld [vmem:[%s6300_s6 + $0x28] sm:$0xff]  }
 0x41a   : > { %v4161_v21 = vpack.c.bf16 %v4153_v14, %v4152_v42  ;;  %v5329_v14 = vunpack.c.l.bf16 %v5392_v26 }
 0x41c   : > { %4269 = vmatmul.bf16.gmra.mxu3 %v4161_v21 }
 0x43f   : > { %v4240_v9 = vpop.f32.mrf.mxu3 }
 0x440   : > { %v4281_v27 = vmul.f32 %v7521_v13, %v4240_v9 }
 0x442   : > { %v4301_v36 = vadd.f32 %v7531_v35, %v4281_v27  ;;  %v5330_v27 = vunpack.c.h.bf16 %v5392_v26 }
 0x444   : > { %v4349_v45 = vadd.f32 %v5313_v23, %v4301_v36 }
 0x446   : > { %v4365_v52 = vmax.f32 %v4349_v45, 0.0 }
 0x447   : > { %v4242_v62 = vpop.f32.mrf.mxu3 }
 0x448   : > { %v4282_v63 = vmul.f32 %v7521_v13, %v4242_v62 }
 0x44a   : > { %v4302_v34 = vadd.f32 %v7531_v35, %v4282_v63 }
 0x44c   : > { %v4350_v3 = vadd.f32 %v5314_v48, %v4302_v34 }
 0x44e   : > { %v4366_v57 = vmax.f32 %v4350_v3, 0.0  ;;  %v5393_v3 = vld [vmem:[%s6300_s6 + $0x30] sm:$0xff]  }
 0x44f   : > { %v4245_v41 = vpop.f32.mrf.mxu3 }
 0x450   : > { %v5347_v51 = vpack.c.bf16 %v4366_v57, %v4365_v52  ;;  %v4283_v50 = vmul.f32 %v7521_v13, %v4245_v41  ;;  %v5333_v57 = vunpack.c.l.bf16 %v5393_v3 }
 0x452   : > { %5395 = vst [vmem:[%s6395_s19 + $0x8] sm:$0xff] %v5347_v51   ;;  %v4303_v44 = vadd.f32 %v7531_v35, %v4283_v50  ;;  %v5334_v50 = vunpack.c.h.bf16 %v5393_v3 }
 0x454   : > { %v4351_v10 = vadd.f32 %v5317_v19, %v4303_v44 }
 0x456   : > { %v4367_v46 = vmax.f32 %v4351_v10, 0.0 }
 0x457   : > { %v4247_v39 = vpop.f32.mrf.mxu3 }
 0x458   : > { %v4284_v32 = vmul.f32 %v7521_v13, %v4247_v39 }
 0x45a   : > { %v4304_v6 = vadd.f32 %v7531_v35, %v4284_v32 }
 0x45c   : > { %v4352_v7 = vadd.f32 %v5318_v43, %v4304_v6 }
 0x45e   : > { %v4368_v0 = vmax.f32 %v4352_v7, 0.0  ;;  %v5394_v7 = vld [vmem:[%s6300_s6 + $0x38] sm:$0xff]   ;;  %s4427_s6 = sshll.u32 %s6395_s19, 4  ;;  %s4428_s6 = int_to_ptr.vmem [resolvable:$true] %s4427_s6 }
 0x45f   : > { %v4250_v1 = vpop.f32.mrf.mxu3 }
 0x460   : > { %v5352_v40 = vpack.c.bf16 %v4368_v0, %v4367_v46  ;;  %v4285_v28 = vmul.f32 %v7521_v13, %v4250_v1  ;;  %v5337_v0 = vunpack.c.l.bf16 %v5394_v7 }
 0x462   : > { %5396 = vst [vmem:[%s6395_s19 + $0x10] sm:$0xff] %v5352_v40   ;;  %v4305_v15 = vadd.f32 %v7531_v35, %v4285_v28  ;;  %v5338_v28 = vunpack.c.h.bf16 %v5394_v7 }
 0x464   : > { %v4353_v17 = vadd.f32 %v5321_v56, %v4305_v15 }
 0x466   : > { %v4369_v38 = vmax.f32 %v4353_v17, 0.0 }
 0x467   : > { %v4252_v53 = vpop.f32.mrf.mxu3 }
 0x468   : > { %v4286_v5 = vmul.f32 %v7521_v13, %v4252_v53 }
 0x46a   : > { %v4306_v12 = vadd.f32 %v7531_v35, %v4286_v5 }
 0x46c   : > { %v4354_v37 = vadd.f32 %v5322_v55, %v4306_v12 }
 0x46e   : > { %v4370_v18 = vmax.f32 %v4354_v37, 0.0 }
 0x46f   : > { %v4255_v25 = vpop.f32.mrf.mxu3 }
 0x470   : > { %v5357_v24 = vpack.c.bf16 %v4370_v18, %v4369_v38  ;;  %v4287_v61 = vmul.f32 %v7521_v13, %v4255_v25 }
 0x472   : > { %5397 = vst [vmem:[%s6395_s19 + $0x18] sm:$0xff] %v5357_v24   ;;  %v4307_v8 = vadd.f32 %v7531_v35, %v4287_v61 }
 0x474   : > { %v4355_v4 = vadd.f32 %v5325_v20, %v4307_v8 }
 0x476   : > { %v4371_v58 = vmax.f32 %v4355_v4, 0.0 }
 0x477   : > { %v4257_v54 = vpop.f32.mrf.mxu3 }
 0x478   : > { %v4288_v31 = vmul.f32 %v7521_v13, %v4257_v54 }
 0x47a   : > { %v4308_v47 = vadd.f32 %v7531_v35, %v4288_v31 }
 0x47c   : > { %v4356_v11 = vadd.f32 %v5326_v29, %v4308_v47 }
 0x47e   : > { %v4372_v59 = vmax.f32 %v4356_v11, 0.0 }
 0x47f   : > { %v4260_v49 = vpop.f32.mrf.mxu3 }
 0x480   : > { %v5362_v2 = vpack.c.bf16 %v4372_v59, %v4371_v58  ;;  %v4289_v30 = vmul.f32 %v7521_v13, %v4260_v49 }
 0x482   : > { %5398 = vst [vmem:[%s6395_s19 + $0x20] sm:$0xff] %v5362_v2   ;;  %v4309_v42 = vadd.f32 %v7531_v35, %v4289_v30 }
 0x484   : > { %v4357_v16 = vadd.f32 %v5329_v14, %v4309_v42 }
 0x486   : > { %v4373_v62 = vmax.f32 %v4357_v16, 0.0 }
 0x487   : > { %v4262_v21 = vpop.f32.mrf.mxu3 }
 0x488   : > { %v4290_v9 = vmul.f32 %v7521_v13, %v4262_v21 }
 0x48a   : > { %v4310_v36 = vadd.f32 %v7531_v35, %v4290_v9 }
 0x48c   : > { %v4358_v23 = vadd.f32 %v5330_v27, %v4310_v36 }
 0x48e   : > { %v4374_v63 = vmax.f32 %v4358_v23, 0.0 }
 0x48f   : > { %v4265_v48 = vpop.f32.mrf.mxu3 }
 0x490   : > { %v5367_v45 = vpack.c.bf16 %v4374_v63, %v4373_v62  ;;  %v4291_v34 = vmul.f32 %v7521_v13, %v4265_v48 }
 0x492   : > { %5399 = vst [vmem:[%s6395_s19 + $0x28] sm:$0xff] %v5367_v45   ;;  %v4311_v52 = vadd.f32 %v7531_v35, %v4291_v34 }
 0x494   : > { %v4359_v33 = vadd.f32 %v5333_v57, %v4311_v52 }
 0x496   : > { %v4375_v39 = vmax.f32 %v4359_v33, 0.0 }
 0x497   : > { %v4267_v41 = vpop.f32.mrf.mxu3 }
 0x498   : > { %v4292_v51 = vmul.f32 %v7521_v13, %v4267_v41 }
 0x49a   : > { %v4312_v44 = vadd.f32 %v7531_v35, %v4292_v51 }
 0x49c   : > { %v4360_v19 = vadd.f32 %v5334_v50, %v4312_v44 }
 0x49e   : > { %v4376_v32 = vmax.f32 %v4360_v19, 0.0 }
 0x49f   : > { %v4270_v43 = vpop.f32.mrf.mxu3 }
 0x4a0   : > { %v5372_v10 = vpack.c.bf16 %v4376_v32, %v4375_v39  ;;  %v4293_v6 = vmul.f32 %v7521_v13, %v4270_v43 }
 0x4a2   : > { %5400 = vst [vmem:[%s6395_s19 + $0x30] sm:$0xff] %v5372_v10   ;;  %v4313_v46 = vadd.f32 %v7531_v35, %v4293_v6 }
 0x4a4   : > { %v4361_v60 = vadd.f32 %v5337_v0, %v4313_v46 }
 0x4a6   : > { %v4377_v53 = vmax.f32 %v4361_v60, 0.0 }
 0x4a7   : > { %v4272_v1 = vpop.f32.mrf.mxu3 }
 0x4a8   : > { %v4294_v40 = vmul.f32 %v7521_v13, %v4272_v1 }
 0x4aa   : > { %v4314_v15 = vadd.f32 %v7531_v35, %v4294_v40 }
 0x4ac   : > { %v4362_v56 = vadd.f32 %v5338_v28, %v4314_v15 }
 0x4ae   : > { %v4378_v5 = vmax.f32 %v4362_v56, 0.0 }
 0x4b0   : > { %v5377_v55 = vpack.c.bf16 %v4378_v5, %v4377_v53 }
 0x4b2   : > { %5401 = vst [vmem:[%s6395_s19 + $0x38] sm:$0xff] %v5377_v55  }
 0x4b3   : > { %5814 = shalt.err (!%p5811_p13)
}
 0x4b4   : > { %s5960_s24 = smov 64   ;;  %s5961_s19 = smov 4  }
 0x4b5   : > { %5444 = dma.vmem_to_hbm [thread:$0]  (%p6231_p5), %s4428_s6, 1024, %s4430_s12, %s4412_s25, %s5960_s24, %s5960_s24, %s5961_s19  }
 0x4b6 PF: > { %p5477_p12 = scmp.ge.s32.totalorder %s5949_s16, 2  ;;  %s4444_s10 = sand.u32 1, %s5921_s27  }
 0x4b7   : > { %s4445_s4 = scalar_lea.sflag [#allocation5], %s4444_s10 }
 0x4b8   : > { %p5467_p7 = pnand %p5477_p12, %p6235_p11 }
 0x4ba   : > { %p5468_p6 = pneg %p5467_p7 }
 0x4bc   : > { %5892 = dma.done.wait (%p5468_p6), %s4445_s4, 1024  }
 0x4bd   : > { %5894 = vsyncadd (%p5468_p6), %s4445_s4, 4294966272  ;;  %s33_s16 = sadd.s32 1, %s5949_s16   ;;  %s8045_s21 = sld [smem:[#allocation22_spill]] }
 0x4be   : > { %p7641_p1 = scmp.ge.s32.totalorder %s33_s16, 6   ;;  %s8046_s24 = sld [smem:[#allocation23_spill]] }
 0x4bf   : > { %s8047_s25 = sld [smem:[#allocation24_spill]]  ;;  %s8055_s22 = smov %s5905_s23 }
 0x4c0   : > { %s8048_s26 = sld [smem:[#allocation36_spill]]  ;;  %s8056_s23 = smov %s6277_s11 }
 0x4c1   : > { %s8049_s5 = sld [smem:[#allocation25_spill]]  ;;  %s8057_s27 = smov %s5925_s28 }
 0x4c2   : > { %s8050_s29 = sld [smem:[#allocation37_spill]] }
 0x4c3   : > { %s8051_s30 = sld [smem:[#allocation28_spill]]  ;;  %32 = sbr.rel (!%p7641_p1) target bundleno = 28 (0x1c), region = 157 }
 0x4c4   : > { %s8052_s13 = sld [smem:[#allocation29_spill]] }
 0x4c5   : > { %s8053_s14 = sld [smem:[#allocation31_spill]] }
 0x4c6   : > { %s8054_s15 = sld [smem:[#allocation32_spill]] }
 0x4c7   : > { %s8058_s28 = smov %s8049_s5 }
 0x4c8   :  { %4451 = vsyncpa [#allocation4], 1 }
 0x4c9   :  { %4453 = vsyncpa [#allocation4 + $0x1], 1 }
 0x4ca   :  { %4454 = vsyncpa [#allocation7], 1 }
 0x4cb   :  { %4456 = vsyncpa [#allocation7 + $0x1], 1 }
 0x4cc   :  { %4457 = vsyncpa [#allocation10], 1 }
 0x4cd   :  { %4458 = vsyncpa [#allocation13], 1 }
 0x4ce   :  { %4459 = vsyncpa [#allocation5], 1 }
 0x4cf   :  { %4461 = vsyncpa [#allocation5 + $0x1], 1 }

// kernel: tpu_custom_call.1
= control target key start
LH: loop header
LB: loop body
LE: loop exit
PB: predicated region body
PF: predicated region fallthrough
CT: control target
= control target key end

     0   :  { %s7688_s0 = inlined_call_operand.hbm [shape: bf16[2,16,16,128], index: 0, kind: input, shape index: {}]   ;;  %s7689_s1 = inlined_call_operand.hbm [shape: bf16[2,16,16,128], index: 1, kind: input, shape index: {}]   ;;  %s7690_s2 = inlined_call_operand.hbm [shape: bf16[2,16,16,128], index: 2, kind: input, shape index: {}]   ;;  %s7691_s3 = inlined_call_operand.hbm [shape: bf16[128,128], index: 3, kind: input, shape index: {}]   ;;  %s7692_s4 = inlined_call_operand.vmem [shape: f32[1,128], index: 4, kind: input, shape index: {}]   ;;  %s7693_s5 = inlined_call_operand.vmem [shape: f32[1,128], index: 5, kind: input, shape index: {}]   ;;  %s7694_s6 = inlined_call_operand.hbm [shape: bf16[1152,128], index: 6, kind: input, shape index: {}]   ;;  %s7695_s7 = inlined_call_operand.vmem [shape: f32[1,128], index: 7, kind: input, shape index: {}]   ;;  %s7696_s8 = inlined_call_operand.vmem [shape: f32[1,128], index: 8, kind: input, shape index: {}]   ;;  %s7697_s9 = inlined_call_operand.hbm [shape: bf16[128,128], index: 9, kind: input, shape index: {}]   ;;  %s7698_s10 = inlined_call_operand.vmem [shape: f32[1,128], index: 10, kind: input, shape index: {}]   ;;  %s7699_s11 = inlined_call_operand.vmem [shape: f32[1,128], index: 11, kind: input, shape index: {}]   ;;  %s7700_s12 = inlined_call_operand.hbm [shape: bf16[2,16,16,128], index: 12, kind: output, shape index: {}]  }
   0x1   :  { %7776 = sst [smem:[#allocation47_spill]] %s7688_s0 }
   0x2   :  { %7777 = sst [smem:[#allocation48_spill]] %s7689_s1 }
   0x3   :  { %7778 = sst [smem:[#allocation49_spill]] %s7690_s2 }
   0x4   :  { %7779 = sst [smem:[#allocation50_spill]] %s7691_s3 }
   0x5   :  { %7780 = sst [smem:[#allocation51_spill]] %s7692_s4 }
   0x6   :  { %7781 = sst [smem:[#allocation52_spill]] %s7693_s5 }
   0x7   :  { %7782 = sst [smem:[#allocation53_spill]] %s7694_s6 }
   0x8   :  { %7783 = sst [smem:[#allocation54_spill]] %s7695_s7 }
   0x9   :  { %7784 = sst [smem:[#allocation55_spill]] %s7696_s8 }
   0xa   :  { %7785 = sst [smem:[#allocation56_spill]] %s7697_s9 }
   0xb   :  { %7786 = sst [smem:[#allocation57_spill]] %s7698_s10 }
   0xc   :  { %7787 = sst [smem:[#allocation58_spill]] %s7699_s11 }
   0xd   :  { %7788 = sst [smem:[#allocation59_spill]] %s7700_s12 }
   0xe   :  { %17 = vsyncpa [#allocation4], 0 }
   0xf   :  { %19 = vsyncpa [#allocation4 + $0x1], 0 }
  0x10   :  { %20 = vsyncpa [#allocation7], 0 }
  0x11   :  { %22 = vsyncpa [#allocation7 + $0x1], 0 }
  0x12   :  { %23 = vsyncpa [#allocation10], 0 }
  0x13   :  { %24 = vsyncpa [#allocation13], 0 }
  0x14   :  { %25 = vsyncpa [#allocation5], 0 }
  0x15   :  { %27 = vsyncpa [#allocation5 + $0x1], 0  ;;  %s6027_s21 = smov 0   ;;  %s6029_s22 = smov 0  }
  0x16   :  { %s6031_s23 = smov 0   ;;  %s6033_s24 = smov 0  }
  0x17   :  { %s6035_s25 = smov 0   ;;  %s6037_s26 = smov 0  }
  0x18   :  { %s6039_s27 = smov 0   ;;  %s6041_s28 = smov 0  }
  0x19   :  { %s6043_s29 = smov 0   ;;  %s6045_s30 = smov 0  }
  0x1a   :  { %s6047_s13 = smov 0   ;;  %s6049_s14 = smov 0  }
  0x1b   :  { %s6051_s15 = smov 0   ;;  %s6053_s16 = smov 0  }
  0x1c LB: > { %7789 = sst [smem:[#allocation21_spill]] %s5897_s21  ;;  %s6098_s17 = sadd.s32 4294967295, %s5949_s16   ;;  %s5949_s16 = sphi %s6053_s16, %s33_s16   ;;  %s5945_s15 = sphi %s6051_s15, %s8054_s15   ;;  %s5941_s14 = sphi %s6049_s14, %s8053_s14   ;;  %s5937_s13 = sphi %s6047_s13, %s8052_s13   ;;  %s5933_s30 = sphi %s6045_s30, %s8051_s30   ;;  %s5929_s29 = sphi %s6043_s29, %s8050_s29   ;;  %s5925_s28 = sphi %s6041_s28, %s8058_s28   ;;  %s5921_s27 = sphi %s6039_s27, %s8057_s27   ;;  %s5917_s26 = sphi %s6037_s26, %s8048_s26   ;;  %s5913_s25 = sphi %s6035_s25, %s8047_s25   ;;  %s5909_s24 = sphi %s6033_s24, %s8046_s24   ;;  %s5905_s23 = sphi %s6031_s23, %s8056_s23   ;;  %s5901_s22 = sphi %s6029_s22, %s8055_s22   ;;  %s5897_s21 = sphi %s6027_s21, %s8045_s21  }
  0x1d   : > { %7790 = sst [smem:[#allocation22_spill]] %s5901_s22  ;;  %p4606_p0 = scmp.ge.s32.totalorder %s5949_s16, 1 }
  0x1e   : > { %7791 = sst [smem:[#allocation23_spill]] %s5913_s25  ;;  %p68_p1 = scmp.eq.s32.totalorder %s6098_s17, 0 }
  0x1f   : > { %7792 = sst [smem:[#allocation24_spill]] %s5917_s26  ;;  %p367_p2 = scmp.lt.s32.totalorder %s5949_s16, 5 }
  0x20   : > { %7793 = sst [smem:[#allocation25_spill]] %s5929_s29  ;;  %s7702_s18 = smov 64  }
  0x21   : > { %7794 = sst [smem:[#allocation26_spill]] %s5933_s30  ;;  %p6106_p3 = pnand %p4606_p0, %p367_p2 }
  0x22   : > { %7795 = sst [smem:[#allocation27_spill]] %s5937_s13  ;;  %s5951_s13 = smov [#allocation9]  }
  0x23   : > { %7796 = sst [smem:[#allocation28_spill]] %s5941_s14  ;;  %p5446_p4 = pneg %p6106_p3 }
  0x24   : > { %7797 = sst [smem:[#allocation29_spill]] %s5945_s15  ;;  %s380_s11 = sshll.u32 %s5951_s13, 4  ;;  %s381_s11 = int_to_ptr.vmem [resolvable:$true] %s380_s11 }
  0x25   : > { %s7798_s3 = sld [smem:[#allocation50_spill]]  ;;  %p6114_p5 = pnand %p5446_p4, %p68_p1 }
  0x26   : > { %s7799_s12 = scalar_select %p6106_p3, 1, 0 }
  0x27   : > { %s7704_s19 = smov 4   ;;  %s45_s8 = sadd.s32 1, %s5945_s15 }
  0x28   : > { %7800 = sst [smem:[#allocation30_spill]] %s7799_s12  ;;  %p62_p7 = scmp.eq.s32.totalorder %s5949_s16, 0 }
  0x29   : > { %s4600_s13 = sshll.u32 %s5941_s14, 3  ;;  %p97_p12 = scmp.ne.s32.totalorder %s5917_s26, %s5913_s25 }
  0x2a   : > { %s4601_s30 = sadd.s32 4294967295, %s4600_s13  ;;  %p103_p0 = scmp.ne.s32.totalorder %s5913_s25, %s5909_s24 }
  0x2b   : > { %s378_s20 = sshll.u32 %s7798_s3, 4  ;;  %s42_s3 = sadd.s32 1, %s5941_s14  ;;  %s379_s20 = int_to_ptr.hbm [resolvable:$true] %s378_s20 }
  0x2c   : > { %5449 = dma.hbm_to_vmem [thread:$0]  (!%p6114_p5), %s379_s20, 1024, %s381_s11, [#allocation10], %s7702_s18, %s7702_s18, %s7704_s19  }
  0x2d   : > { %p43_p6 = scmp.ge.s32.totalorder %s42_s3, 2  ;;  %p79_p9 = scmp.gt.s32.totalorder %s4601_s30, 0 }
  0x2e   : > { %s90_s20 = sadd.s32 1, %s5917_s26  ;;  %p6148_p13 = por %p97_p12, %p62_p7 }
  0x2f   : > { %s8060_s3 = smov (%p43_p6, %s42_s3), 0  ;;  %s8062_s8 = smov (!%p43_p6, %s45_s8), %s5945_s15 }
  0x30   : > { %7802 = sst [smem:[#allocation31_spill]] %s8060_s3  ;;  %s50_s7 = ssub.s32 %s5941_s14, %s8060_s3 }
  0x31   : > { %p47_p8 = scmp.ge.s32.totalorder %s8062_s8, 2  ;;  %s4602_s11 = sshll.u32 %s8060_s3, 3 }
  0x32   : > { %s8066_s30 = smov (!%p79_p9, %s4601_s30), 0  ;;  %s4603_s19 = sadd.s32 4294967295, %s4602_s11 }
  0x33   : > { %s8064_s8 = smov (%p47_p8, %s8062_s8), 0  ;;  %p83_p10 = scmp.gt.s32.totalorder %s4603_s19, 0 }
  0x34   : > { %7803 = sst [smem:[#allocation32_spill]] %s8064_s8  ;;  %s6138_s18 = ssub.s32 %s5945_s15, %s8064_s8 }
  0x35   : > { %7804 = sst [smem:[#allocation33_spill]] %s6138_s18  ;;  %s6141_s5 = sor.u32 %s50_s7, %s6138_s18 }
  0x36   : > { %p52_p11 = scmp.eq.s32.totalorder %s6141_s5, 0  ;;  %s8068_s19 = smov (!%p83_p10, %s4603_s19), 0 }
  0x37   : > { %s86_s8 = ssub.s32 %s8066_s30, %s8068_s19  ;;  %s6154_s4 = sadd.s32 8, %s4600_s13 }
  0x38   : > { %7806 = sst [smem:[#allocation34_spill]] %s6154_s4  ;;  %s87_s7 = sor.u32 %s86_s8, %s6138_s18 }
  0x39   : > { %p6159_p2 = por %p103_p0, %p68_p1  ;;  %p88_p4 = scmp.eq.s32.totalorder %s87_s7, 0 }
  0x3a   : > { %p115_p6 = scmp.lt.s32.totalorder %s6154_s4, 15  ;;  %s6164_s2 = sadd.s32 8, %s4602_s11 }
  0x3b   : > { %s7807_s12 = scalar_select %p6159_p2, 1, 0 }
  0x3c   : > { %p7720_p8 = scmp.lt.s32.totalorder %s5949_s16, 4  ;;  %s6172_s24 = sshll.u32 %s5945_s15, 5 }
  0x3d   : > { %7808 = sst [smem:[#allocation35_spill]] %s7807_s12  ;;  %s465_s8 = sand.u32 1, %s5949_s16  }
  0x3e   : > { %s6168_s0 = scalar_select %p88_p4, %s5917_s26, %s90_s20  }
  0x3f   : > { %s467_s19 = sand.u32 1, %s5917_s26   ;;  %s4619_s25 = sshll.u32 %s8066_s30, 1 }
  0x40   : > { %7809 = sst [smem:[#allocation36_spill]] %s6168_s0  ;;  %s4616_s13 = sshll.u32 %s467_s19, 3 }
  0x41   : > { %s478_s18 = sadd.s32 %s4619_s25, %s6172_s24  ;;  %s469_s12 = scalar_lea.vmem [#allocation6], %s4616_s13 }
  0x42   : > { %s483_s7 = sshll.u32 %s469_s12, 4  ;;  %s4621_s21 = sshll.u32 %s478_s18, 2  ;;  %s484_s7 = int_to_ptr.vmem [resolvable:$true] %s483_s7 }
  0x43   : > { %s7810_s1 = sld [smem:[#allocation48_spill]]  ;;  %p5460_p10 = pnand %p7720_p8, %p6148_p13 }
  0x44   : > { %s7811_s6 = sld [smem:[#allocation53_spill]]  ;;  %s6187_s12 = scalar_lea.sflag [#allocation7], %s465_s8 }
  0x45   : > { %s7812_s25 = smov 4   ;;  %s7813_s18 = smov 64  }
  0x46   : > { %s5954_s0 = smov [#allocation11]   ;;  %s7814_s9 = sld [smem:[#allocation56_spill]] }
  0x47   : > { %s400_s3 = sshll.u32 %s5954_s0, 4  ;;  %s5955_s15 = smov [#allocation12]   ;;  %s401_s3 = int_to_ptr.vmem [resolvable:$true] %s400_s3 }
  0x48   : > { %s420_s8 = sshll.u32 %s5955_s15, 4  ;;  %s4599_s19 = sadd.s32 4294967294, %s5949_s16   ;;  %s421_s8 = int_to_ptr.vmem [resolvable:$true] %s420_s8 }
  0x49   : > { %s480_s4 = scalar_lea.hbm %s7810_s1, %s4621_s21  ;;  %s54_s13 = sadd.s32 1, %s5929_s29 }
  0x4a   : > { %s481_s20 = sshll.u32 %s480_s4, 4  ;;  %s398_s30 = sshll.u32 %s7811_s6, 4  ;;  %s482_s20 = int_to_ptr.hbm [resolvable:$true] %s481_s20  ;;  %s399_s30 = int_to_ptr.hbm [resolvable:$true] %s398_s30 }
  0x4b   : > { %5462 = dma.hbm_to_vmem [thread:$0]  (!%p5460_p10), %s482_s20, 128, %s484_s7, %s6187_s12, %s7813_s18, %s7813_s18, %s7812_s25  }
  0x4c   : > { %s418_s22 = sshll.u32 %s7814_s9, 4  ;;  %p61_p12 = scmp.ne.s32.totalorder %s5929_s29, %s5925_s28  ;;  %s419_s22 = int_to_ptr.hbm [resolvable:$true] %s418_s22 }
  0x4d   : > { %5452 = dma.hbm_to_vmem [thread:$0]  (!%p6114_p5), %s399_s30, 9216, %s401_s3, [#allocation10], %s7813_s18, %s7813_s18, %s7812_s25  }
  0x4e   : > { %5455 = dma.hbm_to_vmem [thread:$0]  (!%p6114_p5), %s419_s22, 1024, %s421_s8, [#allocation13], %s7813_s18, %s7813_s18, %s7812_s25  }
  0x4f   : > { %s6213_s7 = scalar_select %p52_p11, %s5929_s29, %s54_s13  }
  0x50   : > { %p6217_p13 = por %p62_p7, %p61_p12  ;;  %p67_p0 = scmp.ne.s32.totalorder %s5925_s28, %s5921_s27 }
  0x51   : > { %7815 = sst [smem:[#allocation37_spill]] %s6213_s7  ;;  %p354_p4 = scmp.eq.s32.totalorder %s6098_s17, 3 }
  0x52   : > { %p360_p10 = scmp.eq.s32.totalorder %s4599_s19, 3  ;;  %p6226_p9 = por %p68_p1, %p67_p0 }
  0x53   : > { %s440_s20 = sand.u32 1, %s5929_s29   ;;  %p6231_p5 = por %p354_p4, %p61_p12 }
  0x54   : > { %s7819_s30 = sld [smem:[#allocation34_spill]]  ;;  %p6235_p11 = por %p360_p10, %p67_p0 }
  0x55   : > { %s4611_s3 = sshll.u32 %s440_s20, 6  ;;  %s7821_s4 = sld [smem:[#allocation22_spill]] }
  0x56   : > { %s5136_s21 = sshll.u32 %s5941_s14, 4  ;;  %s7822_s22 = sld [smem:[#allocation21_spill]] }
  0x57   : > { %s450_s15 = sadd.s32 %s5136_s21, %s6172_s24  ;;  %s444_s8 = scalar_lea.vmem [#allocation3], %s4611_s3 }
  0x58   : > { %s455_s19 = sshll.u32 %s444_s8, 4  ;;  %s7823_s13 = sld [smem:[#allocation33_spill]]  ;;  %s456_s19 = int_to_ptr.vmem [resolvable:$true] %s455_s19 }
  0x59   : > { %s4615_s1 = sshll.u32 %s450_s15, 2  ;;  %s7824_s7 = sld [smem:[#allocation47_spill]] }
  0x5a   : > { %p5457_p12 = pnand %p7720_p8, %p6217_p13  ;;  %s441_s14 = scalar_lea.sflag [#allocation4], %s440_s20 }
  0x5b   : > { %s126_s3 = sadd.s32 1, %s5905_s23  ;;  %s8070_s30 = smov (!%p115_p6, %s7819_s30), 15 }
  0x5c   : > { %p7825_p0 = scmp.lt.s32.totalorder %s6164_s2, 15  ;;  %p133_p4 = scmp.ne.s32.totalorder %s5905_s23, %s7821_s4 }
  0x5d   : > { %p139_p10 = scmp.ne.s32.totalorder %s7821_s4, %s7822_s22  ;;  %s495_s6 = sand.u32 1, %s5905_s23  }
  0x5e   : > { %s8072_s2 = smov (!%p7825_p0, %s6164_s2), 15  ;;  %p6266_p13 = por %p133_p4, %p62_p7 }
  0x5f   : > { %s452_s29 = scalar_lea.hbm %s7824_s7, %s4615_s1  ;;  %s122_s1 = ssub.s32 %s8070_s30, %s8072_s2 }
  0x60   : > { %s453_s26 = sshll.u32 %s452_s29, 4  ;;  %s123_s9 = sor.u32 %s122_s1, %s7823_s13  ;;  %s454_s26 = int_to_ptr.hbm [resolvable:$true] %s453_s26 }
  0x61   : > { %5459 = dma.hbm_to_vmem [thread:$0]  (!%p5457_p12), %s454_s26, 1024, %s456_s19, %s441_s14, %s7813_s18, %s7813_s18, %s7812_s25  }
  0x62   : > { %p124_p8 = scmp.eq.s32.totalorder %s123_s9, 0  ;;  %p6272_p12 = por %p139_p10, %p68_p1 }
  0x63   : > { %s4622_s14 = sshll.u32 %s495_s6, 3  ;;  %s4624_s7 = sshll.u32 %s8070_s30, 1 }
  0x64   : > { %s6277_s11 = scalar_select %p124_p8, %s5905_s23, %s126_s3  }
  0x65   : > { %s506_s2 = sadd.s32 %s4624_s7, %s6172_s24  ;;  %s497_s4 = scalar_lea.vmem [#allocation8], %s4622_s14 }
  0x66   : > { %s4626_s20 = sshll.u32 %s506_s2, 2  ;;  %s511_s21 = sshll.u32 %s497_s4, 4  ;;  %s512_s21 = int_to_ptr.vmem [resolvable:$true] %s511_s21 }
  0x67   : > { %s7828_s8 = sld [smem:[#allocation49_spill]]  ;;  %p7829_p7 = scmp.lt.s32.totalorder %s5949_s16, 4 }
  0x69   : > { %p5463_p6 = pnand %p7829_p7, %p6266_p13 }
  0x6b   : > { %523 = sbr.rel (%p6106_p3) target bundleno = 1206 (0x4b6), region = 68 }
  0x6d   : > { %s508_s19 = scalar_lea.hbm %s7828_s8, %s4626_s20 }
  0x6e   : > { %s509_s13 = sshll.u32 %s508_s19, 4  ;;  %s510_s13 = int_to_ptr.hbm [resolvable:$true] %s509_s13 }
  0x6f   : > { %5465 = dma.hbm_to_vmem [thread:$0]  (!%p5463_p6), %s510_s13, 128, %s512_s21, %s6187_s12, %s7813_s18, %s7813_s18, %s7812_s25  }
  0x70   : > { %s6294_s24 = sand.u32 1, %s5925_s28  }
  0x71   : > { %s4628_s3 = sshll.u32 %s6294_s24, 6  ;;  %s526_s1 = scalar_lea.sflag [#allocation4], %s6294_s24 }
  0x72   : > { %s6300_s6 = scalar_lea.vmem [#allocation3], %s4628_s3 }
  0x73   : > { %5872 = dma.done.wait (%p6226_p9), %s526_s1, 1024  }
  0x74   : > { %5874 = vsyncadd (%p6226_p9), %s526_s1, 4294966272  ;;  %s7831_s12 = sld [smem:[#allocation23_spill]]  ;;  %s535_s18 = sand.u32 1, %s6098_s17  }
  0x75   : > { %s536_s14 = scalar_lea.sflag [#allocation7], %s535_s18 }
  0x7a   : > { %s537_s9 = sand.u32 1, %s7831_s12  }
  0x7b   : > { %s6308_s29 = sshll.u32 %s537_s9, 3 }
  0x7c   : > { %s539_s7 = scalar_lea.vmem [#allocation6], %s6308_s29 }
  0x7d   : > { %5876 = dma.done.wait (%p6159_p2), %s536_s14, 128  }
  0x7e   : > { %5878 = vsyncadd (%p6159_p2), %s536_s14, 4294967168  ;;  %s7833_s2 = sld [smem:[#allocation22_spill]] }
  0x84   : > { %s547_s20 = sand.u32 1, %s7833_s2  }
  0x85   : > { %s6316_s10 = sshll.u32 %s547_s20, 3 }
  0x86   : > { %s549_s4 = scalar_lea.vmem [#allocation8], %s6316_s10 }
  0x87   : > { %5880 = dma.done.wait (%p6272_p12), %s536_s14, 128  }
  0x88   : > { %5882 = vsyncadd (%p6272_p12), %s536_s14, 4294967168 }
  0x89   : > { %5884 = dma.done.wait (%p68_p1), [#allocation10], 10240  }
  0x8a   : > { %5886 = vsyncadd (%p68_p1), [#allocation10], 4294957056 }
  0x8b   : > { %5888 = dma.done.wait (%p68_p1), [#allocation13], 1024  }
  0x8c   : > { %5890 = vsyncadd (%p68_p1), [#allocation13], 4294966272  ;;  %v7748_v0 = vmov 0   ;;  %v5156_v1 = vld [vmem:[#allocation9 + $0x38] sm:$0xff]  ;;  %v5155_v2 = vld [vmem:[#allocation9 + $0x30] sm:$0xff]  ;;  %s7834_s21 = sld [smem:[#allocation51_spill]] }
  0x8d   : > { %900 = vst [vmem:[#allocation2] sm:$0xf] %v7748_v0  ;;  %773 = vmatpush.bf16.msra.mxu0 %v5156_v1  ;;  %v5154_v3 = vld [vmem:[#allocation9 + $0x28] sm:$0xff]  ;;  %v5153_v4 = vld [vmem:[#allocation9 + $0x20] sm:$0xff]  ;;  %v5152_v5 = vld [vmem:[#allocation9 + $0x18] sm:$0xff]  ;;  %s7835_s8 = sld [smem:[#allocation52_spill]] }
  0x8e   : > { %901 = vst [vmem:[#allocation2 + $0x54] sm:$0xf] %v7748_v0  ;;  %v5151_v6 = vld [vmem:[#allocation9 + $0x10] sm:$0xff]  ;;  %v5150_v7 = vld [vmem:[#allocation9 + $0x8] sm:$0xff]  ;;  %v5149_v8 = vld [vmem:[#allocation9] sm:$0xff]  ;;  %s6395_s19 = scalar_lea.vmem [#allocation14], %s4628_s3 }
  0x8f   : > { %v5139_v9 = vld [vmem:[%s539_s7] sm:$0xff]  ;;  %v5142_v12 = vld [vmem:[%s6300_s6 + $0x10] sm:$0xff]  ;;  %v5143_v13 = vld [vmem:[%s6300_s6 + $0x18] sm:$0xff]  ;;  %s7836_s13 = sld [smem:[#allocation26_spill]] }
  0x90   : > { %v5140_v10 = vld [vmem:[%s6300_s6] sm:$0xff]  ;;  %v5141_v11 = vld [vmem:[%s6300_s6 + $0x8] sm:$0xff]  ;;  %v5146_v16 = vld [vmem:[%s6300_s6 + $0x30] sm:$0xff] }
  0x91   : > { %774 = vmatpush.bf16.msra.mxu0 %v5155_v2  ;;  %v5144_v14 = vld [vmem:[%s6300_s6 + $0x20] sm:$0xff]  ;;  %v5145_v15 = vld [vmem:[%s6300_s6 + $0x28] sm:$0xff]  ;;  %v5147_v19 = vld [vmem:[%s6300_s6 + $0x38] sm:$0xff] }
  0x92   : > { %v6343_v17 = vld [vmem:[%s7834_s21] ss:$0 sm:$0xff]  ;;  %v5148_v27 = vld [vmem:[%s549_s4] sm:$0xff] }
  0x93   : > { %v6348_v18 = vld [vmem:[%s7835_s8] ss:$0 sm:$0xff] }
  0x95   : > { %775 = vmatpush.bf16.msra.mxu0 %v5154_v3  ;;  %p4707_p1 = scmp.ne.s32.totalorder %s7836_s13, 0 }
  0x99   : > { %776 = vmatpush.bf16.msra.mxu0 %v5153_v4 }
  0x9d   : > { %777 = vmatpush.bf16.msra.mxu0 %v5152_v5 }
  0xa1   : > { %778 = vmatpush.bf16.msra.mxu0 %v5151_v6 }
  0xa5   : > { %779 = vmatpush.bf16.msra.mxu0 %v5150_v7 }
  0xa9   : > { %780 = vmatpush.bf16.msra.mxu0 %v5149_v8 }
  0xac   : > { %781 = vmatmul.bf16.vlgmr.msra.gmra.mxu0 %v5139_v9 }
  0xbc   : > { %786 = vmatmul.bf16.gmra.mxu0 %v5140_v10 }
  0xcc   : > { %791 = vmatmul.bf16.gmra.mxu0 %v5141_v11 }
  0xdc   : > { %796 = vmatmul.bf16.gmra.mxu0 %v5142_v12 }
  0xec   : > { %801 = vmatmul.bf16.gmra.mxu0 %v5143_v13 }
  0xfc   : > { %806 = vmatmul.bf16.gmra.mxu0 %v5144_v14 }
 0x10c   : > { %811 = vmatmul.bf16.gmra.mxu0 %v5145_v15 }
 0x11c   : > { %816 = vmatmul.bf16.gmra.mxu0 %v5146_v16 }
 0x129   : > { %v782_v20 = vpop.f32.mrf.mxu0 }
 0x12a   : > { %v836_v21 = vmul.f32 %v6343_v17, %v782_v20 }
 0x12c   : > { %v860_v22 = vadd.f32 %v6348_v18, %v836_v21  ;;  %821 = vmatmul.bf16.gmra.mxu0 %v5147_v19 }
 0x12e   : > { %v880_v23 = vmax.f32 %v860_v22, 0.0 }
 0x130   : > { %v902_v24 = vpack.c.bf16 %v880_v23, %v880_v23 }
 0x131   : > { %v784_v25 = vpop.f32.mrf.mxu0 }
 0x132   : > { %922 = vst [vmem:[#allocation2 + $0x4] sm:$0xf] %v902_v24  ;;  %v837_v26 = vmul.f32 %v6343_v17, %v784_v25 }
 0x134   : > { %v861_v29 = vadd.f32 %v6348_v18, %v837_v26 }
 0x136   : > { %v881_v32 = vmax.f32 %v861_v29, 0.0 }
 0x139   : > { %v787_v28 = vpop.f32.mrf.mxu0 }
 0x13a   : > { %v838_v30 = vmul.f32 %v6343_v17, %v787_v28 }
 0x13c   : > { %v862_v31 = vadd.f32 %v6348_v18, %v838_v30  ;;  %826 = vmatmul.bf16.gmra.mxu0 %v5148_v27 }
 0x13e   : > { %v882_v33 = vmax.f32 %v862_v31, 0.0 }
 0x140   : > { %v5265_v34 = vpack.c.bf16 %v882_v33, %v881_v32 }
 0x141   : > { %v789_v35 = vpop.f32.mrf.mxu0 }
 0x142   : > { %5379 = vst [vmem:[#allocation2 + $0x8] sm:$0xff] %v5265_v34   ;;  %v839_v36 = vmul.f32 %v6343_v17, %v789_v35 }
 0x144   : > { %v863_v38 = vadd.f32 %v6348_v18, %v839_v36 }
 0x146   : > { %v883_v41 = vmax.f32 %v863_v38, 0.0 }
 0x149   : > { %v792_v37 = vpop.f32.mrf.mxu0 }
 0x14a   : > { %v840_v39 = vmul.f32 %v6343_v17, %v792_v37 }
 0x14c   : > { %v864_v40 = vadd.f32 %v6348_v18, %v840_v39 }
 0x14e   : > { %v884_v42 = vmax.f32 %v864_v40, 0.0 }
 0x150   : > { %v5270_v43 = vpack.c.bf16 %v884_v42, %v883_v41 }
 0x151   : > { %v794_v44 = vpop.f32.mrf.mxu0 }
 0x152   : > { %5380 = vst [vmem:[#allocation2 + $0x10] sm:$0xff] %v5270_v43   ;;  %v841_v45 = vmul.f32 %v6343_v17, %v794_v44 }
 0x154   : > { %v865_v47 = vadd.f32 %v6348_v18, %v841_v45 }
 0x156   : > { %v885_v50 = vmax.f32 %v865_v47, 0.0 }
 0x159   : > { %v797_v46 = vpop.f32.mrf.mxu0 }
 0x15a   : > { %v842_v48 = vmul.f32 %v6343_v17, %v797_v46 }
 0x15c   : > { %v866_v49 = vadd.f32 %v6348_v18, %v842_v48 }
 0x15e   : > { %v886_v51 = vmax.f32 %v866_v49, 0.0 }
 0x160   : > { %v5275_v52 = vpack.c.bf16 %v886_v51, %v885_v50 }
 0x161   : > { %v799_v53 = vpop.f32.mrf.mxu0 }
 0x162   : > { %5381 = vst [vmem:[#allocation2 + $0x18] sm:$0xff] %v5275_v52   ;;  %v843_v54 = vmul.f32 %v6343_v17, %v799_v53 }
 0x164   : > { %v867_v56 = vadd.f32 %v6348_v18, %v843_v54 }
 0x166   : > { %v887_v59 = vmax.f32 %v867_v56, 0.0 }
 0x169   : > { %v802_v55 = vpop.f32.mrf.mxu0 }
 0x16a   : > { %v844_v57 = vmul.f32 %v6343_v17, %v802_v55 }
 0x16c   : > { %v868_v58 = vadd.f32 %v6348_v18, %v844_v57 }
 0x16e   : > { %v888_v60 = vmax.f32 %v868_v58, 0.0 }
 0x170   : > { %v5280_v61 = vpack.c.bf16 %v888_v60, %v887_v59 }
 0x171   : > { %v804_v62 = vpop.f32.mrf.mxu0 }
 0x172   : > { %5382 = vst [vmem:[#allocation2 + $0x20] sm:$0xff] %v5280_v61   ;;  %v845_v63 = vmul.f32 %v6343_v17, %v804_v62 }
 0x174   : > { %v869_v2 = vadd.f32 %v6348_v18, %v845_v63 }
 0x176   : > { %v889_v5 = vmax.f32 %v869_v2, 0.0 }
 0x179   : > { %v807_v1 = vpop.f32.mrf.mxu0 }
 0x17a   : > { %v846_v3 = vmul.f32 %v6343_v17, %v807_v1 }
 0x17c   : > { %v870_v4 = vadd.f32 %v6348_v18, %v846_v3 }
 0x17e   : > { %v890_v6 = vmax.f32 %v870_v4, 0.0 }
 0x180   : > { %v5285_v7 = vpack.c.bf16 %v890_v6, %v889_v5 }
 0x181   : > { %v809_v8 = vpop.f32.mrf.mxu0 }
 0x182   : > { %5383 = vst [vmem:[#allocation2 + $0x28] sm:$0xff] %v5285_v7   ;;  %v847_v9 = vmul.f32 %v6343_v17, %v809_v8 }
 0x184   : > { %v871_v11 = vadd.f32 %v6348_v18, %v847_v9 }
 0x186   : > { %v891_v14 = vmax.f32 %v871_v11, 0.0 }
 0x189   : > { %v812_v10 = vpop.f32.mrf.mxu0 }
 0x18a   : > { %v848_v12 = vmul.f32 %v6343_v17, %v812_v10 }
 0x18c   : > { %v872_v13 = vadd.f32 %v6348_v18, %v848_v12 }
 0x18e   : > { %v892_v15 = vmax.f32 %v872_v13, 0.0 }
 0x190   : > { %v5290_v16 = vpack.c.bf16 %v892_v15, %v891_v14 }
 0x191   : > { %v814_v19 = vpop.f32.mrf.mxu0 }
 0x192   : > { %5384 = vst [vmem:[#allocation2 + $0x30] sm:$0xff] %v5290_v16   ;;  %v849_v20 = vmul.f32 %v6343_v17, %v814_v19 }
 0x194   : > { %v873_v22 = vadd.f32 %v6348_v18, %v849_v20 }
 0x196   : > { %v893_v25 = vmax.f32 %v873_v22, 0.0 }
 0x199   : > { %v817_v21 = vpop.f32.mrf.mxu0 }
 0x19a   : > { %v850_v23 = vmul.f32 %v6343_v17, %v817_v21 }
 0x19c   : > { %v874_v24 = vadd.f32 %v6348_v18, %v850_v23 }
 0x19e   : > { %v894_v26 = vmax.f32 %v874_v24, 0.0 }
 0x1a0   : > { %v5295_v27 = vpack.c.bf16 %v894_v26, %v893_v25 }
 0x1a1   : > { %v819_v28 = vpop.f32.mrf.mxu0 }
 0x1a2   : > { %5385 = vst [vmem:[#allocation2 + $0x38] sm:$0xff] %v5295_v27   ;;  %v851_v29 = vmul.f32 %v6343_v17, %v819_v28 }
 0x1a4   : > { %v875_v31 = vadd.f32 %v6348_v18, %v851_v29 }
 0x1a6   : > { %v895_v34 = vmax.f32 %v875_v31, 0.0 }
 0x1a9   : > { %v822_v30 = vpop.f32.mrf.mxu0 }
 0x1aa   : > { %v852_v32 = vmul.f32 %v6343_v17, %v822_v30 }
 0x1ac   : > { %v876_v33 = vadd.f32 %v6348_v18, %v852_v32 }
 0x1ae   : > { %v896_v35 = vmax.f32 %v876_v33, 0.0 }
 0x1b0   : > { %v5300_v36 = vpack.c.bf16 %v896_v35, %v895_v34 }
 0x1b1   : > { %v824_v37 = vpop.f32.mrf.mxu0 }
 0x1b2   : > { %5386 = vst [vmem:[#allocation2 + $0x40] sm:$0xff] %v5300_v36   ;;  %v853_v38 = vmul.f32 %v6343_v17, %v824_v37 }
 0x1b4   : > { %v877_v40 = vadd.f32 %v6348_v18, %v853_v38 }
 0x1b6   : > { %v897_v43 = vmax.f32 %v877_v40, 0.0 }
 0x1b9   : > { %v827_v39 = vpop.f32.mrf.mxu0 }
 0x1ba   : > { %v854_v41 = vmul.f32 %v6343_v17, %v827_v39 }
 0x1bc   : > { %v878_v42 = vadd.f32 %v6348_v18, %v854_v41 }
 0x1be   : > { %v898_v44 = vmax.f32 %v878_v42, 0.0 }
 0x1c0   : > { %v5305_v45 = vpack.c.bf16 %v898_v44, %v897_v43 }
 0x1c1   : > { %v829_v46 = vpop.f32.mrf.mxu0 }
 0x1c2   : > { %5387 = vst [vmem:[#allocation2 + $0x48] sm:$0xff] %v5305_v45   ;;  %v855_v47 = vmul.f32 %v6343_v17, %v829_v46 }
 0x1c4   : > { %v879_v48 = vadd.f32 %v6348_v18, %v855_v47 }
 0x1c6   : > { %v899_v49 = vmax.f32 %v879_v48, 0.0  ;;  %945 = sbr.rel (%p4707_p1) target bundleno = 462 (0x1ce), region = 96 }
 0x1c8   : > { %v921_v50 = vpack.c.bf16 %v899_v49, %v899_v49 }
 0x1ca   : > { %941 = vst [vmem:[#allocation2 + $0x50] sm:$0xf] %v921_v50 }
 0x1cb   : > { %v5957_v51 = vmov 0  }
 0x1cc   : > { %946 = vst [vmem:[#allocation2 + $0x4] sm:$0xf] %v5957_v51 }
 0x1cd   : > { %947 = vst [vmem:[#allocation2 + $0x8] sm:$0xf] %v5957_v51 }
 0x1ce PF: > { %s7837_s30 = sld [smem:[#allocation26_spill]] }
 0x1d4   : > { %p4708_p3 = scmp.ne.s32.totalorder %s7837_s30, 1 }
 0x1d6   : > { %951 = sbr.rel (%p4708_p3) target bundleno = 478 (0x1de), region = 100 }
 0x1db   : > { %v5958_v52 = vmov 0  }
 0x1dc   : > { %952 = vst [vmem:[#allocation2 + $0x4c] sm:$0xf] %v5958_v52 }
 0x1dd   : > { %953 = vst [vmem:[#allocation2 + $0x50] sm:$0xf] %v5958_v52 }
 0x1de PF: > { %v5180_v17 = vld [vmem:[#allocation11 + $0x78] sm:$0xff]  ;;  %v954_v54 = vlaneseq  ;;  %v5179_v56 = vld [vmem:[#allocation11 + $0x70] sm:$0xff]  ;;  %v5178_v1 = vld [vmem:[#allocation11 + $0x68] sm:$0xff]  ;;  %vm1276_vm3 = vsmask.f32 3328  ;;  %v6417_v15 = vunpack.c.l.b16 %v7748_v0  ;;  %vm5959_vm5 = vmmov 1  }
 0x1df   : > { %v5172_v18 = vld [vmem:[#allocation11 + $0x38] sm:$0xff]  ;;  %1702 = vmatpush.bf16.msra.mxu1 %v5180_v17  ;;  %v5171_v57 = vld [vmem:[#allocation11 + $0x30] sm:$0xff]  ;;  %v5170_v2 = vld [vmem:[#allocation11 + $0x28] sm:$0xff]  ;;  %vm1277_vm4 = vsmask.f32 7440  ;;  %v6440_v33 = vunpack.c.h.b16 %v7748_v0  ;;  %s8022_s12 = sld [smem:[#allocation54_spill]] }
 0x1e0   : > { %v5236_v53 = vld [vmem:[#allocation11 + $0x1b8] sm:$0xff]  ;;  %1931 = vmatpush.bf16.msra.mxu2 %v5172_v18  ;;  %v6399_v58 = vshrl.u32 %v954_v54, 7  ;;  %v5235_v59 = vld [vmem:[#allocation11 + $0x1b0] sm:$0xff]  ;;  %v5234_v4 = vld [vmem:[#allocation11 + $0x1a8] sm:$0xff]  ;;  %vm2061_vm13 = vsmask.f32 256 }
 0x1e1   : > { %v5188_v55 = vld [vmem:[#allocation11 + $0xb8] sm:$0xff]  ;;  %3574 = vmatpush.bf16.msrb.mxu0 %v5236_v53  ;;  %v5187_v60 = vld [vmem:[#allocation11 + $0xb0] sm:$0xff]  ;;  %v5186_v5 = vld [vmem:[#allocation11 + $0xa8] sm:$0xff]  ;;  %vm2062_vm14 = vsmask.f32 4368  ;;  %s8023_s9 = sld [smem:[#allocation55_spill]] }
 0x1e2   : > { %2527 = vmatpush.bf16.msra.mxu3 %v5188_v55  ;;  %v957_v61 = vadd.s32 16, %v6399_v58  ;;  %v975_v62 = vand.u32 15, %v6399_v58  ;;  %v956_v63 = vadd.s32 8, %v6399_v58  ;;  %v958_v3 = vadd.s32 24, %v6399_v58  ;;  %v5177_v9 = vld [vmem:[#allocation11 + $0x60] sm:$0xff]  ;;  %vm1245_vm6 = vmpackc.low %vm5959_vm5, %vm5959_vm5  ;;  %v5176_v22 = vld [vmem:[#allocation11 + $0x58] sm:$0xff] }
 0x1e3   : > { %1703 = vmatpush.bf16.msra.mxu1 %v5179_v56  ;;  %v5169_v10 = vld [vmem:[#allocation11 + $0x20] sm:$0xff]  ;;  %v6425_v20 = vadd.s32 32, %v6399_v58  ;;  %v6428_v21 = vadd.s32 40, %v6399_v58  ;;  %v5168_v23 = vld [vmem:[#allocation11 + $0x18] sm:$0xff]  ;;  %v1261_v24 = vsel %vm1245_vm6, 65537, %v7748_v0  ;;  %v5175_v38 = vld [vmem:[#allocation11 + $0x50] sm:$0xff] }
 0x1e4   : > { %1932 = vmatpush.bf16.msra.mxu2 %v5171_v57  ;;  %v989_v6 = vand.u32 15, %v957_v61  ;;  %vm6405_vm0 = vcmp.gt.s32.totalorder %v975_v62, 0  ;;  %v982_v8 = vand.u32 15, %v956_v63  ;;  %v996_v11 = vand.u32 15, %v958_v3  ;;  %v5233_v12 = vld [vmem:[#allocation11 + $0x1a0] sm:$0xff]  ;;  %v5232_v28 = vld [vmem:[#allocation11 + $0x198] sm:$0xff]  ;;  %vm6454_vm12 = vmor %vm1276_vm3, %vm1277_vm4 }
 0x1e5   : > { %3575 = vmatpush.bf16.msrb.mxu0 %v5235_v59  ;;  %v5185_v13 = vld [vmem:[#allocation11 + $0xa0] sm:$0xff]  ;;  %vm1244_vm2 = vmpackc.low %vm6405_vm0, %vm6405_vm0  ;;  %v5184_v29 = vld [vmem:[#allocation11 + $0x98] sm:$0xff]  ;;  %v1289_v31 = vshll.u32 %v1261_v24, 16  ;;  %v1293_v32 = vshrl.u32 %v1261_v24, 16  ;;  %v1003_v42 = vand.u32 15, %v6425_v20  ;;  %v1010_v43 = vand.u32 15, %v6428_v21 }
 0x1e6   : > { %2528 = vmatpush.bf16.msra.mxu3 %v5187_v60  ;;  %vm6409_vm1 = vcmp.gt.s32.totalorder %v989_v6, 0  ;;  %v1260_v16 = vsel %vm1244_vm2, 65537, %v7748_v0  ;;  %vm6420_vm7 = vcmp.lt.s32.totalorder %v982_v8, 15  ;;  %vm6434_vm9 = vcmp.lt.s32.totalorder %v996_v11, 15  ;;  %v5167_v39 = vld [vmem:[#allocation11 + $0x10] sm:$0xff]  ;;  %v5174_v61 = vld [vmem:[#allocation11 + $0x48] sm:$0xff] }
 0x1e7   : > { %1704 = vmatpush.bf16.msra.mxu1 %v5178_v1  ;;  %vm1246_vm8 = vmpackc.low %vm6409_vm1, %vm6409_vm1  ;;  %v1280_v25 = vshll.u32 %v1260_v16, 16  ;;  %v1283_v26 = vshrl.u32 %v1260_v16, 16  ;;  %v6445_v40 = vrot.slane %v1289_v31, 5  ;;  %v1295_v41 = vrot.slane %v1293_v32, 4  ;;  %v5231_v44 = vld [vmem:[#allocation11 + $0x190] sm:$0xff]  ;;  %v5166_v62 = vld [vmem:[#allocation11 + $0x8] sm:$0xff] }
 0x1e8   : > { %1933 = vmatpush.bf16.msra.mxu2 %v5170_v2  ;;  %v1262_v30 = vsel %vm1246_vm8, 65537, %v7748_v0  ;;  %vm2030_vm10 = vmpackc.low %vm6420_vm7, %vm6420_vm7  ;;  %v5183_v45 = vld [vmem:[#allocation11 + $0x90] sm:$0xff]  ;;  %v1195_v53 = vld [vmem:[#allocation2] sm:$0x8]  ;;  %v2067_v56 = vrot.slane %v1293_v32, 7  ;;  %s8029_s7 = sld [smem:[#allocation57_spill]] }
 0x1e9   : > { %3576 = vmatpush.bf16.msrb.mxu0 %v5234_v4  ;;  %v1282_v34 = vrot.slane %v1280_v25, 5  ;;  %v1285_v35 = vrot.slane %v1283_v26, 4  ;;  %v1299_v36 = vshll.u32 %v1262_v30, 16  ;;  %v1303_v37 = vshrl.u32 %v1262_v30, 16  ;;  %vm2032_vm11 = vmpackc.low %vm6434_vm9, %vm6434_vm9  ;;  %v5182_v6 = vld [vmem:[#allocation11 + $0x88] sm:$0xff]  ;;  %v5165_v24 = vld [vmem:[#allocation11] sm:$0xff] }
 0x1ea   : > { %2529 = vmatpush.bf16.msra.mxu3 %v5186_v5  ;;  %v1296_v51 = vor.u32 %v1295_v41, %v6445_v40  ;;  %v6465_v17 = vsel %vm2030_vm10, 65537, %v7748_v0  ;;  %v6473_v18 = vsel %vm2032_vm11, 65537, %v7748_v0  ;;  %v6488_v3 = vor.u32 %v2067_v56, %v1289_v31  ;;  %v5230_v5 = vld [vmem:[#allocation11 + $0x188] sm:$0xff]  ;;  %v3345_v11 = vld [vmem:[#allocation2 + $0x10] sm:$0x8]  ;;  %s8030_s10 = sld [smem:[#allocation58_spill]] }
 0x1eb   : > { %1705 = vmatpush.bf16.msra.mxu1 %v5177_v9  ;;  %v1286_v46 = vor.u32 %v1285_v35, %v1282_v34  ;;  %v1301_v47 = vrot.slane %v1299_v36, 5  ;;  %v1305_v48 = vrot.slane %v1303_v37, 4  ;;  %v1438_v49 = vunpack.c.l.b16 %v1282_v34  ;;  %v1197_v25 = vld [vmem:[#allocation2 + $0x8] sm:$0xf]  ;;  %v3348_v31 = vld [vmem:[#allocation2 + $0x1c] sm:$0xf] }
 0x1ec   : > { %1934 = vmatpush.bf16.msra.mxu2 %v5169_v10  ;;  %v1439_v52 = vunpack.c.h.b16 %v1282_v34  ;;  %v6476_v57 = vrot.slane %v1296_v51, 4  ;;  %v2073_v59 = vshrl.u32 %v6465_v17, 16  ;;  %v2076_v60 = vshll.u32 %v6465_v17, 16  ;;  %v5229_v35 = vld [vmem:[#allocation11 + $0x180] sm:$0xff]  ;;  %v5157_v51 = vld [vmem:[#allocation2 + $0x4] sm:$0xff]  ;;  %s8040_s4 = sld [smem:[#allocation26_spill]] }
 0x1ed   : > { %3577 = vmatpush.bf16.msrb.mxu0 %v5233_v12  ;;  %v1287_v54 = vrot.slane %v1286_v46, 4  ;;  %v1306_v55 = vor.u32 %v1305_v48, %v1301_v47  ;;  %vm1442_vm15 = vcmp.ne.s32.totalorder %v1438_v49, %v6417_v15  ;;  %v6490_v4 = vrot.slane %v2067_v56, 4  ;;  %v5173_v12 = vld [vmem:[#allocation11 + $0x40] sm:$0xff]  ;;  %v5212_v46 = vld [vmem:[#allocation11 + $0x138] sm:$0xff]  ;;  %s8041_s17 = sld [smem:[#allocation27_spill]]  ;;  %s4412_s25 = scalar_lea.sflag [#allocation5], %s6294_s24 }
 0x1ee   : > { %2530 = vmatpush.bf16.msra.mxu3 %v5185_v13  ;;  %vm1443_vm0 = vcmp.ne.s32.totalorder %v1439_v52, %v6440_v33  ;;  %v1302_v7 = vsel %vm6454_vm12, %v6476_v57, %v1301_v47  ;;  %v1196_v13 = vld [vmem:[#allocation2 + $0x4] sm:$0xf]  ;;  %v2075_v34 = vrot.slane %v2073_v59, 7  ;;  %v5181_v36 = vld [vmem:[#allocation11 + $0x80] sm:$0xff]  ;;  %v5204_v49 = vld [vmem:[#allocation11 + $0xf8] sm:$0xff]  ;;  %s8042_s30 = sld [smem:[#allocation59_spill]] }
 0x1ef   : > { %1706 = vmatpush.bf16.msra.mxu1 %v5176_v22  ;;  %v1292_v63 = vsel %vm6454_vm12, %v1287_v54, %v6445_v40  ;;  %v1307_v1 = vrot.slane %v1306_v55, 4  ;;  %vm6484_vm1 = vmpackc.low %vm1443_vm0, %vm1442_vm15  ;;  %v1452_v16 = vunpack.c.l.b16 %v1302_v7  ;;  %v1453_v19 = vunpack.c.h.b16 %v1302_v7  ;;  %v1994_v50 = vld [vmem:[#allocation2 + $0x3c] sm:$0xf]  ;;  %v3064_v37 = vld [vmem:[#allocation2 + $0x10] sm:$0xf] }
 0x1f0   : > { %1935 = vmatpush.bf16.msra.mxu2 %v5168_v23  ;;  %v1445_v8 = vunpack.c.l.b16 %v1292_v63  ;;  %v1446_v9 = vunpack.c.h.b16 %v1292_v63  ;;  %v1557_v10 = vsel %vm6484_vm1, %v1195_v53, 0  ;;  %v3346_v23 = vld [vmem:[#allocation2 + $0x14] sm:$0xf]  ;;  %v3362_v32 = vsel %vm6484_vm1, %v3345_v11, 0  ;;  %vm6540_vm0 = vmor %vm2061_vm13, %vm2062_vm14 }
 0x1f1   : > { %3578 = vmatpush.bf16.msrb.mxu0 %v5232_v28  ;;  %v1312_v14 = vsel %vm6454_vm12, %v1307_v1, %v6445_v40  ;;  %v1768_v22 = vunpack.c.l.b16 %v1557_v10  ;;  %v3347_v28 = vld [vmem:[#allocation2 + $0x18] sm:$0xf]  ;;  %vm1456_vm5 = vcmp.ne.s32.totalorder %v1452_v16, %v6417_v15  ;;  %vm1457_vm6 = vcmp.ne.s32.totalorder %v1453_v19, %v6440_v33 }
 0x1f2   : > { %2531 = vmatpush.bf16.msra.mxu3 %v5184_v29  ;;  %vm1449_vm2 = vcmp.ne.s32.totalorder %v1445_v8, %v6417_v15  ;;  %vm1450_vm3 = vcmp.ne.s32.totalorder %v1446_v9, %v6440_v33  ;;  %v1459_v26 = vunpack.c.l.b16 %v1312_v14  ;;  %v1460_v27 = vunpack.c.h.b16 %v1312_v14  ;;  %v1198_v29 = vld [vmem:[#allocation2 + $0xc] sm:$0xf]  ;;  %vm6510_vm7 = vmpackc.low %vm1457_vm6, %vm1456_vm5  ;;  %s5261_s26 = sshll.u32 %s8040_s4, 4 }
 0x1f3   : > { %1707 = vmatpush.bf16.msra.mxu1 %v5175_v38  ;;  %vm6502_vm4 = vmpackc.low %vm1450_vm3, %vm1449_vm2  ;;  %v3364_v47 = vsel %vm6510_vm7, %v3347_v28, 0  ;;  %v3412_v48 = vunpack.c.l.b16 %v3362_v32  ;;  %vm7721_vm11 = vsmask.f32 4352  ;;  %vm6534_vm15 = vcmp.gt.s32.totalorder %v1003_v42, 0  ;;  %s5128_s21 = sshll.u32 %s8041_s17, 5 }
 0x1f4   : > { %1936 = vmatpush.bf16.msra.mxu2 %v5167_v39  ;;  %vm1463_vm8 = vcmp.ne.s32.totalorder %v1459_v26, %v6417_v15  ;;  %vm1464_vm9 = vcmp.ne.s32.totalorder %v1460_v27, %v6440_v33  ;;  %v1558_v38 = vsel %vm6502_vm4, %v1196_v13, 0  ;;  %v3363_v39 = vsel %vm6502_vm4, %v3346_v23, 0  ;;  %vm1248_vm3 = vmpackc.low %vm6534_vm15, %vm6534_vm15  ;;  %s4424_s22 = sadd.s32 %s5261_s26, %s5128_s21  ;;  %s8043_s3 = smov %s8042_s30 }
 0x1f5   : > { %3579 = vmatpush.bf16.msrb.mxu0 %v5231_v44  ;;  %vm6520_vm10 = vmpackc.low %vm1464_vm9, %vm1463_vm8  ;;  %v1559_v44 = vsel %vm6510_vm7, %v1197_v25, 0  ;;  %v3413_v55 = vunpack.c.l.b16 %v3363_v39  ;;  %v2078_v20 = vor.u32 %v2076_v60, %v2075_v34  ;;  %v2080_v42 = vrot.slane %v2075_v34, 4  ;;  %s5129_s15 = sshll.u32 %s4424_s22, 2 }
 0x1f6   : > { %2532 = vmatpush.bf16.msra.mxu3 %v5183_v45  ;;  %v1769_v45 = vunpack.c.l.b16 %v1558_v38  ;;  %v1560_v52 = vsel %vm6520_vm10, %v1198_v29, 0  ;;  %v1770_v53 = vunpack.c.l.b16 %v1559_v44  ;;  %v3365_v54 = vsel %vm6520_vm10, %v3348_v31, 0  ;;  %s4426_s1 = scalar_lea.hbm %s8042_s30, %s5129_s15 }
 0x1f7   : > { %1708 = vmatpush.bf16.msra.mxu1 %v5174_v61  ;;  %v1771_v59 = vunpack.c.l.b16 %v1560_v52  ;;  %v3415_v63 = vunpack.c.l.b16 %v3365_v54  ;;  %v2079_v13 = vsel %vm6540_vm0, %v6490_v4, %v2078_v20  ;;  %v2088_v17 = vsel %vm6540_vm0, %v2080_v42, %v6488_v3 }
 0x1f8   : > { %1937 = vmatpush.bf16.msra.mxu2 %v5166_v62  ;;  %v1785_v61 = vpack.c.b16 %v1769_v45, %v1768_v22  ;;  %v3414_v62 = vunpack.c.l.b16 %v3364_v47  ;;  %v2207_v38 = vunpack.c.l.b16 %v6488_v3  ;;  %v2208_v39 = vunpack.c.h.b16 %v6488_v3  ;;  %v5211_v45 = vld [vmem:[#allocation11 + $0x130] sm:$0xff]  ;;  %v1980_v47 = vld [vmem:[#allocation2 + $0x4] sm:$0xf] }
 0x1f9   : > { %3580 = vmatpush.bf16.msrb.mxu0 %v5230_v5  ;;  %v3429_v5 = vpack.c.b16 %v3413_v55, %v3412_v48  ;;  %v1786_v7 = vpack.c.b16 %v1771_v59, %v1770_v53  ;;  %v2214_v44 = vunpack.c.l.b16 %v2079_v13  ;;  %v1981_v53 = vld [vmem:[#allocation2 + $0x8] sm:$0xf]  ;;  %v7860_v59 = vmov 0 }
 0x1fa   : > { %2533 = vmatpush.bf16.msra.mxu3 %v5182_v6  ;;  %v2091_v6 = vshrl.u32 %v6473_v18, 16  ;;  %v1796_v8 = vshrl.u32 %v1785_v61, 16  ;;  %v1799_v9 = vshll.u32 %v1785_v61, 16  ;;  %v3430_v10 = vpack.c.b16 %v3415_v63, %v3414_v62  ;;  %v1982_v62 = vld [vmem:[#allocation2 + $0xc] sm:$0xf] }
 0x1fb   : > { %1709 = vmatpush.bf16.msra.mxu1 %v5173_v12  ;;  %v3439_v11 = vshrl.u32 %v3429_v5, 16  ;;  %v3442_v12 = vshll.u32 %v3429_v5, 16  ;;  %v1804_v16 = vshrl.u32 %v1786_v7, 16  ;;  %v1807_v19 = vshll.u32 %v1786_v7, 16 }
 0x1fc   : > { %1938 = vmatpush.bf16.msra.mxu2 %v5165_v24  ;;  %v1798_v60 = vrot.slane %v1796_v8, 3  ;;  %v1801_v14 = vrot.slane %v1799_v9, 4  ;;  %v3447_v24 = vshrl.u32 %v3430_v10, 16  ;;  %v3450_v25 = vshll.u32 %v3430_v10, 16 }
 0x1fd   : > { %3581 = vmatpush.bf16.msrb.mxu0 %v5229_v35  ;;  %v3441_v22 = vrot.slane %v3439_v11, 3  ;;  %v3444_v23 = vrot.slane %v3442_v12, 4  ;;  %v1806_v27 = vrot.slane %v1804_v16, 3  ;;  %v1809_v28 = vrot.slane %v1807_v19, 4 }
 0x1fe   : > { %2534 = vmatpush.bf16.msra.mxu3 %v5181_v36  ;;  %1710 = vmatmul.bf16.vlgmr.msra.gmra.mxu1 %v5157_v51  ;;  %v1802_v26 = vor.u32 %v1801_v14, %v1798_v60  ;;  %v6553_v29 = vrot.slane %v2091_v6, 7  ;;  %v3449_v32 = vrot.slane %v3447_v24, 3  ;;  %v3452_v34 = vrot.slane %v3450_v25, 4  ;;  %v1983_v6 = vld [vmem:[#allocation2 + $0x10] sm:$0xf] }
 0x1ff   : > { %2821 = vmatpush.bf16.msrb.mxu1 %v5204_v49  ;;  %v3445_v31 = vor.u32 %v3444_v23, %v3441_v22  ;;  %v2094_v35 = vshll.u32 %v6473_v18, 16  ;;  %v6556_v36 = vor.u32 %v1809_v28, %v1806_v27  ;;  %v2215_v49 = vunpack.c.h.b16 %v2079_v13  ;;  %v5203_v18 = vld [vmem:[#allocation11 + $0xf0] sm:$0xff] }
 0x200   : > { %2998 = vmatpush.bf16.msrb.mxu2 %v5212_v46  ;;  %v6560_v46 = vor.u32 %v3452_v34, %v3449_v32  ;;  %v2221_v51 = vunpack.c.l.b16 %v2088_v17  ;;  %vm2211_vm13 = vcmp.ne.s32.totalorder %v2207_v38, %v6417_v15  ;;  %vm2212_vm14 = vcmp.ne.s32.totalorder %v2208_v39, %v6440_v33 }
 0x201   : > { %v2096_v48 = vor.u32 %v2094_v35, %v6553_v29  ;;  %v1811_v52 = vsel %vm7721_vm11, %v1802_v26, %v6556_v36  ;;  %vm2218_vm2 = vcmp.ne.s32.totalorder %v2214_v44, %v6417_v15  ;;  %vm6576_vm5 = vmpackc.low %vm2212_vm14, %vm2211_vm13  ;;  %vm2219_vm6 = vcmp.ne.s32.totalorder %v2215_v49, %v6440_v33  ;;  %v3349_v49 = vld [vmem:[#allocation2 + $0x20] sm:$0xf] }
 0x202   : > { %1939 = vmatmul.bf16.vlgmr.msra.gmra.mxu2 %v1811_v52  ;;  %v3454_v54 = vsel %vm7721_vm11, %v3445_v31, %v6560_v46  ;;  %v7861_v59 = vsel %vm6576_vm5, 4294967295, %v7860_v59  ;;  %v2222_v61 = vunpack.c.h.b16 %v2088_v17  ;;  %vm6581_vm8 = vmpackc.low %vm2219_vm6, %vm2218_vm2  ;;  %vm2225_vm9 = vcmp.ne.s32.totalorder %v2221_v51, %v6417_v15  ;;  %v5158_v17 = vld [vmem:[#allocation2 + $0xc] sm:$0xff] }
 0x203   : > { %v2097_v55 = vsel %vm6540_vm0, %v6490_v4, %v2096_v48  ;;  %3582 = vmatmul.bf16.vlgmr.msrb.gmra.mxu0 %v3454_v54  ;;  %v2326_v42 = vsel %vm6576_vm5, %v1980_v47, 0  ;;  %2822 = vmatpush.bf16.msrb.mxu1 %v5203_v18  ;;  %v2327_v7 = vsel %vm6581_vm8, %v1981_v53, 0  ;;  %v7864_v9 = vmov 0  ;;  %v1199_v47 = vld [vmem:[#allocation2 + $0x10] sm:$0xf] }
 0x204   : > { %2999 = vmatpush.bf16.msrb.mxu2 %v5211_v45  ;;  %v2228_v5 = vunpack.c.l.b16 %v2097_v55  ;;  %v2229_v20 = vunpack.c.h.b16 %v2097_v55  ;;  %vm2226_vm13 = vcmp.ne.s32.totalorder %v2222_v61, %v6440_v33  ;;  %v2376_v8 = vunpack.c.l.b16 %v2326_v42  ;;  %v3819_v61 = vld [vmem:[#allocation2 + $0x20] sm:$0xf] }
 0x205   : > { %vm6591_vm14 = vmpackc.low %vm2226_vm13, %vm2225_vm9  ;;  %v2377_v10 = vunpack.c.l.b16 %v2327_v7  ;;  %vm7724_vm11 = vsmask.f32 7424  ;;  %v1264_v11 = vsel %vm1248_vm3, 65537, %v7748_v0  ;;  %v7866_v12 = vmov 0 }
 0x206   : > { %v7865_v9 = vsel %vm6591_vm14, 4294967295, %v7864_v9  ;;  %vm2232_vm2 = vcmp.ne.s32.totalorder %v2228_v5, %v6417_v15  ;;  %vm2233_vm6 = vcmp.ne.s32.totalorder %v2229_v20, %v6440_v33  ;;  %v2328_v13 = vsel %vm6591_vm14, %v1982_v62, 0 }
 0x207   : > { %vm6603_vm5 = vmpackc.low %vm2233_vm6, %vm2232_vm2  ;;  %v1319_v60 = vshll.u32 %v1264_v11, 16  ;;  %v1323_v14 = vshrl.u32 %v1264_v11, 16  ;;  %vm1184_vm9 = vcmp.lt.s32.totalorder %v1010_v43, 15  ;;  %v2378_v19 = vunpack.c.l.b16 %v2328_v13  ;;  %v3350_v13 = vld [vmem:[#allocation2 + $0x24] sm:$0xf] }
 0x208   : > { %v7867_v12 = vsel %vm6603_vm5, 4294967295, %v7866_v12  ;;  %v2329_v16 = vsel %vm6603_vm5, %v1983_v6, 0  ;;  %v2393_v56 = vpack.c.b16 %v2377_v10, %v2376_v8  ;;  %vm2034_vm15 = vmpackc.low %vm1184_vm9, %vm1184_vm9  ;;  %v2098_v22 = vrot.slane %v6553_v29, 4  ;;  %v1984_v6 = vld [vmem:[#allocation2 + $0x14] sm:$0xf] }
 0x209   : > { %v2379_v23 = vunpack.c.l.b16 %v2329_v16  ;;  %v1321_v24 = vrot.slane %v1319_v60, 5  ;;  %v1325_v25 = vrot.slane %v1323_v14, 4  ;;  %v2050_v26 = vsel %vm2034_vm15, 65537, %v7748_v0  ;;  %v1200_v10 = vld [vmem:[#allocation2 + $0x14] sm:$0xf] }
 0x20a   : > { %v2404_v27 = vshrl.u32 %v2393_v56, 16  ;;  %v2406_v28 = vshll.u32 %v2393_v56, 16  ;;  %v2106_v21 = vsel %vm6540_vm0, %v2098_v22, %v6488_v3  ;;  %v2109_v43 = vshrl.u32 %v2050_v26, 16  ;;  %v1985_v56 = vld [vmem:[#allocation2 + $0x18] sm:$0xf] }
 0x20b   : > { %v2394_v31 = vpack.c.b16 %v2379_v23, %v2378_v19  ;;  %v1322_v32 = vsel %vm6454_vm12, %v6476_v57, %v1321_v24  ;;  %v1326_v34 = vor.u32 %v1325_v25, %v1321_v24  ;;  %v2112_v29 = vshll.u32 %v2050_v26, 16 }
 0x20c   : > { %v2408_v35 = vrot.slane %v2406_v28, 1  ;;  %v1466_v38 = vunpack.c.l.b16 %v1322_v32  ;;  %v1467_v39 = vunpack.c.h.b16 %v1322_v32  ;;  %v6621_v44 = vrot.slane %v2109_v43, 7  ;;  %v5210_v43 = vld [vmem:[#allocation11 + $0x128] sm:$0xff] }
 0x20d   : > { %v2411_v45 = vshll.u32 %v2394_v31, 16  ;;  %v1327_v48 = vrot.slane %v1326_v34, 4  ;;  %v2235_v51 = vunpack.c.l.b16 %v2106_v21  ;;  %v2236_v52 = vunpack.c.h.b16 %v2106_v21  ;;  %3000 = vmatpush.bf16.msrb.mxu2 %v5210_v43 }
 0x20e   : > { %1715 = vmatmul.bf16.gmra.mxu1 %v5158_v17  ;;  %v2409_v53 = vor.u32 %v2408_v35, %v2404_v27  ;;  %vm1470_vm3 = vcmp.ne.s32.totalorder %v1466_v38, %v6417_v15  ;;  %vm1471_vm13 = vcmp.ne.s32.totalorder %v1467_v39, %v6440_v33  ;;  %v2114_v18 = vor.u32 %v2112_v29, %v6621_v44  ;;  %v5202_v29 = vld [vmem:[#allocation11 + $0xe8] sm:$0xff] }
 0x20f   : > { %v2413_v54 = vrot.slane %v2411_v45, 1  ;;  %v1332_v55 = vsel %vm6454_vm12, %v1327_v48, %v6445_v40  ;;  %vm6629_vm2 = vmpackc.low %vm1471_vm13, %vm1470_vm3  ;;  %vm2239_vm6 = vcmp.ne.s32.totalorder %v2235_v51, %v6417_v15  ;;  %vm2240_vm9 = vcmp.ne.s32.totalorder %v2236_v52, %v6440_v33  ;;  %2823 = vmatpush.bf16.msrb.mxu1 %v5202_v29 }
 0x210   : > { %v1473_v62 = vunpack.c.l.b16 %v1332_v55  ;;  %v1474_v5 = vunpack.c.h.b16 %v1332_v55  ;;  %v1561_v20 = vsel %vm6629_vm2, %v1199_v47, 0  ;;  %v3366_v42 = vsel %vm6629_vm2, %v3349_v49, 0  ;;  %vm6639_vm15 = vmpackc.low %vm2240_vm9, %vm2239_vm6  ;;  %v5159_v47 = vld [vmem:[#allocation2 + $0x14] sm:$0xff] }
 0x211   : > { %v7870_v7 = vmov 0  ;;  %v2414_v8 = vsel %vm7724_vm11, %v2409_v53, %v2413_v54  ;;  %v1772_v11 = vunpack.c.l.b16 %v1561_v20  ;;  %v2115_v17 = vsel %vm6540_vm0, %v6490_v4, %v2114_v18 }
 0x212   : > { %v7871_v7 = vsel %vm6639_vm15, 4294967295, %v7870_v7  ;;  %2535 = vmatmul.bf16.vlgmr.msra.gmra.mxu3 %v2414_v8  ;;  %vm1477_vm3 = vcmp.ne.s32.totalorder %v1473_v62, %v6417_v15  ;;  %vm1478_vm13 = vcmp.ne.s32.totalorder %v1474_v5, %v6440_v33  ;;  %v2242_v60 = vunpack.c.l.b16 %v2115_v17 }
 0x213   : > { %v2243_v14 = vunpack.c.h.b16 %v2115_v17  ;;  %vm6649_vm6 = vmpackc.low %vm1478_vm13, %vm1477_vm3  ;;  %v7872_v16 = vmov 0  ;;  %v3416_v19 = vunpack.c.l.b16 %v3366_v42  ;;  %v2330_v22 = vsel %vm6639_vm15, %v1984_v6, 0 }
 0x214   : > { %v7873_v16 = vsel %vm6649_vm6, 4294967295, %v7872_v16  ;;  %v2415_v23 = vshrl.u32 %v2394_v31, 16  ;;  %v961_v24 = vadd.s32 48, %v6399_v58  ;;  %v1562_v25 = vsel %vm6649_vm6, %v1200_v10, 0 }
 0x215   : > { %v3367_v26 = vsel %vm6649_vm6, %v3350_v13, 0  ;;  %vm2246_vm9 = vcmp.ne.s32.totalorder %v2242_v60, %v6417_v15  ;;  %vm2247_vm3 = vcmp.ne.s32.totalorder %v2243_v14, %v6440_v33  ;;  %v1773_v27 = vunpack.c.l.b16 %v1562_v25 }
 0x216   : > { %v3417_v28 = vunpack.c.l.b16 %v3367_v26  ;;  %vm6662_vm13 = vmpackc.low %vm2247_vm3, %vm2246_vm9  ;;  %v7874_v21 = vmov 0  ;;  %v2380_v32 = vunpack.c.l.b16 %v2330_v22  ;;  %v1017_v34 = vand.u32 15, %v961_v24 }
 0x217   : > { %v7875_v21 = vsel %vm6662_vm13, 4294967295, %v7874_v21  ;;  %v2331_v31 = vsel %vm6662_vm13, %v1985_v56, 0  ;;  %v1787_v35 = vpack.c.b16 %v1773_v27, %v1772_v11  ;;  %v2417_v45 = vor.u32 %v2415_v23, %v2413_v54 }
 0x218   : > { %v3431_v38 = vpack.c.b16 %v3417_v28, %v3416_v19  ;;  %v2381_v39 = vunpack.c.l.b16 %v2331_v31  ;;  %vm1169_vm11 = vcmp.gt.s32.totalorder %v1017_v34, 0  ;;  %v962_v48 = vadd.s32 56, %v6399_v58 }
 0x219   : > { %v2116_v49 = vrot.slane %v6621_v44, 4  ;;  %v963_v51 = vadd.s32 64, %v6399_v58  ;;  %v1813_v52 = vshrl.u32 %v1787_v35, 16  ;;  %v1816_v53 = vshll.u32 %v1787_v35, 16  ;;  %vm1250_vm9 = vmpackc.low %vm1169_vm11, %vm1169_vm11 }
 0x21a   : > { %v3456_v18 = vshrl.u32 %v3431_v38, 16  ;;  %v3459_v55 = vshll.u32 %v3431_v38, 16  ;;  %v2395_v62 = vpack.c.b16 %v2381_v39, %v2380_v32  ;;  %v1266_v5 = vsel %vm1250_vm9, 65537, %v7748_v0  ;;  %v1986_v38 = vld [vmem:[#allocation2 + $0x1c] sm:$0xf] }
 0x21b   : > { %v1024_v20 = vand.u32 15, %v962_v48  ;;  %v2124_v54 = vsel %vm6540_vm0, %v2116_v49, %v6488_v3  ;;  %v1815_v42 = vrot.slane %v1813_v52, 3  ;;  %v1818_v6 = vrot.slane %v1816_v53, 4 }
 0x21c   : > { %v3458_v8 = vrot.slane %v3456_v18, 3  ;;  %v3461_v44 = vrot.slane %v3459_v55, 4  ;;  %v2419_v10 = vshll.u32 %v2395_v62, 16  ;;  %v1339_v11 = vshll.u32 %v1266_v5, 16 }
 0x21d   : > { %v1343_v13 = vshrl.u32 %v1266_v5, 16  ;;  %vm1186_vm3 = vcmp.lt.s32.totalorder %v1024_v20, 15  ;;  %v6675_v17 = vor.u32 %v1818_v6, %v1815_v42  ;;  %v2249_v14 = vunpack.c.l.b16 %v2124_v54 }
 0x21e   : > { %1720 = vmatmul.bf16.gmra.mxu1 %v5159_v47  ;;  %v6677_v60 = vor.u32 %v3461_v44, %v3458_v8  ;;  %vm2036_vm11 = vmpackc.low %vm1186_vm3, %vm1186_vm3  ;;  %v2250_v19 = vunpack.c.h.b16 %v2124_v54  ;;  %v2421_v56 = vrot.slane %v2419_v10, 1  ;;  %v1341_v22 = vrot.slane %v1339_v11, 5  ;;  %v3351_v47 = vld [vmem:[#allocation2 + $0x28] sm:$0xf]  ;;  %v5209_v8 = vld [vmem:[#allocation11 + $0x120] sm:$0xff] }
 0x21f   : > { %v1345_v23 = vrot.slane %v1343_v13, 4  ;;  %v2052_v24 = vsel %vm2036_vm11, 65537, %v7748_v0  ;;  %vm7876_vm9 = vsmask.f32 4352  ;;  %vm7878_vm3 = vsmask.f32 7424  ;;  %3001 = vmatpush.bf16.msrb.mxu2 %v5209_v8 }
 0x220   : > { %v1820_v25 = vsel %vm7876_vm9, %v6556_v36, %v6675_v17  ;;  %vm7877_vm13 = vmmov %vm7876_vm9  ;;  %v2127_v27 = vshrl.u32 %v2052_v24, 16  ;;  %v2130_v28 = vshll.u32 %v2052_v24, 16  ;;  %v2422_v43 = vsel %vm7878_vm3, %v2417_v45, %v2421_v56  ;;  %v1202_v44 = vld [vmem:[#allocation2 + $0x1c] sm:$0xf]  ;;  %v3352_v11 = vld [vmem:[#allocation2 + $0x2c] sm:$0xf] }
 0x221   : > { %v3463_v26 = vsel %vm7877_vm13, %v6560_v46, %v6677_v60  ;;  %1944 = vmatmul.bf16.gmra.mxu2 %v1820_v25  ;;  %v1342_v31 = vsel %vm6454_vm12, %v6476_v57, %v1341_v22  ;;  %v1346_v32 = vor.u32 %v1345_v23, %v1341_v22  ;;  %v2423_v34 = vshrl.u32 %v2395_v62, 16  ;;  %v1201_v46 = vld [vmem:[#allocation2 + $0x18] sm:$0xf]  ;;  %v5160_v23 = vld [vmem:[#allocation2 + $0x1c] sm:$0xff] }
 0x222   : > { %3587 = vmatmul.bf16.gmra.mxu0 %v3463_v26  ;;  %v1480_v29 = vunpack.c.l.b16 %v1342_v31  ;;  %v1481_v35 = vunpack.c.h.b16 %v1342_v31  ;;  %v2129_v36 = vrot.slane %v2127_v27, 7  ;;  %vm2253_vm11 = vcmp.ne.s32.totalorder %v2249_v14, %v6417_v15  ;;  %2540 = vmatmul.bf16.gmra.mxu3 %v2422_v43  ;;  %v5201_v24 = vld [vmem:[#allocation11 + $0xe0] sm:$0xff]  ;;  %v1987_v26 = vld [vmem:[#allocation2 + $0x20] sm:$0xf] }
 0x223   : > { %v1347_v39 = vrot.slane %v1346_v32, 4  ;;  %vm2254_vm13 = vcmp.ne.s32.totalorder %v2250_v19, %v6440_v33  ;;  %v6692_v48 = vor.u32 %v2423_v34, %v2421_v56  ;;  %v1031_v45 = vand.u32 15, %v963_v51  ;;  %2824 = vmatpush.bf16.msrb.mxu1 %v5201_v24 }
 0x224   : > { %vm1484_vm9 = vcmp.ne.s32.totalorder %v1480_v29, %v6417_v15  ;;  %vm1485_vm3 = vcmp.ne.s32.totalorder %v1481_v35, %v6440_v33  ;;  %v2132_v49 = vor.u32 %v2130_v28, %v2129_v36  ;;  %vm6696_vm15 = vmpackc.low %vm2254_vm13, %vm2253_vm11  ;;  %v7879_v52 = vmov 0 }
 0x225   : > { %v7880_v52 = vsel %vm6696_vm15, 4294967295, %v7879_v52  ;;  %v964_v53 = vadd.s32 72, %v6399_v58  ;;  %v1352_v18 = vsel %vm6454_vm12, %v1347_v39, %v6445_v40  ;;  %vm6704_vm6 = vmpackc.low %vm1485_vm3, %vm1484_vm9  ;;  %v7881_v55 = vmov 0 }
 0x226   : > { %v7882_v55 = vsel %vm6704_vm6, 4294967295, %v7881_v55  ;;  %v2332_v51 = vsel %vm6696_vm15, %v1986_v38, 0  ;;  %vm6710_vm5 = vcmp.gt.s32.totalorder %v1031_v45, 0  ;;  %v2134_v5 = vrot.slane %v2129_v36, 4 }
 0x227   : > { %v1487_v20 = vunpack.c.l.b16 %v1352_v18  ;;  %v1488_v54 = vunpack.c.h.b16 %v1352_v18  ;;  %v1563_v42 = vsel %vm6704_vm6, %v1201_v46, 0  ;;  %v3368_v6 = vsel %vm6704_vm6, %v3351_v47, 0  ;;  %vm1252_vm11 = vmpackc.low %vm6710_vm5, %vm6710_vm5 }
 0x228   : > { %v1774_v10 = vunpack.c.l.b16 %v1563_v42  ;;  %v3418_v13 = vunpack.c.l.b16 %v3368_v6  ;;  %v2133_v14 = vsel %vm6540_vm0, %v6490_v4, %v2132_v49  ;;  %v2382_v19 = vunpack.c.l.b16 %v2332_v51 }
 0x229   : > { %vm1491_vm13 = vcmp.ne.s32.totalorder %v1487_v20, %v6417_v15  ;;  %vm1492_vm9 = vcmp.ne.s32.totalorder %v1488_v54, %v6440_v33  ;;  %v2256_v56 = vunpack.c.l.b16 %v2133_v14  ;;  %v2257_v22 = vunpack.c.h.b16 %v2133_v14  ;;  %v1204_v20 = vld [vmem:[#allocation2 + $0x24] sm:$0xf]  ;;  %v3354_v54 = vld [vmem:[#allocation2 + $0x34] sm:$0xf] }
 0x22a   : > { %vm6726_vm3 = vmpackc.low %vm1492_vm9, %vm1491_vm13  ;;  %v7885_v25 = vmov 0  ;;  %v1268_v27 = vsel %vm1252_vm11, 65537, %v7748_v0  ;;  %v1038_v28 = vand.u32 15, %v964_v53  ;;  %v2142_v43 = vsel %vm6540_vm0, %v2134_v5, %v6488_v3 }
 0x22b   : > { %v7886_v25 = vsel %vm6726_vm3, 4294967295, %v7885_v25  ;;  %v6740_v31 = vadd.s32 80, %v6399_v58  ;;  %v1564_v32 = vsel %vm6726_vm3, %v1202_v44, 0  ;;  %v3369_v34 = vsel %vm6726_vm3, %v3352_v11, 0 }
 0x22c   : > { %vm2260_vm13 = vcmp.ne.s32.totalorder %v2256_v56, %v6417_v15  ;;  %vm2261_vm9 = vcmp.ne.s32.totalorder %v2257_v22, %v6440_v33  ;;  %v1775_v29 = vunpack.c.l.b16 %v1564_v32  ;;  %v3419_v35 = vunpack.c.l.b16 %v3369_v34 }
 0x22d   : > { %vm6748_vm5 = vmpackc.low %vm2261_vm9, %vm2260_vm13  ;;  %v7887_v38 = vmov 0  ;;  %v1359_v36 = vshll.u32 %v1268_v27, 16  ;;  %v1363_v46 = vshrl.u32 %v1268_v27, 16  ;;  %vm1188_vm11 = vcmp.lt.s32.totalorder %v1038_v28, 15 }
 0x22e   : > { %v7888_v38 = vsel %vm6748_vm5, 4294967295, %v7887_v38  ;;  %v2333_v39 = vsel %vm6748_vm5, %v1987_v26, 0  ;;  %1725 = vmatmul.bf16.gmra.mxu1 %v5160_v23  ;;  %v2263_v47 = vunpack.c.l.b16 %v2142_v43  ;;  %v2264_v45 = vunpack.c.h.b16 %v2142_v43  ;;  %vm2038_vm15 = vmpackc.low %vm1188_vm11, %vm1188_vm11 }
 0x22f   : > { %v1788_v49 = vpack.c.b16 %v1775_v29, %v1774_v10  ;;  %v3432_v53 = vpack.c.b16 %v3419_v35, %v3418_v13  ;;  %v2383_v18 = vunpack.c.l.b16 %v2333_v39  ;;  %v1361_v51 = vrot.slane %v1359_v36, 5  ;;  %v3353_v29 = vld [vmem:[#allocation2 + $0x30] sm:$0xf] }
 0x230   : > { %v1365_v62 = vrot.slane %v1363_v46, 4  ;;  %v2054_v5 = vsel %vm2038_vm15, 65537, %v7748_v0  ;;  %vm6756_vm13 = vcmp.ne.s32.totalorder %v2263_v47, %v6417_v15  ;;  %vm6761_vm9 = vcmp.ne.s32.totalorder %v2264_v45, %v6440_v33 }
 0x231   : > { %v1822_v42 = vshrl.u32 %v1788_v49, 16  ;;  %v1825_v6 = vshll.u32 %v1788_v49, 16  ;;  %v3465_v8 = vshrl.u32 %v3432_v53, 16  ;;  %v3468_v44 = vshll.u32 %v3432_v53, 16  ;;  %vm6786_vm5 = vmpackc.low %vm6761_vm9, %vm6756_vm13 }
 0x232   : > { %v6765_v10 = vpack.c.b16 %v2383_v18, %v2382_v19  ;;  %v1362_v11 = vsel %vm6454_vm12, %v6476_v57, %v1361_v51  ;;  %v1366_v13 = vor.u32 %v1365_v62, %v1361_v51  ;;  %v2145_v14 = vshrl.u32 %v2054_v5, 16  ;;  %v1203_v19 = vld [vmem:[#allocation2 + $0x20] sm:$0xf]  ;;  %v1988_v62 = vld [vmem:[#allocation2 + $0x24] sm:$0xf] }
 0x233   : > { %v1824_v56 = vrot.slane %v1822_v42, 3  ;;  %v1827_v22 = vrot.slane %v1825_v6, 4  ;;  %v3467_v23 = vrot.slane %v3465_v8, 3  ;;  %v3470_v24 = vrot.slane %v3468_v44, 4 }
 0x234   : > { %v2427_v26 = vshll.u32 %v6765_v10, 16  ;;  %v1367_v27 = vrot.slane %v1366_v13, 4  ;;  %v1494_v28 = vunpack.c.l.b16 %v1362_v11  ;;  %v1495_v43 = vunpack.c.h.b16 %v1362_v11 }
 0x235   : > { %v6771_v32 = vor.u32 %v1827_v22, %v1824_v56  ;;  %v6773_v34 = vor.u32 %v3470_v24, %v3467_v23  ;;  %v6775_v35 = vrot.slane %v2145_v14, 7  ;;  %v2148_v36 = vshll.u32 %v2054_v5, 16  ;;  %v5161_v14 = vld [vmem:[#allocation2 + $0x24] sm:$0xff] }
 0x236   : > { %v2429_v46 = vrot.slane %v2427_v26, 1  ;;  %v1372_v39 = vsel %vm6454_vm12, %v1367_v27, %v6445_v40  ;;  %vm1498_vm15 = vcmp.ne.s32.totalorder %v1494_v28, %v6417_v15  ;;  %vm1499_vm11 = vcmp.ne.s32.totalorder %v1495_v43, %v6440_v33  ;;  %v1989_v43 = vld [vmem:[#allocation2 + $0x28] sm:$0xf] }
 0x237   : > { %v7893_v47 = vmov 0  ;;  %vm7895_vm3 = vsmask.f32 4352  ;;  %vm6796_vm14 = vmpackc.low %vm1499_vm11, %vm1498_vm15  ;;  %v1501_v18 = vunpack.c.l.b16 %v1372_v39  ;;  %v1502_v51 = vunpack.c.h.b16 %v1372_v39 }
 0x238   : > { %v7894_v47 = vsel %vm6786_vm5, 4294967295, %v7893_v47  ;;  %v1829_v45 = vsel %vm7895_vm3, %v6675_v17, %v6771_v32  ;;  %vm7896_vm6 = vmmov %vm7895_vm3  ;;  %vm7899_vm13 = vsmask.f32 7424  ;;  %v1565_v17 = vsel %vm6796_vm14, %v1203_v19, 0  ;;  %v5208_v19 = vld [vmem:[#allocation11 + $0x118] sm:$0xff] }
 0x239   : > { %v3472_v49 = vsel %vm7896_vm6, %v6677_v60, %v6773_v34  ;;  %1949 = vmatmul.bf16.gmra.mxu2 %v1829_v45  ;;  %v2430_v5 = vsel %vm7899_vm13, %v6692_v48, %v2429_v46  ;;  %v3370_v60 = vsel %vm6796_vm14, %v3353_v29, 0  ;;  %v2150_v42 = vor.u32 %v2148_v36, %v6775_v35  ;;  %v5200_v29 = vld [vmem:[#allocation11 + $0xd8] sm:$0xff] }
 0x23a   : > { %3592 = vmatmul.bf16.gmra.mxu0 %v3472_v49  ;;  %2545 = vmatmul.bf16.gmra.mxu3 %v2430_v5  ;;  %vm1505_vm6 = vcmp.ne.s32.totalorder %v1501_v18, %v6417_v15  ;;  %vm1506_vm3 = vcmp.ne.s32.totalorder %v1502_v51, %v6440_v33  ;;  %v1776_v6 = vunpack.c.l.b16 %v1565_v17  ;;  %v3420_v8 = vunpack.c.l.b16 %v3370_v60 }
 0x23b   : > { %vm6809_vm9 = vmpackc.low %vm1506_vm3, %vm1505_vm6  ;;  %v7900_v44 = vmov 0  ;;  %v2151_v48 = vsel %vm6540_vm0, %v6490_v4, %v2150_v42  ;;  %v2334_v11 = vsel %vm6786_vm5, %v1988_v62, 0  ;;  %v2431_v13 = vshrl.u32 %v6765_v10, 16  ;;  %3002 = vmatpush.bf16.msrb.mxu2 %v5208_v19  ;;  %2825 = vmatpush.bf16.msrb.mxu1 %v5200_v29 }
 0x23c   : > { %v7901_v44 = vsel %vm6809_vm9, 4294967295, %v7900_v44  ;;  %v1045_v56 = vand.u32 15, %v6740_v31  ;;  %v1566_v22 = vsel %vm6809_vm9, %v1204_v20, 0  ;;  %v3371_v23 = vsel %vm6809_vm9, %v3354_v54, 0 }
 0x23d   : > { %v2270_v24 = vunpack.c.l.b16 %v2151_v48  ;;  %v2271_v26 = vunpack.c.h.b16 %v2151_v48  ;;  %v1777_v27 = vunpack.c.l.b16 %v1566_v22  ;;  %v3421_v28 = vunpack.c.l.b16 %v3371_v23 }
 0x23e   : > { %vm6826_vm13 = vcmp.gt.s32.totalorder %v1045_v56, 0  ;;  %v966_v31 = vadd.s32 88, %v6399_v58  ;;  %v7904_v45 = vmov 0  ;;  %v2384_v49 = vunpack.c.l.b16 %v2334_v11  ;;  %1730 = vmatmul.bf16.gmra.mxu1 %v5161_v14 }
 0x23f   : > { %vm2274_vm15 = vcmp.ne.s32.totalorder %v2270_v24, %v6417_v15  ;;  %vm2275_vm11 = vcmp.ne.s32.totalorder %v2271_v26, %v6440_v33  ;;  %v1789_v36 = vpack.c.b16 %v1777_v27, %v1776_v6  ;;  %v3433_v39 = vpack.c.b16 %v3421_v28, %v3420_v8  ;;  %vm1254_vm3 = vmpackc.low %vm6826_vm13, %vm6826_vm13 }
 0x240   : > { %vm6831_vm6 = vmpackc.low %vm2275_vm11, %vm2274_vm15  ;;  %v2152_v18 = vrot.slane %v6775_v35, 4  ;;  %v2433_v62 = vor.u32 %v2431_v13, %v2429_v46  ;;  %v1052_v5 = vand.u32 15, %v966_v31  ;;  %v6842_v20 = vadd.s32 96, %v6399_v58 }
 0x241   : > { %v7905_v45 = vsel %vm6831_vm6, 4294967295, %v7904_v45  ;;  %v2335_v51 = vsel %vm6831_vm6, %v1989_v43, 0  ;;  %v1831_v17 = vshrl.u32 %v1789_v36, 16  ;;  %v1834_v54 = vshll.u32 %v1789_v36, 16 }
 0x242   : > { %v3474_v60 = vshrl.u32 %v3433_v39, 16  ;;  %v3477_v42 = vshll.u32 %v3433_v39, 16  ;;  %v2385_v6 = vunpack.c.l.b16 %v2335_v51  ;;  %v1270_v35 = vsel %vm1254_vm3, 65537, %v7748_v0 }
 0x243   : > { %vm1190_vm15 = vcmp.lt.s32.totalorder %v1052_v5, 15  ;;  %v2160_v46 = vsel %vm6540_vm0, %v2152_v18, %v6488_v3  ;;  %v1833_v8 = vrot.slane %v1831_v17, 3  ;;  %v1836_v48 = vrot.slane %v1834_v54, 4  ;;  %v1990_v17 = vld [vmem:[#allocation2 + $0x2c] sm:$0xf] }
 0x244   : > { %v3476_v11 = vrot.slane %v3474_v60, 3  ;;  %v3479_v13 = vrot.slane %v3477_v42, 4  ;;  %vm2040_vm11 = vmpackc.low %vm1190_vm15, %vm1190_vm15  ;;  %v2397_v14 = vpack.c.b16 %v2385_v6, %v2384_v49  ;;  %v1379_v56 = vshll.u32 %v1270_v35, 16  ;;  %v1205_v54 = vld [vmem:[#allocation2 + $0x28] sm:$0xf] }
 0x245   : > { %v1383_v22 = vshrl.u32 %v1270_v35, 16  ;;  %v2056_v23 = vsel %vm2040_vm11, 65537, %v7748_v0  ;;  %v6849_v24 = vor.u32 %v1836_v48, %v1833_v8  ;;  %v2277_v10 = vunpack.c.l.b16 %v2160_v46  ;;  %v3355_v35 = vld [vmem:[#allocation2 + $0x38] sm:$0xf] }
 0x246   : > { %v6851_v26 = vor.u32 %v3479_v13, %v3476_v11  ;;  %v2163_v27 = vshrl.u32 %v2056_v23, 16  ;;  %v2166_v28 = vshll.u32 %v2056_v23, 16  ;;  %v2435_v43 = vshll.u32 %v2397_v14, 16  ;;  %v5162_v13 = vld [vmem:[#allocation2 + $0x2c] sm:$0xff] }
 0x247   : > { %v1381_v19 = vrot.slane %v1379_v56, 5  ;;  %v1385_v29 = vrot.slane %v1383_v22, 4  ;;  %vm7906_vm13 = vsmask.f32 4352  ;;  %v2278_v49 = vunpack.c.h.b16 %v2160_v46 }
 0x248   : > { %v1838_v31 = vsel %vm7906_vm13, %v6771_v32, %v6849_v24  ;;  %vm7907_vm3 = vmmov %vm7906_vm13  ;;  %v6859_v39 = vrot.slane %v2163_v27, 7  ;;  %v2437_v18 = vrot.slane %v2435_v43, 1  ;;  %vm2281_vm15 = vcmp.ne.s32.totalorder %v2277_v10, %v6417_v15  ;;  %v5207_v10 = vld [vmem:[#allocation11 + $0x110] sm:$0xff] }
 0x249   : > { %v3481_v36 = vsel %vm7907_vm3, %v6773_v34, %v6851_v26  ;;  %v1382_v51 = vsel %vm6454_vm12, %v6476_v57, %v1381_v19  ;;  %v1386_v5 = vor.u32 %v1385_v29, %v1381_v19  ;;  %1954 = vmatmul.bf16.gmra.mxu2 %v1838_v31  ;;  %vm2282_vm11 = vcmp.ne.s32.totalorder %v2278_v49, %v6440_v33  ;;  %v1991_v29 = vld [vmem:[#allocation2 + $0x30] sm:$0xf]  ;;  %v1206_v31 = vld [vmem:[#allocation2 + $0x2c] sm:$0xf]  ;;  %v3356_v49 = vld [vmem:[#allocation2 + $0x3c] sm:$0xf] }
 0x24a   : > { %3597 = vmatmul.bf16.gmra.mxu0 %v3481_v36  ;;  %v1508_v32 = vunpack.c.l.b16 %v1382_v51  ;;  %v1509_v60 = vunpack.c.h.b16 %v1382_v51  ;;  %v2168_v42 = vor.u32 %v2166_v28, %v6859_v39  ;;  %vm7908_vm13 = vsmask.f32 7424  ;;  %vm6868_vm3 = vmpackc.low %vm2282_vm11, %vm2281_vm15  ;;  %3003 = vmatpush.bf16.msrb.mxu2 %v5207_v10 }
 0x24b   : > { %v2438_v34 = vsel %vm7908_vm13, %v2433_v62, %v2437_v18  ;;  %v1387_v6 = vrot.slane %v1386_v5, 4  ;;  %v7909_v46 = vmov 0  ;;  %v2439_v8 = vshrl.u32 %v2397_v14, 16 }
 0x24c   : > { %v7910_v46 = vsel %vm6868_vm3, 4294967295, %v7909_v46  ;;  %v1059_v48 = vand.u32 15, %v6842_v20  ;;  %2550 = vmatmul.bf16.gmra.mxu3 %v2438_v34  ;;  %vm1512_vm6 = vcmp.ne.s32.totalorder %v1508_v32, %v6417_v15  ;;  %vm1513_vm5 = vcmp.ne.s32.totalorder %v1509_v60, %v6440_v33 }
 0x24d   : > { %7911 = vst [vmem:[#allocation38_spill] sm:$0xff] %v7910_v46  ;;  %v2169_v11 = vsel %vm6540_vm0, %v6490_v4, %v2168_v42  ;;  %v2336_v62 = vsel %vm6868_vm3, %v1990_v17, 0  ;;  %v1392_v56 = vsel %vm6454_vm12, %v1387_v6, %v6445_v40  ;;  %vm6883_vm15 = vmpackc.low %vm1513_vm5, %vm1512_vm6  ;;  %v7912_v14 = vmov 0 }
 0x24e   : > { %v7913_v14 = vsel %vm6883_vm15, 4294967295, %v7912_v14  ;;  %v2284_v20 = vunpack.c.l.b16 %v2169_v11  ;;  %v2285_v22 = vunpack.c.h.b16 %v2169_v11  ;;  %v2386_v23 = vunpack.c.l.b16 %v2336_v62  ;;  %1735 = vmatmul.bf16.gmra.mxu1 %v5162_v13  ;;  %v6921_v11 = vld [vmem:[#allocation11 + $0x1f8] sm:$0xff] }
 0x24f   : > { %v1515_v27 = vunpack.c.l.b16 %v1392_v56  ;;  %v1516_v28 = vunpack.c.h.b16 %v1392_v56  ;;  %v1567_v43 = vsel %vm6883_vm15, %v1205_v54, 0  ;;  %v3372_v19 = vsel %vm6883_vm15, %v3355_v35, 0  ;;  %3751 = vmatpush.bf16.msra.mxu0 %v6921_v11 }
 0x250   : > { %v1778_v36 = vunpack.c.l.b16 %v1567_v43  ;;  %v3422_v51 = vunpack.c.l.b16 %v3372_v19  ;;  %vm2288_vm5 = vcmp.ne.s32.totalorder %v2284_v20, %v6417_v15  ;;  %vm2289_vm6 = vcmp.ne.s32.totalorder %v2285_v22, %v6440_v33  ;;  %v6933_v19 = vld [vmem:[#allocation11 + $0x1f0] sm:$0xff] }
 0x251   : > { %vm1519_vm11 = vcmp.ne.s32.totalorder %v1515_v27, %v6417_v15  ;;  %vm1520_vm13 = vcmp.ne.s32.totalorder %v1516_v28, %v6440_v33  ;;  %vm6895_vm3 = vmpackc.low %vm2289_vm6, %vm2288_vm5  ;;  %v7914_v5 = vmov 0  ;;  %v2441_v17 = vor.u32 %v2439_v8, %v2437_v18 }
 0x252   : > { %v7915_v5 = vsel %vm6895_vm3, 4294967295, %v7914_v5  ;;  %vm6899_vm15 = vcmp.gt.s32.totalorder %v1059_v48, 0  ;;  %vm6903_vm9 = vmpackc.low %vm1520_vm13, %vm1519_vm11  ;;  %v7919_v32 = vmov 0  ;;  %v2337_v60 = vsel %vm6895_vm3, %v1991_v29, 0  ;;  %v5199_v48 = vld [vmem:[#allocation11 + $0xd0] sm:$0xff] }
 0x253   : > { %7916 = vst [vmem:[#allocation39_spill] sm:$0xff] %v7915_v5  ;;  %v7920_v32 = vsel %vm6903_vm9, 4294967295, %v7919_v32  ;;  %v968_v42 = vadd.s32 104, %v6399_v58  ;;  %v2170_v34 = vrot.slane %v6859_v39, 4  ;;  %v6912_v6 = vadd.s32 112, %v6399_v58  ;;  %vm1256_vm5 = vmpackc.low %vm6899_vm15, %vm6899_vm15  ;;  %2826 = vmatpush.bf16.msrb.mxu1 %v5199_v48  ;;  %3752 = vmatpush.bf16.msra.mxu0 %v6933_v19 }
 0x254   : > { %v1568_v18 = vsel %vm6903_vm9, %v1206_v31, 0  ;;  %v3373_v35 = vsel %vm6903_vm9, %v3356_v49, 0  ;;  %v2387_v8 = vunpack.c.l.b16 %v2337_v60  ;;  %v6924_v62 = vadd.s32 120, %v6399_v58 }
 0x255   : > { %v1779_v39 = vunpack.c.l.b16 %v1568_v18  ;;  %v3423_v13 = vunpack.c.l.b16 %v3373_v35  ;;  %v1272_v56 = vsel %vm1256_vm5, 65537, %v7748_v0  ;;  %v1066_v20 = vand.u32 15, %v968_v42 }
 0x256   : > { %v6927_v22 = vpack.c.b16 %v2387_v8, %v2386_v23  ;;  %v1399_v27 = vshll.u32 %v1272_v56, 16  ;;  %v1403_v28 = vshrl.u32 %v1272_v56, 16  ;;  %v2178_v43 = vsel %vm6540_vm0, %v2170_v34, %v6488_v3 }
 0x257   : > { %v1790_v58 = vpack.c.b16 %v1779_v39, %v1778_v36  ;;  %v3434_v29 = vpack.c.b16 %v3423_v13, %v3422_v51  ;;  %vm1192_vm15 = vcmp.lt.s32.totalorder %v1066_v20, 15  ;;  %v2291_v10 = vunpack.c.l.b16 %v2178_v43  ;;  %v6943_v20 = vld [vmem:[#allocation11 + $0x1e8] sm:$0xff] }
 0x258   : > { %v2443_v31 = vshll.u32 %v6927_v22, 16  ;;  %v1401_v49 = vrot.slane %v1399_v27, 5  ;;  %v1405_v23 = vrot.slane %v1403_v28, 4  ;;  %vm2042_vm6 = vmpackc.low %vm1192_vm15, %vm1192_vm15  ;;  %v2292_v54 = vunpack.c.h.b16 %v2178_v43  ;;  %3753 = vmatpush.bf16.msra.mxu0 %v6943_v20 }
 0x259   : > { %v1840_v60 = vshrl.u32 %v1790_v58, 16  ;;  %v1843_v42 = vshll.u32 %v1790_v58, 16  ;;  %v3483_v18 = vshrl.u32 %v3434_v29, 16  ;;  %v3486_v35 = vshll.u32 %v3434_v29, 16 }
 0x25a   : > { %v6936_v34 = vrot.slane %v2443_v31, 1  ;;  %v1402_v8 = vsel %vm6454_vm12, %v6476_v57, %v1401_v49  ;;  %v1406_v36 = vor.u32 %v1405_v23, %v1401_v49  ;;  %v2058_v51 = vsel %vm2042_vm6, 65537, %v7748_v0  ;;  %v1207_v49 = vld [vmem:[#allocation2 + $0x30] sm:$0xf]  ;;  %v3357_v23 = vld [vmem:[#allocation2 + $0x40] sm:$0xf] }
 0x25b   : > { %v1842_v48 = vrot.slane %v1840_v60, 3  ;;  %v1845_v39 = vrot.slane %v1843_v42, 4  ;;  %v3485_v13 = vrot.slane %v3483_v18, 3  ;;  %v3488_v56 = vrot.slane %v3486_v35, 4  ;;  %v5163_v42 = vld [vmem:[#allocation2 + $0x34] sm:$0xff] }
 0x25c   : > { %vm7921_vm11 = vsmask.f32 7424  ;;  %v1407_v28 = vrot.slane %v1406_v36, 4  ;;  %v1522_v43 = vunpack.c.l.b16 %v1402_v8  ;;  %v1523_v58 = vunpack.c.h.b16 %v1402_v8  ;;  %v1208_v8 = vld [vmem:[#allocation2 + $0x34] sm:$0xf] }
 0x25d   : > { %v2446_v27 = vsel %vm7921_vm11, %v2441_v17, %v6936_v34  ;;  %v6947_v29 = vor.u32 %v1845_v39, %v1842_v48  ;;  %v6949_v31 = vor.u32 %v3488_v56, %v3485_v13  ;;  %v2181_v0 = vshrl.u32 %v2058_v51, 16  ;;  %v6979_v56 = vld [vmem:[#allocation11 + $0x1e0] sm:$0xff]  ;;  %v3073_v36 = vld [vmem:[#allocation2 + $0x34] sm:$0xf] }
 0x25e   : > { %v2184_v5 = vshll.u32 %v2058_v51, 16  ;;  %2555 = vmatmul.bf16.gmra.mxu3 %v2446_v27  ;;  %v1412_v60 = vsel %vm6454_vm12, %v1407_v28, %v6445_v40  ;;  %vm1526_vm13 = vcmp.ne.s32.totalorder %v1522_v43, %v6417_v15  ;;  %vm1527_vm5 = vcmp.ne.s32.totalorder %v1523_v58, %v6440_v33  ;;  %1740 = vmatmul.bf16.gmra.mxu1 %v5163_v42 }
 0x25f   : > { %vm6957_vm15 = vcmp.ne.s32.totalorder %v2291_v10, %v6417_v15  ;;  %vm7924_vm6 = vsmask.f32 4352  ;;  %vm6967_vm3 = vmpackc.low %vm1527_vm5, %vm1526_vm13  ;;  %v1529_v51 = vunpack.c.l.b16 %v1412_v60  ;;  %v1530_v48 = vunpack.c.h.b16 %v1412_v60  ;;  %v1992_v10 = vld [vmem:[#allocation2 + $0x34] sm:$0xf]  ;;  %v5206_v60 = vld [vmem:[#allocation11 + $0x108] sm:$0xff]  ;;  %3754 = vmatpush.bf16.msra.mxu0 %v6979_v56 }
 0x260   : > { %v1847_v18 = vsel %vm7924_vm6, %v6849_v24, %v6947_v29  ;;  %vm7925_vm11 = vmmov %vm7924_vm6  ;;  %v1569_v39 = vsel %vm6967_vm3, %v1207_v49, 0  ;;  %v3358_v24 = vld [vmem:[#allocation2 + $0x44] sm:$0xf]  ;;  %v3374_v13 = vsel %vm6967_vm3, %v3357_v23, 0  ;;  %vm2296_vm13 = vcmp.ne.s32.totalorder %v2292_v54, %v6440_v33  ;;  %3004 = vmatpush.bf16.msrb.mxu2 %v5206_v60 }
 0x261   : > { %v3490_v35 = vsel %vm7925_vm11, %v6851_v26, %v6949_v31  ;;  %1959 = vmatmul.bf16.gmra.mxu2 %v1847_v18  ;;  %v6976_v26 = vrot.slane %v2181_v0, 7  ;;  %vm1533_vm5 = vcmp.ne.s32.totalorder %v1529_v51, %v6417_v15  ;;  %vm1534_vm6 = vcmp.ne.s32.totalorder %v1530_v48, %v6440_v33  ;;  %vm6985_vm11 = vmpackc.low %vm2296_vm13, %vm6957_vm15 }
 0x262   : > { %3602 = vmatmul.bf16.gmra.mxu0 %v3490_v35  ;;  %v1780_v27 = vunpack.c.l.b16 %v1569_v39  ;;  %v3424_v28 = vunpack.c.l.b16 %v3374_v13  ;;  %v7928_v43 = vmov 0  ;;  %vm6989_vm9 = vmpackc.low %vm1534_vm6, %vm1533_vm5  ;;  %v7931_v58 = vmov 0 }
 0x263   : > { %v7929_v43 = vsel %vm6985_vm11, 4294967295, %v7928_v43  ;;  %v7932_v58 = vsel %vm6989_vm9, 4294967295, %v7931_v58  ;;  %v2186_v0 = vor.u32 %v2184_v5, %v6976_v26  ;;  %v2338_v54 = vsel %vm6985_vm11, %v1992_v10, 0  ;;  %v5220_v5 = vld [vmem:[#allocation11 + $0x178] sm:$0xff] }
 0x264   : > { %7930 = vst [vmem:[#allocation40_spill] sm:$0xff] %v7929_v43  ;;  %v2447_v49 = vshrl.u32 %v6927_v22, 16  ;;  %v1073_v23 = vand.u32 15, %v6912_v6  ;;  %v1570_v17 = vsel %vm6989_vm9, %v1208_v8, 0  ;;  %v3375_v18 = vsel %vm6989_vm9, %v3358_v24, 0  ;;  %v5198_v6 = vld [vmem:[#allocation11 + $0xc8] sm:$0xff]  ;;  %3280 = vmatpush.bf16.msrb.mxu3 %v5220_v5 }
 0x265   : > { %7933 = vst [vmem:[#allocation41_spill] sm:$0xff] %v7932_v58  ;;  %v1080_v35 = vand.u32 15, %v6924_v62  ;;  %v1781_v51 = vunpack.c.l.b16 %v1570_v17  ;;  %v3425_v48 = vunpack.c.l.b16 %v3375_v18  ;;  %v2187_v22 = vsel %vm6540_vm0, %v6490_v4, %v2186_v0  ;;  %v7007_v10 = vld [vmem:[#allocation11 + $0x1d8] sm:$0xff]  ;;  %v5219_v62 = vld [vmem:[#allocation11 + $0x170] sm:$0xff]  ;;  %v1993_v18 = vld [vmem:[#allocation2 + $0x38] sm:$0xf]  ;;  %2827 = vmatpush.bf16.msrb.mxu1 %v5198_v6 }
 0x266   : > { %v2388_v42 = vunpack.c.l.b16 %v2338_v54  ;;  %v2298_v8 = vunpack.c.l.b16 %v2187_v22  ;;  %v2299_v39 = vunpack.c.h.b16 %v2187_v22  ;;  %vm1177_vm15 = vcmp.gt.s32.totalorder %v1073_v23, 0  ;;  %3755 = vmatpush.bf16.msra.mxu0 %v7007_v10  ;;  %v5218_v6 = vld [vmem:[#allocation11 + $0x168] sm:$0xff] }
 0x267   : > { %vm7009_vm13 = vcmp.lt.s32.totalorder %v1080_v35, 15  ;;  %v1791_v13 = vpack.c.b16 %v1781_v51, %v1780_v27  ;;  %v3435_v17 = vpack.c.b16 %v3425_v48, %v3424_v28  ;;  %v7014_v43 = vor.u32 %v2447_v49, %v6936_v34  ;;  %vm1258_vm5 = vmpackc.low %vm1177_vm15, %vm1177_vm15  ;;  %v7024_v27 = vld [vmem:[#allocation11 + $0x1d0] sm:$0xff] }
 0x268   : > { %v2188_v0 = vrot.slane %v6976_v26, 4  ;;  %vm2302_vm6 = vcmp.ne.s32.totalorder %v2298_v8, %v6417_v15  ;;  %vm2303_vm11 = vcmp.ne.s32.totalorder %v2299_v39, %v6440_v33  ;;  %v7936_v54 = vmov 0   ;;  %vm2044_vm9 = vmpackc.low %vm7009_vm13, %vm7009_vm13  ;;  %3281 = vmatpush.bf16.msrb.mxu3 %v5219_v62 }
 0x269   : > { %v1274_v23 = vsel %vm1258_vm5, 65537, %v7936_v54  ;;  %v1849_v28 = vshrl.u32 %v1791_v13, 16  ;;  %v1852_v49 = vshll.u32 %v1791_v13, 16  ;;  %v3492_v26 = vshrl.u32 %v3435_v17, 16  ;;  %vm7027_vm15 = vmpackc.low %vm2303_vm11, %vm2302_vm6 }
 0x26a   : > { %v3495_v60 = vshll.u32 %v3435_v17, 16  ;;  %v7937_v35 = vmov 0  ;;  %v2339_v5 = vsel %vm7027_vm15, %v1993_v18, 0  ;;  %v1419_v51 = vshll.u32 %v1274_v23, 16  ;;  %3756 = vmatpush.bf16.msra.mxu0 %v7024_v27  ;;  %v7038_v18 = vld [vmem:[#allocation11 + $0x1c8] sm:$0xff] }
 0x26b   : > { %v7938_v35 = vsel %vm7027_vm15, 4294967295, %v7937_v35  ;;  %v1423_v48 = vshrl.u32 %v1274_v23, 16  ;;  %v2060_v22 = vsel %vm2044_vm9, 65537, %v7936_v54  ;;  %v1851_v8 = vrot.slane %v1849_v28, 3 }
 0x26c   : > { %7939 = vst [vmem:[#allocation42_spill] sm:$0xff] %v7938_v35  ;;  %v1854_v39 = vrot.slane %v1852_v49, 4  ;;  %v3494_v24 = vrot.slane %v3492_v26, 3  ;;  %v3497_v34 = vrot.slane %v3495_v60, 4  ;;  %v2389_v13 = vunpack.c.l.b16 %v2339_v5  ;;  %3282 = vmatpush.bf16.msrb.mxu3 %v5218_v6 }
 0x26d   : > { %v1421_v46 = vrot.slane %v1419_v51, 5  ;;  %v1425_v17 = vrot.slane %v1423_v48, 4  ;;  %v2196_v58 = vsel %vm6540_vm0, %v2188_v0, %v6488_v3  ;;  %v2199_v62 = vshrl.u32 %v2060_v22, 16  ;;  %v5217_v3 = vld [vmem:[#allocation11 + $0x160] sm:$0xff] }
 0x26e   : > { %v7040_v23 = vor.u32 %v1854_v39, %v1851_v8  ;;  %v7042_v54 = vor.u32 %v3497_v34, %v3494_v24  ;;  %v2202_v28 = vshll.u32 %v2060_v22, 16  ;;  %v7044_v49 = vpack.c.b16 %v2389_v13, %v2388_v42  ;;  %v1209_v51 = vld [vmem:[#allocation2 + $0x38] sm:$0xf]  ;;  %v5164_v22 = vld [vmem:[#allocation2 + $0x3c] sm:$0xff]  ;;  %v3359_v24 = vld [vmem:[#allocation2 + $0x48] sm:$0xf]  ;;  %3757 = vmatpush.bf16.msra.mxu0 %v7038_v18 }
 0x26f   : > { %v1422_v26 = vsel %vm6454_vm12, %v6476_v57, %v1421_v46  ;;  %v1426_v60 = vor.u32 %v1425_v17, %v1421_v46  ;;  %v2305_v5 = vunpack.c.l.b16 %v2196_v58  ;;  %vm7940_vm9 = vsmask.f32 4352  ;;  %v7067_v13 = vld [vmem:[#allocation11 + $0x1c0] sm:$0xff]  ;;  %1745 = vmatmul.bf16.gmra.mxu1 %v5164_v22 }
 0x270   : > { %v1856_v0 = vsel %vm7940_vm9, %v6947_v29, %v7040_v23  ;;  %vm7941_vm11 = vmmov %vm7940_vm9  ;;  %v1536_v48 = vunpack.c.l.b16 %v1422_v26  ;;  %v1537_v42 = vunpack.c.h.b16 %v1422_v26  ;;  %v2451_v8 = vshll.u32 %v7044_v49, 16  ;;  %3283 = vmatpush.bf16.msrb.mxu3 %v5217_v3 }
 0x271   : > { %v3499_v34 = vsel %vm7941_vm11, %v6949_v31, %v7042_v54  ;;  %v1427_v39 = vrot.slane %v1426_v60, 4  ;;  %v7056_v46 = vrot.slane %v2199_v62, 7  ;;  %v2306_v6 = vunpack.c.h.b16 %v2196_v58  ;;  %1964 = vmatmul.bf16.gmra.mxu2 %v1856_v0  ;;  %v1210_v58 = vld [vmem:[#allocation2 + $0x3c] sm:$0xf] }
 0x272   : > { %3607 = vmatmul.bf16.gmra.mxu0 %v3499_v34  ;;  %vm1540_vm13 = vcmp.ne.s32.totalorder %v1536_v48, %v6417_v15  ;;  %vm1541_vm5 = vcmp.ne.s32.totalorder %v1537_v42, %v6440_v33  ;;  %vm7062_vm6 = vcmp.ne.s32.totalorder %v2305_v5, %v6417_v15  ;;  %v1551_v31 = vunpack.c.h.b16 %v6476_v57  ;;  %v5252_v5 = vld [vmem:[#allocation11 + $0x238] sm:$0xff] }
 0x273   : > { %v7069_v17 = vrot.slane %v2451_v8, 1  ;;  %v1432_v62 = vsel %vm6454_vm12, %v1427_v39, %v6445_v40  ;;  %vm7074_vm9 = vmpackc.low %vm1541_vm5, %vm1540_vm13  ;;  %v2204_v60 = vor.u32 %v2202_v28, %v7056_v46  ;;  %vm2310_vm11 = vcmp.ne.s32.totalorder %v2306_v6, %v6440_v33  ;;  %v5205_v28 = vld [vmem:[#allocation11 + $0x100] sm:$0xff]  ;;  %v3360_v39 = vld [vmem:[#allocation2 + $0x4c] sm:$0xf]  ;;  %3758 = vmatpush.bf16.msra.mxu0 %v7067_v13 }
 0x274   : > { %v1543_v0 = vunpack.c.l.b16 %v1432_v62  ;;  %v1544_v34 = vunpack.c.h.b16 %v1432_v62  ;;  %v1571_v48 = vsel %vm7074_vm9, %v1209_v51, 0  ;;  %v3376_v42 = vsel %vm7074_vm9, %v3359_v24, 0  ;;  %vm7086_vm12 = vmpackc.low %vm2310_vm11, %vm7062_vm6  ;;  %v1995_v6 = vld [vmem:[#allocation2 + $0x40] sm:$0xf]  ;;  %v5216_v24 = vld [vmem:[#allocation11 + $0x158] sm:$0xff]  ;;  %3005 = vmatpush.bf16.msrb.mxu2 %v5205_v28 }
 0x275   : > { %v7946_v40 = vmov 0  ;;  %vm7949_vm13 = vsmask.f32 7424  ;;  %v1782_v8 = vunpack.c.l.b16 %v1571_v48  ;;  %v2205_v51 = vsel %vm6540_vm0, %v6490_v4, %v2204_v60  ;;  %v1211_v62 = vld [vmem:[#allocation2 + $0x40] sm:$0xf]  ;;  %v5197_v48 = vld [vmem:[#allocation11 + $0xc0] sm:$0xff]  ;;  %3284 = vmatpush.bf16.msrb.mxu3 %v5216_v24 }
 0x276   : > { %v7947_v40 = vsel %vm7086_vm12, 4294967295, %v7946_v40  ;;  %v2454_v3 = vsel %vm7949_vm13, %v7014_v43, %v7069_v17  ;;  %vm1547_vm5 = vcmp.ne.s32.totalorder %v1543_v0, %v6417_v15  ;;  %vm1548_vm6 = vcmp.ne.s32.totalorder %v1544_v34, %v6440_v33  ;;  %v3361_v43 = vld [vmem:[#allocation2 + $0x50] sm:$0xf]  ;;  %v5251_v0 = vld [vmem:[#allocation11 + $0x230] sm:$0xff]  ;;  %2828 = vmatpush.bf16.msrb.mxu1 %v5197_v48 }
 0x277   : > { %7948 = vst [vmem:[#allocation43_spill] sm:$0xff] %v7947_v40  ;;  %2560 = vmatmul.bf16.gmra.mxu3 %v2454_v3  ;;  %v2312_v22 = vunpack.c.l.b16 %v2205_v51  ;;  %v2313_v29 = vunpack.c.h.b16 %v2205_v51  ;;  %vm7099_vm11 = vmpackc.low %vm1548_vm6, %vm1547_vm5  ;;  %v3426_v1 = vunpack.c.l.b16 %v3376_v42  ;;  %v2340_v4 = vsel %vm7086_vm12, %v1994_v50, 0  ;;  %4033 = vmatpush.bf16.msrb.mxu0 %v5252_v5  ;;  %v5215_v34 = vld [vmem:[#allocation11 + $0x150] sm:$0xff] }
 0x278   : > { %v7952_v60 = vunpack.c.l.b16 %v6476_v57  ;;  %vm1555_vm13 = vcmp.ne.s32.totalorder %v1551_v31, %v6440_v33  ;;  %v1572_v28 = vsel %vm7099_vm11, %v1210_v58, 0  ;;  %v3377_v3 = vsel %vm7099_vm11, %v3360_v39, 0  ;;  %5410 = vmatpush.bf16.msra.mxu2 %v5252_v5 }
 0x279   : > { %vm2316_vm5 = vcmp.ne.s32.totalorder %v2312_v22, %v6417_v15  ;;  %vm2317_vm6 = vcmp.ne.s32.totalorder %v2313_v29, %v6440_v33  ;;  %v7953_v42 = vmov 0  ;;  %v1783_v57 = vunpack.c.l.b16 %v1572_v28  ;;  %3285 = vmatpush.bf16.msrb.mxu3 %v5215_v34 }
 0x27a   : > { %vm1554_vm0 = vcmp.ne.s32.totalorder %v7952_v60, %v6417_v15  ;;  %v3427_v31 = vunpack.c.l.b16 %v3377_v3  ;;  %vm7119_vm15 = vmpackc.low %vm2317_vm6, %vm2316_vm5  ;;  %v7956_v50 = vmov 0  ;;  %v2390_v58 = vunpack.c.l.b16 %v2340_v4  ;;  %5402 = vmatpush.bf16.msra.mxu1 %v6921_v11  ;;  %v5250_v4 = vld [vmem:[#allocation11 + $0x228] sm:$0xff] }
 0x27b   : > { %vm7115_vm12 = vmpackc.low %vm1555_vm13, %vm1554_vm0  ;;  %v7957_v50 = vsel %vm7119_vm15, 4294967295, %v7956_v50  ;;  %v2341_v51 = vsel %vm7119_vm15, %v1995_v6, 0  ;;  %v2206_v5 = vrot.slane %v7056_v46, 4  ;;  %v1792_v29 = vpack.c.b16 %v1783_v57, %v1782_v8  ;;  %4034 = vmatpush.bf16.msrb.mxu0 %v5251_v0  ;;  %v5214_v3 = vld [vmem:[#allocation11 + $0x148] sm:$0xff] }
 0x27c   : > { %v7954_v42 = vsel %vm7115_vm12, 4294967295, %v7953_v42  ;;  %7958 = vst [vmem:[#allocation45_spill] sm:$0xff] %v7957_v50  ;;  %v1573_v39 = vsel %vm7115_vm12, %v1211_v62, 0  ;;  %v3378_v22 = vsel %vm7115_vm12, %v3361_v43, 0  ;;  %v3436_v48 = vpack.c.b16 %v3427_v31, %v3426_v1  ;;  %5411 = vmatpush.bf16.msra.mxu2 %v5251_v0 }
 0x27d   : > { %7955 = vst [vmem:[#allocation44_spill] sm:$0xff] %v7954_v42  ;;  %v1784_v24 = vunpack.c.l.b16 %v1573_v39  ;;  %v2391_v60 = vunpack.c.l.b16 %v2341_v51  ;;  %v3428_v28 = vunpack.c.l.b16 %v3378_v22  ;;  %v2455_v62 = vshrl.u32 %v7044_v49, 16  ;;  %3286 = vmatpush.bf16.msrb.mxu3 %v5214_v3  ;;  %v5249_v49 = vld [vmem:[#allocation11 + $0x220] sm:$0xff]  ;;  %v2594_v3 = vld [vmem:[#allocation2 + $0x10] sm:$0xf] }
 0x27e   : > { %v2319_v40 = vunpack.c.l.b16 %v2206_v5  ;;  %v1858_v6 = vshrl.u32 %v1792_v29, 16  ;;  %v1861_v39 = vshll.u32 %v1792_v29, 16  ;;  %v3501_v50 = vshrl.u32 %v3436_v48, 16  ;;  %5403 = vmatpush.bf16.msra.mxu1 %v6933_v19  ;;  %v2592_v19 = vld [vmem:[#allocation2 + $0x8] sm:$0x8] }
 0x27f   : > { %v1793_v11 = vpack.c.b16 %v1784_v24, %v1784_v24  ;;  %v3504_v42 = vshll.u32 %v3436_v48, 16  ;;  %v7133_v46 = vpack.c.b16 %v2391_v60, %v2390_v58  ;;  %v3437_v43 = vpack.c.b16 %v3428_v28, %v3428_v28  ;;  %4035 = vmatpush.bf16.msrb.mxu0 %v5250_v4  ;;  %v5213_v24 = vld [vmem:[#allocation11 + $0x140] sm:$0xff]  ;;  %v1996_v28 = vld [vmem:[#allocation2 + $0x44] sm:$0x1] }
 0x280   : > { %v2320_v1 = vunpack.c.h.b16 %v2206_v5  ;;  %v1860_v57 = vrot.slane %v1858_v6, 3  ;;  %v1863_v34 = vrot.slane %v1861_v39, 4  ;;  %v3503_v31 = vrot.slane %v3501_v50, 3  ;;  %5412 = vmatpush.bf16.msra.mxu2 %v5250_v4  ;;  %v2593_v50 = vld [vmem:[#allocation2 + $0xc] sm:$0xf] }
 0x281   : > { %v1867_v8 = vshrl.u32 %v1793_v11, 16  ;;  %v3506_v51 = vrot.slane %v3504_v42, 4  ;;  %v2457_v0 = vor.u32 %v2455_v62, %v7069_v17  ;;  %v2459_v22 = vshll.u32 %v7133_v46, 16  ;;  %v7142_v42 = vpop.f32.mrf.mxu1  ;;  %3287 = vmatpush.bf16.msrb.mxu3 %v5213_v24 }
 0x282   : > { %v1870_v29 = vshll.u32 %v1793_v11, 16  ;;  %v3510_v48 = vshrl.u32 %v3437_v43, 16  ;;  %v7137_v58 = vor.u32 %v1863_v34, %v1860_v57  ;;  %v3513_v5 = vshll.u32 %v3437_v43, 16  ;;  %5404 = vmatpush.bf16.msra.mxu1 %v6943_v20  ;;  %v2595_v20 = vld [vmem:[#allocation2 + $0x14] sm:$0xf] }
 0x283   : > { %v7139_v60 = vor.u32 %v3506_v51, %v3503_v31  ;;  %vm2323_vm0 = vcmp.ne.s32.totalorder %v2319_v40, %v6417_v15  ;;  %v2461_v17 = vrot.slane %v2459_v22, 1  ;;  %vm2324_vm13 = vcmp.ne.s32.totalorder %v2320_v1, %v6440_v33  ;;  %4036 = vmatpush.bf16.msrb.mxu0 %v5249_v49  ;;  %v5248_v40 = vld [vmem:[#allocation11 + $0x218] sm:$0xff]  ;;  %v5247_v22 = vld [vmem:[#allocation11 + $0x210] sm:$0xff] }
 0x284   : > { %vm7959_vm5 = vsmask.f32 4352  ;;  %v7152_v11 = vrot.slane %v1867_v8, 3  ;;  %vm7154_vm15 = vmpackc.low %vm2324_vm13, %vm2323_vm0  ;;  %v2609_v33 = vsel %vm6484_vm1, %v2592_v19, 0  ;;  %v7161_v6 = vrot.slane %v1870_v29, 4  ;;  %5413 = vmatpush.bf16.msra.mxu2 %v5249_v49 }
 0x285   : > { %v1865_v4 = vsel %vm7959_vm5, %v7040_v23, %v7137_v58  ;;  %vm7960_vm6 = vmmov %vm7959_vm5  ;;  %vm7963_vm5 = vsmask.f32 7424  ;;  %v2610_v39 = vsel %vm6502_vm4, %v2593_v50, 0  ;;  %v7167_v8 = vrot.slane %v3510_v48, 3  ;;  %v3065_v19 = vld [vmem:[#allocation2 + $0x14] sm:$0xf] }
 0x286   : > { %v3508_v62 = vsel %vm7960_vm6, %v7042_v54, %v7139_v60  ;;  %1969 = vmatmul.bf16.gmra.mxu2 %v1865_v4  ;;  %v2462_v23 = vsel %vm7963_vm5, %v2457_v0, %v2461_v17  ;;  %v2342_v54 = vsel %vm7154_vm15, %v1996_v28, 0  ;;  %v7169_v43 = vrot.slane %v3513_v5, 4  ;;  %5405 = vmatpush.bf16.msra.mxu1 %v6979_v56  ;;  %v3063_v0 = vld [vmem:[#allocation2 + $0xc] sm:$0xf]  ;;  %v3066_v5 = vld [vmem:[#allocation2 + $0x18] sm:$0xf] }
 0x287   : > { %3612 = vmatmul.bf16.gmra.mxu0 %v3508_v62  ;;  %v2392_v2 = vunpack.c.l.b16 %v2342_v54  ;;  %v2611_v1 = vsel %vm6510_vm7, %v2594_v3, 0  ;;  %2565 = vmatmul.bf16.gmra.mxu3 %v2462_v23  ;;  %v2612_v57 = vsel %vm6520_vm10, %v2595_v20, 0  ;;  %v2659_v34 = vunpack.c.l.b16 %v2609_v33  ;;  %v2596_v28 = vld [vmem:[#allocation2 + $0x18] sm:$0xf]  ;;  %v2597_v62 = vld [vmem:[#allocation2 + $0x1c] sm:$0xf] }
 0x288   : > { %v2660_v31 = vunpack.c.l.b16 %v2610_v39  ;;  %v2661_v51 = vunpack.c.l.b16 %v2611_v1  ;;  %v2662_v24 = vunpack.c.l.b16 %v2612_v57  ;;  %4037 = vmatpush.bf16.msrb.mxu0 %v5248_v40  ;;  %v2463_v29 = vshrl.u32 %v7133_v46, 16  ;;  %5414 = vmatpush.bf16.msra.mxu2 %v5248_v40 }
 0x289   : > { %v2401_v30 = vpack.c.b16 %v2392_v2, %v2392_v2  ;;  %v1873_v49 = vor.u32 %v7161_v6, %v7152_v11  ;;  %v7179_v41 = vpop.f32.mrf.mxu1  ;;  %v3516_v50 = vor.u32 %v7169_v43, %v7167_v8  ;;  %vm7964_vm1 = vnez %v7861_v59  ;;  %v5246_v6 = vld [vmem:[#allocation11 + $0x208] sm:$0xff] }
 0x28a   : > { %v2676_v48 = vpack.c.b16 %v2660_v31, %v2659_v34  ;;  %v2677_v56 = vpack.c.b16 %v2662_v24, %v2661_v51  ;;  %5406 = vmatpush.bf16.msra.mxu1 %v7007_v10  ;;  %v3080_v46 = vsel %vm7964_vm1, %v3063_v0, 0  ;;  %v3081_v23 = vsel %vm6581_vm8, %v3064_v37, 0  ;;  %v3818_v51 = vld [vmem:[#allocation2 + $0x1c] sm:$0xf]  ;;  %v1940_v0 = vpop.f32.mrf.mxu2 }
 0x28b   : > { %v2467_v20 = vshll.u32 %v2401_v30, 16  ;;  %v2465_v40 = vor.u32 %v2463_v29, %v2461_v17  ;;  %v2613_v39 = vsel %vm6629_vm2, %v2596_v28, 0  ;;  %vm7965_vm4 = vnez %v7865_v9  ;;  %v5245_v29 = vld [vmem:[#allocation11 + $0x200] sm:$0xff]  ;;  %vm7968_vm2 = vmmov %vm7960_vm6 }
 0x28c   : > { %v2686_v3 = vshrl.u32 %v2676_v48, 16  ;;  %v2689_v4 = vshll.u32 %v2676_v48, 16  ;;  %v2694_v11 = vshrl.u32 %v2677_v56, 16  ;;  %v2697_v33 = vshll.u32 %v2677_v56, 16  ;;  %4038 = vmatpush.bf16.msrb.mxu0 %v5247_v22  ;;  %5415 = vmatpush.bf16.msra.mxu2 %v5247_v22  ;;  %vm7969_vm0 = vmmov %vm7968_vm2 }
 0x28d   : > { %v3082_v2 = vsel %vm7965_vm4, %v3065_v19, 0  ;;  %vm7966_vm7 = vnez %v7867_v12  ;;  %v3130_v34 = vunpack.c.l.b16 %v3080_v46  ;;  %v3131_v31 = vunpack.c.l.b16 %v3081_v23  ;;  %vm7970_vm13 = vmmov %vm7969_vm0  ;;  %v3816_v23 = vld [vmem:[#allocation2 + $0x14] sm:$0xf] }
 0x28e   : > { %v2688_v54 = vrot.slane %v2686_v3, 3  ;;  %v2691_v10 = vrot.slane %v2689_v4, 4  ;;  %v2696_v8 = vrot.slane %v2694_v11, 3  ;;  %v2699_v43 = vrot.slane %v2697_v33, 4  ;;  %5407 = vmatpush.bf16.msra.mxu1 %v7024_v27  ;;  %vm7971_vm6 = vmmov %vm7963_vm5  ;;  %v7214_v4 = vpop.f32.mrf.mxu0  ;;  %v2599_v11 = vld [vmem:[#allocation2 + $0x24] sm:$0xf] }
 0x28f   : > { %v3083_v1 = vsel %vm7966_vm7, %v3066_v5, 0  ;;  %vm7967_vm10 = vnez %v7873_v16  ;;  %v2469_v30 = vrot.slane %v2467_v20, 1  ;;  %v2663_v48 = vunpack.c.l.b16 %v2613_v39  ;;  %v2598_v20 = vld [vmem:[#allocation2 + $0x20] sm:$0xf] }
 0x290   : > { %v2692_v57 = vor.u32 %v2691_v10, %v2688_v54  ;;  %v2614_v17 = vsel %vm7967_vm10, %v2597_v62, 0  ;;  %v7197_v24 = vor.u32 %v2699_v43, %v2696_v8  ;;  %4039 = vmatpush.bf16.msrb.mxu0 %v5246_v6  ;;  %v1874_v22 = vsel %vm7968_vm2, %v7137_v58, %v1873_v49  ;;  %5416 = vmatpush.bf16.msra.mxu2 %v5246_v6  ;;  %v3817_v54 = vld [vmem:[#allocation2 + $0x18] sm:$0xf]  ;;  %vm7977_vm10 = vmmov %vm7971_vm6 }
 0x291   : > { %v2664_v37 = vunpack.c.l.b16 %v2614_v17  ;;  %v3517_v27 = vsel %vm7969_vm0, %v7139_v60, %v3516_v50  ;;  %v1941_v56 = vadd.f32 %v1940_v0, %v7142_v42  ;;  %v7206_v19 = vpop.f32.mrf.mxu1  ;;  %v3835_v28 = vsel %vm7965_vm4, %v3818_v51, 0  ;;  %v3068_v0 = vld [vmem:[#allocation2 + $0x20] sm:$0xf] }
 0x292   : > { %v2701_v16 = vsel %vm7970_vm13, %v2692_v57, %v7197_v24  ;;  %v3836_v3 = vsel %vm7966_vm7, %v3819_v61, 0  ;;  %5408 = vmatpush.bf16.msra.mxu1 %v7038_v18  ;;  %v3132_v58 = vunpack.c.l.b16 %v3082_v2  ;;  %v3133_v60 = vunpack.c.l.b16 %v3083_v1 }
 0x293   : > { %v2678_v5 = vpack.c.b16 %v2664_v37, %v2663_v48  ;;  %2829 = vmatmul.bf16.vlgmr.msrb.gmra.mxu1 %v2701_v16  ;;  %v3147_v49 = vpack.c.b16 %v3131_v31, %v3130_v34  ;;  %v3885_v42 = vunpack.c.l.b16 %v3835_v28  ;;  %v2470_v50 = vsel %vm7971_vm6, %v2465_v40, %v2469_v30 }
 0x294   : > { %4040 = vmatpush.bf16.msrb.mxu0 %v5245_v29  ;;  %v3886_v9 = vunpack.c.l.b16 %v3836_v3  ;;  %5417 = vmatpush.bf16.msra.mxu2 %v5245_v29  ;;  %v7217_v18 = vpack.c.b16 %v3133_v60, %v3132_v58  ;;  %vm7972_vm5 = vnez %v7882_v55  ;;  %vm7973_vm4 = vnez %v7886_v25  ;;  %v3067_v25 = vld [vmem:[#allocation2 + $0x1c] sm:$0xf]  ;;  %v5189_v58 = vld [vmem:[#allocation2 + $0xc] sm:$0xff]  ;;  %v5221_v60 = vld [vmem:[#allocation2 + $0x14] sm:$0xff] }
 0x295   : > { %v2703_v46 = vshrl.u32 %v2678_v5, 16  ;;  %v2706_v62 = vshll.u32 %v2678_v5, 16  ;;  %v3159_v33 = vshll.u32 %v3147_v49, 16  ;;  %v2615_v8 = vsel %vm7972_vm5, %v2598_v20, 0  ;;  %v2536_v16 = vpop.f32.mrf.mxu3  ;;  %v2600_v20 = vld [vmem:[#allocation2 + $0x28] sm:$0xf]  ;;  %vm7981_vm5 = vmmov %vm7971_vm6 }
 0x296   : > { %1974 = vmatmul.bf16.gmra.mxu2 %v1874_v22  ;;  %v3901_v12 = vpack.c.b16 %v3886_v9, %v3885_v42  ;;  %5409 = vmatpush.bf16.msra.mxu1 %v7067_v13  ;;  %v2616_v43 = vsel %vm7973_vm4, %v2599_v11, 0  ;;  %v3157_v2 = vshrl.u32 %v3147_v49, 16  ;;  %v3164_v34 = vshll.u32 %v7217_v18, 16  ;;  %v7235_v29 = vpop.f32.mrf.mxu0  ;;  %v2601_v11 = vld [vmem:[#allocation2 + $0x2c] sm:$0xf] }
 0x297   : > { %3617 = vmatmul.bf16.gmra.mxu0 %v3517_v27  ;;  %2570 = vmatmul.bf16.gmra.mxu3 %v2470_v50  ;;  %v2705_v6 = vrot.slane %v2703_v46, 3  ;;  %v2708_v40 = vrot.slane %v2706_v62, 4  ;;  %v3161_v57 = vrot.slane %v3159_v33, 1  ;;  %v3833_v31 = vsel %vm7964_vm1, %v3816_v23, 0  ;;  %v7247_v50 = vpop.f32.mrf.mxu2 }
 0x298   : > { %v3917_v10 = vshll.u32 %v3901_v12, 16  ;;  %v3921_v39 = vshrl.u32 %v3901_v12, 16  ;;  %v3834_v17 = vsel %vm6581_vm8, %v3817_v54, 0  ;;  %v2665_v61 = vunpack.c.l.b16 %v2615_v8  ;;  %vm7975_vm8 = vmmov %vm7969_vm0 }
 0x299   : > { %v7225_v13 = vpop.f32.mrf.mxu1  ;;  %v2709_v51 = vor.u32 %v2708_v40, %v2705_v6  ;;  %v2666_v30 = vunpack.c.l.b16 %v2616_v43  ;;  %v3883_v48 = vunpack.c.l.b16 %v3833_v31  ;;  %v3884_v37 = vunpack.c.l.b16 %v3834_v17  ;;  %v3069_v17 = vld [vmem:[#allocation2 + $0x24] sm:$0xf] }
 0x29a   : > { %v7223_v1 = vrot.slane %v3917_v10, 1  ;;  %v3162_v22 = vor.u32 %v3161_v57, %v3157_v2  ;;  %v3166_v27 = vrot.slane %v3164_v34, 1  ;;  %vm7974_vm1 = vnez %v7871_v7 }
 0x29b   : > { %v3084_v59 = vsel %vm7974_vm1, %v3067_v25, 0  ;;  %v7239_v63 = vadd.f32 %v2536_v16, %v1941_v56  ;;  %v2710_v5 = vsel %vm7975_vm8, %v7197_v24, %v2709_v51  ;;  %vm7976_vm7 = vnez %v7875_v21  ;;  %v5256_v21 = vld [vmem:[#allocation12 + $0x18] sm:$0xff] }
 0x29c   : > { %v7233_v55 = vor.u32 %v3921_v39, %v7223_v1  ;;  %v3085_v28 = vsel %vm7976_vm7, %v3068_v0, 0  ;;  %v2679_v3 = vpack.c.b16 %v2666_v30, %v2665_v61  ;;  %v3900_v49 = vpack.c.b16 %v3884_v37, %v3883_v48  ;;  %v3070_v0 = vld [vmem:[#allocation2 + $0x28] sm:$0xf] }
 0x29d   : > { %v3134_v46 = vunpack.c.l.b16 %v3084_v59  ;;  %v3135_v62 = vunpack.c.l.b16 %v3085_v28  ;;  %v3167_v56 = vsel %vm7977_vm10, %v3162_v22, %v3166_v27  ;;  %v7250_v33 = vpop.f32.mrf.mxu3  ;;  %v2617_v10 = vsel %vm6796_vm14, %v2600_v20, 0  ;;  %vm7984_vm10 = vmmov %vm7969_vm0 }
 0x29e   : > { %v2712_v9 = vshrl.u32 %v2679_v3, 16  ;;  %v2715_v12 = vshll.u32 %v2679_v3, 16  ;;  %v3912_v24 = vshll.u32 %v3900_v49, 16  ;;  %vm7978_vm2 = vnez %v7901_v44  ;;  %v5190_v3 = vld [vmem:[#allocation2 + $0x14] sm:$0xff] }
 0x29f   : > { %v3149_v23 = vpack.c.b16 %v3135_v62, %v3134_v46  ;;  %v7252_v6 = vpop.f32.mrf.mxu0  ;;  %v2618_v39 = vsel %vm7978_vm2, %v2601_v11, 0  ;;  %v3910_v8 = vshrl.u32 %v3900_v49, 16  ;;  %v3168_v57 = vshrl.u32 %v7217_v18, 16 }
 0x2a0   : > { %v2714_v40 = vrot.slane %v2712_v9, 3  ;;  %v2717_v54 = vrot.slane %v2715_v12, 4  ;;  %v3914_v43 = vrot.slane %v3912_v24, 1  ;;  %v2667_v25 = vunpack.c.l.b16 %v2617_v10  ;;  %v2602_v12 = vld [vmem:[#allocation2 + $0x30] sm:$0xf] }
 0x2a1   : > { %v7245_v42 = vpop.f32.mrf.mxu1  ;;  %v3172_v34 = vshll.u32 %v3149_v23, 16  ;;  %v2668_v61 = vunpack.c.l.b16 %v2618_v39  ;;  %v3170_v37 = vor.u32 %v3168_v57, %v3166_v27  ;;  %vm7979_vm14 = vnez %v7880_v52  ;;  %v2603_v24 = vld [vmem:[#allocation2 + $0x34] sm:$0xf] }
 0x2a2   : > { %v2718_v31 = vor.u32 %v2717_v54, %v2714_v40  ;;  %v3915_v48 = vor.u32 %v3914_v43, %v3910_v8  ;;  %v3086_v16 = vsel %vm7979_vm14, %v3069_v17, 0  ;;  %vm7980_vm13 = vnez %v7888_v38 }
 0x2a3   : > { %2834 = vmatmul.bf16.gmra.mxu1 %v2710_v5  ;;  %v3174_v22 = vrot.slane %v3172_v34, 1  ;;  %v3087_v5 = vsel %vm7980_vm13, %v3070_v0, 0  ;;  %v2680_v28 = vpack.c.b16 %v2668_v61, %v2667_v25  ;;  %v3136_v27 = vunpack.c.l.b16 %v3086_v16  ;;  %v3071_v61 = vld [vmem:[#allocation2 + $0x2c] sm:$0xf] }
 0x2a4   : > { %v1945_v30 = vpop.f32.mrf.mxu2  ;;  %v2719_v18 = vsel %vm7969_vm0, %v2709_v51, %v2718_v31  ;;  %v3137_v49 = vunpack.c.l.b16 %v3087_v5  ;;  %vm7982_vm4 = vnez %v7913_v14  ;;  %vm7983_vm8 = vnez %v7920_v32 }
 0x2a5   : > { %v1946_v53 = vadd.f32 %v1945_v30, %v7206_v19  ;;  %v2541_v44 = vpop.f32.mrf.mxu3  ;;  %v3175_v46 = vsel %vm7981_vm5, %v3170_v37, %v3174_v22  ;;  %v2721_v62 = vshrl.u32 %v2680_v28, 16  ;;  %v2619_v10 = vsel %vm7982_vm4, %v2602_v12, 0  ;;  %v3072_v30 = vld [vmem:[#allocation2 + $0x30] sm:$0xf] }
 0x2a6   : > { %3006 = vmatmul.bf16.vlgmr.msrb.gmra.mxu2 %v5189_v58  ;;  %v3920_v58 = vsel %vm7971_vm6, %v3915_v48, %v7223_v1  ;;  %v3150_v20 = vpack.c.b16 %v3137_v49, %v3136_v27  ;;  %v2620_v39 = vsel %vm7983_vm8, %v2603_v24, 0  ;;  %v3176_v43 = vshrl.u32 %v3149_v23, 16  ;;  %v5191_v23 = vld [vmem:[#allocation2 + $0x1c] sm:$0xff]  ;;  %vm7987_vm6 = vmmov %vm7981_vm5  ;;  %v7988_v12 = vld [vmem:[#allocation41_spill] sm:$0xff] }
 0x2a7   : > { %3759 = vmatmul.bf16.vlgmr.msra.gmra.mxu0 %v5221_v60  ;;  %3288 = vmatmul.bf16.vlgmr.msrb.gmra.mxu3 %v3167_v56  ;;  %v7264_v59 = vadd.f32 %v2541_v44, %v1946_v53  ;;  %v7271_v60 = vpop.f32.mrf.mxu0  ;;  %v2724_v56 = vshll.u32 %v2680_v28, 16  ;;  %v2723_v40 = vrot.slane %v2721_v62, 3  ;;  %v2669_v17 = vunpack.c.l.b16 %v2619_v10  ;;  %v2605_v62 = vld [vmem:[#allocation2 + $0x3c] sm:$0xf] }
 0x2a8   : > { %v3180_v57 = vshll.u32 %v3150_v20, 16  ;;  %v2670_v25 = vunpack.c.l.b16 %v2620_v39  ;;  %v3178_v0 = vor.u32 %v3176_v43, %v3174_v22  ;;  %vm7985_vm2 = vnez %v7894_v47 }
 0x2a9   : > { %v7258_v2 = vpop.f32.mrf.mxu1  ;;  %v2726_v54 = vrot.slane %v2724_v56, 4  ;;  %v3088_v14 = vsel %vm7985_vm2, %v3071_v61, 0  ;;  %vm7986_vm0 = vnez %v7905_v45  ;;  %vm7989_vm5 = vnez %v7988_v12  ;;  %v7429_v45 = vld [vmem:[%s8022_s12] ss:$0 sm:$0xff]  ;;  %s4429_s12 = sshll.u32 %s4426_s1, 4  ;;  %s4430_s12 = int_to_ptr.hbm [resolvable:$true] %s4429_s12 }
 0x2aa   : > { %v3182_v48 = vrot.slane %v3180_v57, 1  ;;  %v3089_v32 = vsel %vm7986_vm0, %v3072_v30, 0  ;;  %v2681_v37 = vpack.c.b16 %v2670_v25, %v2669_v17  ;;  %v3138_v28 = vunpack.c.l.b16 %v3088_v14  ;;  %s5801_s18 = sshra.s32 %s4430_s12, 4  ;;  %s5802_s18 = int_to_ptr.hbm [resolvable:$true] %s5801_s18 }
 0x2ab   : > { %v2727_v34 = vor.u32 %v2726_v54, %v2723_v40  ;;  %v3139_v22 = vunpack.c.l.b16 %v3089_v32  ;;  %v2622_v24 = vsel %vm7989_vm5, %v2605_v62, 0  ;;  %v3184_v39 = vshrl.u32 %v3150_v20, 16  ;;  %p5808_p0 = scmp.lt.s32.totalorder %s5802_s18, %s8043_s3 }
 0x2ac   : > { %v1947_v51 = vpop.f32.mrf.mxu2  ;;  %v2733_v27 = vshll.u32 %v2681_v37, 16  ;;  %v2672_v61 = vunpack.c.l.b16 %v2622_v24 }
 0x2ad   : > { %v1948_v9 = vadd.f32 %v1947_v51, %v7225_v13  ;;  %v2543_v1 = vpop.f32.mrf.mxu3  ;;  %v2728_v53 = vsel %vm7984_vm10, %v2718_v31, %v2727_v34  ;;  %v3151_v56 = vpack.c.b16 %v3139_v22, %v3138_v28 }
 0x2af   : > { %v7277_v11 = vadd.f32 %v2543_v1, %v1948_v9  ;;  %v2735_v9 = vrot.slane %v2733_v27, 4  ;;  %v3188_v43 = vshll.u32 %v3151_v56, 16 }
 0x2b1   : > { %v7273_v19 = vpop.f32.mrf.mxu1  ;;  %v3190_v14 = vrot.slane %v3188_v43, 1  ;;  %v3192_v43 = vshrl.u32 %v3151_v56, 16  ;;  %v8001_v56 = vld [vmem:[#allocation42_spill] sm:$0xff] }
 0x2b3   : > { %2839 = vmatmul.bf16.gmra.mxu1 %v2719_v18  ;;  %v3194_v26 = vor.u32 %v3192_v43, %v3190_v14 }
 0x2b6   : > { %3011 = vmatmul.bf16.gmra.mxu2 %v5190_v3  ;;  %v3183_v3 = vsel %vm7987_vm6, %v3178_v0, %v3182_v48  ;;  %v3074_v0 = vld [vmem:[#allocation2 + $0x38] sm:$0xf] }
 0x2b7   : > { %4041 = vmatmul.bf16.vlgmr.msrb.gmra.mxu0 %v3920_v58  ;;  %3293 = vmatmul.bf16.gmra.mxu3 %v3175_v46  ;;  %v7285_v13 = vpop.f32.mrf.mxu0  ;;  %v2730_v58 = vshrl.u32 %v2681_v37, 16  ;;  %v2604_v46 = vld [vmem:[#allocation2 + $0x38] sm:$0xf] }
 0x2b8   : > { %v7991_v37 = vld [vmem:[#allocation38_spill] sm:$0xff] }
 0x2b9   : > { %v7283_v8 = vpop.f32.mrf.mxu1  ;;  %v2732_v51 = vrot.slane %v2730_v58, 3  ;;  %vm7992_vm4 = vnez %v7991_v37 }
 0x2bb   : > { %v2736_v17 = vor.u32 %v2735_v9, %v2732_v51  ;;  %v2606_v9 = vld [vmem:[#allocation2 + $0x40] sm:$0xf] }
 0x2bc   : > { %v1950_v44 = vpop.f32.mrf.mxu2 }
 0x2bd   : > { %v1951_v18 = vadd.f32 %v1950_v44, %v7245_v42  ;;  %v2546_v5 = vpop.f32.mrf.mxu3  ;;  %v2621_v42 = vsel %vm6967_vm3, %v2604_v46, 0  ;;  %vm7990_vm3 = vmmov %vm7984_vm10 }
 0x2be   : > { %v2671_v25 = vunpack.c.l.b16 %v2621_v42  ;;  %v2737_v32 = vsel %vm7990_vm3, %v2727_v34, %v2736_v17  ;;  %vm7995_vm10 = vmmov %vm7987_vm6  ;;  %v2607_v42 = vld [vmem:[#allocation2 + $0x44] sm:$0xf]  ;;  %vm8002_vm6 = vnez %v8001_v56 }
 0x2bf   : > { %v7296_v31 = vpop.f32.mrf.mxu0  ;;  %v7298_v49 = vadd.f32 %v2546_v5, %v1951_v18  ;;  %v5192_v18 = vld [vmem:[#allocation2 + $0x24] sm:$0xff]  ;;  %vm8003_vm5 = vmmov %vm7995_vm10 }
 0x2c0   : > { %v2682_v44 = vpack.c.b16 %v2672_v61, %v2671_v25 }
 0x2c1   : > { %v7292_v16 = vpop.f32.mrf.mxu1 }
 0x2c2   : > { %v2739_v34 = vshrl.u32 %v2682_v44, 16  ;;  %v2742_v46 = vshll.u32 %v2682_v44, 16 }
 0x2c3   : > { %2844 = vmatmul.bf16.gmra.mxu1 %v2728_v53  ;;  %v3186_v53 = vor.u32 %v3184_v39, %v3182_v48 }
 0x2c4   : > { %v1952_v1 = vpop.f32.mrf.mxu2  ;;  %v2744_v24 = vrot.slane %v2742_v46, 4 }
 0x2c5   : > { %v1953_v54 = vadd.f32 %v1952_v1, %v7258_v2  ;;  %v2548_v10 = vpop.f32.mrf.mxu3  ;;  %v7993_v2 = vld [vmem:[#allocation39_spill] sm:$0xff]  ;;  %v3191_v58 = vsel %vm7995_vm10, %v3186_v53, %v3190_v14  ;;  %v2623_v1 = vsel %vm7074_vm9, %v2606_v9, 0  ;;  %vm7998_vm9 = vmmov %vm7990_vm3 }
 0x2c6   : > { %3016 = vmatmul.bf16.gmra.mxu2 %v5191_v23  ;;  %v3090_v23 = vsel %vm7992_vm4, %v3073_v36, 0  ;;  %vm7994_vm8 = vnez %v7993_v2 }
 0x2c7   : > { %3298 = vmatmul.bf16.gmra.mxu3 %v3183_v3  ;;  %v7307_v57 = vpop.f32.mrf.mxu0  ;;  %v7309_v30 = vadd.f32 %v2548_v10, %v1953_v54  ;;  %v3091_v20 = vsel %vm7994_vm8, %v3074_v0, 0  ;;  %v3140_v22 = vunpack.c.l.b16 %v3090_v23  ;;  %v2624_v54 = vsel %vm7099_vm11, %v2607_v42, 0  ;;  %v3075_v23 = vld [vmem:[#allocation2 + $0x3c] sm:$0xf] }
 0x2c8   : > { %v3141_v3 = vunpack.c.l.b16 %v3091_v20  ;;  %v2673_v0 = vunpack.c.l.b16 %v2623_v1  ;;  %v2674_v53 = vunpack.c.l.b16 %v2624_v54  ;;  %v3076_v20 = vld [vmem:[#allocation2 + $0x40] sm:$0xf] }
 0x2c9   : > { %v7304_v40 = vpop.f32.mrf.mxu1 }
 0x2ca   : > { %v3152_v12 = vpack.c.b16 %v3141_v3, %v3140_v22  ;;  %v3093_v22 = vsel %vm8002_vm6, %v3076_v20, 0  ;;  %v2683_v3 = vpack.c.b16 %v2674_v53, %v2673_v0 }
 0x2cc   : > { %v1955_v5 = vpop.f32.mrf.mxu2  ;;  %v3196_v25 = vshll.u32 %v3152_v12, 16  ;;  %v2748_v9 = vshrl.u32 %v2683_v3, 16  ;;  %v2751_v14 = vshll.u32 %v2683_v3, 16  ;;  %v3200_v53 = vshrl.u32 %v3152_v12, 16 }
 0x2cd   : > { %v1956_v28 = vadd.f32 %v1955_v5, %v7273_v19  ;;  %v2741_v19 = vrot.slane %v2739_v34, 3  ;;  %v3143_v34 = vunpack.c.l.b16 %v3093_v22 }
 0x2ce   : > { %v2753_v43 = vrot.slane %v2751_v14, 4  ;;  %v8007_v14 = vld [vmem:[#allocation43_spill] sm:$0xff] }
 0x2cf   : > { %v2551_v48 = vpop.f32.mrf.mxu3  ;;  %v7322_v51 = vpop.f32.mrf.mxu0  ;;  %v2745_v36 = vor.u32 %v2744_v24, %v2741_v19  ;;  %v2608_v24 = vld [vmem:[#allocation2 + $0x48] sm:$0xf] }
 0x2d0   : > { %v7320_v62 = vadd.f32 %v2551_v48, %v1956_v28  ;;  %7996 = vst [vmem:[#allocation41_spill] sm:$0xff] %v7322_v51  ;;  %v7999_v28 = vld [vmem:[#allocation40_spill] sm:$0xff]  ;;  %v2625_v0 = vsel %vm7115_vm12, %v2608_v24, 0  ;;  %vm8008_vm12 = vnez %v8007_v14  ;;  %v3824_v51 = vld [vmem:[#allocation2 + $0x34] sm:$0xf] }
 0x2d1   : > { %v7318_v27 = vpop.f32.mrf.mxu1  ;;  %v2746_v35 = vsel %vm7998_vm9, %v2736_v17, %v2745_v36  ;;  %vm8000_vm11 = vnez %v7999_v28  ;;  %vm8011_vm9 = vmmov %vm8003_vm5 }
 0x2d3   : > { %2849 = vmatmul.bf16.gmra.mxu1 %v2737_v32 }
 0x2d4   : > { %v1957_v10 = vpop.f32.mrf.mxu2 }
 0x2d5   : > { %v1958_v39 = vadd.f32 %v1957_v10, %v7283_v8  ;;  %v3092_v8 = vsel %vm8000_vm11, %v3075_v23, 0 }
 0x2d6   : > { %3021 = vmatmul.bf16.gmra.mxu2 %v5192_v18  ;;  %v3198_v18 = vrot.slane %v3196_v25, 1  ;;  %v3142_v48 = vunpack.c.l.b16 %v3092_v8  ;;  %v3077_v8 = vld [vmem:[#allocation2 + $0x44] sm:$0xf] }
 0x2d7   : > { %3303 = vmatmul.bf16.gmra.mxu3 %v3191_v58  ;;  %v2553_v61 = vpop.f32.mrf.mxu3  ;;  %v5193_v58 = vld [vmem:[#allocation2 + $0x2c] sm:$0xff]  ;;  %v3094_v12 = vsel %vm8008_vm12, %v3077_v8, 0 }
 0x2d8   : > { %v7329_v32 = vadd.f32 %v2553_v61, %v1958_v39  ;;  %v3199_v46 = vsel %vm8003_vm5, %v3194_v26, %v3198_v18  ;;  %v3153_v1 = vpack.c.b16 %v3143_v34, %v3142_v48  ;;  %v2750_v39 = vrot.slane %v2748_v9, 3  ;;  %v5194_v9 = vld [vmem:[#allocation2 + $0x34] sm:$0xff]  ;;  %vm8013_vm5 = vmmov %vm7990_vm3 }
 0x2d9   : > { %v7331_v44 = vpop.f32.mrf.mxu1  ;;  %v2675_v26 = vunpack.c.l.b16 %v2625_v0  ;;  %v3202_v22 = vor.u32 %v3200_v53, %v3198_v18  ;;  %v3144_v18 = vunpack.c.l.b16 %v3094_v12 }
 0x2da   : > { %v3204_v23 = vshll.u32 %v3153_v1, 16  ;;  %v2754_v20 = vor.u32 %v2753_v43, %v2750_v39 }
 0x2dc   : > { %v3206_v3 = vrot.slane %v3204_v23, 1  ;;  %v2755_v34 = vsel %vm7990_vm3, %v2745_v36, %v2754_v20  ;;  %vm8015_vm3 = vmmov %vm8011_vm9 }
 0x2df   : > { %v7333_v5 = vpop.f32.mrf.mxu0 }
 0x2e0   : > { %7997 = vst [vmem:[#allocation38_spill] sm:$0xff] %v7333_v5 }
 0x2e1   : > { %v2556_v19 = vpop.f32.mrf.mxu3  ;;  %v7344_v10 = vpop.f32.mrf.mxu1 }
 0x2e3   : > { %2854 = vmatmul.bf16.gmra.mxu1 %v2746_v35 }
 0x2e4   : > { %v1960_v42 = vpop.f32.mrf.mxu2 }
 0x2e5   : > { %v1961_v17 = vadd.f32 %v1960_v42, %v7292_v16  ;;  %v3078_v16 = vld [vmem:[#allocation2 + $0x48] sm:$0xf]  ;;  %v8009_v42 = vld [vmem:[#allocation45_spill] sm:$0xff] }
 0x2e6   : > { %3026 = vmatmul.bf16.gmra.mxu2 %v5193_v58  ;;  %vm8010_vm10 = vnez %v8009_v42 }
 0x2e7   : > { %3308 = vmatmul.bf16.gmra.mxu3 %v3199_v46  ;;  %v7342_v54 = vpop.f32.mrf.mxu0  ;;  %v7346_v25 = vadd.f32 %v2556_v19, %v1961_v17  ;;  %v2684_v46 = vpack.c.b16 %v2675_v26, %v2675_v26  ;;  %v3095_v19 = vsel %vm8010_vm10, %v3078_v16, 0  ;;  %v3207_v17 = vsel %vm8011_vm9, %v3202_v22, %v3206_v3 }
 0x2e8   : > { %8004 = vst [vmem:[#allocation39_spill] sm:$0xff] %v7342_v54  ;;  %v3145_v39 = vunpack.c.l.b16 %v3095_v19  ;;  %v3208_v54 = vshrl.u32 %v3153_v1, 16 }
 0x2e9   : > { %v7352_v58 = vpop.f32.mrf.mxu3  ;;  %v7361_v24 = vpop.f32.mrf.mxu1  ;;  %v2757_v43 = vshrl.u32 %v2684_v46, 16  ;;  %v2760_v61 = vshll.u32 %v2684_v46, 16  ;;  %v3079_v46 = vld [vmem:[#allocation2 + $0x4c] sm:$0x1] }
 0x2ea   : > { %v3154_v23 = vpack.c.b16 %v3145_v39, %v3144_v18  ;;  %v3096_v18 = vsel %vm7154_vm15, %v3079_v46, 0  ;;  %v3821_v46 = vld [vmem:[#allocation2 + $0x28] sm:$0xf] }
 0x2eb   : > { %v2759_v26 = vrot.slane %v2757_v43, 3  ;;  %v2762_v8 = vrot.slane %v2760_v61, 4  ;;  %v3146_v61 = vunpack.c.l.b16 %v3096_v18 }
 0x2ec   : > { %v7350_v35 = vpop.f32.mrf.mxu2  ;;  %v3212_v22 = vshll.u32 %v3154_v23, 16 }
 0x2ed   : > { %v2763_v12 = vor.u32 %v2762_v8, %v2759_v26 }
 0x2ee   : > { %v3214_v5 = vrot.slane %v3212_v22, 1  ;;  %v3820_v22 = vld [vmem:[#allocation2 + $0x24] sm:$0xf] }
 0x2ef   : > { %v7354_v48 = vpop.f32.mrf.mxu0  ;;  %v3837_v18 = vsel %vm7974_vm1, %v3820_v22, 0  ;;  %vm8018_vm1 = vmmov %vm8015_vm3 }
 0x2f0   : > { %8006 = vst [vmem:[#allocation40_spill] sm:$0xff] %v7354_v48 }
 0x2f3   : > { %2859 = vmatmul.bf16.gmra.mxu1 %v2755_v34  ;;  %v1746_v34 = vpop.f32.mrf.mxu1 }
 0x2f4   : > { %v1965_v0 = vpop.f32.mrf.mxu2 }
 0x2f5   : > { %v1966_v36 = vadd.f32 %v1965_v0, %v7318_v27  ;;  %v5195_v27 = vld [vmem:[#allocation2 + $0x3c] sm:$0xff]  ;;  %v5260_v0 = vld [vmem:[#allocation12 + $0x38] sm:$0xff] }
 0x2f6   : > { %3031 = vmatmul.bf16.gmra.mxu2 %v5194_v9  ;;  %v3210_v9 = vor.u32 %v3208_v54, %v3206_v3  ;;  %4226 = vmatpush.bf16.msra.mxu0 %v5260_v0  ;;  %v5259_v3 = vld [vmem:[#allocation12 + $0x30] sm:$0xff] }
 0x2f7   : > { %3313 = vmatmul.bf16.gmra.mxu3 %v3207_v17  ;;  %v7365_v53 = vpop.f32.mrf.mxu0  ;;  %v2764_v17 = vsel %vm8013_vm5, %v2754_v20, %v2763_v12  ;;  %v3155_v20 = vpack.c.b16 %v3146_v61, %v3146_v61 }
 0x2f8   : > { %8012 = vst [vmem:[#allocation42_spill] sm:$0xff] %v7365_v53  ;;  %v3215_v1 = vsel %vm8015_vm3, %v3210_v9, %v3214_v5  ;;  %5418 = vmatpush.bf16.msra.mxu3 %v5260_v0  ;;  %v3216_v9 = vshrl.u32 %v3154_v23, 16 }
 0x2fa   : > { %v2561_v16 = vpop.f32.mrf.mxu3  ;;  %4227 = vmatpush.bf16.msra.mxu0 %v5259_v3  ;;  %v3218_v0 = vor.u32 %v3216_v9, %v3214_v5  ;;  %v5255_v9 = vld [vmem:[#allocation12 + $0x10] sm:$0xff] }
 0x2fb   : > { %v7367_v48 = vadd.f32 %v2561_v16, %v1966_v36  ;;  %v7379_v36 = vpop.f32.mrf.mxu1 }
 0x2fc   : > { %v7369_v19 = vpop.f32.mrf.mxu2  ;;  %5419 = vmatpush.bf16.msra.mxu3 %v5259_v3 }
 0x302   : > { %v7374_v39 = vpop.f32.mrf.mxu3 }
 0x303   : > { %2864 = vmatmul.bf16.gmra.mxu1 %v2764_v17  ;;  %v3220_v17 = vshll.u32 %v3155_v20, 16 }
 0x304   : > { %v7376_v43 = vpop.f32.mrf.mxu0 }
 0x305   : > { %8014 = vst [vmem:[#allocation44_spill] sm:$0xff] %v7376_v43 }
 0x306   : > { %3036 = vmatmul.bf16.gmra.mxu2 %v5195_v27  ;;  %v5258_v27 = vld [vmem:[#allocation12 + $0x28] sm:$0xff] }
 0x307   : > { %3318 = vmatmul.bf16.gmra.mxu3 %v3215_v1  ;;  %4228 = vmatpush.bf16.msra.mxu0 %v5258_v27  ;;  %v5222_v1 = vld [vmem:[#allocation2 + $0x1c] sm:$0xff] }
 0x308   : > { %5420 = vmatpush.bf16.msra.mxu3 %v5258_v27 }
 0x309   : > { %v1970_v54 = vpop.f32.mrf.mxu2 }
 0x30a   : > { %v1971_v26 = vadd.f32 %v1970_v54, %v7344_v10  ;;  %v2566_v8 = vpop.f32.mrf.mxu3  ;;  %v3838_v10 = vsel %vm7976_vm7, %v3821_v46, 0  ;;  %v3222_v54 = vrot.slane %v3220_v17, 1  ;;  %vm8020_vm7 = vmmov %vm8018_vm1 }
 0x30b   : > { %v3888_v23 = vunpack.c.l.b16 %v3838_v10 }
 0x30c   : > { %v7382_v16 = vpop.f32.mrf.mxu0  ;;  %v7384_v12 = vadd.f32 %v2566_v8, %v1971_v26  ;;  %v5257_v26 = vld [vmem:[#allocation12 + $0x20] sm:$0xff]  ;;  %v5196_v8 = vld [vmem:[#allocation2 + $0x44] sm:$0xff]  ;;  %v3223_v7 = vsel %vm8018_vm1, %v3218_v0, %v3222_v54  ;;  %v3823_v0 = vld [vmem:[#allocation2 + $0x30] sm:$0xf] }
 0x30d   : > { %8016 = vst [vmem:[#allocation43_spill] sm:$0xff] %v7382_v16  ;;  %v3887_v16 = vunpack.c.l.b16 %v3837_v18  ;;  %4229 = vmatpush.bf16.msra.mxu0 %v5257_v26  ;;  %5421 = vmatpush.bf16.msra.mxu3 %v5257_v26  ;;  %v5254_v54 = vld [vmem:[#allocation12 + $0x8] sm:$0xff] }
 0x30f   : > { %v3902_v22 = vpack.c.b16 %v3888_v23, %v3887_v16  ;;  %v5223_v16 = vld [vmem:[#allocation2 + $0x24] sm:$0xff] }
 0x310   : > { %v2830_v3 = vpop.f32.mrf.mxu1 }
 0x311   : > { %v7390_v61 = vpop.f32.mrf.mxu2  ;;  %4230 = vmatpush.bf16.msra.mxu0 %v5256_v21  ;;  %5422 = vmatpush.bf16.msra.mxu3 %v5256_v21  ;;  %v3925_v10 = vshll.u32 %v3902_v22, 16 }
 0x312   : > { %v7392_v20 = vpop.f32.mrf.mxu3 }
 0x313   : > { %3764 = vmatmul.bf16.vlgmr.msra.gmra.mxu1 %v5222_v1  ;;  %v3822_v1 = vld [vmem:[#allocation2 + $0x2c] sm:$0xf] }
 0x314   : > { %v7394_v43 = vpop.f32.mrf.mxu0  ;;  %v3839_v23 = vsel %vm7979_vm14, %v3822_v1, 0  ;;  %v2870_v1 = vadd.f32 %v2830_v3, %v7239_v63  ;;  %vm8021_vm14 = vmmov %vm8018_vm1 }
 0x315   : > { %8017 = vst [vmem:[#allocation45_spill] sm:$0xff] %v7394_v43  ;;  %4231 = vmatpush.bf16.msra.mxu0 %v5255_v9  ;;  %5423 = vmatpush.bf16.msra.mxu3 %v5255_v9 }
 0x316   : > { %3041 = vmatmul.bf16.gmra.mxu2 %v5196_v8  ;;  %v3927_v8 = vrot.slane %v3925_v10, 1 }
 0x317   : > { %3323 = vmatmul.bf16.gmra.mxu3 %v3223_v7 }
 0x318   : > { %v2832_v46 = vpop.f32.mrf.mxu1 }
 0x319   : > { %v1975_v5 = vpop.f32.mrf.mxu2  ;;  %4232 = vmatpush.bf16.msra.mxu0 %v5254_v54  ;;  %5424 = vmatpush.bf16.msra.mxu3 %v5254_v54  ;;  %v3928_v54 = vsel %vm8020_vm7, %v7233_v55, %v3927_v8  ;;  %v3929_v55 = vshrl.u32 %v3902_v22, 16 }
 0x31a   : > { %v1976_v17 = vadd.f32 %v1975_v5, %v1746_v34  ;;  %v2571_v27 = vpop.f32.mrf.mxu3  ;;  %v3840_v34 = vsel %vm7980_vm13, %v3823_v0, 0  ;;  %v5253_v5 = vld [vmem:[#allocation12] sm:$0xff]  ;;  %vm8024_vm13 = vmmov %vm8018_vm1 }
 0x31b   : > { %v3890_v52 = vunpack.c.l.b16 %v3840_v34 }
 0x31c   : > { %v7397_v18 = vpop.f32.mrf.mxu0  ;;  %v7399_v26 = vadd.f32 %v2571_v27, %v1976_v17 }
 0x31d   : > { %8019 = vst [vmem:[#allocation46_spill] sm:$0xff] %v7397_v18  ;;  %v3889_v18 = vunpack.c.l.b16 %v3839_v23  ;;  %4233 = vmatpush.bf16.msra.mxu0 %v5253_v5  ;;  %5425 = vmatpush.bf16.msra.mxu3 %v5253_v5  ;;  %v3825_v5 = vld [vmem:[#allocation2 + $0x38] sm:$0xf] }
 0x31f   : > { %v3903_v38 = vpack.c.b16 %v3890_v52, %v3889_v18  ;;  %v3931_v18 = vor.u32 %v3929_v55, %v3927_v8  ;;  %v5224_v52 = vld [vmem:[#allocation2 + $0x2c] sm:$0xff] }
 0x320   : > { %v2835_v21 = vpop.f32.mrf.mxu1 }
 0x321   : > { %v1977_v7 = vpop.f32.mrf.mxu2  ;;  %v2872_v17 = vadd.f32 %v2835_v21, %v7264_v59  ;;  %v1943_v59 = vadd.f32 %v7247_v50, %v7179_v41  ;;  %v3933_v23 = vshll.u32 %v3903_v38, 16  ;;  %v3841_v41 = vsel %vm7985_vm2, %v3824_v51, 0  ;;  %vm8025_vm2 = vmmov %vm8018_vm1 }
 0x322   : > { %v7406_v9 = vadd.f32 %v1977_v7, %v7379_v36  ;;  %v7409_v27 = vpop.f32.mrf.mxu3  ;;  %v3842_v50 = vsel %vm7986_vm0, %v3825_v5, 0  ;;  %v3891_v8 = vunpack.c.l.b16 %v3841_v41  ;;  %v3827_v41 = vld [vmem:[#allocation2 + $0x40] sm:$0xf]  ;;  %vm8026_vm0 = vmmov %vm8018_vm1 }
 0x323   : > { %3769 = vmatmul.bf16.gmra.mxu1 %v5223_v16  ;;  %v2577_v16 = vadd.f32 %v7250_v33, %v1943_v59 }
 0x324   : > { %v3760_v10 = vpop.f32.mrf.mxu0 }
 0x325   : > { %v2871_v63 = vadd.f32 %v2832_v46, %v2577_v16  ;;  %v3892_v46 = vunpack.c.l.b16 %v3842_v50 }
 0x326   : > { %4046 = vmatmul.bf16.vlgmr.msra.gmra.mxu2 %v3928_v54  ;;  %v3935_v54 = vrot.slane %v3933_v23, 1 }
 0x328   : > { %v2837_v36 = vpop.f32.mrf.mxu1  ;;  %v3936_v33 = vsel %vm8021_vm14, %v3931_v18, %v3935_v54  ;;  %v3937_v18 = vshrl.u32 %v3903_v38, 16 }
 0x329   : > { %v3007_v0 = vpop.f32.mrf.mxu2  ;;  %v2873_v21 = vadd.f32 %v2837_v36, %v7277_v11 }
 0x32a   : > { %v3047_v7 = vadd.f32 %v3007_v0, %v2870_v1  ;;  %v3289_v43 = vpop.f32.mrf.mxu3 }
 0x32c   : > { %v3762_v53 = vpop.f32.mrf.mxu0  ;;  %v3329_v34 = vadd.f32 %v3289_v43, %v3047_v7  ;;  %v3904_v7 = vpack.c.b16 %v3892_v46, %v3891_v8 }
 0x32e   : > { %v3623_v3 = vadd.f32 %v7214_v4, %v3329_v34  ;;  %v7435_v34 = vld [vmem:[%s8023_s9] ss:$0 sm:$0xff]  ;;  %s5803_s9 = scalar_lea.hbm %s5802_s18, 64 }
 0x32f   : > { %p5804_p2 = scmp.ne.s32.totalorder %s5802_s18, %s5803_s9 }
 0x330   : > { %v2840_v22 = vpop.f32.mrf.mxu1  ;;  %v3800_v4 = vadd.f32 %v3760_v10, %v3623_v3 }
 0x331   : > { %v3009_v11 = vpop.f32.mrf.mxu2  ;;  %v2874_v43 = vadd.f32 %v2840_v22, %v7298_v49  ;;  %v3939_v22 = vor.u32 %v3937_v18, %v3935_v54  ;;  %v3829_v18 = vld [vmem:[#allocation2 + $0x48] sm:$0xf]  ;;  %p5805_p8 = pnand %p5804_p2, %p6231_p5 }
 0x332   : > { %v3048_v1 = vadd.f32 %v3009_v11, %v2871_v63  ;;  %v3291_v0 = vpop.f32.mrf.mxu3  ;;  %v3941_v63 = vshll.u32 %v3904_v7, 16 }
 0x333   : > { %3774 = vmatmul.bf16.gmra.mxu1 %v5224_v52  ;;  %v3826_v52 = vld [vmem:[#allocation2 + $0x3c] sm:$0xf]  ;;  %p5806_p9 = pneg %p5805_p8 }
 0x334   : > { %v4042_v36 = vpop.f32.mrf.mxu0  ;;  %v3330_v59 = vadd.f32 %v3291_v0, %v3048_v1  ;;  %v3943_v1 = vrot.slane %v3941_v63, 1 }
 0x335   : > { %v4082_v51 = vadd.f32 %v4042_v36, %v3800_v4  ;;  %v5225_v36 = vld [vmem:[#allocation2 + $0x34] sm:$0xff] }
 0x336   : > { %v3624_v47 = vadd.f32 %v7235_v29, %v3330_v59  ;;  %4051 = vmatmul.bf16.gmra.mxu2 %v3936_v33  ;;  %v3944_v54 = vsel %vm8024_vm13, %v3939_v22, %v3943_v1 }
 0x337   : > { %v4102_v23 = vmul.f32 %v7429_v45, %v4082_v51 }
 0x338   : > { %v2842_v55 = vpop.f32.mrf.mxu1  ;;  %v3801_v29 = vadd.f32 %v3762_v53, %v3624_v47  ;;  %v3843_v53 = vsel %vm7992_vm4, %v3826_v52, 0  ;;  %vm8027_vm4 = vmmov %vm8026_vm0 }
 0x339   : > { %v3012_v49 = vpop.f32.mrf.mxu2  ;;  %v2875_v5 = vadd.f32 %v2842_v55, %v7309_v30  ;;  %v4122_v50 = vadd.f32 %v7435_v34, %v4102_v23  ;;  %v3844_v30 = vsel %vm7994_vm8, %v3827_v41, 0  ;;  %v3893_v4 = vunpack.c.l.b16 %v3843_v53 }
 0x33a   : > { %v7437_v10 = vadd.f32 %v3012_v49, %v2872_v17  ;;  %v3894_v47 = vunpack.c.l.b16 %v3844_v30  ;;  %v3846_v41 = vsel %vm8002_vm6, %v3829_v18, 0 }
 0x33b   : > { %v4138_v33 = vmax.f32 %v4122_v50, 0.0 }
 0x33c   : > { %v4044_v16 = vpop.f32.mrf.mxu0  ;;  %v3905_v37 = vpack.c.b16 %v3894_v47, %v3893_v4  ;;  %v5227_v4 = vld [vmem:[#allocation2 + $0x44] sm:$0xff] }
 0x33d   : > { %v4083_v3 = vadd.f32 %v4044_v16, %v3801_v29  ;;  %v3945_v29 = vshrl.u32 %v3904_v7, 16  ;;  %v3828_v16 = vld [vmem:[#allocation2 + $0x44] sm:$0xf] }
 0x33e   : > { %v3845_v52 = vsel %vm8000_vm11, %v3828_v16, 0 }
 0x33f   : > { %v4103_v11 = vmul.f32 %v7429_v45, %v4083_v3  ;;  %v5226_v3 = vld [vmem:[#allocation2 + $0x3c] sm:$0xff]  ;;  %v3895_v7 = vunpack.c.l.b16 %v3845_v52 }
 0x340   : > { %v2845_v38 = vpop.f32.mrf.mxu1 }
 0x341   : > { %v4123_v0 = vadd.f32 %v7435_v34, %v4103_v11  ;;  %v3014_v17 = vpop.f32.mrf.mxu2  ;;  %v2876_v59 = vadd.f32 %v2845_v38, %v7320_v62  ;;  %v3947_v62 = vor.u32 %v3945_v29, %v3943_v1  ;;  %v1963_v1 = vadd.f32 %v7350_v35, %v7304_v40 }
 0x342   : > { %v7447_v46 = vadd.f32 %v3014_v17, %v2873_v21  ;;  %v3949_v21 = vshll.u32 %v3905_v37, 16  ;;  %v3953_v17 = vshrl.u32 %v3905_v37, 16  ;;  %v1968_v29 = vadd.f32 %v7369_v19, %v7331_v44 }
 0x343   : > { %v4139_v8 = vmax.f32 %v4123_v0, 0.0  ;;  %3779 = vmatmul.bf16.gmra.mxu1 %v5225_v36  ;;  %v3896_v0 = vunpack.c.l.b16 %v3846_v41  ;;  %v2585_v36 = vadd.f32 %v7352_v58, %v1963_v1  ;;  %v5228_v41 = vld [vmem:[#allocation2 + $0x4c] sm:$0xff] }
 0x344   : > { %v3951_v63 = vrot.slane %v3949_v21, 1  ;;  %v2587_v21 = vadd.f32 %v7374_v39, %v1968_v29 }
 0x345   : > { %v4154_v51 = vpack.c.bf16 %v4139_v8, %v4138_v33  ;;  %v3906_v28 = vpack.c.b16 %v3896_v0, %v3895_v7  ;;  %v3831_v33 = vld [vmem:[#allocation2 + $0x50] sm:$0xf]  ;;  %v1973_v7 = vadd.f32 %v7390_v61, %v7361_v24 }
 0x346   : > { %4056 = vmatmul.bf16.gmra.mxu2 %v3944_v54  ;;  %v3955_v8 = vor.u32 %v3953_v17, %v3951_v63  ;;  %v3848_v35 = vsel %vm8010_vm10, %v3831_v33, 0 }
 0x347   : > { %4234 = vmatmul.bf16.vlgmr.msra.gmra.mxu0 %v4154_v51  ;;  %v3957_v38 = vshll.u32 %v3906_v28, 16  ;;  %v2589_v1 = vadd.f32 %v7392_v20, %v1973_v7  ;;  %v2591_v20 = vadd.f32 %v7409_v27, %v7406_v9 }
 0x348   : > { %v2847_v2 = vpop.f32.mrf.mxu1 }
 0x349   : > { %v3017_v49 = vpop.f32.mrf.mxu2  ;;  %v2877_v23 = vadd.f32 %v2847_v2, %v7329_v32  ;;  %v3952_v32 = vsel %vm8025_vm2, %v3947_v62, %v3951_v63  ;;  %v3959_v54 = vrot.slane %v3957_v38, 1  ;;  %v3898_v2 = vunpack.c.l.b16 %v3848_v35 }
 0x34a   : > { %v7451_v55 = vadd.f32 %v3017_v49, %v2874_v43  ;;  %v3961_v62 = vshrl.u32 %v3906_v28, 16 }
 0x34b   : > { %v3960_v37 = vsel %vm8026_vm0, %v3955_v8, %v3959_v54  ;;  %v3294_v8 = vpop.f32.mrf.mxu3 }
 0x34c   : > { %v3331_v27 = vadd.f32 %v3294_v8, %v7437_v10 }
 0x350   : > { %v2850_v11 = vpop.f32.mrf.mxu1 }
 0x351   : > { %v3019_v50 = vpop.f32.mrf.mxu2  ;;  %v2878_v43 = vadd.f32 %v2850_v11, %v7346_v25  ;;  %v3830_v25 = vld [vmem:[#allocation2 + $0x4c] sm:$0xf] }
 0x352   : > { %v7458_v22 = vadd.f32 %v3019_v50, %v2875_v5  ;;  %v3847_v40 = vsel %vm8008_vm12, %v3830_v25, 0 }
 0x353   : > { %3784 = vmatmul.bf16.gmra.mxu1 %v5226_v3  ;;  %v3897_v49 = vunpack.c.l.b16 %v3847_v40  ;;  %v3963_v3 = vor.u32 %v3961_v62, %v3959_v54 }
 0x355   : > { %v3907_v14 = vpack.c.b16 %v3898_v2, %v3897_v49 }
 0x356   : > { %4061 = vmatmul.bf16.gmra.mxu2 %v3952_v32 }
 0x357   : > { %v3965_v63 = vshll.u32 %v3907_v14, 16 }
 0x358   : > { %v2852_v53 = vpop.f32.mrf.mxu1 }
 0x359   : > { %v3022_v56 = vpop.f32.mrf.mxu2  ;;  %v2879_v5 = vadd.f32 %v2852_v53, %v2585_v36  ;;  %v3967_v52 = vrot.slane %v3965_v63, 1  ;;  %v3969_v53 = vshrl.u32 %v3907_v14, 16 }
 0x35a   : > { %v7465_v30 = vadd.f32 %v3022_v56, %v2876_v59 }
 0x35b   : > { %v3968_v32 = vsel %vm8027_vm4, %v3963_v3, %v3967_v52  ;;  %v3971_v17 = vor.u32 %v3969_v53, %v3967_v52 }
 0x360   : > { %v2855_v58 = vpop.f32.mrf.mxu1 }
 0x361   : > { %v3024_v47 = vpop.f32.mrf.mxu2  ;;  %v2880_v59 = vadd.f32 %v2855_v58, %v7367_v48  ;;  %v3832_v48 = vld [vmem:[#allocation2 + $0x54] sm:$0x1] }
 0x362   : > { %v7471_v51 = vadd.f32 %v3024_v47, %v2877_v23  ;;  %v3849_v50 = vsel %vm7154_vm15, %v3832_v48, 0  ;;  %vm8028_vm15 = vmmov %vm8026_vm0  ;;  %v3296_v47 = vpop.f32.mrf.mxu3 }
 0x363   : > { %3789 = vmatmul.bf16.gmra.mxu1 %v5227_v4  ;;  %v3332_v63 = vadd.f32 %v3296_v47, %v7447_v46  ;;  %v5308_v47 = vld [vmem:[%s6300_s6] sm:$0xff]  }
 0x366   : > { %4066 = vmatmul.bf16.gmra.mxu2 %v3960_v37 }
 0x368   : > { %v2857_v16 = vpop.f32.mrf.mxu1 }
 0x369   : > { %v3027_v42 = vpop.f32.mrf.mxu2  ;;  %v2881_v23 = vadd.f32 %v2857_v16, %v2587_v21  ;;  %v3625_v16 = vadd.f32 %v7252_v6, %v3331_v27 }
 0x36a   : > { %v7478_v18 = vadd.f32 %v3027_v42, %v2878_v43  ;;  %v3899_v43 = vunpack.c.l.b16 %v3849_v50  ;;  %v3299_v49 = vpop.f32.mrf.mxu3 }
 0x36c   : > { %v3908_v0 = vpack.c.b16 %v3899_v43, %v3899_v43  ;;  %v3333_v43 = vadd.f32 %v3299_v49, %v7451_v55 }
 0x370   : > { %v2860_v19 = vpop.f32.mrf.mxu1 }
 0x371   : > { %v3029_v44 = vpop.f32.mrf.mxu2  ;;  %v2882_v39 = vadd.f32 %v2860_v19, %v7384_v12 }
 0x372   : > { %v7482_v11 = vadd.f32 %v3029_v44, %v2879_v5  ;;  %v3973_v5 = vshll.u32 %v3908_v0, 16  ;;  %v3301_v9 = vpop.f32.mrf.mxu3 }
 0x373   : > { %3794 = vmatmul.bf16.gmra.mxu1 %v5228_v41  ;;  %v3626_v41 = vadd.f32 %v7271_v60, %v3332_v63 }
 0x374   : > { %v3975_v12 = vrot.slane %v3973_v5, 1 }
 0x376   : > { %4071 = vmatmul.bf16.gmra.mxu2 %v3968_v32  ;;  %v3976_v61 = vsel %vm8028_vm15, %v3971_v17, %v3975_v12 }
 0x378   : > { %v2862_v15 = vpop.f32.mrf.mxu1 }
 0x379   : > { %v3032_v28 = vpop.f32.mrf.mxu2  ;;  %v2883_v56 = vadd.f32 %v2862_v15, %v2589_v1  ;;  %v3627_v1 = vadd.f32 %v7285_v13, %v3333_v43  ;;  %v3334_v15 = vadd.f32 %v3301_v9, %v7458_v22  ;;  %v7521_v13 = vld [vmem:[%s8029_s7] ss:$0 sm:$0xff]  ;;  %v5309_v9 = vunpack.c.l.bf16 %v5308_v47  ;;  %s5807_s7 = scalar_lea.hbm %s8043_s3, 256 }
 0x37a   : > { %v7489_v36 = vadd.f32 %v3032_v28, %v2880_v59  ;;  %v3304_v52 = vpop.f32.mrf.mxu3  ;;  %p5809_p4 = scmp.lt.s32.totalorder %s5807_s7, %s5803_s9 }
 0x37b   : > { %v3628_v17 = vadd.f32 %v7296_v31, %v3334_v15  ;;  %v3335_v8 = vadd.f32 %v3304_v52, %v7465_v30  ;;  %v8031_v52 = vld [vmem:[#allocation41_spill] sm:$0xff]  ;;  %v8032_v15 = vld [vmem:[#allocation38_spill] sm:$0xff] }
 0x37c   : > { %p5810_p10 = por %p5809_p4, %p5808_p0 }
 0x37d   : > { %v3629_v49 = vadd.f32 %v7307_v57, %v3335_v8 }
 0x37e   : > { %p5811_p13 = pnand %p5810_p10, %p5806_p9 }
 0x380   : > { %v2865_v25 = vpop.f32.mrf.mxu1 }
 0x381   : > { %v3034_v38 = vpop.f32.mrf.mxu2  ;;  %v2884_v24 = vadd.f32 %v2865_v25, %v7399_v26 }
 0x382   : > { %v7491_v33 = vadd.f32 %v3034_v38, %v2881_v23  ;;  %v3306_v46 = vpop.f32.mrf.mxu3 }
 0x383   : > { %v3336_v30 = vadd.f32 %v3306_v46, %v7471_v51 }
 0x385   : > { %v3630_v57 = vadd.f32 %v8031_v52, %v3336_v30 }
 0x386   : > { %4076 = vmatmul.bf16.gmra.mxu2 %v3976_v61 }
 0x388   : > { %v2867_v4 = vpop.f32.mrf.mxu1 }
 0x389   : > { %v3037_v54 = vpop.f32.mrf.mxu2  ;;  %v2885_v35 = vadd.f32 %v2867_v4, %v2591_v20 }
 0x38a   : > { %v7497_v40 = vadd.f32 %v3037_v54, %v2882_v39  ;;  %v3309_v25 = vpop.f32.mrf.mxu3 }
 0x390   : > { %v3765_v59 = vpop.f32.mrf.mxu1 }
 0x391   : > { %v3039_v58 = vpop.f32.mrf.mxu2  ;;  %v3802_v48 = vadd.f32 %v3765_v59, %v3625_v16 }
 0x392   : > { %v7499_v37 = vadd.f32 %v3039_v58, %v2883_v56  ;;  %v3311_v16 = vpop.f32.mrf.mxu3 }
 0x398   : > { %v3767_v26 = vpop.f32.mrf.mxu1 }
 0x399   : > { %v3042_v2 = vpop.f32.mrf.mxu2  ;;  %v3803_v50 = vadd.f32 %v3767_v26, %v3626_v41 }
 0x39a   : > { %v7501_v29 = vadd.f32 %v3042_v2, %v2884_v24 }
 0x3a0   : > { %v3770_v21 = vpop.f32.mrf.mxu1 }
 0x3a1   : > { %v3044_v14 = vpop.f32.mrf.mxu2  ;;  %v3804_v56 = vadd.f32 %v3770_v21, %v3627_v1  ;;  %v3314_v1 = vpop.f32.mrf.mxu3 }
 0x3a2   : > { %v7503_v42 = vadd.f32 %v3044_v14, %v2885_v35  ;;  %v7531_v35 = vld [vmem:[%s8030_s10] ss:$0 sm:$0xff] }
 0x3a8   : > { %v3772_v62 = vpop.f32.mrf.mxu1 }
 0x3a9   : > { %v4047_v23 = vpop.f32.mrf.mxu2  ;;  %v3805_v12 = vadd.f32 %v3772_v62, %v3628_v17 }
 0x3aa   : > { %v4084_v3 = vadd.f32 %v4047_v23, %v3802_v48  ;;  %v5310_v48 = vunpack.c.h.bf16 %v5308_v47 }
 0x3ac   : > { %v4104_v44 = vmul.f32 %v7429_v45, %v4084_v3 }
 0x3ae   : > { %v4124_v10 = vadd.f32 %v7435_v34, %v4104_v44 }
 0x3b0   : > { %v3775_v32 = vpop.f32.mrf.mxu1  ;;  %v4140_v0 = vmax.f32 %v4124_v10, 0.0 }
 0x3b1   : > { %v4049_v19 = vpop.f32.mrf.mxu2  ;;  %v3806_v14 = vadd.f32 %v3775_v32, %v3629_v49  ;;  %v8034_v49 = vld [vmem:[#allocation40_spill] sm:$0xff] }
 0x3b2   : > { %v4085_v39 = vadd.f32 %v4049_v19, %v3803_v50 }
 0x3b4   : > { %v4105_v6 = vmul.f32 %v7429_v45, %v4085_v39 }
 0x3b6   : > { %v4125_v7 = vadd.f32 %v7435_v34, %v4105_v6  ;;  %v3337_v6 = vadd.f32 %v3309_v25, %v7478_v18  ;;  %v8033_v25 = vld [vmem:[#allocation39_spill] sm:$0xff] }
 0x3b8   : > { %v4141_v28 = vmax.f32 %v4125_v7, 0.0  ;;  %v3777_v55 = vpop.f32.mrf.mxu1 }
 0x3b9   : > { %v4052_v60 = vpop.f32.mrf.mxu2  ;;  %v3807_v51 = vadd.f32 %v3777_v55, %v3630_v57  ;;  %v3338_v55 = vadd.f32 %v3311_v16, %v7482_v11 }
 0x3ba   : > { %v4155_v53 = vpack.c.bf16 %v4141_v28, %v4140_v0  ;;  %v4086_v5 = vadd.f32 %v4052_v60, %v3804_v56  ;;  %v3631_v56 = vadd.f32 %v8032_v15, %v3337_v6 }
 0x3bc   : > { %4239 = vmatmul.bf16.vlgmr.msra.gmra.mxu3 %v4155_v53  ;;  %v4106_v38 = vmul.f32 %v7429_v45, %v4086_v5 }
 0x3be   : > { %v4126_v20 = vadd.f32 %v7435_v34, %v4106_v38 }
 0x3c0   : > { %v3780_v58 = vpop.f32.mrf.mxu1  ;;  %v4142_v59 = vmax.f32 %v4126_v20, 0.0 }
 0x3c1   : > { %v4054_v24 = vpop.f32.mrf.mxu2  ;;  %v3808_v17 = vadd.f32 %v3780_v58, %v3631_v56 }
 0x3c2   : > { %v4087_v61 = vadd.f32 %v4054_v24, %v3805_v12  ;;  %v3632_v24 = vadd.f32 %v8033_v25, %v3338_v55  ;;  %v8038_v25 = vld [vmem:[#allocation45_spill] sm:$0xff] }
 0x3c4   : > { %v4235_v22 = vpop.f32.mrf.mxu0  ;;  %v4107_v54 = vmul.f32 %v7429_v45, %v4087_v61  ;;  %v3316_v61 = vpop.f32.mrf.mxu3 }
 0x3c5   : > { %v4279_v4 = vmul.f32 %v7521_v13, %v4235_v22 }
 0x3c6   : > { %v4127_v31 = vadd.f32 %v7435_v34, %v4107_v54 }
 0x3c7   : > { %v4299_v21 = vadd.f32 %v7531_v35, %v4279_v4 }
 0x3c8   : > { %v4143_v2 = vmax.f32 %v4127_v31, 0.0  ;;  %v3782_v39 = vpop.f32.mrf.mxu1  ;;  %v3339_v31 = vadd.f32 %v3314_v1, %v7489_v36  ;;  %v8035_v36 = vld [vmem:[#allocation42_spill] sm:$0xff] }
 0x3c9   : > { %v4057_v26 = vpop.f32.mrf.mxu2  ;;  %v4347_v3 = vadd.f32 %v5309_v9, %v4299_v21  ;;  %v3809_v22 = vadd.f32 %v3782_v39, %v3632_v24  ;;  %v3340_v21 = vadd.f32 %v3316_v61, %v7491_v33 }
 0x3ca   : > { %v4156_v27 = vpack.c.bf16 %v4143_v2, %v4142_v59  ;;  %v4088_v62 = vadd.f32 %v4057_v26, %v3806_v14  ;;  %v3633_v2 = vadd.f32 %v8034_v49, %v3339_v31 }
 0x3cb   : > { %v4363_v32 = vmax.f32 %v4347_v3, 0.0 }
 0x3cc   : > { %v4237_v23 = vpop.f32.mrf.mxu0  ;;  %4244 = vmatmul.bf16.gmra.mxu3 %v4156_v27  ;;  %v4108_v50 = vmul.f32 %v7429_v45, %v4088_v62  ;;  %v3319_v26 = vpop.f32.mrf.mxu3 }
 0x3cd   : > { %v4280_v63 = vmul.f32 %v7521_v13, %v4237_v23  ;;  %v3634_v23 = vadd.f32 %v8035_v36, %v3340_v21 }
 0x3ce   : > { %v4128_v7 = vadd.f32 %v7435_v34, %v4108_v50 }
 0x3cf   : > { %v4300_v41 = vadd.f32 %v7531_v35, %v4280_v63 }
 0x3d0   : > { %v4144_v60 = vmax.f32 %v4128_v7, 0.0  ;;  %v3785_v38 = vpop.f32.mrf.mxu1 }
 0x3d1   : > { %v4348_v44 = vadd.f32 %v5310_v48, %v4300_v41  ;;  %v4059_v19 = vpop.f32.mrf.mxu2  ;;  %v3810_v9 = vadd.f32 %v3785_v38, %v3633_v2  ;;  %v3341_v41 = vadd.f32 %v3319_v26, %v7497_v40  ;;  %v8037_v40 = vld [vmem:[#allocation43_spill] sm:$0xff] }
 0x3d2   : > { %v4089_v10 = vadd.f32 %v4059_v19, %v3807_v51  ;;  %v8036_v19 = vld [vmem:[#allocation44_spill] sm:$0xff] }
 0x3d3   : > { %v4364_v43 = vmax.f32 %v4348_v44, 0.0  ;;  %v3635_v39 = vadd.f32 %v8036_v19, %v3341_v41 }
 0x3d4   : > { %v4109_v0 = vmul.f32 %v7429_v45, %v4089_v10  ;;  %v3321_v57 = vpop.f32.mrf.mxu3 }
 0x3d5   : > { %v5342_v46 = vpack.c.bf16 %v4364_v43, %v4363_v32  ;;  %v3342_v6 = vadd.f32 %v3321_v57, %v7499_v37 }
 0x3d6   : > { %v4129_v28 = vadd.f32 %v7435_v34, %v4109_v0 }
 0x3d7   : > { %5343 = vst [vmem:[%s6395_s19] sm:$0xff] %v5342_v46  }
 0x3d8   : > { %v4145_v53 = vmax.f32 %v4129_v28, 0.0  ;;  %v3787_v11 = vpop.f32.mrf.mxu1  ;;  %v3636_v28 = vadd.f32 %v8037_v40, %v3342_v6 }
 0x3d9   : > { %v4062_v5 = vpop.f32.mrf.mxu2  ;;  %v3811_v63 = vadd.f32 %v3787_v11, %v3634_v23 }
 0x3da   : > { %v4157_v12 = vpack.c.bf16 %v4145_v53, %v4144_v60  ;;  %v4090_v18 = vadd.f32 %v4062_v5, %v3808_v17 }
 0x3dc   : > { %4249 = vmatmul.bf16.gmra.mxu3 %v4157_v12  ;;  %v4110_v8 = vmul.f32 %v7429_v45, %v4090_v18  ;;  %v3324_v1 = vpop.f32.mrf.mxu3 }
 0x3dd   : > { %v3343_v55 = vadd.f32 %v3324_v1, %v7501_v29 }
 0x3de   : > { %v4130_v4 = vadd.f32 %v7435_v34, %v4110_v8 }
 0x3df   : > { %v3637_v24 = vadd.f32 %v8038_v25, %v3343_v55 }
 0x3e0   : > { %v4146_v59 = vmax.f32 %v4130_v4, 0.0  ;;  %v3790_v62 = vpop.f32.mrf.mxu1  ;;  %v8039_v4 = vld [vmem:[#allocation46_spill] sm:$0xff] }
 0x3e1   : > { %v4064_v20 = vpop.f32.mrf.mxu2  ;;  %v3812_v7 = vadd.f32 %v3790_v62, %v3635_v39 }
 0x3e2   : > { %v4091_v54 = vadd.f32 %v4064_v20, %v3809_v22 }
 0x3e4   : > { %v4111_v47 = vmul.f32 %v7429_v45, %v4091_v54  ;;  %v3326_v38 = vpop.f32.mrf.mxu3 }
 0x3e5   : > { %v3344_v8 = vadd.f32 %v3326_v38, %v7503_v42 }
 0x3e6   : > { %v4131_v58 = vadd.f32 %v7435_v34, %v4111_v47 }
 0x3e7   : > { %v3638_v47 = vadd.f32 %v8039_v4, %v3344_v8 }
 0x3e8   : > { %v4147_v30 = vmax.f32 %v4131_v58, 0.0  ;;  %v3792_v43 = vpop.f32.mrf.mxu1 }
 0x3e9   : > { %v4067_v14 = vpop.f32.mrf.mxu2  ;;  %v3813_v60 = vadd.f32 %v3792_v43, %v3636_v28 }
 0x3ea   : > { %v4158_v27 = vpack.c.bf16 %v4147_v30, %v4146_v59  ;;  %v4092_v16 = vadd.f32 %v4067_v14, %v3810_v9 }
 0x3ec   : > { %4254 = vmatmul.bf16.gmra.mxu3 %v4158_v27  ;;  %v4112_v48 = vmul.f32 %v7429_v45, %v4092_v16  ;;  %v5388_v16 = vld [vmem:[%s6300_s6 + $0x8] sm:$0xff]  }
 0x3ed   : > { %v5313_v23 = vunpack.c.l.bf16 %v5388_v16 }
 0x3ee   : > { %v4132_v51 = vadd.f32 %v7435_v34, %v4112_v48  ;;  %v5314_v48 = vunpack.c.h.bf16 %v5388_v16 }
 0x3f0   : > { %v4148_v44 = vmax.f32 %v4132_v51, 0.0  ;;  %v3795_v5 = vpop.f32.mrf.mxu1 }
 0x3f1   : > { %v4069_v3 = vpop.f32.mrf.mxu2  ;;  %v3814_v20 = vadd.f32 %v3795_v5, %v3637_v24 }
 0x3f2   : > { %v4093_v52 = vadd.f32 %v4069_v3, %v3811_v63 }
 0x3f4   : > { %v4113_v50 = vmul.f32 %v7429_v45, %v4093_v52 }
 0x3f6   : > { %v4133_v33 = vadd.f32 %v7435_v34, %v4113_v50 }
 0x3f8   : > { %v4149_v32 = vmax.f32 %v4133_v33, 0.0  ;;  %v3797_v29 = vpop.f32.mrf.mxu1  ;;  %v5389_v33 = vld [vmem:[%s6300_s6 + $0x10] sm:$0xff]  }
 0x3f9   : > { %v4072_v10 = vpop.f32.mrf.mxu2  ;;  %v3815_v11 = vadd.f32 %v3797_v29, %v3638_v47  ;;  %v5317_v19 = vunpack.c.l.bf16 %v5389_v33  ;;  %v5318_v43 = vunpack.c.h.bf16 %v5389_v33 }
 0x3fa   : > { %v4159_v46 = vpack.c.bf16 %v4149_v32, %v4148_v44  ;;  %v4094_v0 = vadd.f32 %v4072_v10, %v3812_v7 }
 0x3fc   : > { %4259 = vmatmul.bf16.gmra.mxu3 %v4159_v46  ;;  %v4114_v15 = vmul.f32 %v7429_v45, %v4094_v0 }
 0x3fe   : > { %v4134_v17 = vadd.f32 %v7435_v34, %v4114_v15 }
 0x400   : > { %v4150_v18 = vmax.f32 %v4134_v17, 0.0 }
 0x401   : > { %v4074_v56 = vpop.f32.mrf.mxu2 }
 0x402   : > { %v4095_v53 = vadd.f32 %v4074_v56, %v3813_v60  ;;  %v5390_v60 = vld [vmem:[%s6300_s6 + $0x18] sm:$0xff]  }
 0x403   : > { %v5321_v56 = vunpack.c.l.bf16 %v5390_v60  ;;  %v5322_v55 = vunpack.c.h.bf16 %v5390_v60 }
 0x404   : > { %v4115_v12 = vmul.f32 %v7429_v45, %v4095_v53 }
 0x406   : > { %v4135_v37 = vadd.f32 %v7435_v34, %v4115_v12 }
 0x408   : > { %v4151_v61 = vmax.f32 %v4135_v37, 0.0 }
 0x409   : > { %v4077_v22 = vpop.f32.mrf.mxu2 }
 0x40a   : > { %v4160_v54 = vpack.c.bf16 %v4151_v61, %v4150_v18  ;;  %v4096_v31 = vadd.f32 %v4077_v22, %v3814_v20  ;;  %v5391_v22 = vld [vmem:[%s6300_s6 + $0x20] sm:$0xff]  }
 0x40b   : > { %v5325_v20 = vunpack.c.l.bf16 %v5391_v22  ;;  %v5326_v29 = vunpack.c.h.bf16 %v5391_v22 }
 0x40c   : > { %4264 = vmatmul.bf16.gmra.mxu3 %v4160_v54  ;;  %v4116_v58 = vmul.f32 %v7429_v45, %v4096_v31 }
 0x40e   : > { %v4136_v2 = vadd.f32 %v7435_v34, %v4116_v58 }
 0x410   : > { %v4152_v42 = vmax.f32 %v4136_v2, 0.0 }
 0x411   : > { %v4079_v59 = vpop.f32.mrf.mxu2 }
 0x412   : > { %v4097_v49 = vadd.f32 %v4079_v59, %v3815_v11 }
 0x414   : > { %v4117_v30 = vmul.f32 %v7429_v45, %v4097_v49 }
 0x416   : > { %v4137_v26 = vadd.f32 %v7435_v34, %v4117_v30 }
 0x418   : > { %v4153_v14 = vmax.f32 %v4137_v26, 0.0  ;;  %v5392_v26 = vld [vmem:[%s6300_s6 + $0x28] sm:$0xff]  }
 0x41a   : > { %v4161_v21 = vpack.c.bf16 %v4153_v14, %v4152_v42  ;;  %v5329_v14 = vunpack.c.l.bf16 %v5392_v26 }
 0x41c   : > { %4269 = vmatmul.bf16.gmra.mxu3 %v4161_v21 }
 0x43f   : > { %v4240_v9 = vpop.f32.mrf.mxu3 }
 0x440   : > { %v4281_v27 = vmul.f32 %v7521_v13, %v4240_v9 }
 0x442   : > { %v4301_v36 = vadd.f32 %v7531_v35, %v4281_v27  ;;  %v5330_v27 = vunpack.c.h.bf16 %v5392_v26 }
 0x444   : > { %v4349_v45 = vadd.f32 %v5313_v23, %v4301_v36 }
 0x446   : > { %v4365_v52 = vmax.f32 %v4349_v45, 0.0 }
 0x447   : > { %v4242_v62 = vpop.f32.mrf.mxu3 }
 0x448   : > { %v4282_v63 = vmul.f32 %v7521_v13, %v4242_v62 }
 0x44a   : > { %v4302_v34 = vadd.f32 %v7531_v35, %v4282_v63 }
 0x44c   : > { %v4350_v3 = vadd.f32 %v5314_v48, %v4302_v34 }
 0x44e   : > { %v4366_v57 = vmax.f32 %v4350_v3, 0.0  ;;  %v5393_v3 = vld [vmem:[%s6300_s6 + $0x30] sm:$0xff]  }
 0x44f   : > { %v4245_v41 = vpop.f32.mrf.mxu3 }
 0x450   : > { %v5347_v51 = vpack.c.bf16 %v4366_v57, %v4365_v52  ;;  %v4283_v50 = vmul.f32 %v7521_v13, %v4245_v41  ;;  %v5333_v57 = vunpack.c.l.bf16 %v5393_v3 }
 0x452   : > { %5395 = vst [vmem:[%s6395_s19 + $0x8] sm:$0xff] %v5347_v51   ;;  %v4303_v44 = vadd.f32 %v7531_v35, %v4283_v50  ;;  %v5334_v50 = vunpack.c.h.bf16 %v5393_v3 }
 0x454   : > { %v4351_v10 = vadd.f32 %v5317_v19, %v4303_v44 }
 0x456   : > { %v4367_v46 = vmax.f32 %v4351_v10, 0.0 }
 0x457   : > { %v4247_v39 = vpop.f32.mrf.mxu3 }
 0x458   : > { %v4284_v32 = vmul.f32 %v7521_v13, %v4247_v39 }
 0x45a   : > { %v4304_v6 = vadd.f32 %v7531_v35, %v4284_v32 }
 0x45c   : > { %v4352_v7 = vadd.f32 %v5318_v43, %v4304_v6 }
 0x45e   : > { %v4368_v0 = vmax.f32 %v4352_v7, 0.0  ;;  %v5394_v7 = vld [vmem:[%s6300_s6 + $0x38] sm:$0xff]   ;;  %s4427_s6 = sshll.u32 %s6395_s19, 4  ;;  %s4428_s6 = int_to_ptr.vmem [resolvable:$true] %s4427_s6 }
 0x45f   : > { %v4250_v1 = vpop.f32.mrf.mxu3 }
 0x460   : > { %v5352_v40 = vpack.c.bf16 %v4368_v0, %v4367_v46  ;;  %v4285_v28 = vmul.f32 %v7521_v13, %v4250_v1  ;;  %v5337_v0 = vunpack.c.l.bf16 %v5394_v7 }
 0x462   : > { %5396 = vst [vmem:[%s6395_s19 + $0x10] sm:$0xff] %v5352_v40   ;;  %v4305_v15 = vadd.f32 %v7531_v35, %v4285_v28  ;;  %v5338_v28 = vunpack.c.h.bf16 %v5394_v7 }
 0x464   : > { %v4353_v17 = vadd.f32 %v5321_v56, %v4305_v15 }
 0x466   : > { %v4369_v38 = vmax.f32 %v4353_v17, 0.0 }
 0x467   : > { %v4252_v53 = vpop.f32.mrf.mxu3 }
 0x468   : > { %v4286_v5 = vmul.f32 %v7521_v13, %v4252_v53 }
 0x46a   : > { %v4306_v12 = vadd.f32 %v7531_v35, %v4286_v5 }
 0x46c   : > { %v4354_v37 = vadd.f32 %v5322_v55, %v4306_v12 }
 0x46e   : > { %v4370_v18 = vmax.f32 %v4354_v37, 0.0 }
 0x46f   : > { %v4255_v25 = vpop.f32.mrf.mxu3 }
 0x470   : > { %v5357_v24 = vpack.c.bf16 %v4370_v18, %v4369_v38  ;;  %v4287_v61 = vmul.f32 %v7521_v13, %v4255_v25 }
 0x472   : > { %5397 = vst [vmem:[%s6395_s19 + $0x18] sm:$0xff] %v5357_v24   ;;  %v4307_v8 = vadd.f32 %v7531_v35, %v4287_v61 }
 0x474   : > { %v4355_v4 = vadd.f32 %v5325_v20, %v4307_v8 }
 0x476   : > { %v4371_v58 = vmax.f32 %v4355_v4, 0.0 }
 0x477   : > { %v4257_v54 = vpop.f32.mrf.mxu3 }
 0x478   : > { %v4288_v31 = vmul.f32 %v7521_v13, %v4257_v54 }
 0x47a   : > { %v4308_v47 = vadd.f32 %v7531_v35, %v4288_v31 }
 0x47c   : > { %v4356_v11 = vadd.f32 %v5326_v29, %v4308_v47 }
 0x47e   : > { %v4372_v59 = vmax.f32 %v4356_v11, 0.0 }
 0x47f   : > { %v4260_v49 = vpop.f32.mrf.mxu3 }
 0x480   : > { %v5362_v2 = vpack.c.bf16 %v4372_v59, %v4371_v58  ;;  %v4289_v30 = vmul.f32 %v7521_v13, %v4260_v49 }
 0x482   : > { %5398 = vst [vmem:[%s6395_s19 + $0x20] sm:$0xff] %v5362_v2   ;;  %v4309_v42 = vadd.f32 %v7531_v35, %v4289_v30 }
 0x484   : > { %v4357_v16 = vadd.f32 %v5329_v14, %v4309_v42 }
 0x486   : > { %v4373_v62 = vmax.f32 %v4357_v16, 0.0 }
 0x487   : > { %v4262_v21 = vpop.f32.mrf.mxu3 }
 0x488   : > { %v4290_v9 = vmul.f32 %v7521_v13, %v4262_v21 }
 0x48a   : > { %v4310_v36 = vadd.f32 %v7531_v35, %v4290_v9 }
 0x48c   : > { %v4358_v23 = vadd.f32 %v5330_v27, %v4310_v36 }
 0x48e   : > { %v4374_v63 = vmax.f32 %v4358_v23, 0.0 }
 0x48f   : > { %v4265_v48 = vpop.f32.mrf.mxu3 }
 0x490   : > { %v5367_v45 = vpack.c.bf16 %v4374_v63, %v4373_v62  ;;  %v4291_v34 = vmul.f32 %v7521_v13, %v4265_v48 }
 0x492   : > { %5399 = vst [vmem:[%s6395_s19 + $0x28] sm:$0xff] %v5367_v45   ;;  %v4311_v52 = vadd.f32 %v7531_v35, %v4291_v34 }
 0x494   : > { %v4359_v33 = vadd.f32 %v5333_v57, %v4311_v52 }
 0x496   : > { %v4375_v39 = vmax.f32 %v4359_v33, 0.0 }
 0x497   : > { %v4267_v41 = vpop.f32.mrf.mxu3 }
 0x498   : > { %v4292_v51 = vmul.f32 %v7521_v13, %v4267_v41 }
 0x49a   : > { %v4312_v44 = vadd.f32 %v7531_v35, %v4292_v51 }
 0x49c   : > { %v4360_v19 = vadd.f32 %v5334_v50, %v4312_v44 }
 0x49e   : > { %v4376_v32 = vmax.f32 %v4360_v19, 0.0 }
 0x49f   : > { %v4270_v43 = vpop.f32.mrf.mxu3 }
 0x4a0   : > { %v5372_v10 = vpack.c.bf16 %v4376_v32, %v4375_v39  ;;  %v4293_v6 = vmul.f32 %v7521_v13, %v4270_v43 }
 0x4a2   : > { %5400 = vst [vmem:[%s6395_s19 + $0x30] sm:$0xff] %v5372_v10   ;;  %v4313_v46 = vadd.f32 %v7531_v35, %v4293_v6 }
 0x4a4   : > { %v4361_v60 = vadd.f32 %v5337_v0, %v4313_v46 }
 0x4a6   : > { %v4377_v53 = vmax.f32 %v4361_v60, 0.0 }
 0x4a7   : > { %v4272_v1 = vpop.f32.mrf.mxu3 }
 0x4a8   : > { %v4294_v40 = vmul.f32 %v7521_v13, %v4272_v1 }
 0x4aa   : > { %v4314_v15 = vadd.f32 %v7531_v35, %v4294_v40 }
 0x4ac   : > { %v4362_v56 = vadd.f32 %v5338_v28, %v4314_v15 }
 0x4ae   : > { %v4378_v5 = vmax.f32 %v4362_v56, 0.0 }
 0x4b0   : > { %v5377_v55 = vpack.c.bf16 %v4378_v5, %v4377_v53 }
 0x4b2   : > { %5401 = vst [vmem:[%s6395_s19 + $0x38] sm:$0xff] %v5377_v55  }
 0x4b3   : > { %5814 = shalt.err (!%p5811_p13)
}
 0x4b4   : > { %s5960_s24 = smov 64   ;;  %s5961_s19 = smov 4  }
 0x4b5   : > { %5444 = dma.vmem_to_hbm [thread:$0]  (%p6231_p5), %s4428_s6, 1024, %s4430_s12, %s4412_s25, %s5960_s24, %s5960_s24, %s5961_s19  }
 0x4b6 PF: > { %p5477_p12 = scmp.ge.s32.totalorder %s5949_s16, 2  ;;  %s4444_s10 = sand.u32 1, %s5921_s27  }
 0x4b7   : > { %s4445_s4 = scalar_lea.sflag [#allocation5], %s4444_s10 }
 0x4b8   : > { %p5467_p7 = pnand %p5477_p12, %p6235_p11 }
 0x4ba   : > { %p5468_p6 = pneg %p5467_p7 }
 0x4bc   : > { %5892 = dma.done.wait (%p5468_p6), %s4445_s4, 1024  }
 0x4bd   : > { %5894 = vsyncadd (%p5468_p6), %s4445_s4, 4294966272  ;;  %s33_s16 = sadd.s32 1, %s5949_s16   ;;  %s8045_s21 = sld [smem:[#allocation22_spill]] }
 0x4be   : > { %p7641_p1 = scmp.ge.s32.totalorder %s33_s16, 6   ;;  %s8046_s24 = sld [smem:[#allocation23_spill]] }
 0x4bf   : > { %s8047_s25 = sld [smem:[#allocation24_spill]]  ;;  %s8055_s22 = smov %s5905_s23 }
 0x4c0   : > { %s8048_s26 = sld [smem:[#allocation36_spill]]  ;;  %s8056_s23 = smov %s6277_s11 }
 0x4c1   : > { %s8049_s5 = sld [smem:[#allocation25_spill]]  ;;  %s8057_s27 = smov %s5925_s28 }
 0x4c2   : > { %s8050_s29 = sld [smem:[#allocation37_spill]] }
 0x4c3   : > { %s8051_s30 = sld [smem:[#allocation28_spill]]  ;;  %32 = sbr.rel (!%p7641_p1) target bundleno = 28 (0x1c), region = 157 }
 0x4c4   : > { %s8052_s13 = sld [smem:[#allocation29_spill]] }
 0x4c5   : > { %s8053_s14 = sld [smem:[#allocation31_spill]] }
 0x4c6   : > { %s8054_s15 = sld [smem:[#allocation32_spill]] }
 0x4c7   : > { %s8058_s28 = smov %s8049_s5 }
 0x4c8   :  { %4451 = vsyncpa [#allocation4], 1 }
 0x4c9   :  { %4453 = vsyncpa [#allocation4 + $0x1], 1 }
 0x4ca   :  { %4454 = vsyncpa [#allocation7], 1 }
 0x4cb   :  { %4456 = vsyncpa [#allocation7 + $0x1], 1 }
 0x4cc   :  { %4457 = vsyncpa [#allocation10], 1 }
 0x4cd   :  { %4458 = vsyncpa [#allocation13], 1 }
 0x4ce   :  { %4459 = vsyncpa [#allocation5], 1 }
 0x4cf   :  { %4461 = vsyncpa [#allocation5 + $0x1], 1 }

</bundles_post_ra>
